<compile_context>
chip_gen: v7x
topology: tpu7x:2x2x1
jax: 0.10.0
libtpu: 0.0.40
codegen_flags: <defaults>
</compile_context>

<pallas_src>
import functools

import jax
import jax.numpy as jnp
from jax.experimental import pallas as pl
from jax.experimental.pallas import tpu as pltpu


# ----------------------------------------------------------------------------
# Chip-dependent defaults
# ----------------------------------------------------------------------------

_CFG_CACHE = {}


def _cfg():
    if not _CFG_CACHE:
        kind = ""
        try:
            kind = jax.devices()[0].device_kind.lower()
        except Exception:
            pass
        if "v7" in kind:          # 64 MiB VMEM / TC, 2 TCs per chip
            _CFG_CACHE.update(vmem=48 * 1024 * 1024, row_cap=512, min_blocks=2)
        elif ("v5" in kind) or ("v6" in kind):   # 128 MiB VMEM, 1 TC
            _CFG_CACHE.update(vmem=96 * 1024 * 1024, row_cap=2048, min_blocks=1)
        else:                     # unknown: conservative, leave vmem limit alone
            _CFG_CACHE.update(vmem=None, row_cap=1024, min_blocks=1)
    return _CFG_CACHE


def _mosaic(semantics):
    cfg = _cfg()
    kw = dict(dimension_semantics=semantics)
    if cfg["vmem"] is not None:
        kw["vmem_limit_bytes"] = cfg["vmem"]
    return pltpu.CompilerParams(**kw)


def _round_up(x, m):
    return (x + m - 1) // m * m


def _row_tiling(rows):
    """Row-block tiling: one big tile on single-TC chips, >=2 blocks on v7x."""
    cfg = _cfg()
    nb = max(cfg["min_blocks"], -(-rows // cfg["row_cap"]))
    nb = min(nb, rows)
    tb = -(-rows // nb)
    return nb * tb, tb


def _gelu(x):
    # tanh-approx GELU (see semantics note at top of file).
    return 0.5 * x * (1.0 + jnp.tanh(
        0.7978845608028654 * (x + 0.044715 * x * x * x)))


# Static tap groups: each group = tuple of (di, dj) offsets into the 1-padded
# input; every group's taps are K-stacked into ONE MXU dot.
_CONV3_GROUPS = (tuple((di, dj) for di in range(3) for dj in range(3)),)
# ConvTranspose2d(4,4,s=2,p=1) as 4 output-parity phases (group g = 2*r + s),
# each a 2x2-tap conv on the 1-padded low-res input.
_CT_GROUPS = tuple(
    tuple((r + dh, s + dw) for dh in (0, 1) for dw in (0, 1))
    for r in (0, 1) for s in (0, 1))


# ----------------------------------------------------------------------------
# Pallas kernels
# ----------------------------------------------------------------------------

def _tap_conv_kernel(x_ref, w_ref, b_ref, o_ref, *stats, groups):
    """Grouped shifted-tap convolution on one (1-padded) image.

    x_ref : (1, Hp, Wp, Cin) padded input, resident for this grid step.
    w_ref : (G, ntaps*Cin, Cg) K-stacked weights (row order == window order).
    b_ref : (1, G*Cg) bias.
    o_ref : (1, Hp-2, Wp-2, G*Cg); each group writes its own lane range.
    stats : optional (1, 2, G*Cg) per-image (sum, sumsq) over valid positions
            (fused BatchNorm statistics; padded/cropped rows never contribute).
    """
    x = x_ref[...]
    _, hp, wp, cin = x.shape
    ho, wo = hp - 2, wp - 2
    cg = w_ref.shape[2]
    sums, sqs = [], []
    for g, taps in enumerate(groups):
        wins = [x[0, di:di + ho, dj:dj + wo, :] for (di, dj) in taps]
        k = jnp.concatenate(wins, axis=-1).reshape(ho * wo, len(taps) * cin)
        val = (jnp.dot(k, w_ref[g], preferred_element_type=jnp.float32)
               + b_ref[0:1, g * cg:(g + 1) * cg])
        o_ref[0, :, :, g * cg:(g + 1) * cg] = val.reshape(ho, wo, cg)
        if stats:
            sums.append(jnp.sum(val, axis=0, keepdims=True))
            sqs.append(jnp.sum(val * val, axis=0, keepdims=True))
    if stats:
        srow = jnp.concatenate(sums, axis=-1)
        qrow = jnp.concatenate(sqs, axis=-1)
        stats[0][0, :, :] = jnp.concatenate([srow, qrow], axis=0)


def _dwt_mlp_kernel(x_ref, wci_ref, zb_ref, w1_ref, b1_ref, w2_ref, b2_ref,
                    o_ref):
    """Fused conv_input(1x1) + 2D Haar DWT + [fc1 -> GELU -> Dropout(id) -> fc2].

    x_ref: (tb, 2, Wh, 2C) -- free view of NHWC rows: axis1 = row parity,
           last axis packs (column parity, channel).
    Neither the C/4 conv_input activation nor the (., C) DWT concat ever
    touches HBM.
    """
    x = x_ref[...]
    tb, _, wh, c2 = x.shape
    c = c2 // 2
    a = x[:, 0, :, :c]     # (row even, col even)
    b = x[:, 0, :, c:]     # (row even, col odd)
    cc = x[:, 1, :, :c]    # (row odd,  col even)
    d = x[:, 1, :, c:]     # (row odd,  col odd)
    rows = tb * wh
    # DWT(conv_input(x)) == conv_input(DWT corner sums) by linearity of the
    # 1x1 conv; the conv bias only survives in the LL band (zb handles it).
    s_ll = ((a + b) + (cc + d)) * 0.5
    s_lh = ((a - b) + (cc - d)) * 0.5
    s_hl = ((a + b) - (cc + d)) * 0.5
    s_hh = ((a - b) - (cc - d)) * 0.5
    bands = [jnp.dot(s.reshape(rows, c), wci_ref[...],
                     preferred_element_type=jnp.float32)
             for s in (s_ll, s_lh, s_hl, s_hh)]
    z = jnp.concatenate(bands, axis=-1) + zb_ref[...]   # cat order ll|lh|hl|hh
    h = _gelu(jnp.dot(z, w1_ref[...], preferred_element_type=jnp.float32)
              + b1_ref[...])
    out = (jnp.dot(h, w2_ref[...], preferred_element_type=jnp.float32)
           + b2_ref[...])
    o_ref[...] = out.reshape(tb, wh, c)


def _bn_interleave_kernel(z_ref, r_ref, ss_ref, o_ref):
    """BatchNorm (precomputed scale/shift) + ConvT-phase interleave + residual.

    z_ref : (tb, Wh, 4C) phase layout [(r0,s0)|(r0,s1)|(r1,s0)|(r1,s1)].
    r_ref : (tb, 2, Wh, 2C) residual (NHWC viewed as rows/parities).
    ss_ref: (2, 4C): row0 = gamma*rsqrt(var+eps) tiled x4, row1 = shift.
    o_ref : (tb, 2, Wh, 2C), same view as r_ref.  The interleave is a pure
            lane-range reinterpretation -- no shuffles.
    """
    zn = z_ref[...] * ss_ref[0:1, :] + ss_ref[1:2, :]
    c2 = o_ref.shape[3]
    o_ref[:, 0, :, :] = zn[:, :, :c2] + r_ref[:, 0, :, :]
    o_ref[:, 1, :, :] = zn[:, :, c2:] + r_ref[:, 1, :, :]


def _gap_fc_kernel(x_ref, w_ref, b_ref, o_ref, acc_ref, *, inv_hw):
    """AdaptiveAvgPool2d(1) accumulated over spatial tiles; the classifier
    Linear(dim, num_class) is fused into the last grid step."""
    @pl.when(pl.program_id(0) == 0)
    def _():
        acc_ref[...] = jnp.zeros_like(acc_ref)

    acc_ref[...] += jnp.sum(x_ref[...], axis=1) * inv_hw

    @pl.when(pl.program_id(0) == pl.num_programs(0) - 1)
    def _():
        o_ref[...] = (jnp.dot(acc_ref[...], w_ref[...],
                              preferred_element_type=jnp.float32)
                      + b_ref[...])


# ----------------------------------------------------------------------------
# Wrappers (pallas_call + light JAX glue)
# ----------------------------------------------------------------------------
# TODO(synk): optionally cast activations / tap / MLP weights to bf16 for the
# MXU dots on v6e/v7x (keep f32 accumulation); kept f32 for reference parity.
# TODO(synk): mark constant-index operands (weights/biases) with
# pipeline_mode=pl.Buffered(1) once verified on the target toolchain (halves
# their VMEM footprint, matters most on v7x).

def tap_conv_groups(xp, w, b, groups, *, with_stats=False):
    """Grouped K-stacked tap convolution over 1-padded images.
    xp: (N, Hp, Wp, Cin); w: (G, ntaps*Cin, Cg); b: (1, G*Cg).
    Returns (N, Hp-2, Wp-2, G*Cg) [, per-image (N, 2, G*Cg) sum/sumsq]."""
    n, hp, wp, cin = xp.shape
    ho, wo = hp - 2, wp - 2
    ng, kdim, cg = w.shape
    ctot = ng * cg
    out_shape = [jax.ShapeDtypeStruct((n, ho, wo, ctot), jnp.float32)]
    out_specs = [pl.BlockSpec((1, ho, wo, ctot), lambda i: (i, 0, 0, 0))]
    if with_stats:
        out_shape.append(jax.ShapeDtypeStruct((n, 2, ctot), jnp.float32))
        out_specs.append(pl.BlockSpec((1, 2, ctot), lambda i: (i, 0, 0)))
    # TODO(synk): for large images switch the per-image resident block to
    # halo'd row-block DMA (manual make_async_copy) so VMEM stays O(tile).
    return pl.pallas_call(
        functools.partial(_tap_conv_kernel, groups=groups),
        out_shape=tuple(out_shape) if with_stats else out_shape[0],
        grid_spec=pltpu.PrefetchScalarGridSpec(
            num_scalar_prefetch=0,
            grid=(n,),
            in_specs=[pl.BlockSpec((1, hp, wp, cin), lambda i: (i, 0, 0, 0)),
                      pl.BlockSpec((ng, kdim, cg), lambda i: (0, 0, 0)),
                      pl.BlockSpec((1, ctot), lambda i: (0, 0))],
            out_specs=tuple(out_specs) if with_stats else out_specs[0]),
        compiler_params=_mosaic(("parallel",)),
    )(xp, w, b)


def dwt_mlp(xv, wci, zb, w1, b1, w2, b2):
    """xv: (N*Hh, 2, Wh, 2C) view of NHWC -> (N*Hh, Wh, C)."""
    rows, _, wh, c2 = xv.shape
    c = c2 // 2
    c4 = wci.shape[1]
    hid = w1.shape[1]
    rows_p, tb = _row_tiling(rows)
    if rows_p != rows:
        xv = jnp.pad(xv, ((0, rows_p - rows), (0, 0), (0, 0), (0, 0)))
    out = pl.pallas_call(
        _dwt_mlp_kernel,
        out_shape=jax.ShapeDtypeStruct((rows_p, wh, c), jnp.float32),
        grid_spec=pltpu.PrefetchScalarGridSpec(
            num_scalar_prefetch=0,
            grid=(rows_p // tb,),
            in_specs=[pl.BlockSpec((tb, 2, wh, c2), lambda i: (i, 0, 0, 0)),
                      pl.BlockSpec((c, c4), lambda i: (0, 0)),
                      pl.BlockSpec((1, c), lambda i: (0, 0)),
                      pl.BlockSpec((c, hid), lambda i: (0, 0)),
                      pl.BlockSpec((1, hid), lambda i: (0, 0)),
                      pl.BlockSpec((hid, c), lambda i: (0, 0)),
                      pl.BlockSpec((1, c), lambda i: (0, 0))],
            out_specs=pl.BlockSpec((tb, wh, c), lambda i: (i, 0, 0))),
        compiler_params=_mosaic(("parallel",)),
    )(xv, wci, zb, w1, b1, w2, b2)
    return out[:rows]


def bn_interleave_residual(zt, res, ss):
    """zt: (N*Hh, Wh, 4C) phase layout; res: (N*Hh, 2, Wh, 2C) residual view;
    ss: (2, 4C) scale/shift.  Returns (N*Hh, 2, Wh, 2C)."""
    rows, wh, c4tot = zt.shape
    c2 = c4tot // 2
    rows_p, tb = _row_tiling(rows)
    if rows_p != rows:
        zt = jnp.pad(zt, ((0, rows_p - rows), (0, 0), (0, 0)))
        res = jnp.pad(res, ((0, rows_p - rows), (0, 0), (0, 0), (0, 0)))
    out = pl.pallas_call(
        _bn_interleave_kernel,
        out_shape=jax.ShapeDtypeStruct((rows_p, 2, wh, c2), jnp.float32),
        grid_spec=pltpu.PrefetchScalarGridSpec(
            num_scalar_prefetch=0,
            grid=(rows_p // tb,),
            in_specs=[pl.BlockSpec((tb, wh, c4tot), lambda i: (i, 0, 0)),
                      pl.BlockSpec((tb, 2, wh, c2), lambda i: (i, 0, 0, 0)),
                      pl.BlockSpec((2, c4tot), lambda i: (0, 0))],
            out_specs=pl.BlockSpec((tb, 2, wh, c2), lambda i: (i, 0, 0, 0))),
        compiler_params=_mosaic(("parallel",)),
    )(zt, res, ss)
    return out[:rows]


def gap_fc(x, wfc, bfc):
    """AdaptiveAvgPool2d(1) + squeeze + Linear, fused: (N,H,W,C) -> (N, nc)."""
    n, h, w, c = x.shape
    hw = h * w
    nc = wfc.shape[1]
    ts = _round_up(min(hw, 1024), 8)
    hw_p = _round_up(hw, ts)
    xs = x.reshape(n, hw, c)
    if hw_p != hw:
        xs = jnp.pad(xs, ((0, 0), (0, hw_p - hw), (0, 0)))
    return pl.pallas_call(
        functools.partial(_gap_fc_kernel, inv_hw=1.0 / hw),
        out_shape=jax.ShapeDtypeStruct((n, nc), jnp.float32),
        grid_spec=pltpu.PrefetchScalarGridSpec(
            num_scalar_prefetch=0,
            grid=(hw_p // ts,),
            in_specs=[pl.BlockSpec((n, ts, c), lambda i: (0, i, 0)),
                      pl.BlockSpec((c, nc), lambda i: (0, 0)),
                      pl.BlockSpec((1, nc), lambda i: (0, 0))],
            out_specs=pl.BlockSpec((n, nc), lambda i: (0, 0)),
            scratch_shapes=[pltpu.VMEM((n, c), jnp.float32)]),
        compiler_params=_mosaic(("arbitrary",)),
    )(xs, wfc, bfc)


# ----------------------------------------------------------------------------
# Model
# ----------------------------------------------------------------------------

def bn_scale_shift(stats, gamma, beta, count, eps=1e-5):
    """Combine per-image, per-phase (sum, sumsq) into BN scale/shift.
    Batch statistics (training-mode forward), biased variance."""
    c = gamma.shape[0]
    s = jnp.sum(stats, axis=0).reshape(2, 4, c).sum(axis=1)    # (2, C)
    mean = s[0] / count
    # TODO(synk): E[x^2]-E[x]^2 is cancellation-prone for very large counts.
    var = s[1] / count - mean * mean
    scale = gamma * jax.lax.rsqrt(var + eps)
    shift = beta - mean * scale
    return jnp.stack([jnp.tile(scale, 4), jnp.tile(shift, 4)], axis=0)  # (2,4C)


def wavemix_block(x, bp):
    n, h, w, c = x.shape
    hh, wh = h // 2, w // 2
    xv = x.reshape(n * hh, 2, wh, 2 * c)     # free view: (row parity, (col parity, ch))
    # 1) fused conv_input(1x1) + Haar DWT + fc1 -> GELU -> fc2 (Dropout == id)
    z = dwt_mlp(xv, bp["ci_w"], bp["zb"], bp["fc1_w"], bp["fc1_b"],
                bp["fc2_w"], bp["fc2_b"]).reshape(n, hh, wh, c)
    # 2) ConvTranspose2d(4,4,s2,p1): 4 K-stacked parity-phase dots per image,
    #    with per-image BatchNorm sum/sumsq emitted as a fused second output.
    zp = jnp.pad(z, ((0, 0), (1, 1), (1, 1), (0, 0)))
    zt, stats = tap_conv_groups(zp, bp["ct_w"], bp["ct_b"], _CT_GROUPS,
                                with_stats=True)
    # 3) BatchNorm (batch stats) + phase interleave + residual in one kernel.
    ss = bn_scale_shift(stats, bp["bn_g"], bp["bn_b"], count=n * h * w)
    out = bn_interleave_residual(zt.reshape(n * hh, wh, 4 * c), xv, ss)
    return out.reshape(n, h, w, c)


def wavemix_lite_classifier(x_nchw, params):
    """Full forward pass. x_nchw: (N, 3, H, W) float32 -> (N, num_class)."""
    x = jnp.transpose(x_nchw, (0, 2, 3, 1)).astype(jnp.float32)   # NCHW -> NHWC
    # stem: two 3x3 'same' convs (3 -> dim/2 -> dim), each ONE K=9*Cin dot
    xp = jnp.pad(x, ((0, 0), (1, 1), (1, 1), (0, 8 - 3)))   # halo + ch pad to 8
    x = tap_conv_groups(xp, params["stem1_w"], params["stem1_b"], _CONV3_GROUPS)
    x = jnp.pad(x, ((0, 0), (1, 1), (1, 1), (0, 0)))
    x = tap_conv_groups(x, params["stem2_w"], params["stem2_b"], _CONV3_GROUPS)
    # WaveMixLite blocks
    for bp in params["blocks"]:
        x = wavemix_block(x, bp)
    # AdaptiveAvgPool2d(1) + squeeze + Linear(dim, num_class), fused
    return gap_fc(x, params["fc_w"], params["fc_b"])


# ----------------------------------------------------------------------------
# Parameters: PyTorch layouts + one-time kernel-layout prep
# ----------------------------------------------------------------------------

def init_params(key, num_class, num_block, dim, mul):
    keys = iter(jax.random.split(key, 8 + 8 * num_block))

    def rnd(shape, scale=0.05):
        return jax.random.normal(next(keys), shape, jnp.float32) * scale

    params = {
        # PyTorch layouts: Conv2d (Cout, Cin, kh, kw); ConvTranspose2d
        # (Cin, Cout, kh, kw); Linear (out, in).
        "stem1_w": rnd((dim // 2, 3, 3, 3)), "stem1_b": rnd((dim // 2,)),
        "stem2_w": rnd((dim, dim // 2, 3, 3)), "stem2_b": rnd((dim,)),
        "fc_w": rnd((num_class, dim)), "fc_b": rnd((num_class,)),
        "blocks": [],
    }
    for _ in range(num_block):
        params["blocks"].append({
            "ci_w": rnd((dim // 4, dim, 1, 1)), "ci_b": rnd((dim // 4,)),
            "fc1_w": rnd((dim * mul, dim, 1, 1)), "fc1_b": rnd((dim * mul,)),
            "fc2_w": rnd((dim, dim * mul, 1, 1)), "fc2_b": rnd((dim,)),
            "ct_w": rnd((dim, dim, 4, 4)), "ct_b": rnd((dim,)),
            "bn_g": jnp.ones((dim,), jnp.float32),
            "bn_b": jnp.zeros((dim,), jnp.float32),
        })
    return params


def prepare_params(p):
    """One-time conversion into kernel-ready layouts (K-stacked tap weights,
    transposed 1x1 weights, (1, C) bias rows).  Hoisted out of the forward."""

    def conv3_kstack(w_pt, cinp):                 # Conv2d (Cout, Cin, 3, 3)
        co, ci, _, _ = w_pt.shape
        mats = []
        for di in range(3):
            for dj in range(3):
                m = jnp.transpose(w_pt[:, :, di, dj])         # (Cin, Cout)
                if cinp != ci:
                    m = jnp.pad(m, ((0, cinp - ci), (0, 0)))
                mats.append(m)
        return jnp.concatenate(mats, axis=0)[None]            # (1, 9*cinp, Cout)

    def convT_kstack(w_pt):                       # ConvTranspose2d (Cin, Cout, 4, 4)
        groups = []
        for r in (0, 1):
            for s in (0, 1):
                taps = [w_pt[:, :, 3 - r - 2 * dh, 3 - s - 2 * dw]
                        for dh in (0, 1) for dw in (0, 1)]     # (Cin, Cout) each
                groups.append(jnp.concatenate(taps, axis=0))   # (4*Cin, Cout)
        return jnp.stack(groups, axis=0)                       # (4, 4*Cin, Cout)

    def row(b):
        return b.reshape(1, -1)

    dim = p["stem2_w"].shape[0]
    out = {
        "stem1_w": conv3_kstack(p["stem1_w"], 8), "stem1_b": row(p["stem1_b"]),
        "stem2_w": conv3_kstack(p["stem2_w"], dim // 2),
        "stem2_b": row(p["stem2_b"]),
        "fc_w": jnp.transpose(p["fc_w"]), "fc_b": row(p["fc_b"]),
        "blocks": [],
    }
    for bp in p["blocks"]:
        c4 = bp["ci_w"].shape[0]
        out["blocks"].append({
            "ci_w": jnp.transpose(bp["ci_w"][:, :, 0, 0]),     # (C, C/4)
            # conv_input bias survives only in the LL band (x2); zero elsewhere
            "zb": jnp.concatenate(
                [2.0 * bp["ci_b"], jnp.zeros((3 * c4,), jnp.float32)])[None],
            "fc1_w": jnp.transpose(bp["fc1_w"][:, :, 0, 0]),
            "fc1_b": row(bp["fc1_b"]),
            "fc2_w": jnp.transpose(bp["fc2_w"][:, :, 0, 0]),
            "fc2_b": row(bp["fc2_b"]),
            "ct_w": convT_kstack(bp["ct_w"]),
            "ct_b": row(jnp.tile(bp["ct_b"], 4)),   # same bias for all 4 phases
            "bn_g": bp["bn_g"], "bn_b": bp["bn_b"],
        })
    return out


# ----------------------------------------------------------------------------
# Main
# ----------------------------------------------------------------------------

if __name__ == "__main__":
    NUM_CLASS = 10
    NUM_BLOCK = 2
    DIM = 16          # dim_channel (divisible by 4)
    MUL = 2
    BATCH, H, W = 2, 16, 16

    key = jax.random.PRNGKey(0)
    k_x, k_p = jax.random.split(key)
    x = jax.random.normal(k_x, (BATCH, 3, H, W), jnp.float32)     # NCHW input
    params = prepare_params(init_params(k_p, NUM_CLASS, NUM_BLOCK, DIM, MUL))

    fwd = jax.jit(wavemix_lite_classifier)
    logits = jax.block_until_ready(fwd(x, params))

    assert logits.shape == (BATCH, NUM_CLASS), logits.shape
    assert bool(jnp.all(jnp.isfinite(logits)))
    print("KERNEL_OK")
</pallas_src>

<mosaic_0001>
module attributes {stable_mosaic.version = 11 : i64} {
  func.func @_tap_conv_kernel(%arg0: i32, %arg1: memref<1x18x18x8xf32, #tpu.memory_space<vmem>>, %arg2: memref<1x72x8xf32, #tpu.memory_space<vmem>>, %arg3: memref<1x8xf32, #tpu.memory_space<vmem>>, %arg4: memref<1x16x16x8xf32, #tpu.memory_space<vmem>>) attributes {dimension_semantics = [#tpu.dimension_semantics<parallel>], iteration_bounds = array<i64: 2>, scalar_prefetch = 0 : i64, scratch_operands = 0 : i64, tpu.core_type = #tpu.core_type<tc>, window_params = [{transform_indices = @transform_0, window_bounds = array<i64: 1, 18, 18, 8>}, {pipeline_mode = #tpu.pipeline_mode<synchronous>, transform_indices = @transform_1, window_bounds = array<i64: 1, 72, 8>}, {pipeline_mode = #tpu.pipeline_mode<synchronous>, transform_indices = @transform_2, window_bounds = array<i64: 1, 8>}, {transform_indices = @transform_3, window_bounds = array<i64: 1, 16, 16, 8>}]} {
    %c0 = arith.constant 0 : index
    %c0_0 = arith.constant 0 : index
    %c0_1 = arith.constant 0 : index
    %c0_2 = arith.constant 0 : index
    %0 = vector.load %arg1[%c0, %c0_0, %c0_1, %c0_2] : memref<1x18x18x8xf32, #tpu.memory_space<vmem>>, vector<1x18x18x8xf32>
    %1 = vector.extract_strided_slice %0 {offsets = [0, 0, 0, 0], sizes = [1, 16, 16, 8], strides = [1, 1, 1, 1]} : vector<1x18x18x8xf32> to vector<1x16x16x8xf32>
    %2 = vector.shape_cast %1 : vector<1x16x16x8xf32> to vector<16x16x8xf32>
    %3 = vector.extract_strided_slice %0 {offsets = [0, 0, 1, 0], sizes = [1, 16, 16, 8], strides = [1, 1, 1, 1]} : vector<1x18x18x8xf32> to vector<1x16x16x8xf32>
    %4 = vector.shape_cast %3 : vector<1x16x16x8xf32> to vector<16x16x8xf32>
    %5 = vector.extract_strided_slice %0 {offsets = [0, 0, 2, 0], sizes = [1, 16, 16, 8], strides = [1, 1, 1, 1]} : vector<1x18x18x8xf32> to vector<1x16x16x8xf32>
    %6 = vector.shape_cast %5 : vector<1x16x16x8xf32> to vector<16x16x8xf32>
    %7 = vector.extract_strided_slice %0 {offsets = [0, 1, 0, 0], sizes = [1, 16, 16, 8], strides = [1, 1, 1, 1]} : vector<1x18x18x8xf32> to vector<1x16x16x8xf32>
    %8 = vector.shape_cast %7 : vector<1x16x16x8xf32> to vector<16x16x8xf32>
    %9 = vector.extract_strided_slice %0 {offsets = [0, 1, 1, 0], sizes = [1, 16, 16, 8], strides = [1, 1, 1, 1]} : vector<1x18x18x8xf32> to vector<1x16x16x8xf32>
    %10 = vector.shape_cast %9 : vector<1x16x16x8xf32> to vector<16x16x8xf32>
    %11 = vector.extract_strided_slice %0 {offsets = [0, 1, 2, 0], sizes = [1, 16, 16, 8], strides = [1, 1, 1, 1]} : vector<1x18x18x8xf32> to vector<1x16x16x8xf32>
    %12 = vector.shape_cast %11 : vector<1x16x16x8xf32> to vector<16x16x8xf32>
    %13 = vector.extract_strided_slice %0 {offsets = [0, 2, 0, 0], sizes = [1, 16, 16, 8], strides = [1, 1, 1, 1]} : vector<1x18x18x8xf32> to vector<1x16x16x8xf32>
    %14 = vector.shape_cast %13 : vector<1x16x16x8xf32> to vector<16x16x8xf32>
    %15 = vector.extract_strided_slice %0 {offsets = [0, 2, 1, 0], sizes = [1, 16, 16, 8], strides = [1, 1, 1, 1]} : vector<1x18x18x8xf32> to vector<1x16x16x8xf32>
    %16 = vector.shape_cast %15 : vector<1x16x16x8xf32> to vector<16x16x8xf32>
    %17 = vector.extract_strided_slice %0 {offsets = [0, 2, 2, 0], sizes = [1, 16, 16, 8], strides = [1, 1, 1, 1]} : vector<1x18x18x8xf32> to vector<1x16x16x8xf32>
    %18 = vector.shape_cast %17 : vector<1x16x16x8xf32> to vector<16x16x8xf32>
    %19 = tpu.concatenate %2, %4, %6, %8, %10, %12, %14, %16, %18 in 2 : vector<16x16x8xf32>, vector<16x16x8xf32>, vector<16x16x8xf32>, vector<16x16x8xf32>, vector<16x16x8xf32>, vector<16x16x8xf32>, vector<16x16x8xf32>, vector<16x16x8xf32>, vector<16x16x8xf32> -> vector<16x16x72xf32>
    %20 = vector.shape_cast %19 : vector<16x16x72xf32> to vector<256x72xf32>
    %c0_3 = arith.constant 0 : index
    %c0_4 = arith.constant 0 : index
    %c0_5 = arith.constant 0 : index
    %21 = vector.load %arg2[%c0_3, %c0_4, %c0_5] : memref<1x72x8xf32, #tpu.memory_space<vmem>>, vector<1x72x8xf32>
    %22 = vector.shape_cast %21 : vector<1x72x8xf32> to vector<72x8xf32>
    %cst = arith.constant dense<0.000000e+00> : vector<256x8xf32>
    %23 = tpu.matmul %20, %22, %cst {dimension_numbers = #tpu.dot_dimension_numbers<[1], [0], [0], [1], [0, 0, 1, 1], [], []>} : vector<256x72xf32>, vector<72x8xf32>, vector<256x8xf32> -> vector<256x8xf32>
    %c0_6 = arith.constant 0 : index
    %c0_7 = arith.constant 0 : index
    %24 = vector.load %arg3[%c0_6, %c0_7] : memref<1x8xf32, #tpu.memory_space<vmem>>, vector<1x8xf32>
    %25 = vector.broadcast %24 : vector<1x8xf32> to vector<256x8xf32>
    %26 = arith.addf %23, %25 : vector<256x8xf32>
    %27 = vector.shape_cast %26 : vector<256x8xf32> to vector<16x16x8xf32>
    %c0_8 = arith.constant 0 : index
    %c0_9 = arith.constant 0 : index
    %c0_10 = arith.constant 0 : index
    %c0_11 = arith.constant 0 : index
    %28 = vector.load %arg4[%c0_8, %c0_9, %c0_10, %c0_11] : memref<1x16x16x8xf32, #tpu.memory_space<vmem>>, vector<1x16x16x8xf32>
    %29 = vector.shape_cast %28 : vector<1x16x16x8xf32> to vector<16x16x8xf32>
    %30 = vector.shape_cast %27 : vector<16x16x8xf32> to vector<1x16x16x8xf32>
    tpu.vector_store %arg4[%c0_8, %c0_9, %c0_10, %c0_11], %30 {strides = array<i32>} : memref<1x16x16x8xf32, #tpu.memory_space<vmem>>, vector<1x16x16x8xf32>,
    return
  }
  func.func @transform_0(%arg0: i32) -> (i32, i32, i32, i32) {
    %c0_i32 = arith.constant 0 : i32
    %c0_i32_0 = arith.constant 0 : i32
    %c0_i32_1 = arith.constant 0 : i32
    %c0_i32_2 = arith.constant 0 : i32
    return %arg0, %c0_i32, %c0_i32_0, %c0_i32_1 : i32, i32, i32, i32
  }
  func.func @transform_1(%arg0: i32) -> (i32, i32, i32) {
    %c0_i32 = arith.constant 0 : i32
    %c0_i32_0 = arith.constant 0 : i32
    %c0_i32_1 = arith.constant 0 : i32
    %c0_i32_2 = arith.constant 0 : i32
    return %c0_i32, %c0_i32_0, %c0_i32_1 : i32, i32, i32
  }
  func.func @transform_2(%arg0: i32) -> (i32, i32) {
    %c0_i32 = arith.constant 0 : i32
    %c0_i32_0 = arith.constant 0 : i32
    %c0_i32_1 = arith.constant 0 : i32
    return %c0_i32, %c0_i32_0 : i32, i32
  }
  func.func @transform_3(%arg0: i32) -> (i32, i32, i32, i32) {
    %c0_i32 = arith.constant 0 : i32
    %c0_i32_0 = arith.constant 0 : i32
    %c0_i32_1 = arith.constant 0 : i32
    %c0_i32_2 = arith.constant 0 : i32
    return %arg0, %c0_i32, %c0_i32_0, %c0_i32_1 : i32, i32, i32, i32
  }
}

module attributes {stable_mosaic.version = 11 : i64} {
  func.func @_tap_conv_kernel(%arg0: i32, %arg1: memref<1x18x18x8xf32, #tpu.memory_space<vmem>>, %arg2: memref<1x72x16xf32, #tpu.memory_space<vmem>>, %arg3: memref<1x16xf32, #tpu.memory_space<vmem>>, %arg4: memref<1x16x16x16xf32, #tpu.memory_space<vmem>>) attributes {dimension_semantics = [#tpu.dimension_semantics<parallel>], iteration_bounds = array<i64: 2>, scalar_prefetch = 0 : i64, scratch_operands = 0 : i64, tpu.core_type = #tpu.core_type<tc>, window_params = [{transform_indices = @transform_0, window_bounds = array<i64: 1, 18, 18, 8>}, {pipeline_mode = #tpu.pipeline_mode<synchronous>, transform_indices = @transform_1, window_bounds = array<i64: 1, 72, 16>}, {pipeline_mode = #tpu.pipeline_mode<synchronous>, transform_indices = @transform_2, window_bounds = array<i64: 1, 16>}, {transform_indices = @transform_3, window_bounds = array<i64: 1, 16, 16, 16>}]} {
    %c0 = arith.constant 0 : index
    %c0_0 = arith.constant 0 : index
    %c0_1 = arith.constant 0 : index
    %c0_2 = arith.constant 0 : index
    %0 = vector.load %arg1[%c0, %c0_0, %c0_1, %c0_2] : memref<1x18x18x8xf32, #tpu.memory_space<vmem>>, vector<1x18x18x8xf32>
    %1 = vector.extract_strided_slice %0 {offsets = [0, 0, 0, 0], sizes = [1, 16, 16, 8], strides = [1, 1, 1, 1]} : vector<1x18x18x8xf32> to vector<1x16x16x8xf32>
    %2 = vector.shape_cast %1 : vector<1x16x16x8xf32> to vector<16x16x8xf32>
    %3 = vector.extract_strided_slice %0 {offsets = [0, 0, 1, 0], sizes = [1, 16, 16, 8], strides = [1, 1, 1, 1]} : vector<1x18x18x8xf32> to vector<1x16x16x8xf32>
    %4 = vector.shape_cast %3 : vector<1x16x16x8xf32> to vector<16x16x8xf32>
    %5 = vector.extract_strided_slice %0 {offsets = [0, 0, 2, 0], sizes = [1, 16, 16, 8], strides = [1, 1, 1, 1]} : vector<1x18x18x8xf32> to vector<1x16x16x8xf32>
    %6 = vector.shape_cast %5 : vector<1x16x16x8xf32> to vector<16x16x8xf32>
    %7 = vector.extract_strided_slice %0 {offsets = [0, 1, 0, 0], sizes = [1, 16, 16, 8], strides = [1, 1, 1, 1]} : vector<1x18x18x8xf32> to vector<1x16x16x8xf32>
    %8 = vector.shape_cast %7 : vector<1x16x16x8xf32> to vector<16x16x8xf32>
    %9 = vector.extract_strided_slice %0 {offsets = [0, 1, 1, 0], sizes = [1, 16, 16, 8], strides = [1, 1, 1, 1]} : vector<1x18x18x8xf32> to vector<1x16x16x8xf32>
    %10 = vector.shape_cast %9 : vector<1x16x16x8xf32> to vector<16x16x8xf32>
    %11 = vector.extract_strided_slice %0 {offsets = [0, 1, 2, 0], sizes = [1, 16, 16, 8], strides = [1, 1, 1, 1]} : vector<1x18x18x8xf32> to vector<1x16x16x8xf32>
    %12 = vector.shape_cast %11 : vector<1x16x16x8xf32> to vector<16x16x8xf32>
    %13 = vector.extract_strided_slice %0 {offsets = [0, 2, 0, 0], sizes = [1, 16, 16, 8], strides = [1, 1, 1, 1]} : vector<1x18x18x8xf32> to vector<1x16x16x8xf32>
    %14 = vector.shape_cast %13 : vector<1x16x16x8xf32> to vector<16x16x8xf32>
    %15 = vector.extract_strided_slice %0 {offsets = [0, 2, 1, 0], sizes = [1, 16, 16, 8], strides = [1, 1, 1, 1]} : vector<1x18x18x8xf32> to vector<1x16x16x8xf32>
    %16 = vector.shape_cast %15 : vector<1x16x16x8xf32> to vector<16x16x8xf32>
    %17 = vector.extract_strided_slice %0 {offsets = [0, 2, 2, 0], sizes = [1, 16, 16, 8], strides = [1, 1, 1, 1]} : vector<1x18x18x8xf32> to vector<1x16x16x8xf32>
    %18 = vector.shape_cast %17 : vector<1x16x16x8xf32> to vector<16x16x8xf32>
    %19 = tpu.concatenate %2, %4, %6, %8, %10, %12, %14, %16, %18 in 2 : vector<16x16x8xf32>, vector<16x16x8xf32>, vector<16x16x8xf32>, vector<16x16x8xf32>, vector<16x16x8xf32>, vector<16x16x8xf32>, vector<16x16x8xf32>, vector<16x16x8xf32>, vector<16x16x8xf32> -> vector<16x16x72xf32>
    %20 = vector.shape_cast %19 : vector<16x16x72xf32> to vector<256x72xf32>
    %c0_3 = arith.constant 0 : index
    %c0_4 = arith.constant 0 : index
    %c0_5 = arith.constant 0 : index
    %21 = vector.load %arg2[%c0_3, %c0_4, %c0_5] : memref<1x72x16xf32, #tpu.memory_space<vmem>>, vector<1x72x16xf32>
    %22 = vector.shape_cast %21 : vector<1x72x16xf32> to vector<72x16xf32>
    %cst = arith.constant dense<0.000000e+00> : vector<256x16xf32>
    %23 = tpu.matmul %20, %22, %cst {dimension_numbers = #tpu.dot_dimension_numbers<[1], [0], [0], [1], [0, 0, 1, 1], [], []>} : vector<256x72xf32>, vector<72x16xf32>, vector<256x16xf32> -> vector<256x16xf32>
    %c0_6 = arith.constant 0 : index
    %c0_7 = arith.constant 0 : index
    %24 = vector.load %arg3[%c0_6, %c0_7] : memref<1x16xf32, #tpu.memory_space<vmem>>, vector<1x16xf32>
    %25 = vector.broadcast %24 : vector<1x16xf32> to vector<256x16xf32>
    %26 = arith.addf %23, %25 : vector<256x16xf32>
    %27 = vector.shape_cast %26 : vector<256x16xf32> to vector<16x16x16xf32>
    %c0_8 = arith.constant 0 : index
    %c0_9 = arith.constant 0 : index
    %c0_10 = arith.constant 0 : index
    %c0_11 = arith.constant 0 : index
    %28 = vector.load %arg4[%c0_8, %c0_9, %c0_10, %c0_11] : memref<1x16x16x16xf32, #tpu.memory_space<vmem>>, vector<1x16x16x16xf32>
    %29 = vector.shape_cast %28 : vector<1x16x16x16xf32> to vector<16x16x16xf32>
    %30 = vector.shape_cast %27 : vector<16x16x16xf32> to vector<1x16x16x16xf32>
    tpu.vector_store %arg4[%c0_8, %c0_9, %c0_10, %c0_11], %30 {strides = array<i32>} : memref<1x16x16x16xf32, #tpu.memory_space<vmem>>, vector<1x16x16x16xf32>,
    return
  }
  func.func @transform_0(%arg0: i32) -> (i32, i32, i32, i32) {
    %c0_i32 = arith.constant 0 : i32
    %c0_i32_0 = arith.constant 0 : i32
    %c0_i32_1 = arith.constant 0 : i32
    %c0_i32_2 = arith.constant 0 : i32
    return %arg0, %c0_i32, %c0_i32_0, %c0_i32_1 : i32, i32, i32, i32
  }
  func.func @transform_1(%arg0: i32) -> (i32, i32, i32) {
    %c0_i32 = arith.constant 0 : i32
    %c0_i32_0 = arith.constant 0 : i32
    %c0_i32_1 = arith.constant 0 : i32
    %c0_i32_2 = arith.constant 0 : i32
    return %c0_i32, %c0_i32_0, %c0_i32_1 : i32, i32, i32
  }
  func.func @transform_2(%arg0: i32) -> (i32, i32) {
    %c0_i32 = arith.constant 0 : i32
    %c0_i32_0 = arith.constant 0 : i32
    %c0_i32_1 = arith.constant 0 : i32
    return %c0_i32, %c0_i32_0 : i32, i32
  }
  func.func @transform_3(%arg0: i32) -> (i32, i32, i32, i32) {
    %c0_i32 = arith.constant 0 : i32
    %c0_i32_0 = arith.constant 0 : i32
    %c0_i32_1 = arith.constant 0 : i32
    %c0_i32_2 = arith.constant 0 : i32
    return %arg0, %c0_i32, %c0_i32_0, %c0_i32_1 : i32, i32, i32, i32
  }
}

module attributes {stable_mosaic.version = 11 : i64} {
  func.func @_dwt_mlp_kernel(%arg0: i32, %arg1: memref<16x2x8x32xf32, #tpu.memory_space<vmem>>, %arg2: memref<16x4xf32, #tpu.memory_space<vmem>>, %arg3: memref<1x16xf32, #tpu.memory_space<vmem>>, %arg4: memref<16x32xf32, #tpu.memory_space<vmem>>, %arg5: memref<1x32xf32, #tpu.memory_space<vmem>>, %arg6: memref<32x16xf32, #tpu.memory_space<vmem>>, %arg7: memref<1x16xf32, #tpu.memory_space<vmem>>, %arg8: memref<16x8x16xf32, #tpu.memory_space<vmem>>) attributes {dimension_semantics = [#tpu.dimension_semantics<parallel>], iteration_bounds = array<i64: 1>, scalar_prefetch = 0 : i64, scratch_operands = 0 : i64, tpu.core_type = #tpu.core_type<tc>, window_params = [{transform_indices = @transform_0, window_bounds = array<i64: 16, 2, 8, 32>}, {pipeline_mode = #tpu.pipeline_mode<synchronous>, transform_indices = @transform_1, window_bounds = array<i64: 16, 4>}, {pipeline_mode = #tpu.pipeline_mode<synchronous>, transform_indices = @transform_2, window_bounds = array<i64: 1, 16>}, {pipeline_mode = #tpu.pipeline_mode<synchronous>, transform_indices = @transform_3, window_bounds = array<i64: 16, 32>}, {pipeline_mode = #tpu.pipeline_mode<synchronous>, transform_indices = @transform_4, window_bounds = array<i64: 1, 32>}, {pipeline_mode = #tpu.pipeline_mode<synchronous>, transform_indices = @transform_5, window_bounds = array<i64: 32, 16>}, {pipeline_mode = #tpu.pipeline_mode<synchronous>, transform_indices = @transform_6, window_bounds = array<i64: 1, 16>}, {transform_indices = @transform_7, window_bounds = array<i64: 16, 8, 16>}]} {
    %c0 = arith.constant 0 : index
    %c0_0 = arith.constant 0 : index
    %c0_1 = arith.constant 0 : index
    %c0_2 = arith.constant 0 : index
    %0 = vector.load %arg1[%c0, %c0_0, %c0_1, %c0_2] : memref<16x2x8x32xf32, #tpu.memory_space<vmem>>, vector<16x2x8x32xf32>
    %1 = vector.extract_strided_slice %0 {offsets = [0, 0, 0, 0], sizes = [16, 1, 8, 16], strides = [1, 1, 1, 1]} : vector<16x2x8x32xf32> to vector<16x1x8x16xf32>
    %2 = vector.shape_cast %1 : vector<16x1x8x16xf32> to vector<16x8x16xf32>
    %3 = vector.extract_strided_slice %0 {offsets = [0, 0, 0, 16], sizes = [16, 1, 8, 16], strides = [1, 1, 1, 1]} : vector<16x2x8x32xf32> to vector<16x1x8x16xf32>
    %4 = vector.shape_cast %3 : vector<16x1x8x16xf32> to vector<16x8x16xf32>
    %5 = vector.extract_strided_slice %0 {offsets = [0, 1, 0, 0], sizes = [16, 1, 8, 16], strides = [1, 1, 1, 1]} : vector<16x2x8x32xf32> to vector<16x1x8x16xf32>
    %6 = vector.shape_cast %5 : vector<16x1x8x16xf32> to vector<16x8x16xf32>
    %7 = vector.extract_strided_slice %0 {offsets = [0, 1, 0, 16], sizes = [16, 1, 8, 16], strides = [1, 1, 1, 1]} : vector<16x2x8x32xf32> to vector<16x1x8x16xf32>
    %8 = vector.shape_cast %7 : vector<16x1x8x16xf32> to vector<16x8x16xf32>
    %9 = arith.addf %2, %4 : vector<16x8x16xf32>
    %10 = arith.addf %6, %8 : vector<16x8x16xf32>
    %11 = arith.addf %9, %10 : vector<16x8x16xf32>
    %cst = arith.constant 5.000000e-01 : f32
    %12 = vector.broadcast %cst : f32 to vector<16x8x16xf32>
    %13 = arith.mulf %11, %12 : vector<16x8x16xf32>
    %14 = arith.subf %2, %4 : vector<16x8x16xf32>
    %15 = arith.subf %6, %8 : vector<16x8x16xf32>
    %16 = arith.addf %14, %15 : vector<16x8x16xf32>
    %cst_3 = arith.constant 5.000000e-01 : f32
    %17 = vector.broadcast %cst_3 : f32 to vector<16x8x16xf32>
    %18 = arith.mulf %16, %17 : vector<16x8x16xf32>
    %19 = arith.addf %2, %4 : vector<16x8x16xf32>
    %20 = arith.addf %6, %8 : vector<16x8x16xf32>
    %21 = arith.subf %19, %20 : vector<16x8x16xf32>
    %cst_4 = arith.constant 5.000000e-01 : f32
    %22 = vector.broadcast %cst_4 : f32 to vector<16x8x16xf32>
    %23 = arith.mulf %21, %22 : vector<16x8x16xf32>
    %24 = arith.subf %2, %4 : vector<16x8x16xf32>
    %25 = arith.subf %6, %8 : vector<16x8x16xf32>
    %26 = arith.subf %24, %25 : vector<16x8x16xf32>
    %cst_5 = arith.constant 5.000000e-01 : f32
    %27 = vector.broadcast %cst_5 : f32 to vector<16x8x16xf32>
    %28 = arith.mulf %26, %27 : vector<16x8x16xf32>
    %29 = vector.shape_cast %13 : vector<16x8x16xf32> to vector<128x16xf32>
    %c0_6 = arith.constant 0 : index
    %c0_7 = arith.constant 0 : index
    %30 = vector.load %arg2[%c0_6, %c0_7] : memref<16x4xf32, #tpu.memory_space<vmem>>, vector<16x4xf32>
    %cst_8 = arith.constant dense<0.000000e+00> : vector<128x4xf32>
    %31 = tpu.matmul %29, %30, %cst_8 {dimension_numbers = #tpu.dot_dimension_numbers<[1], [0], [0], [1], [0, 0, 1, 1], [], []>} : vector<128x16xf32>, vector<16x4xf32>, vector<128x4xf32> -> vector<128x4xf32>
    %32 = vector.shape_cast %18 : vector<16x8x16xf32> to vector<128x16xf32>
    %c0_9 = arith.constant 0 : index
    %c0_10 = arith.constant 0 : index
    %33 = vector.load %arg2[%c0_9, %c0_10] : memref<16x4xf32, #tpu.memory_space<vmem>>, vector<16x4xf32>
    %cst_11 = arith.constant dense<0.000000e+00> : vector<128x4xf32>
    %34 = tpu.matmul %32, %33, %cst_11 {dimension_numbers = #tpu.dot_dimension_numbers<[1], [0], [0], [1], [0, 0, 1, 1], [], []>} : vector<128x16xf32>, vector<16x4xf32>, vector<128x4xf32> -> vector<128x4xf32>
    %35 = vector.shape_cast %23 : vector<16x8x16xf32> to vector<128x16xf32>
    %c0_12 = arith.constant 0 : index
    %c0_13 = arith.constant 0 : index
    %36 = vector.load %arg2[%c0_12, %c0_13] : memref<16x4xf32, #tpu.memory_space<vmem>>, vector<16x4xf32>
    %cst_14 = arith.constant dense<0.000000e+00> : vector<128x4xf32>
    %37 = tpu.matmul %35, %36, %cst_14 {dimension_numbers = #tpu.dot_dimension_numbers<[1], [0], [0], [1], [0, 0, 1, 1], [], []>} : vector<128x16xf32>, vector<16x4xf32>, vector<128x4xf32> -> vector<128x4xf32>
    %38 = vector.shape_cast %28 : vector<16x8x16xf32> to vector<128x16xf32>
    %c0_15 = arith.constant 0 : index
    %c0_16 = arith.constant 0 : index
    %39 = vector.load %arg2[%c0_15, %c0_16] : memref<16x4xf32, #tpu.memory_space<vmem>>, vector<16x4xf32>
    %cst_17 = arith.constant dense<0.000000e+00> : vector<128x4xf32>
    %40 = tpu.matmul %38, %39, %cst_17 {dimension_numbers = #tpu.dot_dimension_numbers<[1], [0], [0], [1], [0, 0, 1, 1], [], []>} : vector<128x16xf32>, vector<16x4xf32>, vector<128x4xf32> -> vector<128x4xf32>
    %41 = tpu.concatenate %31, %34, %37, %40 in 1 : vector<128x4xf32>, vector<128x4xf32>, vector<128x4xf32>, vector<128x4xf32> -> vector<128x16xf32>
    %c0_18 = arith.constant 0 : index
    %c0_19 = arith.constant 0 : index
    %42 = vector.load %arg3[%c0_18, %c0_19] : memref<1x16xf32, #tpu.memory_space<vmem>>, vector<1x16xf32>
    %43 = vector.broadcast %42 : vector<1x16xf32> to vector<128x16xf32>
    %44 = arith.addf %41, %43 : vector<128x16xf32>
    %c0_20 = arith.constant 0 : index
    %c0_21 = arith.constant 0 : index
    %45 = vector.load %arg4[%c0_20, %c0_21] : memref<16x32xf32, #tpu.memory_space<vmem>>, vector<16x32xf32>
    %cst_22 = arith.constant dense<0.000000e+00> : vector<128x32xf32>
    %46 = tpu.matmul %44, %45, %cst_22 {dimension_numbers = #tpu.dot_dimension_numbers<[1], [0], [0], [1], [0, 0, 1, 1], [], []>} : vector<128x16xf32>, vector<16x32xf32>, vector<128x32xf32> -> vector<128x32xf32>
    %c0_23 = arith.constant 0 : index
    %c0_24 = arith.constant 0 : index
    %47 = vector.load %arg5[%c0_23, %c0_24] : memref<1x32xf32, #tpu.memory_space<vmem>>, vector<1x32xf32>
    %48 = vector.broadcast %47 : vector<1x32xf32> to vector<128x32xf32>
    %49 = arith.addf %46, %48 : vector<128x32xf32>
    %cst_25 = arith.constant 5.000000e-01 : f32
    %50 = vector.broadcast %cst_25 : f32 to vector<128x32xf32>
    %51 = arith.mulf %50, %49 : vector<128x32xf32>
    %cst_26 = arith.constant 4.471500e-02 : f32
    %52 = vector.broadcast %cst_26 : f32 to vector<128x32xf32>
    %53 = arith.mulf %52, %49 : vector<128x32xf32>
    %54 = arith.mulf %53, %49 : vector<128x32xf32>
    %55 = arith.mulf %54, %49 : vector<128x32xf32>
    %56 = arith.addf %49, %55 : vector<128x32xf32>
    %cst_27 = arith.constant 0.797884583 : f32
    %57 = vector.broadcast %cst_27 : f32 to vector<128x32xf32>
    %58 = arith.mulf %57, %56 : vector<128x32xf32>
    %59 = math.tanh %58 : vector<128x32xf32>
    %cst_28 = arith.constant 1.000000e+00 : f32
    %60 = vector.broadcast %cst_28 : f32 to vector<128x32xf32>
    %61 = arith.addf %60, %59 : vector<128x32xf32>
    %62 = arith.mulf %51, %61 : vector<128x32xf32>
    %c0_29 = arith.constant 0 : index
    %c0_30 = arith.constant 0 : index
    %63 = vector.load %arg6[%c0_29, %c0_30] : memref<32x16xf32, #tpu.memory_space<vmem>>, vector<32x16xf32>
    %cst_31 = arith.constant dense<0.000000e+00> : vector<128x16xf32>
    %64 = tpu.matmul %62, %63, %cst_31 {dimension_numbers = #tpu.dot_dimension_numbers<[1], [0], [0], [1], [0, 0, 1, 1], [], []>} : vector<128x32xf32>, vector<32x16xf32>, vector<128x16xf32> -> vector<128x16xf32>
    %c0_32 = arith.constant 0 : index
    %c0_33 = arith.constant 0 : index
    %65 = vector.load %arg7[%c0_32, %c0_33] : memref<1x16xf32, #tpu.memory_space<vmem>>, vector<1x16xf32>
    %66 = vector.broadcast %65 : vector<1x16xf32> to vector<128x16xf32>
    %67 = arith.addf %64, %66 : vector<128x16xf32>
    %68 = vector.shape_cast %67 : vector<128x16xf32> to vector<16x8x16xf32>
    %c0_34 = arith.constant 0 : index
    %c0_35 = arith.constant 0 : index
    %c0_36 = arith.constant 0 : index
    %69 = vector.load %arg8[%c0_34, %c0_35, %c0_36] : memref<16x8x16xf32, #tpu.memory_space<vmem>>, vector<16x8x16xf32>
    tpu.vector_store %arg8[%c0_34, %c0_35, %c0_36], %68 {strides = array<i32>} : memref<16x8x16xf32, #tpu.memory_space<vmem>>, vector<16x8x16xf32>,
    return
  }
  func.func @transform_0(%arg0: i32) -> (i32, i32, i32, i32) {
    %c0_i32 = arith.constant 0 : i32
    %c0_i32_0 = arith.constant 0 : i32
    %c0_i32_1 = arith.constant 0 : i32
    %c0_i32_2 = arith.constant 0 : i32
    return %arg0, %c0_i32, %c0_i32_0, %c0_i32_1 : i32, i32, i32, i32
  }
  func.func @transform_1(%arg0: i32) -> (i32, i32) {
    %c0_i32 = arith.constant 0 : i32
    %c0_i32_0 = arith.constant 0 : i32
    %c0_i32_1 = arith.constant 0 : i32
    return %c0_i32, %c0_i32_0 : i32, i32
  }
  func.func @transform_2(%arg0: i32) -> (i32, i32) {
    %c0_i32 = arith.constant 0 : i32
    %c0_i32_0 = arith.constant 0 : i32
    %c0_i32_1 = arith.constant 0 : i32
    return %c0_i32, %c0_i32_0 : i32, i32
  }
  func.func @transform_3(%arg0: i32) -> (i32, i32) {
    %c0_i32 = arith.constant 0 : i32
    %c0_i32_0 = arith.constant 0 : i32
    %c0_i32_1 = arith.constant 0 : i32
    return %c0_i32, %c0_i32_0 : i32, i32
  }
  func.func @transform_4(%arg0: i32) -> (i32, i32) {
    %c0_i32 = arith.constant 0 : i32
    %c0_i32_0 = arith.constant 0 : i32
    %c0_i32_1 = arith.constant 0 : i32
    return %c0_i32, %c0_i32_0 : i32, i32
  }
  func.func @transform_5(%arg0: i32) -> (i32, i32) {
    %c0_i32 = arith.constant 0 : i32
    %c0_i32_0 = arith.constant 0 : i32
    %c0_i32_1 = arith.constant 0 : i32
    return %c0_i32, %c0_i32_0 : i32, i32
  }
  func.func @transform_6(%arg0: i32) -> (i32, i32) {
    %c0_i32 = arith.constant 0 : i32
    %c0_i32_0 = arith.constant 0 : i32
    %c0_i32_1 = arith.constant 0 : i32
    return %c0_i32, %c0_i32_0 : i32, i32
  }
  func.func @transform_7(%arg0: i32) -> (i32, i32, i32) {
    %c0_i32 = arith.constant 0 : i32
    %c0_i32_0 = arith.constant 0 : i32
    %c0_i32_1 = arith.constant 0 : i32
    return %arg0, %c0_i32, %c0_i32_0 : i32, i32, i32
  }
}

module attributes {stable_mosaic.version = 11 : i64} {
  func.func @_tap_conv_kernel(%arg0: i32, %arg1: memref<1x10x10x16xf32, #tpu.memory_space<vmem>>, %arg2: memref<4x64x16xf32, #tpu.memory_space<vmem>>, %arg3: memref<1x64xf32, #tpu.memory_space<vmem>>, %arg4: memref<1x8x8x64xf32, #tpu.memory_space<vmem>>, %arg5: memref<1x2x64xf32, #tpu.memory_space<vmem>>) attributes {dimension_semantics = [#tpu.dimension_semantics<parallel>], iteration_bounds = array<i64: 2>, scalar_prefetch = 0 : i64, scratch_operands = 0 : i64, tpu.core_type = #tpu.core_type<tc>, window_params = [{transform_indices = @transform_0, window_bounds = array<i64: 1, 10, 10, 16>}, {pipeline_mode = #tpu.pipeline_mode<synchronous>, transform_indices = @transform_1, window_bounds = array<i64: 4, 64, 16>}, {pipeline_mode = #tpu.pipeline_mode<synchronous>, transform_indices = @transform_2, window_bounds = array<i64: 1, 64>}, {transform_indices = @transform_3, window_bounds = array<i64: 1, 8, 8, 64>}, {transform_indices = @transform_4, window_bounds = array<i64: 1, 2, 64>}]} {
    %c0 = arith.constant 0 : index
    %c0_0 = arith.constant 0 : index
    %c0_1 = arith.constant 0 : index
    %c0_2 = arith.constant 0 : index
    %0 = vector.load %arg1[%c0, %c0_0, %c0_1, %c0_2] : memref<1x10x10x16xf32, #tpu.memory_space<vmem>>, vector<1x10x10x16xf32>
    %1 = vector.extract_strided_slice %0 {offsets = [0, 0, 0, 0], sizes = [1, 8, 8, 16], strides = [1, 1, 1, 1]} : vector<1x10x10x16xf32> to vector<1x8x8x16xf32>
    %2 = vector.shape_cast %1 : vector<1x8x8x16xf32> to vector<8x8x16xf32>
    %3 = vector.extract_strided_slice %0 {offsets = [0, 0, 1, 0], sizes = [1, 8, 8, 16], strides = [1, 1, 1, 1]} : vector<1x10x10x16xf32> to vector<1x8x8x16xf32>
    %4 = vector.shape_cast %3 : vector<1x8x8x16xf32> to vector<8x8x16xf32>
    %5 = vector.extract_strided_slice %0 {offsets = [0, 1, 0, 0], sizes = [1, 8, 8, 16], strides = [1, 1, 1, 1]} : vector<1x10x10x16xf32> to vector<1x8x8x16xf32>
    %6 = vector.shape_cast %5 : vector<1x8x8x16xf32> to vector<8x8x16xf32>
    %7 = vector.extract_strided_slice %0 {offsets = [0, 1, 1, 0], sizes = [1, 8, 8, 16], strides = [1, 1, 1, 1]} : vector<1x10x10x16xf32> to vector<1x8x8x16xf32>
    %8 = vector.shape_cast %7 : vector<1x8x8x16xf32> to vector<8x8x16xf32>
    %9 = tpu.concatenate %2, %4, %6, %8 in 2 : vector<8x8x16xf32>, vector<8x8x16xf32>, vector<8x8x16xf32>, vector<8x8x16xf32> -> vector<8x8x64xf32>
    %10 = vector.shape_cast %9 : vector<8x8x64xf32> to vector<64x64xf32>
    %c0_3 = arith.constant 0 : index
    %c0_4 = arith.constant 0 : index
    %c0_5 = arith.constant 0 : index
    %11 = vector.load %arg2[%c0_3, %c0_4, %c0_5] : memref<4x64x16xf32, #tpu.memory_space<vmem>>, vector<1x64x16xf32>
    %12 = vector.shape_cast %11 : vector<1x64x16xf32> to vector<64x16xf32>
    %cst = arith.constant dense<0.000000e+00> : vector<64x16xf32>
    %13 = tpu.matmul %10, %12, %cst {dimension_numbers = #tpu.dot_dimension_numbers<[1], [0], [0], [1], [0, 0, 1, 1], [], []>} : vector<64x64xf32>, vector<64x16xf32>, vector<64x16xf32> -> vector<64x16xf32>
    %c0_6 = arith.constant 0 : index
    %c0_7 = arith.constant 0 : index
    %14 = vector.load %arg3[%c0_6, %c0_7] : memref<1x64xf32, #tpu.memory_space<vmem>>, vector<1x16xf32>
    %15 = vector.broadcast %14 : vector<1x16xf32> to vector<64x16xf32>
    %16 = arith.addf %13, %15 : vector<64x16xf32>
    %17 = vector.shape_cast %16 : vector<64x16xf32> to vector<8x8x16xf32>
    %c0_8 = arith.constant 0 : index
    %c0_9 = arith.constant 0 : index
    %c0_10 = arith.constant 0 : index
    %c0_11 = arith.constant 0 : index
    %18 = vector.load %arg4[%c0_8, %c0_9, %c0_10, %c0_11] : memref<1x8x8x64xf32, #tpu.memory_space<vmem>>, vector<1x8x8x16xf32>
    %19 = vector.shape_cast %18 : vector<1x8x8x16xf32> to vector<8x8x16xf32>
    %20 = vector.shape_cast %17 : vector<8x8x16xf32> to vector<1x8x8x16xf32>
    tpu.vector_store %arg4[%c0_8, %c0_9, %c0_10, %c0_11], %20 {strides = array<i32>} : memref<1x8x8x64xf32, #tpu.memory_space<vmem>>, vector<1x8x8x16xf32>,
    %cst_12 = arith.constant dense<0.000000e+00> : vector<16xf32>
    %21 = vector.multi_reduction <add>, %16, %cst_12 [0] : vector<64x16xf32> to vector<16xf32>
    %22 = vector.shape_cast %21 : vector<16xf32> to vector<1x16xf32>
    %23 = arith.mulf %16, %16 : vector<64x16xf32>
    %cst_13 = arith.constant dense<0.000000e+00> : vector<16xf32>
    %24 = vector.multi_reduction <add>, %23, %cst_13 [0] : vector<64x16xf32> to vector<16xf32>
    %25 = vector.shape_cast %24 : vector<16xf32> to vector<1x16xf32>
    %26 = vector.extract_strided_slice %0 {offsets = [0, 0, 1, 0], sizes = [1, 8, 8, 16], strides = [1, 1, 1, 1]} : vector<1x10x10x16xf32> to vector<1x8x8x16xf32>
    %27 = vector.shape_cast %26 : vector<1x8x8x16xf32> to vector<8x8x16xf32>
    %28 = vector.extract_strided_slice %0 {offsets = [0, 0, 2, 0], sizes = [1, 8, 8, 16], strides = [1, 1, 1, 1]} : vector<1x10x10x16xf32> to vector<1x8x8x16xf32>
    %29 = vector.shape_cast %28 : vector<1x8x8x16xf32> to vector<8x8x16xf32>
    %30 = vector.extract_strided_slice %0 {offsets = [0, 1, 1, 0], sizes = [1, 8, 8, 16], strides = [1, 1, 1, 1]} : vector<1x10x10x16xf32> to vector<1x8x8x16xf32>
    %31 = vector.shape_cast %30 : vector<1x8x8x16xf32> to vector<8x8x16xf32>
    %32 = vector.extract_strided_slice %0 {offsets = [0, 1, 2, 0], sizes = [1, 8, 8, 16], strides = [1, 1, 1, 1]} : vector<1x10x10x16xf32> to vector<1x8x8x16xf32>
    %33 = vector.shape_cast %32 : vector<1x8x8x16xf32> to vector<8x8x16xf32>
    %34 = tpu.concatenate %27, %29, %31, %33 in 2 : vector<8x8x16xf32>, vector<8x8x16xf32>, vector<8x8x16xf32>, vector<8x8x16xf32> -> vector<8x8x64xf32>
    %35 = vector.shape_cast %34 : vector<8x8x64xf32> to vector<64x64xf32>
    %c1 = arith.constant 1 : index
    %c0_14 = arith.constant 0 : index
    %c0_15 = arith.constant 0 : index
    %36 = vector.load %arg2[%c1, %c0_14, %c0_15] : memref<4x64x16xf32, #tpu.memory_space<vmem>>, vector<1x64x16xf32>
    %37 = vector.shape_cast %36 : vector<1x64x16xf32> to vector<64x16xf32>
    %cst_16 = arith.constant dense<0.000000e+00> : vector<64x16xf32>
    %38 = tpu.matmul %35, %37, %cst_16 {dimension_numbers = #tpu.dot_dimension_numbers<[1], [0], [0], [1], [0, 0, 1, 1], [], []>} : vector<64x64xf32>, vector<64x16xf32>, vector<64x16xf32> -> vector<64x16xf32>
    %c0_17 = arith.constant 0 : index
    %c16 = arith.constant 16 : index
    %39 = vector.load %arg3[%c0_17, %c16] : memref<1x64xf32, #tpu.memory_space<vmem>>, vector<1x16xf32>
    %40 = vector.broadcast %39 : vector<1x16xf32> to vector<64x16xf32>
    %41 = arith.addf %38, %40 : vector<64x16xf32>
    %42 = vector.shape_cast %41 : vector<64x16xf32> to vector<8x8x16xf32>
    %c0_18 = arith.constant 0 : index
    %c0_19 = arith.constant 0 : index
    %c0_20 = arith.constant 0 : index
    %c16_21 = arith.constant 16 : index
    %43 = vector.load %arg4[%c0_18, %c0_19, %c0_20, %c16_21] : memref<1x8x8x64xf32, #tpu.memory_space<vmem>>, vector<1x8x8x16xf32>
    %44 = vector.shape_cast %43 : vector<1x8x8x16xf32> to vector<8x8x16xf32>
    %45 = vector.shape_cast %42 : vector<8x8x16xf32> to vector<1x8x8x16xf32>
    tpu.vector_store %arg4[%c0_18, %c0_19, %c0_20, %c16_21], %45 {strides = array<i32>} : memref<1x8x8x64xf32, #tpu.memory_space<vmem>>, vector<1x8x8x16xf32>,
    %cst_22 = arith.constant dense<0.000000e+00> : vector<16xf32>
    %46 = vector.multi_reduction <add>, %41, %cst_22 [0] : vector<64x16xf32> to vector<16xf32>
    %47 = vector.shape_cast %46 : vector<16xf32> to vector<1x16xf32>
    %48 = arith.mulf %41, %41 : vector<64x16xf32>
    %cst_23 = arith.constant dense<0.000000e+00> : vector<16xf32>
    %49 = vector.multi_reduction <add>, %48, %cst_23 [0] : vector<64x16xf32> to vector<16xf32>
    %50 = vector.shape_cast %49 : vector<16xf32> to vector<1x16xf32>
    %51 = vector.extract_strided_slice %0 {offsets = [0, 1, 0, 0], sizes = [1, 8, 8, 16], strides = [1, 1, 1, 1]} : vector<1x10x10x16xf32> to vector<1x8x8x16xf32>
    %52 = vector.shape_cast %51 : vector<1x8x8x16xf32> to vector<8x8x16xf32>
    %53 = vector.extract_strided_slice %0 {offsets = [0, 1, 1, 0], sizes = [1, 8, 8, 16], strides = [1, 1, 1, 1]} : vector<1x10x10x16xf32> to vector<1x8x8x16xf32>
    %54 = vector.shape_cast %53 : vector<1x8x8x16xf32> to vector<8x8x16xf32>
    %55 = vector.extract_strided_slice %0 {offsets = [0, 2, 0, 0], sizes = [1, 8, 8, 16], strides = [1, 1, 1, 1]} : vector<1x10x10x16xf32> to vector<1x8x8x16xf32>
    %56 = vector.shape_cast %55 : vector<1x8x8x16xf32> to vector<8x8x16xf32>
    %57 = vector.extract_strided_slice %0 {offsets = [0, 2, 1, 0], sizes = [1, 8, 8, 16], strides = [1, 1, 1, 1]} : vector<1x10x10x16xf32> to vector<1x8x8x16xf32>
    %58 = vector.shape_cast %57 : vector<1x8x8x16xf32> to vector<8x8x16xf32>
    %59 = tpu.concatenate %52, %54, %56, %58 in 2 : vector<8x8x16xf32>, vector<8x8x16xf32>, vector<8x8x16xf32>, vector<8x8x16xf32> -> vector<8x8x64xf32>
    %60 = vector.shape_cast %59 : vector<8x8x64xf32> to vector<64x64xf32>
    %c2 = arith.constant 2 : index
    %c0_24 = arith.constant 0 : index
    %c0_25 = arith.constant 0 : index
    %61 = vector.load %arg2[%c2, %c0_24, %c0_25] : memref<4x64x16xf32, #tpu.memory_space<vmem>>, vector<1x64x16xf32>
    %62 = vector.shape_cast %61 : vector<1x64x16xf32> to vector<64x16xf32>
    %cst_26 = arith.constant dense<0.000000e+00> : vector<64x16xf32>
    %63 = tpu.matmul %60, %62, %cst_26 {dimension_numbers = #tpu.dot_dimension_numbers<[1], [0], [0], [1], [0, 0, 1, 1], [], []>} : vector<64x64xf32>, vector<64x16xf32>, vector<64x16xf32> -> vector<64x16xf32>
    %c0_27 = arith.constant 0 : index
    %c32 = arith.constant 32 : index
    %64 = vector.load %arg3[%c0_27, %c32] : memref<1x64xf32, #tpu.memory_space<vmem>>, vector<1x16xf32>
    %65 = vector.broadcast %64 : vector<1x16xf32> to vector<64x16xf32>
    %66 = arith.addf %63, %65 : vector<64x16xf32>
    %67 = vector.shape_cast %66 : vector<64x16xf32> to vector<8x8x16xf32>
    %c0_28 = arith.constant 0 : index
    %c0_29 = arith.constant 0 : index
    %c0_30 = arith.constant 0 : index
    %c32_31 = arith.constant 32 : index
    %68 = vector.load %arg4[%c0_28, %c0_29, %c0_30, %c32_31] : memref<1x8x8x64xf32, #tpu.memory_space<vmem>>, vector<1x8x8x16xf32>
    %69 = vector.shape_cast %68 : vector<1x8x8x16xf32> to vector<8x8x16xf32>
    %70 = vector.shape_cast %67 : vector<8x8x16xf32> to vector<1x8x8x16xf32>
    tpu.vector_store %arg4[%c0_28, %c0_29, %c0_30, %c32_31], %70 {strides = array<i32>} : memref<1x8x8x64xf32, #tpu.memory_space<vmem>>, vector<1x8x8x16xf32>,
    %cst_32 = arith.constant dense<0.000000e+00> : vector<16xf32>
    %71 = vector.multi_reduction <add>, %66, %cst_32 [0] : vector<64x16xf32> to vector<16xf32>
    %72 = vector.shape_cast %71 : vector<16xf32> to vector<1x16xf32>
    %73 = arith.mulf %66, %66 : vector<64x16xf32>
    %cst_33 = arith.constant dense<0.000000e+00> : vector<16xf32>
    %74 = vector.multi_reduction <add>, %73, %cst_33 [0] : vector<64x16xf32> to vector<16xf32>
    %75 = vector.shape_cast %74 : vector<16xf32> to vector<1x16xf32>
    %76 = vector.extract_strided_slice %0 {offsets = [0, 1, 1, 0], sizes = [1, 8, 8, 16], strides = [1, 1, 1, 1]} : vector<1x10x10x16xf32> to vector<1x8x8x16xf32>
    %77 = vector.shape_cast %76 : vector<1x8x8x16xf32> to vector<8x8x16xf32>
    %78 = vector.extract_strided_slice %0 {offsets = [0, 1, 2, 0], sizes = [1, 8, 8, 16], strides = [1, 1, 1, 1]} : vector<1x10x10x16xf32> to vector<1x8x8x16xf32>
    %79 = vector.shape_cast %78 : vector<1x8x8x16xf32> to vector<8x8x16xf32>
    %80 = vector.extract_strided_slice %0 {offsets = [0, 2, 1, 0], sizes = [1, 8, 8, 16], strides = [1, 1, 1, 1]} : vector<1x10x10x16xf32> to vector<1x8x8x16xf32>
    %81 = vector.shape_cast %80 : vector<1x8x8x16xf32> to vector<8x8x16xf32>
    %82 = vector.extract_strided_slice %0 {offsets = [0, 2, 2, 0], sizes = [1, 8, 8, 16], strides = [1, 1, 1, 1]} : vector<1x10x10x16xf32> to vector<1x8x8x16xf32>
    %83 = vector.shape_cast %82 : vector<1x8x8x16xf32> to vector<8x8x16xf32>
    %84 = tpu.concatenate %77, %79, %81, %83 in 2 : vector<8x8x16xf32>, vector<8x8x16xf32>, vector<8x8x16xf32>, vector<8x8x16xf32> -> vector<8x8x64xf32>
    %85 = vector.shape_cast %84 : vector<8x8x64xf32> to vector<64x64xf32>
    %c3 = arith.constant 3 : index
    %c0_34 = arith.constant 0 : index
    %c0_35 = arith.constant 0 : index
    %86 = vector.load %arg2[%c3, %c0_34, %c0_35] : memref<4x64x16xf32, #tpu.memory_space<vmem>>, vector<1x64x16xf32>
    %87 = vector.shape_cast %86 : vector<1x64x16xf32> to vector<64x16xf32>
    %cst_36 = arith.constant dense<0.000000e+00> : vector<64x16xf32>
    %88 = tpu.matmul %85, %87, %cst_36 {dimension_numbers = #tpu.dot_dimension_numbers<[1], [0], [0], [1], [0, 0, 1, 1], [], []>} : vector<64x64xf32>, vector<64x16xf32>, vector<64x16xf32> -> vector<64x16xf32>
    %c0_37 = arith.constant 0 : index
    %c48 = arith.constant 48 : index
    %89 = vector.load %arg3[%c0_37, %c48] : memref<1x64xf32, #tpu.memory_space<vmem>>, vector<1x16xf32>
    %90 = vector.broadcast %89 : vector<1x16xf32> to vector<64x16xf32>
    %91 = arith.addf %88, %90 : vector<64x16xf32>
    %92 = vector.shape_cast %91 : vector<64x16xf32> to vector<8x8x16xf32>
    %c0_38 = arith.constant 0 : index
    %c0_39 = arith.constant 0 : index
    %c0_40 = arith.constant 0 : index
    %c48_41 = arith.constant 48 : index
    %93 = vector.load %arg4[%c0_38, %c0_39, %c0_40, %c48_41] : memref<1x8x8x64xf32, #tpu.memory_space<vmem>>, vector<1x8x8x16xf32>
    %94 = vector.shape_cast %93 : vector<1x8x8x16xf32> to vector<8x8x16xf32>
    %95 = vector.shape_cast %92 : vector<8x8x16xf32> to vector<1x8x8x16xf32>
    tpu.vector_store %arg4[%c0_38, %c0_39, %c0_40, %c48_41], %95 {strides = array<i32>} : memref<1x8x8x64xf32, #tpu.memory_space<vmem>>, vector<1x8x8x16xf32>,
    %cst_42 = arith.constant dense<0.000000e+00> : vector<16xf32>
    %96 = vector.multi_reduction <add>, %91, %cst_42 [0] : vector<64x16xf32> to vector<16xf32>
    %97 = vector.shape_cast %96 : vector<16xf32> to vector<1x16xf32>
    %98 = arith.mulf %91, %91 : vector<64x16xf32>
    %cst_43 = arith.constant dense<0.000000e+00> : vector<16xf32>
    %99 = vector.multi_reduction <add>, %98, %cst_43 [0] : vector<64x16xf32> to vector<16xf32>
    %100 = vector.shape_cast %99 : vector<16xf32> to vector<1x16xf32>
    %101 = tpu.concatenate %22, %47, %72, %97 in 1 : vector<1x16xf32>, vector<1x16xf32>, vector<1x16xf32>, vector<1x16xf32> -> vector<1x64xf32>
    %102 = tpu.concatenate %25, %50, %75, %100 in 1 : vector<1x16xf32>, vector<1x16xf32>, vector<1x16xf32>, vector<1x16xf32> -> vector<1x64xf32>
    %103 = tpu.concatenate %101, %102 in 0 : vector<1x64xf32>, vector<1x64xf32> -> vector<2x64xf32>
    %c0_44 = arith.constant 0 : index
    %c0_45 = arith.constant 0 : index
    %c0_46 = arith.constant 0 : index
    %104 = vector.load %arg5[%c0_44, %c0_45, %c0_46] : memref<1x2x64xf32, #tpu.memory_space<vmem>>, vector<1x2x64xf32>
    %105 = vector.shape_cast %104 : vector<1x2x64xf32> to vector<2x64xf32>
    %106 = vector.shape_cast %103 : vector<2x64xf32> to vector<1x2x64xf32>
    tpu.vector_store %arg5[%c0_44, %c0_45, %c0_46], %106 {strides = array<i32>} : memref<1x2x64xf32, #tpu.memory_space<vmem>>, vector<1x2x64xf32>,
    return
  }
  func.func @transform_0(%arg0: i32) -> (i32, i32, i32, i32) {
    %c0_i32 = arith.constant 0 : i32
    %c0_i32_0 = arith.constant 0 : i32
    %c0_i32_1 = arith.constant 0 : i32
    %c0_i32_2 = arith.constant 0 : i32
    return %arg0, %c0_i32, %c0_i32_0, %c0_i32_1 : i32, i32, i32, i32
  }
  func.func @transform_1(%arg0: i32) -> (i32, i32, i32) {
    %c0_i32 = arith.constant 0 : i32
    %c0_i32_0 = arith.constant 0 : i32
    %c0_i32_1 = arith.constant 0 : i32
    %c0_i32_2 = arith.constant 0 : i32
    return %c0_i32, %c0_i32_0, %c0_i32_1 : i32, i32, i32
  }
  func.func @transform_2(%arg0: i32) -> (i32, i32) {
    %c0_i32 = arith.constant 0 : i32
    %c0_i32_0 = arith.constant 0 : i32
    %c0_i32_1 = arith.constant 0 : i32
    return %c0_i32, %c0_i32_0 : i32, i32
  }
  func.func @transform_3(%arg0: i32) -> (i32, i32, i32, i32) {
    %c0_i32 = arith.constant 0 : i32
    %c0_i32_0 = arith.constant 0 : i32
    %c0_i32_1 = arith.constant 0 : i32
    %c0_i32_2 = arith.constant 0 : i32
    return %arg0, %c0_i32, %c0_i32_0, %c0_i32_1 : i32, i32, i32, i32
  }
  func.func @transform_4(%arg0: i32) -> (i32, i32, i32) {
    %c0_i32 = arith.constant 0 : i32
    %c0_i32_0 = arith.constant 0 : i32
    %c0_i32_1 = arith.constant 0 : i32
    return %arg0, %c0_i32, %c0_i32_0 : i32, i32, i32
  }
}

module attributes {stable_mosaic.version = 11 : i64} {
  func.func @_bn_interleave_kernel(%arg0: i32, %arg1: memref<16x8x64xf32, #tpu.memory_space<vmem>>, %arg2: memref<16x2x8x32xf32, #tpu.memory_space<vmem>>, %arg3: memref<2x64xf32, #tpu.memory_space<vmem>>, %arg4: memref<16x2x8x32xf32, #tpu.memory_space<vmem>>) attributes {dimension_semantics = [#tpu.dimension_semantics<parallel>], iteration_bounds = array<i64: 1>, scalar_prefetch = 0 : i64, scratch_operands = 0 : i64, tpu.core_type = #tpu.core_type<tc>, window_params = [{transform_indices = @transform_0, window_bounds = array<i64: 16, 8, 64>}, {transform_indices = @transform_1, window_bounds = array<i64: 16, 2, 8, 32>}, {pipeline_mode = #tpu.pipeline_mode<synchronous>, transform_indices = @transform_2, window_bounds = array<i64: 2, 64>}, {transform_indices = @transform_3, window_bounds = array<i64: 16, 2, 8, 32>}]} {
    %c0 = arith.constant 0 : index
    %c0_0 = arith.constant 0 : index
    %c0_1 = arith.constant 0 : index
    %0 = vector.load %arg1[%c0, %c0_0, %c0_1] : memref<16x8x64xf32, #tpu.memory_space<vmem>>, vector<16x8x64xf32>
    %c0_2 = arith.constant 0 : index
    %c0_3 = arith.constant 0 : index
    %1 = vector.load %arg3[%c0_2, %c0_3] : memref<2x64xf32, #tpu.memory_space<vmem>>, vector<1x64xf32>
    %2 = vector.shape_cast %1 : vector<1x64xf32> to vector<1x1x64xf32>
    %3 = vector.broadcast %2 : vector<1x1x64xf32> to vector<16x8x64xf32>
    %4 = arith.mulf %0, %3 : vector<16x8x64xf32>
    %c1 = arith.constant 1 : index
    %c0_4 = arith.constant 0 : index
    %5 = vector.load %arg3[%c1, %c0_4] : memref<2x64xf32, #tpu.memory_space<vmem>>, vector<1x64xf32>
    %6 = vector.shape_cast %5 : vector<1x64xf32> to vector<1x1x64xf32>
    %7 = vector.broadcast %6 : vector<1x1x64xf32> to vector<16x8x64xf32>
    %8 = arith.addf %4, %7 : vector<16x8x64xf32>
    %9 = vector.extract_strided_slice %8 {offsets = [0, 0, 0], sizes = [16, 8, 32], strides = [1, 1, 1]} : vector<16x8x64xf32> to vector<16x8x32xf32>
    %c0_5 = arith.constant 0 : index
    %c0_6 = arith.constant 0 : index
    %c0_7 = arith.constant 0 : index
    %c0_8 = arith.constant 0 : index
    %10 = vector.load %arg2[%c0_5, %c0_6, %c0_7, %c0_8] : memref<16x2x8x32xf32, #tpu.memory_space<vmem>>, vector<16x1x8x32xf32>
    %11 = vector.shape_cast %10 : vector<16x1x8x32xf32> to vector<16x8x32xf32>
    %12 = arith.addf %9, %11 : vector<16x8x32xf32>
    %c0_9 = arith.constant 0 : index
    %c0_10 = arith.constant 0 : index
    %c0_11 = arith.constant 0 : index
    %c0_12 = arith.constant 0 : index
    %13 = vector.load %arg4[%c0_9, %c0_10, %c0_11, %c0_12] : memref<16x2x8x32xf32, #tpu.memory_space<vmem>>, vector<16x1x8x32xf32>
    %14 = vector.shape_cast %13 : vector<16x1x8x32xf32> to vector<16x8x32xf32>
    %15 = vector.shape_cast %12 : vector<16x8x32xf32> to vector<16x1x8x32xf32>
    tpu.vector_store %arg4[%c0_9, %c0_10, %c0_11, %c0_12], %15 {strides = array<i32>} : memref<16x2x8x32xf32, #tpu.memory_space<vmem>>, vector<16x1x8x32xf32>,
    %16 = vector.extract_strided_slice %8 {offsets = [0, 0, 32], sizes = [16, 8, 32], strides = [1, 1, 1]} : vector<16x8x64xf32> to vector<16x8x32xf32>
    %c0_13 = arith.constant 0 : index
    %c1_14 = arith.constant 1 : index
    %c0_15 = arith.constant 0 : index
    %c0_16 = arith.constant 0 : index
    %17 = vector.load %arg2[%c0_13, %c1_14, %c0_15, %c0_16] : memref<16x2x8x32xf32, #tpu.memory_space<vmem>>, vector<16x1x8x32xf32>
    %18 = vector.shape_cast %17 : vector<16x1x8x32xf32> to vector<16x8x32xf32>
    %19 = arith.addf %16, %18 : vector<16x8x32xf32>
    %c0_17 = arith.constant 0 : index
    %c1_18 = arith.constant 1 : index
    %c0_19 = arith.constant 0 : index
    %c0_20 = arith.constant 0 : index
    %20 = vector.load %arg4[%c0_17, %c1_18, %c0_19, %c0_20] : memref<16x2x8x32xf32, #tpu.memory_space<vmem>>, vector<16x1x8x32xf32>
    %21 = vector.shape_cast %20 : vector<16x1x8x32xf32> to vector<16x8x32xf32>
    %22 = vector.shape_cast %19 : vector<16x8x32xf32> to vector<16x1x8x32xf32>
    tpu.vector_store %arg4[%c0_17, %c1_18, %c0_19, %c0_20], %22 {strides = array<i32>} : memref<16x2x8x32xf32, #tpu.memory_space<vmem>>, vector<16x1x8x32xf32>,
    return
  }
  func.func @transform_0(%arg0: i32) -> (i32, i32, i32) {
    %c0_i32 = arith.constant 0 : i32
    %c0_i32_0 = arith.constant 0 : i32
    %c0_i32_1 = arith.constant 0 : i32
    return %arg0, %c0_i32, %c0_i32_0 : i32, i32, i32
  }
  func.func @transform_1(%arg0: i32) -> (i32, i32, i32, i32) {
    %c0_i32 = arith.constant 0 : i32
    %c0_i32_0 = arith.constant 0 : i32
    %c0_i32_1 = arith.constant 0 : i32
    %c0_i32_2 = arith.constant 0 : i32
    return %arg0, %c0_i32, %c0_i32_0, %c0_i32_1 : i32, i32, i32, i32
  }
  func.func @transform_2(%arg0: i32) -> (i32, i32) {
    %c0_i32 = arith.constant 0 : i32
    %c0_i32_0 = arith.constant 0 : i32
    %c0_i32_1 = arith.constant 0 : i32
    return %c0_i32, %c0_i32_0 : i32, i32
  }
  func.func @transform_3(%arg0: i32) -> (i32, i32, i32, i32) {
    %c0_i32 = arith.constant 0 : i32
    %c0_i32_0 = arith.constant 0 : i32
    %c0_i32_1 = arith.constant 0 : i32
    %c0_i32_2 = arith.constant 0 : i32
    return %arg0, %c0_i32, %c0_i32_0, %c0_i32_1 : i32, i32, i32, i32
  }
}

module attributes {stable_mosaic.version = 11 : i64} {
  func.func @_gap_fc_kernel(%arg0: i32, %arg1: memref<2x256x16xf32, #tpu.memory_space<vmem>>, %arg2: memref<16x10xf32, #tpu.memory_space<vmem>>, %arg3: memref<1x10xf32, #tpu.memory_space<vmem>>, %arg4: memref<2x10xf32, #tpu.memory_space<vmem>>, %arg5: memref<2x16xf32, #tpu.memory_space<vmem>>) attributes {dimension_semantics = [#tpu.dimension_semantics<arbitrary>], iteration_bounds = array<i64: 1>, scalar_prefetch = 0 : i64, scratch_operands = 1 : i64, tpu.core_type = #tpu.core_type<tc>, window_params = [{transform_indices = @transform_0, window_bounds = array<i64: 2, 256, 16>}, {pipeline_mode = #tpu.pipeline_mode<synchronous>, transform_indices = @transform_1, window_bounds = array<i64: 16, 10>}, {pipeline_mode = #tpu.pipeline_mode<synchronous>, transform_indices = @transform_2, window_bounds = array<i64: 1, 10>}, {pipeline_mode = #tpu.pipeline_mode<synchronous>, transform_indices = @transform_3, window_bounds = array<i64: 2, 10>}]} {
    %c0_i32 = arith.constant 0 : i32
    %0 = arith.cmpi eq, %arg0, %c0_i32 : i32
    %1 = arith.extui %0 : i1 to i32
    %c0_i32_0 = arith.constant 0 : i32
    %2 = arith.cmpi ne, %1, %c0_i32_0 : i32
    scf.if %2 {
      %cst_10 = arith.constant 0.000000e+00 : f32
      %13 = vector.broadcast %cst_10 : f32 to vector<2x16xf32>
      %c0_11 = arith.constant 0 : index
      %c0_12 = arith.constant 0 : index
      %14 = vector.load %arg5[%c0_11, %c0_12] : memref<2x16xf32, #tpu.memory_space<vmem>>, vector<2x16xf32>
      tpu.vector_store %arg5[%c0_11, %c0_12], %13 {strides = array<i32>} : memref<2x16xf32, #tpu.memory_space<vmem>>, vector<2x16xf32>,
    } else {
    }
    %c0 = arith.constant 0 : index
    %c0_1 = arith.constant 0 : index
    %3 = vector.load %arg5[%c0, %c0_1] : memref<2x16xf32, #tpu.memory_space<vmem>>, vector<2x16xf32>
    %c0_2 = arith.constant 0 : index
    %c0_3 = arith.constant 0 : index
    %c0_4 = arith.constant 0 : index
    %4 = vector.load %arg1[%c0_2, %c0_3, %c0_4] : memref<2x256x16xf32, #tpu.memory_space<vmem>>, vector<2x256x16xf32>
    %cst = arith.constant dense<0.000000e+00> : vector<2x16xf32>
    %5 = vector.multi_reduction <add>, %4, %cst [1] : vector<2x256x16xf32> to vector<2x16xf32>
    %cst_5 = arith.constant 3.906250e-03 : f32
    %6 = vector.broadcast %cst_5 : f32 to vector<2x16xf32>
    %7 = arith.mulf %5, %6 : vector<2x16xf32>
    %8 = arith.addf %3, %7 : vector<2x16xf32>
    %c0_6 = arith.constant 0 : index
    %c0_7 = arith.constant 0 : index
    %9 = vector.load %arg5[%c0_6, %c0_7] : memref<2x16xf32, #tpu.memory_space<vmem>>, vector<2x16xf32>
    tpu.vector_store %arg5[%c0_6, %c0_7], %8 {strides = array<i32>} : memref<2x16xf32, #tpu.memory_space<vmem>>, vector<2x16xf32>,
    %c0_i32_8 = arith.constant 0 : i32
    %10 = arith.cmpi eq, %arg0, %c0_i32_8 : i32
    %11 = arith.extui %10 : i1 to i32
    %c0_i32_9 = arith.constant 0 : i32
    %12 = arith.cmpi ne, %11, %c0_i32_9 : i32
    scf.if %12 {
      %c0_10 = arith.constant 0 : index
      %c0_11 = arith.constant 0 : index
      %13 = vector.load %arg5[%c0_10, %c0_11] : memref<2x16xf32, #tpu.memory_space<vmem>>, vector<2x16xf32>
      %c0_12 = arith.constant 0 : index
      %c0_13 = arith.constant 0 : index
      %14 = vector.load %arg2[%c0_12, %c0_13] : memref<16x10xf32, #tpu.memory_space<vmem>>, vector<16x10xf32>
      %cst_14 = arith.constant dense<0.000000e+00> : vector<2x10xf32>
      %15 = tpu.matmul %13, %14, %cst_14 {dimension_numbers = #tpu.dot_dimension_numbers<[1], [0], [0], [1], [0, 0, 1, 1], [], []>} : vector<2x16xf32>, vector<16x10xf32>, vector<2x10xf32> -> vector<2x10xf32>
      %c0_15 = arith.constant 0 : index
      %c0_16 = arith.constant 0 : index
      %16 = vector.load %arg3[%c0_15, %c0_16] : memref<1x10xf32, #tpu.memory_space<vmem>>, vector<1x10xf32>
      %17 = vector.broadcast %16 : vector<1x10xf32> to vector<2x10xf32>
      %18 = arith.addf %15, %17 : vector<2x10xf32>
      %c0_17 = arith.constant 0 : index
      %c0_18 = arith.constant 0 : index
      %19 = vector.load %arg4[%c0_17, %c0_18] : memref<2x10xf32, #tpu.memory_space<vmem>>, vector<2x10xf32>
      tpu.vector_store %arg4[%c0_17, %c0_18], %18 {strides = array<i32>} : memref<2x10xf32, #tpu.memory_space<vmem>>, vector<2x10xf32>,
    } else {
    }
    return
  }
  func.func @transform_0(%arg0: i32) -> (i32, i32, i32) {
    %c0_i32 = arith.constant 0 : i32
    %c0_i32_0 = arith.constant 0 : i32
    %c0_i32_1 = arith.constant 0 : i32
    return %c0_i32, %arg0, %c0_i32_0 : i32, i32, i32
  }
  func.func @transform_1(%arg0: i32) -> (i32, i32) {
    %c0_i32 = arith.constant 0 : i32
    %c0_i32_0 = arith.constant 0 : i32
    %c0_i32_1 = arith.constant 0 : i32
    return %c0_i32, %c0_i32_0 : i32, i32
  }
  func.func @transform_2(%arg0: i32) -> (i32, i32) {
    %c0_i32 = arith.constant 0 : i32
    %c0_i32_0 = arith.constant 0 : i32
    %c0_i32_1 = arith.constant 0 : i32
    return %c0_i32, %c0_i32_0 : i32, i32
  }
  func.func @transform_3(%arg0: i32) -> (i32, i32) {
    %c0_i32 = arith.constant 0 : i32
    %c0_i32_0 = arith.constant 0 : i32
    %c0_i32_1 = arith.constant 0 : i32
    return %c0_i32, %c0_i32_0 : i32, i32
  }
}

</mosaic_0001>

<bundles_post_ra>
// kernel: wavemix_lite_classifier.9
= control target key start
LH: loop header
LB: loop body
LE: loop exit
PB: predicated region body
PF: predicated region fallthrough
CT: control target
= control target key end

     0   :  { %s2166_s12 = smov 0   ;;  %s3969_s0 = inlined_call_operand.vmem [shape: f32[2,18,18,8], index: 0, kind: input, shape index: {}]   ;;  %s3970_s1 = inlined_call_operand.vmem [shape: f32[1,72,8], index: 1, kind: input, shape index: {}]   ;;  %s3971_s2 = inlined_call_operand.vmem [shape: f32[1,8], index: 2, kind: input, shape index: {}]   ;;  %s3972_s3 = inlined_call_operand.vmem [shape: f32[2,16,16,8], index: 3, kind: output, shape index: {}]  }
   0x1 LB: > { %s1918_s13 = sadd.s32 4294967295, %s2136_s12   ;;  %p1922_p0 = scmp.ge.s32.totalorder %s2136_s12, 1  ;;  %s2136_s12 = sphi %s2166_s12, %s13_s12  }
   0x2   : > { %p137_p1 = scmp.lt.s32.totalorder %s2136_s12, 3 }
   0x4   : > { %p138_p2 = pnand %p1922_p0, %p137_p1 }
   0x6   : > { %141 = sbr.rel (%p138_p2) target bundleno = 864 (0x360), region = 32 }
   0xd   : > { %p161_p3 = scmp.lt.s32.totalorder %s1918_s13, 1  ;;  %vm273_vm0 = vcmask 1046528   ;;  %s2138_s18 = smov 8   ;;  %vm450_vm1 = vcmask 1045504   ;;  %vm1229_vm2 = vcmask 64512   ;;  %vm1262_vm3 = vcmask 130048  }
   0xe   : > { %s2139_s19 = smov 16   ;;  %s2140_s20 = smov 24   ;;  %vm1295_vm4 = vcmask 195584   ;;  %vm1328_vm5 = vcmask 261120   ;;  %vm1361_vm6 = vcmask 326656   ;;  %vm1394_vm7 = vcmask 392192  }
   0xf   : > { %s4257_s13 = smov (!%p161_p3, %s1918_s13), 1  ;;  %s2141_s21 = smov 32   ;;  %vm1427_vm8 = vcmask 457728   ;;  %vm1460_vm9 = vcmask 523264   ;;  %vm1509_vm10 = vcmask 588800  }
  0x10   : > { %s2095_s14 = smul.u32 432, %s4257_s13  ;;  %s2142_s22 = smov 40  }
  0x11   : > { %s2143_s27 = smov 48   ;;  %s2144_s9 = smov 56  }
  0x12   : > { %s2180_s17 = scalar_lea.vmem %s3969_s0, %s2095_s14 }
  0x13   : > { %v2183_v0 = vld [vmem:[%s2180_s17 + $0x18] sm:$0xff]  ;;  %v2186_v1 = vld [vmem:[%s2180_s17 + $0x20] sm:$0xff]  ;;  %v2194_v5 = vld [vmem:[%s2180_s17 + $0x8] sm:$0xff] }
  0x14   : > { %v2189_v2 = vld [vmem:[%s2180_s17] sm:$0xff]  ;;  %v279_v3 = vrot.slane %v2183_v0, 1  ;;  %v280_v4 = vrot.slane %v2186_v1, 1  ;;  %v2198_v7 = vld [vmem:[%s2180_s17 + $0x28] sm:$0x3]  ;;  %v275_v8 = vrot.slane %v2194_v5, 1 }
  0x15   : > { %v274_v6 = vrot.slane %v2189_v2, 1  ;;  %v282_v9 = vrot.slane %v2198_v7, 1  ;;  %v2203_v10 = vld [vmem:[%s2180_s17 + $0x10] sm:$0x3]  ;;  %v2206_v11 = vld [vmem:[%s2180_s17 + $0x38] sm:$0xff]  ;;  %v2236_v24 = vld [vmem:[%s2180_s17 + $0x48] sm:$0xff] }
  0x16   : > { %v2209_v12 = vsel %vm273_vm0, %v279_v3, %v280_v4  ;;  %v277_v13 = vrot.slane %v2203_v10, 1  ;;  %v2213_v14 = vld [vmem:[%s2180_s17 + $0x40] sm:$0x3]  ;;  %v2216_v15 = vld [vmem:[%s2180_s17 + $0x30] sm:$0xff]  ;;  %v285_v18 = vrot.slane %v2206_v11, 1  ;;  %v289_v29 = vrot.slane %v2236_v24, 1 }
  0x17   : > { %358 = vrot.lane.b32.xlu1 %v2209_v12, %s2138_s18  ;;  %v276_v16 = vsel %vm273_vm0, %v274_v6, %v275_v8  ;;  %v2223_v17 = vsel %vm273_vm0, %v280_v4, %v282_v9  ;;  %v287_v19 = vrot.slane %v2213_v14, 1  ;;  %v284_v21 = vrot.slane %v2216_v15, 1  ;;  %v2230_v22 = vld [vmem:[%s2180_s17 + $0x50] sm:$0xff]  ;;  %v2233_v23 = vld [vmem:[%s2180_s17 + $0x58] sm:$0x3]  ;;  %v2251_v30 = vld [vmem:[%s2180_s17 + $0x68] sm:$0xff] }
  0x18   : > { %354 = vrot.lane.b32.xlu0 %v276_v16, %s2138_s18  ;;  %v278_v20 = vsel %vm273_vm0, %v275_v8, %v277_v13  ;;  %v290_v26 = vrot.slane %v2230_v22, 1  ;;  %v292_v27 = vrot.slane %v2233_v23, 1  ;;  %v2254_v31 = vld [vmem:[%s2180_s17 + $0x70] sm:$0x3]  ;;  %v2257_v32 = vld [vmem:[%s2180_s17 + $0x60] sm:$0xff]  ;;  %v295_v34 = vrot.slane %v2251_v30, 1 }
  0x19   : > { %v2242_v25 = vsel %vm273_vm0, %v285_v18, %v287_v19  ;;  %v2247_v28 = vsel %vm273_vm0, %v284_v21, %v285_v18  ;;  %v297_v35 = vrot.slane %v2254_v31, 1  ;;  %v294_v37 = vrot.slane %v2257_v32, 1  ;;  %v2273_v38 = vld [vmem:[%s2180_s17 + $0x80] sm:$0xff]  ;;  %v2276_v39 = vld [vmem:[%s2180_s17 + $0x88] sm:$0x3]  ;;  %v2279_v40 = vld [vmem:[%s2180_s17 + $0x78] sm:$0xff] }
  0x1a   : > { %v2264_v33 = vsel %vm273_vm0, %v290_v26, %v292_v27  ;;  %v2269_v36 = vsel %vm273_vm0, %v289_v29, %v290_v26  ;;  %v300_v42 = vrot.slane %v2273_v38, 1  ;;  %v302_v43 = vrot.slane %v2276_v39, 1  ;;  %v2295_v46 = vld [vmem:[%s2180_s17 + $0x98] sm:$0xff]  ;;  %v2298_v47 = vld [vmem:[%s2180_s17 + $0xa0] sm:$0x3]  ;;  %v2301_v48 = vld [vmem:[%s2180_s17 + $0x90] sm:$0xff] }
  0x1b   : > { %360 = vrot.lane.b32.xlu1 %v2223_v17, %s2138_s18  ;;  %4077 = vst [vmem:[#allocation2_spill] sm:$0xff] %v2269_v36  ;;  %v2286_v41 = vsel %vm273_vm0, %v295_v34, %v297_v35  ;;  %v2291_v44 = vsel %vm273_vm0, %v294_v37, %v295_v34  ;;  %v299_v45 = vrot.slane %v2279_v40, 1  ;;  %v305_v50 = vrot.slane %v2295_v46, 1  ;;  %v2317_v54 = vld [vmem:[%s2180_s17 + $0xb0] sm:$0xff]  ;;  %v2320_v55 = vld [vmem:[%s2180_s17 + $0xb8] sm:$0x3] }
  0x1c   : > { %356 = vrot.lane.b32.xlu0 %v278_v20, %s2138_s18  ;;  %4078 = vst [vmem:[#allocation3_spill] sm:$0xff] %v2286_v41  ;;  %4079 = vst [vmem:[#allocation4_spill] sm:$0xff] %v2291_v44  ;;  %v2308_v49 = vsel %vm273_vm0, %v300_v42, %v302_v43  ;;  %v307_v51 = vrot.slane %v2298_v47, 1  ;;  %v304_v53 = vrot.slane %v2301_v48, 1  ;;  %v2323_v56 = vld [vmem:[%s2180_s17 + $0xa8] sm:$0xff]  ;;  %v310_v58 = vrot.slane %v2317_v54, 1 }
  0x1d   : > { %4080 = vst [vmem:[#allocation5_spill] sm:$0xff] %v2308_v49  ;;  %v2313_v52 = vsel %vm273_vm0, %v299_v45, %v300_v42  ;;  %v312_v59 = vrot.slane %v2320_v55, 1  ;;  %v309_v61 = vrot.slane %v2323_v56, 1  ;;  %v2339_v62 = vld [vmem:[%s2180_s17 + $0xc8] sm:$0xff]  ;;  %v2342_v63 = vld [vmem:[%s2180_s17 + $0xd0] sm:$0x3] }
  0x1e   : > { %4081 = vst [vmem:[#allocation6_spill] sm:$0xff] %v2313_v52  ;;  %v2330_v57 = vsel %vm273_vm0, %v305_v50, %v307_v51  ;;  %v2335_v60 = vsel %vm273_vm0, %v304_v53, %v305_v50  ;;  %v2345_v3 = vld [vmem:[%s2180_s17 + $0xc0] sm:$0xff]  ;;  %v315_v6 = vrot.slane %v2339_v62, 1  ;;  %v317_v8 = vrot.slane %v2342_v63, 1  ;;  %v2364_v18 = vld [vmem:[%s2180_s17 + $0xe8] sm:$0x3] }
  0x1f   : > { %364 = vrot.lane.b32.xlu1 %v2242_v25, %s2138_s18  ;;  %4082 = vst [vmem:[#allocation7_spill] sm:$0xff] %v2330_v57  ;;  %4083 = vst [vmem:[#allocation8_spill] sm:$0xff] %v2335_v60  ;;  %v2352_v4 = vsel %vm273_vm0, %v310_v58, %v312_v59  ;;  %v2357_v9 = vsel %vm273_vm0, %v309_v61, %v310_v58  ;;  %v314_v13 = vrot.slane %v2345_v3, 1  ;;  %v2361_v16 = vld [vmem:[%s2180_s17 + $0xe0] sm:$0xff]  ;;  %v2367_v19 = vld [vmem:[%s2180_s17 + $0xd8] sm:$0xff]  ;;  %v322_v26 = vrot.slane %v2364_v18, 1 }
  0x20   : > { %362 = vrot.lane.b32.xlu0 %v2247_v28, %s2138_s18  ;;  %4084 = vst [vmem:[#allocation9_spill] sm:$0xff] %v2352_v4  ;;  %4085 = vst [vmem:[#allocation10_spill] sm:$0xff] %v2357_v9  ;;  %v2374_v20 = vsel %vm273_vm0, %v315_v6, %v317_v8  ;;  %v320_v21 = vrot.slane %v2361_v16, 1  ;;  %v319_v29 = vrot.slane %v2367_v19, 1  ;;  %v2383_v34 = vld [vmem:[%s2180_s17 + $0xf8] sm:$0xff]  ;;  %v2389_v37 = vld [vmem:[%s2180_s17 + $0xf0] sm:$0xff] }
  0x21   : > { %4086 = vst [vmem:[#allocation11_spill] sm:$0xff] %v2374_v20  ;;  %v2379_v27 = vsel %vm273_vm0, %v314_v13, %v315_v6  ;;  %v2386_v35 = vld [vmem:[%s2180_s17 + $0x100] sm:$0x3]  ;;  %v325_v43 = vrot.slane %v2383_v34, 1  ;;  %v324_v51 = vrot.slane %v2389_v37, 1  ;;  %v2405_v53 = vld [vmem:[%s2180_s17 + $0x110] sm:$0xff] }
  0x22   : > { %4087 = vst [vmem:[#allocation12_spill] sm:$0xff] %v2379_v27  ;;  %v2396_v42 = vsel %vm273_vm0, %v320_v21, %v322_v26  ;;  %v327_v45 = vrot.slane %v2386_v35, 1  ;;  %v2401_v50 = vsel %vm273_vm0, %v319_v29, %v320_v21  ;;  %v2408_v58 = vld [vmem:[%s2180_s17 + $0x118] sm:$0x3]  ;;  %v2411_v59 = vld [vmem:[%s2180_s17 + $0x108] sm:$0xff]  ;;  %v330_v6 = vrot.slane %v2405_v53, 1 }
  0x23   : > { %368 = vrot.lane.b32.xlu1 %v2264_v33, %s2138_s18  ;;  %4088 = vst [vmem:[#allocation13_spill] sm:$0xff] %v2396_v42  ;;  %4089 = vst [vmem:[#allocation14_spill] sm:$0xff] %v2401_v50  ;;  %v332_v8 = vrot.slane %v2408_v58, 1  ;;  %v2423_v13 = vsel %vm273_vm0, %v324_v51, %v325_v43  ;;  %v329_v21 = vrot.slane %v2411_v59, 1  ;;  %v2427_v26 = vld [vmem:[%s2180_s17 + $0x128] sm:$0xff] }
  0x24   : > { %366 = vrot.lane.b32.xlu0 %v2269_v36, %s2138_s18  ;;  %v2418_v61 = vsel %vm273_vm0, %v325_v43, %v327_v45  ;;  %4091 = vst [vmem:[#allocation16_spill] sm:$0xff] %v2423_v13  ;;  %4092 = vst [vmem:[#allocation17_spill] sm:$0xff] %v2427_v26  ;;  %v2430_v29 = vld [vmem:[%s2180_s17 + $0x130] sm:$0x3]  ;;  %v335_v43 = vrot.slane %v2427_v26, 1 }
  0x25   : > { %4090 = vst [vmem:[#allocation15_spill] sm:$0xff] %v2418_v61  ;;  %v2440_v45 = vsel %vm273_vm0, %v330_v6, %v332_v8  ;;  %v337_v51 = vrot.slane %v2430_v29, 1 }
  0x26   : > { %4094 = vst [vmem:[#allocation19_spill] sm:$0xff] %v2440_v45 }
  0x27   : > { %372 = vrot.lane.b32.xlu1 %v2286_v41, %s2138_s18  ;;  %v2462_v8 = vsel %vm273_vm0, %v335_v43, %v337_v51  ;;  %v2471_v41 = vld [vmem:[%s2180_s17 + $0x158] sm:$0xff] }
  0x28   : > { %370 = vrot.lane.b32.xlu0 %v2291_v44, %s2138_s18  ;;  %4098 = vst [vmem:[#allocation23_spill] sm:$0xff] %v2462_v8  ;;  %4100 = vst [vmem:[#allocation25_spill] sm:$0xff] %v2471_v41  ;;  %v2496_v44 = vld [vmem:[%s2180_s17 + $0x178] sm:$0x3] }
  0x2b   : > { %376 = vrot.lane.b32.xlu1 %v2308_v49, %s2138_s18 }
  0x2c   : > { %374 = vrot.lane.b32.xlu0 %v2313_v52, %s2138_s18 }
  0x2f   : > { %380 = vrot.lane.b32.xlu1 %v2330_v57, %s2138_s18  ;;  %v2452_v57 = vld [vmem:[%s2180_s17 + $0x148] sm:$0x3] }
  0x30   : > { %378 = vrot.lane.b32.xlu0 %v2335_v60, %s2138_s18  ;;  %v2455_v60 = vld [vmem:[%s2180_s17 + $0x138] sm:$0xff] }
  0x31   : > { %4097 = vst [vmem:[#allocation22_spill] sm:$0xff] %v2455_v60  ;;  %v339_v52 = vrot.slane %v2455_v60, 1 }
  0x33   : > { %384 = vrot.lane.b32.xlu1 %v2352_v4, %s2138_s18 }
  0x34   : > { %382 = vrot.lane.b32.xlu0 %v2357_v9, %s2138_s18  ;;  %v2449_v9 = vld [vmem:[%s2180_s17 + $0x140] sm:$0xff] }
  0x35   : > { %4096 = vst [vmem:[#allocation21_spill] sm:$0xff] %v2449_v9 }
  0x37   : > { %388 = vrot.lane.b32.xlu1 %v2374_v20, %s2138_s18  ;;  %v2433_v20 = vld [vmem:[%s2180_s17 + $0x120] sm:$0xff] }
  0x38   : > { %386 = vrot.lane.b32.xlu0 %v2379_v27, %s2138_s18  ;;  %4093 = vst [vmem:[#allocation18_spill] sm:$0xff] %v2433_v20  ;;  %v2445_v27 = vsel %vm273_vm0, %v329_v21, %v330_v6  ;;  %v334_v4 = vrot.slane %v2433_v20, 1  ;;  %v340_v6 = vrot.slane %v2449_v9, 1  ;;  %v342_v21 = vrot.slane %v2452_v57, 1 }
  0x39   : > { %4095 = vst [vmem:[#allocation20_spill] sm:$0xff] %v2445_v27 }
  0x3a   : > { %v2467_v49 = vsel %vm273_vm0, %v334_v4, %v335_v43  ;;  %v2484_v51 = vsel %vm273_vm0, %v340_v6, %v342_v21  ;;  %v345_v4 = vrot.slane %v2471_v41, 1 }
  0x3b   : > { %392 = vrot.lane.b32.xlu1 %v2396_v42, %s2138_s18  ;;  %4099 = vst [vmem:[#allocation24_spill] sm:$0xff] %v2467_v49  ;;  %4102 = vst [vmem:[#allocation27_spill] sm:$0xff] %v2484_v51  ;;  %v2493_v42 = vld [vmem:[%s2180_s17 + $0x170] sm:$0xff] }
  0x3c   : > { %390 = vrot.lane.b32.xlu0 %v2401_v50, %s2138_s18  ;;  %4104 = vst [vmem:[#allocation29_spill] sm:$0xff] %v2493_v42 }
  0x3f   : > { %396 = vrot.lane.b32.xlu1 %v2418_v61, %s2138_s18  ;;  %v2489_v61 = vsel %vm273_vm0, %v339_v52, %v340_v6  ;;  %v350_v52 = vrot.slane %v2493_v42, 1  ;;  %v352_v6 = vrot.slane %v2496_v44, 1 }
  0x40   : > { %394 = vrot.lane.b32.xlu0 %v2423_v13, %s2138_s18  ;;  %4103 = vst [vmem:[#allocation28_spill] sm:$0xff] %v2489_v61 }
  0x43   : > { %400 = vrot.lane.b32.xlu1 %v2440_v45, %s2138_s18  ;;  %v2474_v45 = vld [vmem:[%s2180_s17 + $0x160] sm:$0x3] }
  0x44   : > { %398 = vrot.lane.b32.xlu0 %v2445_v27, %s2138_s18  ;;  %v2477_v27 = vld [vmem:[%s2180_s17 + $0x150] sm:$0xff]  ;;  %v347_v43 = vrot.slane %v2474_v45, 1 }
  0x45   : > { %4101 = vst [vmem:[#allocation26_spill] sm:$0xff] %v2477_v27  ;;  %v344_v13 = vrot.slane %v2477_v27, 1 }
  0x46   : > { %v2506_v21 = vsel %vm273_vm0, %v345_v4, %v347_v43  ;;  %v452_v43 = vrot.slane %v2194_v5, 2  ;;  %v459_v5 = vrot.slane %v2198_v7, 2  ;;  %v461_v7 = vrot.slane %v2216_v15, 2 }
  0x47   : > { %404 = vrot.lane.b32.xlu1 %v2462_v8, %s2138_s18  ;;  %v2499_v8 = vld [vmem:[%s2180_s17 + $0x168] sm:$0xff]  ;;  %4106 = vst [vmem:[#allocation31_spill] sm:$0xff] %v2506_v21 }
  0x48   : > { %402 = vrot.lane.b32.xlu0 %v2467_v49, %s2138_s18  ;;  %4105 = vst [vmem:[#allocation30_spill] sm:$0xff] %v2499_v8  ;;  %v2511_v49 = vsel %vm273_vm0, %v344_v13, %v345_v4  ;;  %v349_v50 = vrot.slane %v2499_v8, 1  ;;  %v451_v13 = vrot.slane %v2189_v2, 2 }
  0x49   : > { %4107 = vst [vmem:[#allocation32_spill] sm:$0xff] %v2511_v49 }
  0x4a   : > { %v2524_v36 = vsel %vm273_vm0, %v349_v50, %v350_v52  ;;  %v456_v50 = vrot.slane %v2183_v0, 2 }
  0x4b   : > { %408 = vrot.lane.b32.xlu1 %v2484_v51, %s2138_s18  ;;  %v2519_v51 = vsel %vm273_vm0, %v350_v52, %v352_v6  ;;  %4109 = vst [vmem:[#allocation34_spill] sm:$0xff] %v2524_v36  ;;  %v457_v6 = vrot.slane %v2186_v1, 2  ;;  %v462_v52 = vrot.slane %v2206_v11, 2 }
  0x4c   : > { %406 = vrot.lane.b32.xlu0 %v2489_v61, %s2138_s18  ;;  %4108 = vst [vmem:[#allocation33_spill] sm:$0xff] %v2519_v51  ;;  %v454_v61 = vrot.slane %v2203_v10, 2  ;;  %v453_v10 = vsel %vm450_vm1, %v451_v13, %v452_v43  ;;  %v467_v13 = vrot.slane %v2230_v22, 2 }
  0x4d   : > { %v2539_v2 = vsel %vm450_vm1, %v457_v6, %v459_v5 }
  0x4e   : > { %v455_v4 = vsel %vm450_vm1, %v452_v43, %v454_v61  ;;  %v464_v61 = vrot.slane %v2213_v14, 2  ;;  %v2557_v14 = vsel %vm450_vm1, %v461_v7, %v462_v52  ;;  %v477_v7 = vrot.slane %v2273_v38, 2 }
  0x4f   : > { %412 = vrot.lane.b32.xlu1 %v2506_v21, %s2138_s18  ;;  %v489_v21 = vrot.slane %v2320_v55, 2 }
  0x50   : > { %410 = vrot.lane.b32.xlu0 %v2511_v49, %s2138_s18  ;;  %v2552_v43 = vsel %vm450_vm1, %v462_v52, %v464_v61  ;;  %v471_v52 = vrot.slane %v2257_v32, 2  ;;  %v494_v49 = vrot.slane %v2342_v63, 2 }
  0x53   : > { %416 = vrot.lane.b32.xlu1 %v2519_v51, %s2138_s18  ;;  %v2544_v51 = vsel %vm450_vm1, %v456_v50, %v457_v6  ;;  %v466_v6 = vrot.slane %v2236_v24, 2  ;;  %v474_v50 = vrot.slane %v2254_v31, 2 }
  0x54   : > { %414 = vrot.lane.b32.xlu0 %v2524_v36, %s2138_s18  ;;  %v484_v36 = vrot.slane %v2298_v47, 2 }
  0x57   : > { %533 = vrot.lane.b32.xlu1 %v455_v4, %s2139_s19  ;;  %v469_v4 = vrot.slane %v2233_v23, 2  ;;  %v2570_v23 = vsel %vm450_vm1, %v466_v6, %v467_v13 }
  0x58   : > { %531 = vrot.lane.b32.xlu0 %v453_v10, %s2139_s19  ;;  %v472_v10 = vrot.slane %v2251_v30, 2 }
  0x59   : > { %v2565_v5 = vsel %vm450_vm1, %v467_v13, %v469_v4  ;;  %v479_v4 = vrot.slane %v2276_v39, 2  ;;  %v476_v13 = vrot.slane %v2279_v40, 2 }
  0x5a   : > { %v2578_v61 = vsel %vm450_vm1, %v472_v10, %v474_v50  ;;  %v2583_v31 = vsel %vm450_vm1, %v471_v52, %v472_v10  ;;  %v482_v50 = vrot.slane %v2295_v46, 2  ;;  %v481_v10 = vrot.slane %v2301_v48, 2 }
  0x5b   : > { %537 = vrot.lane.b32.xlu1 %v2539_v2, %s2139_s19  ;;  %4110 = vst [vmem:[#allocation35_spill] sm:$0xff] %v2578_v61  ;;  %4111 = vst [vmem:[#allocation36_spill] sm:$0xff] %v2583_v31  ;;  %v2591_v6 = vsel %vm450_vm1, %v477_v7, %v479_v4  ;;  %v2596_v39 = vsel %vm450_vm1, %v476_v13, %v477_v7  ;;  %v487_v4 = vrot.slane %v2317_v54, 2  ;;  %v486_v7 = vrot.slane %v2323_v56, 2 }
  0x5c   : > { %535 = vrot.lane.b32.xlu0 %v2544_v51, %s2139_s19  ;;  %4112 = vst [vmem:[#allocation37_spill] sm:$0xff] %v2591_v6  ;;  %4113 = vst [vmem:[#allocation38_spill] sm:$0xff] %v2596_v39  ;;  %v2604_v52 = vsel %vm450_vm1, %v482_v50, %v484_v36  ;;  %v2609_v47 = vsel %vm450_vm1, %v481_v10, %v482_v50  ;;  %v492_v36 = vrot.slane %v2339_v62, 2  ;;  %v491_v50 = vrot.slane %v2345_v3, 2 }
  0x5d   : > { %4114 = vst [vmem:[#allocation39_spill] sm:$0xff] %v2604_v52  ;;  %4115 = vst [vmem:[#allocation40_spill] sm:$0xff] %v2609_v47  ;;  %v2617_v13 = vsel %vm450_vm1, %v487_v4, %v489_v21  ;;  %v2622_v55 = vsel %vm450_vm1, %v486_v7, %v487_v4  ;;  %v497_v21 = vrot.slane %v2361_v16, 2  ;;  %v496_v4 = vrot.slane %v2367_v19, 2 }
  0x5e   : > { %4116 = vst [vmem:[#allocation41_spill] sm:$0xff] %v2617_v13  ;;  %4117 = vst [vmem:[#allocation42_spill] sm:$0xff] %v2622_v55  ;;  %v2630_v10 = vsel %vm450_vm1, %v492_v36, %v494_v49  ;;  %v2635_v63 = vsel %vm450_vm1, %v491_v50, %v492_v36  ;;  %v502_v49 = vrot.slane %v2383_v34, 2  ;;  %v501_v36 = vrot.slane %v2389_v37, 2 }
  0x5f   : > { %541 = vrot.lane.b32.xlu1 %v2552_v43, %s2139_s19  ;;  %4118 = vst [vmem:[#allocation43_spill] sm:$0xff] %v2630_v10  ;;  %4119 = vst [vmem:[#allocation44_spill] sm:$0xff] %v2635_v63 }
  0x60   : > { %539 = vrot.lane.b32.xlu0 %v2557_v14, %s2139_s19 }
  0x63   : > { %545 = vrot.lane.b32.xlu1 %v2565_v5, %s2139_s19 }
  0x64   : > { %543 = vrot.lane.b32.xlu0 %v2570_v23, %s2139_s19 }
  0x67   : > { %549 = vrot.lane.b32.xlu1 %v2578_v61, %s2139_s19 }
  0x68   : > { %547 = vrot.lane.b32.xlu0 %v2583_v31, %s2139_s19 }
  0x6b   : > { %553 = vrot.lane.b32.xlu1 %v2591_v6, %s2139_s19 }
  0x6c   : > { %551 = vrot.lane.b32.xlu0 %v2596_v39, %s2139_s19 }
  0x6f   : > { %557 = vrot.lane.b32.xlu1 %v2604_v52, %s2139_s19  ;;  %v499_v52 = vrot.slane %v2364_v18, 2  ;;  %v2648_v18 = vsel %vm450_vm1, %v496_v4, %v497_v21 }
  0x70   : > { %555 = vrot.lane.b32.xlu0 %v2609_v47, %s2139_s19  ;;  %4121 = vst [vmem:[#allocation46_spill] sm:$0xff] %v2648_v18  ;;  %v524_v47 = vrot.slane %v2474_v45, 2  ;;  %v527_v45 = vrot.slane %v2493_v42, 2 }
  0x71   : > { %v2643_v7 = vsel %vm450_vm1, %v497_v21, %v499_v52  ;;  %v507_v52 = vrot.slane %v2405_v53, 2  ;;  %v506_v21 = vrot.slane %v2411_v59, 2 }
  0x72   : > { %4120 = vst [vmem:[#allocation45_spill] sm:$0xff] %v2643_v7 }
  0x73   : > { %561 = vrot.lane.b32.xlu1 %v2617_v13, %s2139_s19  ;;  %v504_v13 = vrot.slane %v2386_v35, 2  ;;  %v2661_v35 = vsel %vm450_vm1, %v501_v36, %v502_v49 }
  0x74   : > { %559 = vrot.lane.b32.xlu0 %v2622_v55, %s2139_s19  ;;  %v519_v55 = vrot.slane %v2452_v57, 2 }
  0x75   : > { %v2656_v50 = vsel %vm450_vm1, %v502_v49, %v504_v13  ;;  %v512_v13 = vrot.slane %v2427_v26, 2  ;;  %v511_v49 = vrot.slane %v2433_v20, 2 }
  0x77   : > { %565 = vrot.lane.b32.xlu1 %v2630_v10, %s2139_s19  ;;  %v509_v10 = vrot.slane %v2408_v58, 2  ;;  %v2674_v58 = vsel %vm450_vm1, %v506_v21, %v507_v52 }
  0x78   : > { %563 = vrot.lane.b32.xlu0 %v2635_v63, %s2139_s19  ;;  %v514_v63 = vrot.slane %v2430_v29, 2  ;;  %v2687_v29 = vsel %vm450_vm1, %v511_v49, %v512_v13 }
  0x79   : > { %v2669_v4 = vsel %vm450_vm1, %v507_v52, %v509_v10  ;;  %v517_v10 = vrot.slane %v2449_v9, 2  ;;  %4123 = vst [vmem:[#allocation48_spill] sm:$0xff] %v2687_v29  ;;  %v516_v52 = vrot.slane %v2455_v60, 2 }
  0x7a   : > { %v2682_v36 = vsel %vm450_vm1, %v512_v13, %v514_v63  ;;  %v522_v63 = vrot.slane %v2471_v41, 2  ;;  %v521_v13 = vrot.slane %v2477_v27, 2 }
  0x7b   : > { %569 = vrot.lane.b32.xlu1 %v2643_v7, %s2139_s19  ;;  %4122 = vst [vmem:[#allocation47_spill] sm:$0xff] %v2682_v36  ;;  %v2695_v21 = vsel %vm450_vm1, %v517_v10, %v519_v55  ;;  %v2702_v57 = vsel %vm450_vm1, %v516_v52, %v517_v10  ;;  %v526_v52 = vrot.slane %v2499_v8, 2 }
  0x7c   : > { %567 = vrot.lane.b32.xlu0 %v2648_v18, %s2139_s19  ;;  %4124 = vst [vmem:[#allocation49_spill] sm:$0xff] %v2695_v21  ;;  %4126 = vst [vmem:[#allocation51_spill] sm:$0xff] %v2702_v57  ;;  %v2712_v55 = vsel %vm450_vm1, %v522_v63, %v524_v47  ;;  %v2719_v10 = vsel %vm450_vm1, %v521_v13, %v522_v63 }
  0x7d   : > { %4128 = vst [vmem:[#allocation53_spill] sm:$0xff] %v2712_v55  ;;  %4130 = vst [vmem:[#allocation55_spill] sm:$0xff] %v2719_v10 }
  0x7f   : > { %573 = vrot.lane.b32.xlu1 %v2656_v50, %s2139_s19 }
  0x80   : > { %571 = vrot.lane.b32.xlu0 %v2661_v35, %s2139_s19 }
  0x83   : > { %577 = vrot.lane.b32.xlu1 %v2669_v4, %s2139_s19 }
  0x84   : > { %575 = vrot.lane.b32.xlu0 %v2674_v58, %s2139_s19 }
  0x87   : > { %581 = vrot.lane.b32.xlu1 %v2682_v36, %s2139_s19 }
  0x88   : > { %579 = vrot.lane.b32.xlu0 %v2687_v29, %s2139_s19 }
  0x89   : > { %v2699_v6 = vpop.permute.xlu1 %358 }
  0x8a   : > { %4125 = vst [vmem:[#allocation50_spill] sm:$0xff] %v2699_v6  ;;  %v2705_v49 = vpop.permute.xlu0 %354  ;;  %v529_v6 = vrot.slane %v2496_v44, 2  ;;  %v2734_v44 = vsel %vm450_vm1, %v526_v52, %v527_v45 }
  0x8b   : > { %4127 = vst [vmem:[#allocation52_spill] sm:$0xff] %v2705_v49  ;;  %585 = vrot.lane.b32.xlu1 %v2695_v21, %s2139_s19  ;;  %4133 = vst [vmem:[#allocation58_spill] sm:$0xff] %v2734_v44 }
  0x8c   : > { %583 = vrot.lane.b32.xlu0 %v2702_v57, %s2139_s19  ;;  %v2729_v47 = vsel %vm450_vm1, %v527_v45, %v529_v6 }
  0x8d   : > { %v2716_v39 = vpop.permute.xlu1 %360  ;;  %4132 = vst [vmem:[#allocation57_spill] sm:$0xff] %v2729_v47 }
  0x8e   : > { %4129 = vst [vmem:[#allocation54_spill] sm:$0xff] %v2716_v39  ;;  %v2722_v49 = vpop.permute.xlu0 %356 }
  0x8f   : > { %4131 = vst [vmem:[#allocation56_spill] sm:$0xff] %v2722_v49  ;;  %589 = vrot.lane.b32.xlu1 %v2712_v55, %s2139_s19 }
  0x90   : > { %587 = vrot.lane.b32.xlu0 %v2719_v10, %s2139_s19 }
  0x91   : > { %v2731_v21 = vpop.permute.xlu1 %364 }
  0x92   : > { %v2736_v63 = vpop.permute.xlu0 %362 }
  0x93   : > { %593 = vrot.lane.b32.xlu1 %v2729_v47, %s2139_s19 }
  0x94   : > { %591 = vrot.lane.b32.xlu0 %v2734_v44, %s2139_s19  ;;  %s2145_s19 = smov 64  }
  0x95   : > { %v2742_v13 = vpop.permute.xlu1 %368 }
  0x96   : > { %v2744_v55 = vpop.permute.xlu0 %366 }
  0x97   : > { %631 = vrot.lane.b32.xlu1 %v2186_v1, %s2140_s20 }
  0x98   : > { %629 = vrot.lane.b32.xlu0 %v2183_v0, %s2140_s20 }
  0x99   : > { %v2750_v6 = vpop.permute.xlu1 %372 }
  0x9a   : > { %v2752_v45 = vpop.permute.xlu0 %370 }
  0x9b   : > { %635 = vrot.lane.b32.xlu1 %v2206_v11, %s2140_s20 }
  0x9c   : > { %633 = vrot.lane.b32.xlu0 %v2216_v15, %s2140_s20 }
  0x9d   : > { %v2758_v52 = vpop.permute.xlu1 %376 }
  0x9e   : > { %v2760_v47 = vpop.permute.xlu0 %374 }
  0x9f   : > { %639 = vrot.lane.b32.xlu1 %v2230_v22, %s2140_s20 }
  0xa0   : > { %637 = vrot.lane.b32.xlu0 %v2236_v24, %s2140_s20 }
  0xa1   : > { %v2766_v0 = vpop.permute.xlu1 %380 }
  0xa2   : > { %v2768_v1 = vpop.permute.xlu0 %378 }
  0xa3   : > { %643 = vrot.lane.b32.xlu1 %v2251_v30, %s2140_s20 }
  0xa4   : > { %641 = vrot.lane.b32.xlu0 %v2257_v32, %s2140_s20 }
  0xa5   : > { %v2774_v44 = vpop.permute.xlu1 %384 }
  0xa6   : > { %v2776_v10 = vpop.permute.xlu0 %382 }
  0xa7   : > { %647 = vrot.lane.b32.xlu1 %v2273_v38, %s2140_s20 }
  0xa8   : > { %645 = vrot.lane.b32.xlu0 %v2279_v40, %s2140_s20 }
  0xa9   : > { %v2782_v39 = vpop.permute.xlu1 %388 }
  0xaa   : > { %4134 = vst [vmem:[#allocation59_spill] sm:$0xff] %v2782_v39  ;;  %v2784_v49 = vpop.permute.xlu0 %386 }
  0xab   : > { %4135 = vst [vmem:[#allocation60_spill] sm:$0xff] %v2784_v49  ;;  %651 = vrot.lane.b32.xlu1 %v2295_v46, %s2140_s20 }
  0xac   : > { %649 = vrot.lane.b32.xlu0 %v2301_v48, %s2140_s20 }
  0xad   : > { %v2790_v57 = vpop.permute.xlu1 %392 }
  0xae   : > { %4136 = vst [vmem:[#allocation61_spill] sm:$0xff] %v2790_v57  ;;  %v2792_v61 = vpop.permute.xlu0 %390 }
  0xaf   : > { %4137 = vst [vmem:[#allocation62_spill] sm:$0xff] %v2792_v61  ;;  %655 = vrot.lane.b32.xlu1 %v2317_v54, %s2140_s20 }
  0xb0   : > { %653 = vrot.lane.b32.xlu0 %v2323_v56, %s2140_s20 }
  0xb1   : > { %v2798_v36 = vpop.permute.xlu1 %396 }
  0xb2   : > { %v2800_v39 = vpop.permute.xlu0 %394 }
  0xb3   : > { %659 = vrot.lane.b32.xlu1 %v2339_v62, %s2140_s20 }
  0xb4   : > { %657 = vrot.lane.b32.xlu0 %v2345_v3, %s2140_s20 }
  0xb5   : > { %v2806_v49 = vpop.permute.xlu1 %400 }
  0xb6   : > { %v2808_v57 = vpop.permute.xlu0 %398 }
  0xb7   : > { %4138 = vst [vmem:[#allocation63_spill] sm:$0xff] %v2808_v57  ;;  %663 = vrot.lane.b32.xlu1 %v2361_v16, %s2140_s20 }
  0xb8   : > { %661 = vrot.lane.b32.xlu0 %v2367_v19, %s2140_s20 }
  0xb9   : > { %v2814_v61 = vpop.permute.xlu1 %404 }
  0xba   : > { %4139 = vst [vmem:[#allocation64_spill] sm:$0xff] %v2814_v61  ;;  %v2816_v31 = vpop.permute.xlu0 %402 }
  0xbb   : > { %4140 = vst [vmem:[#allocation65_spill] sm:$0xff] %v2816_v31  ;;  %667 = vrot.lane.b32.xlu1 %v2383_v34, %s2140_s20 }
  0xbc   : > { %665 = vrot.lane.b32.xlu0 %v2389_v37, %s2140_s20 }
  0xbd   : > { %v2822_v62 = vpop.permute.xlu1 %408 }
  0xbe   : > { %4141 = vst [vmem:[#allocation66_spill] sm:$0xff] %v2822_v62  ;;  %v2824_v3 = vpop.permute.xlu0 %406 }
  0xbf   : > { %4142 = vst [vmem:[#allocation67_spill] sm:$0xff] %v2824_v3  ;;  %671 = vrot.lane.b32.xlu1 %v2405_v53, %s2140_s20 }
  0xc0   : > { %669 = vrot.lane.b32.xlu0 %v2411_v59, %s2140_s20 }
  0xc1   : > { %v2830_v16 = vpop.permute.xlu1 %412 }
  0xc2   : > { %4143 = vst [vmem:[#allocation68_spill] sm:$0xff] %v2830_v16  ;;  %v2832_v19 = vpop.permute.xlu0 %410 }
  0xc3   : > { %4144 = vst [vmem:[#allocation69_spill] sm:$0xff] %v2832_v19  ;;  %675 = vrot.lane.b32.xlu1 %v2427_v26, %s2140_s20  ;;  %v4156_v26 = vld [vmem:[#allocation13_spill] sm:$0xff] }
  0xc4   : > { %673 = vrot.lane.b32.xlu0 %v2433_v20, %s2140_s20 }
  0xc5   : > { %v2838_v29 = vpop.permute.xlu1 %416 }
  0xc6   : > { %4145 = vst [vmem:[#allocation70_spill] sm:$0xff] %v2838_v29  ;;  %v2840_v3 = vpop.permute.xlu0 %414 }
  0xc7   : > { %4146 = vst [vmem:[#allocation71_spill] sm:$0xff] %v2840_v3  ;;  %679 = vrot.lane.b32.xlu1 %v2449_v9, %s2140_s20  ;;  %v2863_v3 = vld [vmem:[%s2180_s17 + $0x188] sm:$0xff]  ;;  %v4155_v9 = vld [vmem:[#allocation4_spill] sm:$0xff] }
  0xc8   : > { %677 = vrot.lane.b32.xlu0 %v2455_v60, %s2140_s20  ;;  %4151 = vst [vmem:[#allocation76_spill] sm:$0xff] %v2863_v3  ;;  %v4154_v60 = vld [vmem:[#allocation14_spill] sm:$0xff] }
  0xc9   : > { %v2846_v16 = vpop.permute.xlu1 %533 }
  0xca   : > { %4147 = vst [vmem:[#allocation72_spill] sm:$0xff] %v2846_v16  ;;  %v2848_v19 = vpop.permute.xlu0 %531 }
  0xcb   : > { %4148 = vst [vmem:[#allocation73_spill] sm:$0xff] %v2848_v19  ;;  %683 = vrot.lane.b32.xlu1 %v2471_v41, %s2140_s20  ;;  %v2868_v19 = vld [vmem:[%s2180_s17 + $0x180] sm:$0xff] }
  0xcc   : > { %681 = vrot.lane.b32.xlu0 %v2477_v27, %s2140_s20  ;;  %4152 = vst [vmem:[#allocation77_spill] sm:$0xff] %v2868_v19 }
  0xcd   : > { %v2854_v62 = vpop.permute.xlu1 %537 }
  0xce   : > { %4149 = vst [vmem:[#allocation74_spill] sm:$0xff] %v2854_v62  ;;  %v2856_v29 = vpop.permute.xlu0 %535 }
  0xcf   : > { %4150 = vst [vmem:[#allocation75_spill] sm:$0xff] %v2856_v29  ;;  %687 = vrot.lane.b32.xlu1 %v2493_v42, %s2140_s20 }
  0xd0   : > { %685 = vrot.lane.b32.xlu0 %v2499_v8, %s2140_s20 }
  0xd1   : > { %v2865_v16 = vpop.permute.xlu1 %541 }
  0xd2   : > { %v2870_v41 = vpop.permute.xlu0 %539 }
  0xd3   : > { %691 = vrot.lane.b32.xlu1 %v2863_v3, %s2140_s20 }
  0xd4   : > { %689 = vrot.lane.b32.xlu0 %v2868_v19, %s2140_s20 }
  0xd5   : > { %v2876_v62 = vpop.permute.xlu1 %545 }
  0xd6   : > { %v2878_v29 = vpop.permute.xlu0 %543 }
  0xd7   : > { %733 = vrot.lane.b32.xlu1 %v2223_v17, %s2141_s21  ;;  %v4153_v17 = vld [vmem:[#allocation2_spill] sm:$0xff] }
  0xd8   : > { %731 = vrot.lane.b32.xlu0 %v2209_v12, %s2141_s21 }
  0xd9   : > { %v2884_v8 = vpop.permute.xlu1 %549 }
  0xda   : > { %v2886_v42 = vpop.permute.xlu0 %547 }
  0xdb   : > { %737 = vrot.lane.b32.xlu1 %v2242_v25, %s2141_s21 }
  0xdc   : > { %735 = vrot.lane.b32.xlu0 %v2247_v28, %s2141_s21 }
  0xdd   : > { %v2892_v3 = vpop.permute.xlu1 %553 }
  0xde   : > { %v2894_v19 = vpop.permute.xlu0 %551 }
  0xdf   : > { %741 = vrot.lane.b32.xlu1 %v2264_v33, %s2141_s21 }
  0xe0   : > { %739 = vrot.lane.b32.xlu0 %v4153_v17, %s2141_s21 }
  0xe1   : > { %v2900_v12 = vpop.permute.xlu1 %557 }
  0xe2   : > { %v2902_v27 = vpop.permute.xlu0 %555 }
  0xe3   : > { %763 = vrot.lane.b32.xlu1 %v4154_v60, %s2141_s21  ;;  %v1493_v60 = vld [vmem:[%s3970_s1] sm:$0xff] }
  0xe4   : > { %743 = vrot.lane.b32.xlu0 %v4155_v9, %s2141_s21  ;;  %v1494_v9 = vld [vmem:[%s3970_s1 + $0x8] sm:$0xff] }
  0xe5   : > { %v2908_v20 = vpop.permute.xlu1 %561 }
  0xe6   : > { %v2910_v31 = vpop.permute.xlu0 %559 }
  0xe7   : > { %832 = vrot.lane.b32.xlu1 %v2544_v51, %s2142_s22  ;;  %v2069_v51 = vpack.c.bf16 %v1494_v9, %v1493_v60 }
  0xe8   : > { %765 = vrot.lane.b32.xlu0 %v4156_v26, %s2141_s21 }
  0xe9   : > { %v2916_v61 = vpop.permute.xlu1 %565  ;;  %2070 = vmatprep.subr.bf16.mxu0 %v2069_v51  ;;  %2085 = vmatprep.subr.bf16.mxu1 %v2069_v51 }
  0xea   : > { %4157 = vst [vmem:[#allocation2_spill] sm:$0xff] %v2916_v61  ;;  %v2918_v57 = vpop.permute.xlu0 %563  ;;  %2072 = vmatpush3.bf16.msra.mxu0 %v2069_v51  ;;  %2090 = vmatpush3.bf16.msra.mxu1 %v2069_v51 }
  0xeb   : > { %4158 = vst [vmem:[#allocation78_spill] sm:$0xff] %v2918_v57  ;;  %834 = vrot.lane.b32.xlu1 %v2539_v2, %s2142_s22  ;;  %v1495_v2 = vld [vmem:[%s3970_s1 + $0x10] sm:$0xff] }
  0xec   : > { %864 = vrot.lane.b32.xlu0 %v2648_v18, %s2142_s22  ;;  %v1496_v18 = vld [vmem:[%s3970_s1 + $0x18] sm:$0xff]  ;;  %v1499_v57 = vld [vmem:[%s3970_s1 + $0x30] sm:$0xff] }
  0xed   : > { %v2930_v26 = vpop.permute.xlu1 %569  ;;  %v2073_v60 = vpack.c.bf16 %v1496_v18, %v1495_v2 }
  0xee   : > { %4159 = vst [vmem:[#allocation79_spill] sm:$0xff] %v2930_v26  ;;  %v2932_v61 = vpop.permute.xlu0 %567 }
  0xef   : > { %4160 = vst [vmem:[#allocation80_spill] sm:$0xff] %v2932_v61  ;;  %930 = vrot.lane.b32.xlu1 %v2216_v15, %s2143_s27  ;;  %2074 = vmatprep.subr.bf16.mxu0 %v2073_v60  ;;  %v1497_v61 = vld [vmem:[%s3970_s1 + $0x20] sm:$0xff] }
  0xf0   : > { %866 = vrot.lane.b32.xlu0 %v2643_v7, %s2142_s22  ;;  %2086 = vmatprep.subr.bf16.mxu1 %v2073_v60  ;;  %v1498_v7 = vld [vmem:[%s3970_s1 + $0x28] sm:$0xff] }
  0xf1   : > { %v2944_v9 = vpop.permute.xlu1 %573  ;;  %2076 = vmatpush3.bf16.msra.mxu0 %v2073_v60  ;;  %v2077_v18 = vpack.c.bf16 %v1498_v7, %v1497_v61  ;;  %2091 = vmatpush3.bf16.msra.mxu1 %v2073_v60  ;;  %v1500_v61 = vld [vmem:[%s3970_s1 + $0x38] sm:$0xff] }
  0xf2   : > { %v2946_v26 = vpop.permute.xlu0 %571  ;;  %v2081_v7 = vpack.c.bf16 %v1500_v61, %v1499_v57  ;;  %v4166_v61 = vld [vmem:[#allocation15_spill] sm:$0xff] }
  0xf3   : > { %932 = vrot.lane.b32.xlu1 %v2206_v11, %s2143_s27  ;;  %2078 = vmatprep.subr.bf16.mxu0 %v2077_v18 }
  0xf4   : > { %962 = vrot.lane.b32.xlu0 %v2389_v37, %s2143_s27  ;;  %2087 = vmatprep.subr.bf16.mxu1 %v2077_v18 }
  0xf5   : > { %v2958_v51 = vpop.permute.xlu1 %577  ;;  %2080 = vmatpush3.bf16.msra.mxu0 %v2077_v18  ;;  %2092 = vmatpush3.bf16.msra.mxu1 %v2077_v18 }
  0xf6   : > { %4161 = vst [vmem:[#allocation81_spill] sm:$0xff] %v2958_v51  ;;  %v2960_v2 = vpop.permute.xlu0 %575  ;;  %2082 = vmatprep.subr.bf16.mxu0 %v2081_v7  ;;  %2088 = vmatprep.subr.bf16.mxu1 %v2081_v7  ;;  %v1501_v51 = vld [vmem:[%s3970_s1 + $0x40] sm:$0xff] }
  0xf7   : > { %4162 = vst [vmem:[#allocation82_spill] sm:$0xff] %v2960_v2  ;;  %1032 = vrot.lane.b32.xlu1 %v2247_v28, %s2144_s9  ;;  %v4164_v28 = vld [vmem:[#allocation16_spill] sm:$0xff] }
  0xf8   : > { %964 = vrot.lane.b32.xlu0 %v2383_v34, %s2143_s27 }
  0xf9   : > { %v2972_v60 = vpop.permute.xlu1 %581  ;;  %2084 = vmatpush3.bf16.msra.mxu0 %v2081_v7  ;;  %2093 = vmatpush3.bf16.msra.mxu1 %v2081_v7 }
  0xfa   : > { %v2974_v2 = vpop.permute.xlu0 %579  ;;  %2019 = vmatprep.subr.mxu0 %v1501_v51  ;;  %2089 = vmatprep.subr.mxu1 %v1501_v51 }
  0xfb   : > { %4163 = vst [vmem:[#allocation83_spill] sm:$0xff] %v2974_v2  ;;  %767 = vrot.lane.b32.xlu1 %v4164_v28, %s2141_s21 }
  0xfc   : > { %1064 = vrot.lane.b32.xlu0 %v4164_v28, %s2144_s9 }
  0xfd   : > { %v2983_v57 = vpop.permute.xlu1 %585  ;;  %2020 = vmatpush3.msra.mxu0 %v1501_v51  ;;  %2094 = vmatpush3.msra.mxu1 %v1501_v51 }
  0xfe   : > { %v2985_v18 = vpop.permute.xlu0 %583 }
  0xff   : > { %4165 = vst [vmem:[#allocation16_spill] sm:$0xff] %v2985_v18  ;;  %1066 = vrot.lane.b32.xlu1 %v4166_v61, %s2144_s9 }
 0x100   : > { %1034 = vrot.lane.b32.xlu0 %v2242_v25, %s2144_s9 }
 0x101   : > { %v2991_v28 = vpop.permute.xlu1 %589 }
 0x102   : > { %v2993_v2 = vpop.permute.xlu0 %587 }
 0x103   : > { %4167 = vst [vmem:[#allocation15_spill] sm:$0xff] %v2993_v2  ;;  %1165 = vrot.lane.b32.xlu1 %v2661_v35, %s2145_s19 }
 0x104   : > { %1133 = vrot.lane.b32.xlu0 %v2557_v14, %s2145_s19 }
 0x105   : > { %v2999_v7 = vpop.permute.xlu1 %593 }
 0x106   : > { %4168 = vst [vmem:[#allocation84_spill] sm:$0xff] %v2999_v7  ;;  %v3001_v18 = vpop.permute.xlu0 %591 }
 0x107   : > { %836 = vrot.lane.b32.xlu1 %v2557_v14, %s2142_s22  ;;  %v1235_v14 = vsel %vm1229_vm2, %v2206_v11, %v2731_v21 }
 0x108   : > { %769 = vrot.lane.b32.xlu0 %v4166_v61, %s2141_s21  ;;  %v1268_v61 = vsel %vm1262_vm3, %v1235_v14, %v2865_v16 }
 0x109   : > { %v3007_v25 = vpop.permute.xlu1 %631 }
 0x10a   : > { %v3009_v51 = vpop.permute.xlu0 %629 }
 0x10b   : > { %1135 = vrot.lane.b32.xlu1 %v2552_v43, %s2145_s19 }
 0x10c   : > { %868 = vrot.lane.b32.xlu0 %v2661_v35, %s2142_s22  ;;  %v1234_v35 = vsel %vm1229_vm2, %v2216_v15, %v2736_v63  ;;  %v1237_v15 = vsel %vm1229_vm2, %v2230_v22, %v2742_v13 }
 0x10d   : > { %v3015_v2 = vpop.permute.xlu1 %635  ;;  %v1270_v63 = vsel %vm1262_vm3, %v1237_v15, %v2876_v62 }
 0x10e   : > { %4169 = vst [vmem:[#allocation85_spill] sm:$0xff] %v3015_v2  ;;  %v3017_v7 = vpop.permute.xlu0 %633 }
 0x10f   : > { %4170 = vst [vmem:[#allocation86_spill] sm:$0xff] %v3017_v7  ;;  %838 = vrot.lane.b32.xlu1 %v2552_v43, %s2142_s22  ;;  %v1267_v43 = vsel %vm1262_vm3, %v1234_v35, %v2870_v41  ;;  %v1236_v41 = vsel %vm1229_vm2, %v2236_v24, %v2744_v55 }
 0x110   : > { %1167 = vrot.lane.b32.xlu0 %v2656_v50, %s2145_s19 }
 0x111   : > { %v640_v2 = vpop.permute.xlu1 %639 }
 0x112   : > { %v3034_v7 = vsel %vm1295_vm4, %v1268_v61, %v640_v2  ;;  %v638_v11 = vpop.permute.xlu0 %637  ;;  %v1269_v2 = vsel %vm1262_vm3, %v1236_v41, %v2878_v29 }
 0x113   : > { %v3037_v21 = vsel %vm1295_vm4, %v1267_v43, %v638_v11  ;;  %934 = vrot.lane.b32.xlu1 %v2236_v24, %s2143_s27  ;;  %v1239_v24 = vsel %vm1229_vm2, %v2251_v30, %v2750_v6 }
 0x114   : > { %870 = vrot.lane.b32.xlu0 %v2656_v50, %s2142_s22  ;;  %v1238_v50 = vsel %vm1229_vm2, %v2257_v32, %v2752_v45  ;;  %v1272_v29 = vsel %vm1262_vm3, %v1239_v24, %v2884_v8  ;;  %v1241_v45 = vsel %vm1229_vm2, %v2273_v38, %v2758_v52  ;;  %v4171_v52 = vld [vmem:[#allocation20_spill] sm:$0xff] }
 0x115   : > { %v644_v16 = vpop.permute.xlu1 %643  ;;  %v1271_v62 = vsel %vm1262_vm3, %v1238_v50, %v2886_v42  ;;  %v1240_v42 = vsel %vm1229_vm2, %v2279_v40, %v2760_v47  ;;  %v1274_v8 = vsel %vm1262_vm3, %v1241_v45, %v2892_v3  ;;  %v1243_v40 = vsel %vm1229_vm2, %v2295_v46, %v2766_v0  ;;  %v4172_v0 = vld [vmem:[#allocation19_spill] sm:$0xff] }
 0x116   : > { %v3054_v14 = vsel %vm1295_vm4, %v1270_v63, %v644_v16  ;;  %v642_v35 = vpop.permute.xlu0 %641  ;;  %v1273_v11 = vsel %vm1262_vm3, %v1240_v42, %v2894_v19  ;;  %v1242_v47 = vsel %vm1229_vm2, %v2301_v48, %v2768_v1  ;;  %v1276_v3 = vsel %vm1262_vm3, %v1243_v40, %v2900_v12 }
 0x117   : > { %v3057_v13 = vsel %vm1295_vm4, %v1269_v2, %v642_v35  ;;  %936 = vrot.lane.b32.xlu1 %v2230_v22, %s2143_s27  ;;  %v1275_v41 = vsel %vm1262_vm3, %v1242_v47, %v2902_v27  ;;  %v1245_v48 = vsel %vm1229_vm2, %v2317_v54, %v2774_v44  ;;  %v1244_v27 = vsel %vm1229_vm2, %v2323_v56, %v2776_v10  ;;  %v4180_v47 = vld [vmem:[#allocation83_spill] sm:$0xff] }
 0x118   : > { %966 = vrot.lane.b32.xlu0 %v2411_v59, %s2143_s27  ;;  %v1278_v1 = vsel %vm1262_vm3, %v1245_v48, %v2908_v20  ;;  %v1277_v2 = vsel %vm1262_vm3, %v1244_v27, %v2910_v31  ;;  %v1251_v10 = vsel %vm1229_vm2, %v2383_v34, %v2798_v36  ;;  %v4184_v48 = vld [vmem:[#allocation22_spill] sm:$0xff] }
 0x119   : > { %v648_v55 = vpop.permute.xlu1 %647  ;;  %v1284_v44 = vsel %vm1262_vm3, %v1251_v10, %v2944_v9 }
 0x11a   : > { %v3074_v22 = vsel %vm1295_vm4, %v1272_v29, %v648_v55  ;;  %v646_v61 = vpop.permute.xlu0 %645 }
 0x11b   : > { %v3077_v6 = vsel %vm1295_vm4, %v1271_v62, %v646_v61  ;;  %1036 = vrot.lane.b32.xlu1 %v4153_v17, %s2144_s9  ;;  %v4175_v61 = vld [vmem:[#allocation82_spill] sm:$0xff] }
 0x11c   : > { %968 = vrot.lane.b32.xlu0 %v2405_v53, %s2143_s27 }
 0x11d   : > { %v652_v43 = vpop.permute.xlu1 %651 }
 0x11e   : > { %v3094_v17 = vsel %vm1295_vm4, %v1274_v8, %v652_v43  ;;  %v650_v15 = vpop.permute.xlu0 %649  ;;  %v4177_v8 = vld [vmem:[#allocation17_spill] sm:$0xff] }
 0x11f   : > { %v3097_v38 = vsel %vm1295_vm4, %v1273_v11, %v650_v15  ;;  %771 = vrot.lane.b32.xlu1 %v4171_v52, %s2141_s21  ;;  %v4178_v43 = vld [vmem:[#allocation65_spill] sm:$0xff]  ;;  %v4179_v11 = vld [vmem:[#allocation18_spill] sm:$0xff] }
 0x120   : > { %1068 = vrot.lane.b32.xlu0 %v4171_v52, %s2144_s9  ;;  %v1254_v15 = vsel %vm1229_vm2, %v4179_v11, %v4178_v43 }
 0x121   : > { %v656_v19 = vpop.permute.xlu1 %655 }
 0x122   : > { %v3114_v63 = vsel %vm1295_vm4, %v1276_v3, %v656_v19  ;;  %v654_v16 = vpop.permute.xlu0 %653  ;;  %v1287_v3 = vsel %vm1262_vm3, %v1254_v15, %v4180_v47 }
 0x123   : > { %v3117_v46 = vsel %vm1295_vm4, %v1275_v41, %v654_v16  ;;  %1070 = vrot.lane.b32.xlu1 %v4172_v0, %s2144_s9  ;;  %v4182_v16 = vld [vmem:[#allocation21_spill] sm:$0xff] }
 0x124   : > { %1038 = vrot.lane.b32.xlu0 %v2264_v33, %s2144_s9 }
 0x125   : > { %v660_v12 = vpop.permute.xlu1 %659 }
 0x126   : > { %v3134_v35 = vsel %vm1295_vm4, %v1278_v1, %v660_v12  ;;  %v658_v24 = vpop.permute.xlu0 %657 }
 0x127   : > { %v3137_v54 = vsel %vm1295_vm4, %v1277_v2, %v658_v24  ;;  %1169 = vrot.lane.b32.xlu1 %v2674_v58, %s2145_s19  ;;  %v4185_v2 = vld [vmem:[#allocation16_spill] sm:$0xff] }
 0x128   : > { %1137 = vrot.lane.b32.xlu0 %v2570_v23, %s2145_s19 }
 0x129   : > { %v3143_v33 = vpop.permute.xlu1 %663 }
 0x12a   : > { %v3145_v56 = vpop.permute.xlu0 %661 }
 0x12b   : > { %840 = vrot.lane.b32.xlu1 %v2570_v23, %s2142_s22  ;;  %v1250_v23 = vsel %vm1229_vm2, %v2389_v37, %v2800_v39  ;;  %v1253_v37 = vsel %vm1229_vm2, %v2405_v53, %v2806_v49  ;;  %v4173_v39 = vld [vmem:[#allocation63_spill] sm:$0xff]  ;;  %v4176_v49 = vld [vmem:[#allocation64_spill] sm:$0xff] }
 0x12c   : > { %773 = vrot.lane.b32.xlu0 %v4172_v0, %s2141_s21  ;;  %v1283_v29 = vsel %vm1262_vm3, %v1250_v23, %v2946_v26  ;;  %v1252_v26 = vsel %vm1229_vm2, %v2411_v59, %v4173_v39  ;;  %v1255_v59 = vsel %vm1229_vm2, %v4177_v8, %v4176_v49  ;;  %v4192_v49 = vld [vmem:[#allocation24_spill] sm:$0xff] }
 0x12d   : > { %v3151_v20 = vpop.permute.xlu1 %667  ;;  %v1285_v45 = vsel %vm1262_vm3, %v1252_v26, %v4175_v61  ;;  %v1288_v52 = vsel %vm1262_vm3, %v1255_v59, %v2972_v60  ;;  %v4183_v60 = vld [vmem:[#allocation67_spill] sm:$0xff]  ;;  %v4194_v59 = vld [vmem:[#allocation29_spill] sm:$0xff] }
 0x12e   : > { %v3153_v31 = vpop.permute.xlu0 %665  ;;  %v1256_v27 = vsel %vm1229_vm2, %v4184_v48, %v4183_v60  ;;  %v4198_v60 = vld [vmem:[#allocation23_spill] sm:$0xff] }
 0x12f   : > { %1139 = vrot.lane.b32.xlu1 %v2565_v5, %s2145_s19  ;;  %v1289_v24 = vsel %vm1262_vm3, %v1256_v27, %v4185_v2  ;;  %v4199_v27 = vld [vmem:[#allocation3_spill] sm:$0xff]  ;;  %v4200_v2 = vld [vmem:[#allocation48_spill] sm:$0xff] }
 0x130   : > { %872 = vrot.lane.b32.xlu0 %v2674_v58, %s2142_s22  ;;  %v4174_v58 = vld [vmem:[#allocation81_spill] sm:$0xff] }
 0x131   : > { %v672_v50 = vpop.permute.xlu1 %671  ;;  %v1286_v36 = vsel %vm1262_vm3, %v1253_v37, %v4174_v58  ;;  %v4190_v37 = vld [vmem:[#allocation26_spill] sm:$0xff] }
 0x132   : > { %v3170_v55 = vsel %vm1295_vm4, %v1284_v44, %v672_v50  ;;  %v670_v62 = vpop.permute.xlu0 %669  ;;  %v4186_v44 = vld [vmem:[#allocation4_spill] sm:$0xff] }
 0x133   : > { %v3173_v34 = vsel %vm1295_vm4, %v1283_v29, %v670_v62  ;;  %842 = vrot.lane.b32.xlu1 %v2565_v5, %s2142_s22  ;;  %v4187_v50 = vld [vmem:[#allocation68_spill] sm:$0xff]  ;;  %v4188_v29 = vld [vmem:[#allocation25_spill] sm:$0xff] }
 0x134   : > { %1171 = vrot.lane.b32.xlu0 %v2669_v4, %s2145_s19  ;;  %v1259_v62 = vsel %vm1229_vm2, %v4188_v29, %v4187_v50 }
 0x135   : > { %v676_v9 = vpop.permute.xlu1 %675  ;;  %v1292_v26 = vsel %vm1262_vm3, %v1259_v62, %v2991_v28  ;;  %v4195_v28 = vld [vmem:[#allocation71_spill] sm:$0xff] }
 0x136   : > { %v3190_v5 = vsel %vm1295_vm4, %v1286_v36, %v676_v9  ;;  %v674_v42 = vpop.permute.xlu0 %673  ;;  %v4191_v36 = vld [vmem:[#allocation15_spill] sm:$0xff] }
 0x137   : > { %v3193_v53 = vsel %vm1295_vm4, %v1285_v45, %v674_v42  ;;  %938 = vrot.lane.b32.xlu1 %v2257_v32, %s2143_s27 }
 0x138   : > { %874 = vrot.lane.b32.xlu0 %v2669_v4, %s2142_s22  ;;  %v4181_v4 = vld [vmem:[#allocation66_spill] sm:$0xff] }
 0x139   : > { %v680_v40 = vpop.permute.xlu1 %679  ;;  %v1257_v0 = vsel %vm1229_vm2, %v4182_v16, %v4181_v4 }
 0x13a   : > { %v3210_v32 = vsel %vm1295_vm4, %v1288_v52, %v680_v40  ;;  %v678_v19 = vpop.permute.xlu0 %677  ;;  %v1290_v1 = vsel %vm1262_vm3, %v1257_v0, %v2983_v57  ;;  %v4189_v57 = vld [vmem:[#allocation69_spill] sm:$0xff]  ;;  %v4197_v52 = vld [vmem:[#allocation84_spill] sm:$0xff] }
 0x13b   : > { %v3213_v41 = vsel %vm1295_vm4, %v1287_v3, %v678_v19  ;;  %940 = vrot.lane.b32.xlu1 %v2251_v30, %s2143_s27  ;;  %v1258_v39 = vsel %vm1229_vm2, %v4190_v37, %v4189_v57  ;;  %v4202_v57 = vld [vmem:[#allocation47_spill] sm:$0xff] }
 0x13c   : > { %970 = vrot.lane.b32.xlu0 %v4179_v11, %s2143_s27  ;;  %v1291_v9 = vsel %vm1262_vm3, %v1258_v39, %v4191_v36  ;;  %v4196_v11 = vld [vmem:[#allocation30_spill] sm:$0xff]  ;;  %v4203_v37 = vld [vmem:[#allocation35_spill] sm:$0xff] }
 0x13d   : > { %v684_v12 = vpop.permute.xlu1 %683  ;;  %v1260_v15 = vsel %vm1229_vm2, %v4196_v11, %v4195_v28  ;;  %v4204_v28 = vld [vmem:[#allocation28_spill] sm:$0xff] }
 0x13e   : > { %v3230_v30 = vsel %vm1295_vm4, %v1290_v1, %v684_v12  ;;  %v682_v10 = vpop.permute.xlu0 %681  ;;  %v1293_v3 = vsel %vm1262_vm3, %v1260_v15, %v3001_v18  ;;  %v4201_v18 = vld [vmem:[#allocation36_spill] sm:$0xff] }
 0x13f   : > { %v3233_v23 = vsel %vm1295_vm4, %v1289_v24, %v682_v10  ;;  %1040 = vrot.lane.b32.xlu1 %v4186_v44, %s2144_s9 }
 0x140   : > { %972 = vrot.lane.b32.xlu0 %v4177_v8, %s2143_s27  ;;  %v4193_v8 = vld [vmem:[#allocation70_spill] sm:$0xff] }
 0x141   : > { %v688_v58 = vpop.permute.xlu1 %687  ;;  %v1261_v43 = vsel %vm1229_vm2, %v4194_v59, %v4193_v8  ;;  %v2113_v8 = vld [vmem:[%s2180_s17 + $0x80] sm:$0xff] }
 0x142   : > { %v3250_v61 = vsel %vm1295_vm4, %v1292_v26, %v688_v58  ;;  %v686_v45 = vpop.permute.xlu0 %685  ;;  %v1294_v40 = vsel %vm1262_vm3, %v1261_v43, %v4197_v52 }
 0x143   : > { %v3253_v42 = vsel %vm1295_vm4, %v1291_v9, %v686_v45  ;;  %775 = vrot.lane.b32.xlu1 %v4192_v49, %s2141_s21  ;;  %v2112_v9 = vld [vmem:[%s2180_s17 + $0x78] sm:$0xff] }
 0x144   : > { %1072 = vrot.lane.b32.xlu0 %v4192_v49, %s2144_s9 }
 0x145   : > { %v692_v47 = vpop.permute.xlu1 %691 }
 0x146   : > { %v3270_v19 = vsel %vm1295_vm4, %v1294_v40, %v692_v47  ;;  %v690_v4 = vpop.permute.xlu0 %689  ;;  %v3338_v40 = vld [vmem:[%s2180_s17 + $0xc0] sm:$0xff]  ;;  %v4206_v47 = vld [vmem:[#allocation60_spill] sm:$0xff] }
 0x147   : > { %v3273_v0 = vsel %vm1295_vm4, %v1293_v3, %v690_v4  ;;  %1074 = vrot.lane.b32.xlu1 %v4198_v60, %s2144_s9  ;;  %v1246_v3 = vsel %vm1229_vm2, %v3338_v40, %v4206_v47  ;;  %v4207_v4 = vld [vmem:[#allocation27_spill] sm:$0xff] }
 0x148   : > { %1042 = vrot.lane.b32.xlu0 %v4199_v27, %s2144_s9 }
 0x149   : > { %v3279_v1 = vpop.permute.xlu1 %733 }
 0x14a   : > { %v732_v12 = vpop.permute.xlu0 %731 }
 0x14b   : > { %1173 = vrot.lane.b32.xlu1 %v4200_v2, %s2145_s19 }
 0x14c   : > { %1141 = vrot.lane.b32.xlu0 %v4201_v18, %s2145_s19 }
 0x14d   : > { %v3285_v24 = vpop.permute.xlu1 %737 }
 0x14e   : > { %v3287_v10 = vpop.permute.xlu0 %735 }
 0x14f   : > { %777 = vrot.lane.b32.xlu1 %v4198_v60, %s2141_s21  ;;  %v2115_v60 = vld [vmem:[%s2180_s17] sm:$0xff] }
 0x150   : > { %745 = vrot.lane.b32.xlu0 %v4199_v27, %s2141_s21  ;;  %v4208_v27 = vld [vmem:[#allocation52_spill] sm:$0xff] }
 0x151   : > { %v3293_v44 = vpop.permute.xlu1 %741 }
 0x152   : > { %v3295_v50 = vpop.permute.xlu0 %739 }
 0x153   : > { %876 = vrot.lane.b32.xlu1 %v4200_v2, %s2142_s22  ;;  %v1230_v2 = vsel %vm1229_vm2, %v2115_v60, %v4208_v27 }
 0x154   : > { %844 = vrot.lane.b32.xlu0 %v4201_v18, %s2142_s22  ;;  %v4209_v18 = vld [vmem:[#allocation78_spill] sm:$0xff] }
 0x155   : > { %v764_v29 = vpop.permute.xlu1 %763 }
 0x156   : > { %v3301_v62 = vpop.permute.xlu0 %743 }
 0x157   : > { %1175 = vrot.lane.b32.xlu1 %v4202_v57, %s2145_s19 }
 0x158   : > { %1143 = vrot.lane.b32.xlu0 %v4203_v37, %s2145_s19 }
 0x159   : > { %v833_v39 = vpop.permute.xlu1 %832 }
 0x15a   : > { %v3307_v26 = vpop.permute.xlu0 %765 }
 0x15b   : > { %878 = vrot.lane.b32.xlu1 %v4202_v57, %s2142_s22  ;;  %v1279_v57 = vsel %vm1262_vm3, %v1246_v3, %v4209_v18 }
 0x15c   : > { %846 = vrot.lane.b32.xlu0 %v4203_v37, %s2142_s22  ;;  %v4210_v37 = vld [vmem:[#allocation5_spill] sm:$0xff] }
 0x15d   : > { %v3313_v58 = vpop.permute.xlu1 %834 }
 0x15e   : > { %v865_v36 = vpop.permute.xlu0 %864 }
 0x15f   : > { %974 = vrot.lane.b32.xlu1 %v4184_v48, %s2143_s27  ;;  %v4205_v48 = vld [vmem:[#allocation6_spill] sm:$0xff] }
 0x160   : > { %942 = vrot.lane.b32.xlu0 %v2112_v9, %s2143_s27  ;;  %v4211_v9 = vld [vmem:[#allocation73_spill] sm:$0xff] }
 0x161   : > { %v931_v45 = vpop.permute.xlu1 %930 }
 0x162   : > { %v3319_v49 = vpop.permute.xlu0 %866 }
 0x163   : > { %976 = vrot.lane.b32.xlu1 %v4182_v16, %s2143_s27 }
 0x164   : > { %944 = vrot.lane.b32.xlu0 %v2113_v8, %s2143_s27  ;;  %v1263_v8 = vsel %vm1262_vm3, %v1230_v2, %v4211_v9  ;;  %v4212_v2 = vld [vmem:[#allocation51_spill] sm:$0xff] }
 0x165   : > { %v933_v59 = vpop.permute.xlu1 %932  ;;  %v1296_v47 = vsel %vm1295_vm4, %v1263_v8, %v3009_v51  ;;  %v4213_v51 = vld [vmem:[#allocation38_spill] sm:$0xff] }
 0x166   : > { %v963_v43 = vpop.permute.xlu0 %962  ;;  %v1329_v3 = vsel %vm1328_vm5, %v1296_v47, %v732_v12  ;;  %v2116_v47 = vld [vmem:[%s2180_s17 + $0x8] sm:$0xff] }
 0x167   : > { %1076 = vrot.lane.b32.xlu1 %v4204_v28, %s2144_s9 }
 0x168   : > { %1044 = vrot.lane.b32.xlu0 %v4205_v48, %s2144_s9 }
 0x169   : > { %v1033_v11 = vpop.permute.xlu1 %1032 }
 0x16a   : > { %v3329_v15 = vpop.permute.xlu0 %964 }
 0x16b   : > { %779 = vrot.lane.b32.xlu1 %v4204_v28, %s2141_s21  ;;  %v1312_v28 = vsel %vm1295_vm4, %v1279_v57, %v3145_v56  ;;  %v1362_v56 = vsel %vm1361_vm6, %v1329_v3, %v833_v39 }
 0x16c   : > { %747 = vrot.lane.b32.xlu0 %v4205_v48, %s2141_s21  ;;  %v1345_v60 = vsel %vm1328_vm5, %v1312_v28, %v764_v29  ;;  %v1395_v29 = vsel %vm1394_vm7, %v1362_v56, %v931_v45  ;;  %v4215_v45 = vld [vmem:[#allocation72_spill] sm:$0xff] }
 0x16d   : > { %v3335_v16 = vpop.permute.xlu1 %767  ;;  %v1378_v18 = vsel %vm1361_vm6, %v1345_v60, %v865_v36  ;;  %v1428_v36 = vsel %vm1427_vm8, %v1395_v29, %v1033_v11  ;;  %v4214_v60 = vld [vmem:[#allocation56_spill] sm:$0xff] }
 0x16e   : > { %v1065_v52 = vpop.permute.xlu0 %1064  ;;  %v1411_v57 = vsel %vm1394_vm7, %v1378_v18, %v963_v43  ;;  %v1231_v39 = vsel %vm1229_vm2, %v2116_v47, %v4214_v60 }
 0x16f   : > { %1078 = vrot.lane.b32.xlu1 %v4207_v4, %s2144_s9  ;;  %v1444_v9 = vsel %vm1427_vm8, %v1411_v57, %v1065_v52  ;;  %v1264_v52 = vsel %vm1262_vm3, %v1231_v39, %v4215_v45  ;;  %v3396_v57 = vld [vmem:[%s2180_s17 + $0xc8] sm:$0xff] }
 0x170   : > { %1046 = vrot.lane.b32.xlu0 %v4210_v37, %s2144_s9  ;;  %v1297_v11 = vsel %vm1295_vm4, %v1264_v52, %v3007_v25 }
 0x171   : > { %v1067_v48 = vpop.permute.xlu1 %1066 }
 0x172   : > { %v1035_v27 = vpop.permute.xlu0 %1034 }
 0x173   : > { %1177 = vrot.lane.b32.xlu1 %v4212_v2, %s2145_s19 }
 0x174   : > { %1145 = vrot.lane.b32.xlu0 %v4213_v51, %s2145_s19 }
 0x175   : > { %v1166_v12 = vpop.permute.xlu1 %1165 }
 0x176   : > { %v1134_v8 = vpop.permute.xlu0 %1133  ;;  %v1477_v28 = vsel %vm1460_vm9, %v1444_v9, %v1166_v12 }
 0x177   : > { %781 = vrot.lane.b32.xlu1 %v4207_v4, %s2141_s21  ;;  %v1461_v43 = vsel %vm1460_vm9, %v1428_v36, %v1134_v8  ;;  %2045 = vmatprep.mubr.msk.f32.mxu1 %vm1509_vm10, %v1477_v28  ;;  %v1330_v4 = vsel %vm1328_vm5, %v1297_v11, %v3279_v1  ;;  %v4217_v1 = vld [vmem:[#allocation2_spill] sm:$0xff]  ;;  %v2120_v11 = vld [vmem:[%s2180_s17 + $0x158] sm:$0xff] }
 0x178   : > { %749 = vrot.lane.b32.xlu0 %v4210_v37, %s2141_s21  ;;  %2021 = vmatprep.mubr.msk.f32.mxu0 %vm1509_vm10, %v1461_v43  ;;  %v1363_v56 = vsel %vm1361_vm6, %v1330_v4, %v3313_v58  ;;  %v4216_v37 = vld [vmem:[#allocation59_spill] sm:$0xff]  ;;  %v2121_v4 = vld [vmem:[%s2180_s17 + $0x98] sm:$0xff] }
 0x179   : > { %v3385_v3 = vpop.permute.xlu1 %836  ;;  %v1247_v29 = vsel %vm1229_vm2, %v3396_v57, %v4216_v37  ;;  %v1396_v25 = vsel %vm1394_vm7, %v1363_v56, %v933_v59  ;;  %v4218_v59 = vld [vmem:[#allocation49_spill] sm:$0xff] }
 0x17a   : > { %v3389_v18 = vpop.permute.xlu0 %769  ;;  %v1280_v9 = vsel %vm1262_vm3, %v1247_v29, %v4217_v1  ;;  %v1429_v12 = vsel %vm1427_vm8, %v1396_v25, %v1035_v27  ;;  %v4220_v29 = vld [vmem:[#allocation32_spill] sm:$0xff] }
 0x17b   : > { %880 = vrot.lane.b32.xlu1 %v4212_v2, %s2142_s22  ;;  %v1313_v2 = vsel %vm1295_vm4, %v1280_v9, %v3143_v33  ;;  %v4221_v25 = vld [vmem:[#allocation8_spill] sm:$0xff] }
 0x17c   : > { %848 = vrot.lane.b32.xlu0 %v4213_v51, %s2142_s22  ;;  %v1346_v28 = vsel %vm1328_vm5, %v1313_v2, %v3307_v26  ;;  %v4219_v51 = vld [vmem:[#allocation37_spill] sm:$0xff] }
 0x17d   : > { %v1136_v58 = vpop.permute.xlu1 %1135  ;;  %v1379_v27 = vsel %vm1361_vm6, %v1346_v28, %v3319_v49  ;;  %v4223_v28 = vld [vmem:[#allocation50_spill] sm:$0xff] }
 0x17e   : > { %v1462_v36 = vsel %vm1460_vm9, %v1429_v12, %v1136_v58  ;;  %v869_v8 = vpop.permute.xlu0 %868  ;;  %v1412_v33 = vsel %vm1394_vm7, %v1379_v27, %v3329_v15  ;;  %v2118_v15 = vld [vmem:[%s2180_s17 + $0x150] sm:$0xff]  ;;  %v3447_v12 = vld [vmem:[%s2180_s17 + $0xd8] sm:$0xff]  ;;  %v4222_v58 = vld [vmem:[#allocation62_spill] sm:$0xff] }
 0x17f   : > { %1179 = vrot.lane.b32.xlu1 %v4218_v59, %s2145_s19  ;;  %2022 = vmatmul.mubr.msk.f32.vlgmr.msra.gmra.mrb[0].mxu0 %vm1509_vm10, %v1462_v36  ;;  %v1445_v26 = vsel %vm1427_vm8, %v1412_v33, %v1067_v48  ;;  %v2119_v48 = vld [vmem:[%s2180_s17 + $0x90] sm:$0xff]  ;;  %v1248_v2 = vsel %vm1229_vm2, %v3447_v12, %v4222_v58  ;;  %v2123_v36 = vld [vmem:[%s2180_s17 + $0x18] sm:$0xff]  ;;  %v4225_v33 = vld [vmem:[#allocation75_spill] sm:$0xff] }
 0x180   : > { %1147 = vrot.lane.b32.xlu0 %v4219_v51, %s2145_s19  ;;  %v4224_v27 = vld [vmem:[#allocation80_spill] sm:$0xff]  ;;  %v4227_v58 = vld [vmem:[#allocation31_spill] sm:$0xff] }
 0x181   : > { %v3421_v47 = vpop.permute.xlu1 %838 }
 0x182   : > { %v1168_v60 = vpop.permute.xlu0 %1167 }
 0x183   : > { %v1478_v39 = vsel %vm1460_vm9, %v1445_v26, %v1168_v60  ;;  %882 = vrot.lane.b32.xlu1 %v4218_v59, %s2142_s22  ;;  %v1232_v59 = vsel %vm1229_vm2, %v2123_v36, %v4223_v28  ;;  %v4228_v36 = vld [vmem:[#allocation7_spill] sm:$0xff] }
 0x184   : > { %850 = vrot.lane.b32.xlu0 %v4219_v51, %s2142_s22  ;;  %2046 = vmatmul.mubr.msk.f32.vlgmr.msra.gmra.mrb[0].mxu1 %vm1509_vm10, %v1478_v39  ;;  %v1281_v51 = vsel %vm1262_vm3, %v1248_v2, %v4224_v27  ;;  %v1265_v26 = vsel %vm1262_vm3, %v1232_v59, %v4225_v33  ;;  %v4229_v33 = vld [vmem:[#allocation54_spill] sm:$0xff] }
 0x185   : > { %v935_v49 = vpop.permute.xlu1 %934  ;;  %v1314_v60 = vsel %vm1295_vm4, %v1281_v51, %v3153_v31  ;;  %v2124_v51 = vld [vmem:[%s2180_s17 + $0x20] sm:$0xff] }
 0x186   : > { %v3430_v43 = vpop.permute.xlu0 %870 }
 0x187   : > { %978 = vrot.lane.b32.xlu1 %v2118_v15, %s2143_s27  ;;  %v4226_v15 = vld [vmem:[#allocation86_spill] sm:$0xff] }
 0x188   : > { %946 = vrot.lane.b32.xlu0 %v2119_v48, %s2143_s27  ;;  %v1298_v48 = vsel %vm1295_vm4, %v1265_v26, %v4226_v15  ;;  %v4230_v26 = vld [vmem:[#allocation55_spill] sm:$0xff] }
 0x189   : > { %v937_v45 = vpop.permute.xlu1 %936 }
 0x18a   : > { %v967_v52 = vpop.permute.xlu0 %966 }
 0x18b   : > { %980 = vrot.lane.b32.xlu1 %v2120_v11, %s2143_s27  ;;  %v1347_v11 = vsel %vm1328_vm5, %v1314_v60, %v3335_v16  ;;  %v4233_v60 = vld [vmem:[#allocation85_spill] sm:$0xff] }
 0x18c   : > { %948 = vrot.lane.b32.xlu0 %v2121_v4, %s2143_s27 }
 0x18d   : > { %v1037_v56 = vpop.permute.xlu1 %1036 }
 0x18e   : > { %v969_v37 = vpop.permute.xlu0 %968 }
 0x18f   : > { %1080 = vrot.lane.b32.xlu1 %v4220_v29, %s2144_s9 }
 0x190   : > { %1048 = vrot.lane.b32.xlu0 %v4221_v25, %s2144_s9 }
 0x191   : > { %v3444_v1 = vpop.permute.xlu1 %771 }
 0x192   : > { %v1069_v9 = vpop.permute.xlu0 %1068 }
 0x193   : > { %783 = vrot.lane.b32.xlu1 %v4220_v29, %s2141_s21  ;;  %v1331_v29 = vsel %vm1328_vm5, %v1298_v48, %v3287_v10 }
 0x194   : > { %751 = vrot.lane.b32.xlu0 %v4221_v25, %s2141_s21  ;;  %v1380_v25 = vsel %vm1361_vm6, %v1347_v11, %v869_v8  ;;  %v1364_v31 = vsel %vm1361_vm6, %v1331_v29, %v3385_v3  ;;  %v1233_v3 = vsel %vm1229_vm2, %v2124_v51, %v4229_v33 }
 0x195   : > { %v1071_v39 = vpop.permute.xlu1 %1070  ;;  %v1413_v2 = vsel %vm1394_vm7, %v1380_v25, %v967_v52  ;;  %v1397_v28 = vsel %vm1394_vm7, %v1364_v31, %v935_v49  ;;  %v4231_v49 = vld [vmem:[#allocation74_spill] sm:$0xff] }
 0x196   : > { %v1039_v4 = vpop.permute.xlu0 %1038  ;;  %v1446_v16 = vsel %vm1427_vm8, %v1413_v2, %v1069_v9  ;;  %v1430_v10 = vsel %vm1427_vm8, %v1397_v28, %v1037_v56  ;;  %v1266_v9 = vsel %vm1262_vm3, %v1233_v3, %v4231_v49  ;;  %v4232_v56 = vld [vmem:[#allocation40_spill] sm:$0xff]  ;;  %v3506_v31 = vld [vmem:[%s2180_s17 + $0xe0] sm:$0xff]  ;;  %v4234_v2 = vld [vmem:[#allocation61_spill] sm:$0xff] }
 0x197   : > { %1082 = vrot.lane.b32.xlu1 %v4227_v58, %s2144_s9  ;;  %v1299_v15 = vsel %vm1295_vm4, %v1266_v9, %v4233_v60  ;;  %v1249_v28 = vsel %vm1229_vm2, %v3506_v31, %v4234_v2  ;;  %v4236_v3 = vld [vmem:[#allocation53_spill] sm:$0xff]  ;;  %v2126_v49 = vld [vmem:[%s2180_s17 + $0x168] sm:$0xff] }
 0x198   : > { %1050 = vrot.lane.b32.xlu0 %v4228_v36, %s2144_s9  ;;  %v1332_v11 = vsel %vm1328_vm5, %v1299_v15, %v3285_v24  ;;  %v4235_v24 = vld [vmem:[#allocation79_spill] sm:$0xff]  ;;  %v2128_v15 = vld [vmem:[%s2180_s17 + $0x170] sm:$0xff] }
 0x199   : > { %v1170_v59 = vpop.permute.xlu1 %1169  ;;  %v1365_v25 = vsel %vm1361_vm6, %v1332_v11, %v3421_v47  ;;  %v2127_v9 = vld [vmem:[%s2180_s17 + $0xa8] sm:$0xff]  ;;  %v2129_v11 = vld [vmem:[%s2180_s17 + $0xb0] sm:$0xff] }
 0x19a   : > { %v1479_v8 = vsel %vm1460_vm9, %v1446_v16, %v1170_v59  ;;  %v1138_v27 = vpop.permute.xlu0 %1137  ;;  %v1398_v16 = vsel %vm1394_vm7, %v1365_v25, %v937_v45  ;;  %v1282_v59 = vsel %vm1262_vm3, %v1249_v28, %v4235_v24  ;;  %v4238_v28 = vld [vmem:[#allocation34_spill] sm:$0xff] }
 0x19b   : > { %v1463_v52 = vsel %vm1460_vm9, %v1430_v10, %v1138_v27  ;;  %1181 = vrot.lane.b32.xlu1 %v4230_v26, %s2145_s19  ;;  %2048 = vmatprep.mubr.msk.f32.mxu1 %vm1509_vm10, %v1479_v8  ;;  %v1431_v10 = vsel %vm1427_vm8, %v1398_v16, %v1039_v4  ;;  %v4239_v16 = vld [vmem:[#allocation10_spill] sm:$0xff] }
 0x19c   : > { %1149 = vrot.lane.b32.xlu0 %v4232_v56, %s2145_s19  ;;  %2024 = vmatprep.mubr.msk.f32.mxu0 %vm1509_vm10, %v1463_v52  ;;  %v4237_v52 = vld [vmem:[#allocation39_spill] sm:$0xff] }
 0x19d   : > { %v841_v48 = vpop.permute.xlu1 %840 }
 0x19e   : > { %v3499_v29 = vpop.permute.xlu0 %773 }
 0x19f   : > { %785 = vrot.lane.b32.xlu1 %v4227_v58, %s2141_s21  ;;  %v1315_v58 = vsel %vm1295_vm4, %v1282_v59, %v3151_v20  ;;  %v1349_v59 = vsel %vm1328_vm5, %v3173_v34, %v3444_v1 }
 0x1a0   : > { %753 = vrot.lane.b32.xlu0 %v4228_v36, %s2141_s21  ;;  %v1348_v51 = vsel %vm1328_vm5, %v1315_v58, %v3389_v18 }
 0x1a1   : > { %v1140_v47 = vpop.permute.xlu1 %1139  ;;  %v1381_v45 = vsel %vm1361_vm6, %v1348_v51, %v3430_v43 }
 0x1a2   : > { %v1464_v8 = vsel %vm1460_vm9, %v1431_v10, %v1140_v47  ;;  %v873_v27 = vpop.permute.xlu0 %872  ;;  %v1414_v20 = vsel %vm1394_vm7, %v1381_v45, %v969_v37  ;;  %v1333_v47 = vsel %vm1328_vm5, %v3037_v21, %v3295_v50 }
 0x1a3   : > { %884 = vrot.lane.b32.xlu1 %v4230_v26, %s2142_s22  ;;  %2025 = vmatmul.mubr.msk.f32.gmra.mrb[2].mxu0 %vm1509_vm10, %v1464_v8  ;;  %v1447_v36 = vsel %vm1427_vm8, %v1414_v20, %v1071_v39  ;;  %v1382_v58 = vsel %vm1361_vm6, %v1349_v59, %v873_v27  ;;  %v1366_v8 = vsel %vm1361_vm6, %v1333_v47, %v841_v48  ;;  %v4241_v48 = vld [vmem:[#allocation9_spill] sm:$0xff] }
 0x1a4   : > { %852 = vrot.lane.b32.xlu0 %v4232_v56, %s2142_s22 }
 0x1a5   : > { %v843_v4 = vpop.permute.xlu1 %842 }
 0x1a6   : > { %v1172_v33 = vpop.permute.xlu0 %1171 }
 0x1a7   : > { %v1480_v18 = vsel %vm1460_vm9, %v1447_v36, %v1172_v33  ;;  %1183 = vrot.lane.b32.xlu1 %v4236_v3, %s2145_s19  ;;  %v4240_v36 = vld [vmem:[#allocation33_spill] sm:$0xff] }
 0x1a8   : > { %1151 = vrot.lane.b32.xlu0 %v4237_v52, %s2145_s19  ;;  %2049 = vmatmul.mubr.msk.f32.gmra.mrb[2].mxu1 %vm1509_vm10, %v1480_v18 }
 0x1a9   : > { %v939_v43 = vpop.permute.xlu1 %938 }
 0x1aa   : > { %v875_v26 = vpop.permute.xlu0 %874  ;;  %v1399_v45 = vsel %vm1394_vm7, %v1366_v8, %v939_v43  ;;  %v4247_v8 = vld [vmem:[#allocation76_spill] sm:$0xff] }
 0x1ab   : > { %886 = vrot.lane.b32.xlu1 %v4236_v3, %s2142_s22  ;;  %v4242_v3 = vld [vmem:[#allocation58_spill] sm:$0xff] }
 0x1ac   : > { %854 = vrot.lane.b32.xlu0 %v4237_v52, %s2142_s22  ;;  %v4243_v52 = vld [vmem:[#allocation42_spill] sm:$0xff] }
 0x1ad   : > { %v941_v37 = vpop.permute.xlu1 %940 }
 0x1ae   : > { %v971_v39 = vpop.permute.xlu0 %970 }
 0x1af   : > { %982 = vrot.lane.b32.xlu1 %v2126_v49, %s2143_s27  ;;  %v1415_v51 = vsel %vm1394_vm7, %v1382_v58, %v971_v39  ;;  %v1350_v39 = vsel %vm1328_vm5, %v3170_v55, %v3499_v29  ;;  %v4246_v58 = vld [vmem:[#allocation77_spill] sm:$0xff] }
 0x1b0   : > { %950 = vrot.lane.b32.xlu0 %v2127_v9, %s2143_s27  ;;  %v1334_v9 = vsel %vm1328_vm5, %v3034_v7, %v3293_v44 }
 0x1b1   : > { %v1041_v56 = vpop.permute.xlu1 %1040 }
 0x1b2   : > { %v973_v60 = vpop.permute.xlu0 %972  ;;  %v1432_v20 = vsel %vm1427_vm8, %v1399_v45, %v1041_v56  ;;  %v1383_v56 = vsel %vm1361_vm6, %v1350_v39, %v875_v26  ;;  %v726_v45 = vrot.slane %v4246_v58, 1  ;;  %v1335_v39 = vsel %vm1328_vm5, %v3057_v13, %v3301_v62 }
 0x1b3   : > { %984 = vrot.lane.b32.xlu1 %v2128_v15, %s2143_s27  ;;  %v1367_v15 = vsel %vm1361_vm6, %v1334_v9, %v843_v4 }
 0x1b4   : > { %952 = vrot.lane.b32.xlu0 %v2129_v11, %s2143_s27  ;;  %v1416_v11 = vsel %vm1394_vm7, %v1383_v56, %v973_v60  ;;  %v4244_v60 = vld [vmem:[#allocation57_spill] sm:$0xff]  ;;  %v827_v56 = vrot.slane %v4246_v58, 2 }
 0x1b5   : > { %v3549_v25 = vpop.permute.xlu1 %775 }
 0x1b6   : > { %v1073_v2 = vpop.permute.xlu0 %1072 }
 0x1b7   : > { %1084 = vrot.lane.b32.xlu1 %v4238_v28, %s2144_s9  ;;  %v1448_v34 = vsel %vm1427_vm8, %v1415_v51, %v1073_v2  ;;  %v1400_v2 = vsel %vm1394_vm7, %v1367_v15, %v941_v37  ;;  %v727_v51 = vrot.slane %v4247_v8, 1 }
 0x1b8   : > { %1052 = vrot.lane.b32.xlu0 %v4239_v16, %s2144_s9 }
 0x1b9   : > { %v1075_v24 = vpop.permute.xlu1 %1074 }
 0x1ba   : > { %v1043_v10 = vpop.permute.xlu0 %1042  ;;  %v1449_v55 = vsel %vm1427_vm8, %v1416_v11, %v1075_v24 }
 0x1bb   : > { %787 = vrot.lane.b32.xlu1 %v4238_v28, %s2141_s21  ;;  %v1433_v28 = vsel %vm1427_vm8, %v1400_v2, %v1043_v10 }
 0x1bc   : > { %755 = vrot.lane.b32.xlu0 %v4239_v16, %s2141_s21  ;;  %v4245_v16 = vld [vmem:[#allocation41_spill] sm:$0xff] }
 0x1bd   : > { %v1174_v1 = vpop.permute.xlu1 %1173 }
 0x1be   : > { %v1481_v21 = vsel %vm1460_vm9, %v1448_v34, %v1174_v1  ;;  %v1142_v50 = vpop.permute.xlu0 %1141 }
 0x1bf   : > { %v1465_v27 = vsel %vm1460_vm9, %v1432_v20, %v1142_v50  ;;  %1086 = vrot.lane.b32.xlu1 %v4240_v36, %s2144_s9  ;;  %2051 = vmatprep.mubr.msk.f32.mxu1 %vm1509_vm10, %v1481_v21  ;;  %v728_v20 = vsel %vm273_vm0, %v726_v45, %v727_v51  ;;  %v221_v50 = vld [vmem:[%s2180_s17 + $0x190] sm:$0x3] }
 0x1c0   : > { %1054 = vrot.lane.b32.xlu0 %v4241_v48, %s2144_s9  ;;  %2027 = vmatprep.mubr.msk.f32.mxu0 %vm1509_vm10, %v1465_v27  ;;  %v830_v45 = vrot.slane %v221_v50, 2 }
 0x1c1   : > { %v3579_v33 = vpop.permute.xlu1 %777 }
 0x1c2   : > { %v3581_v18 = vpop.permute.xlu0 %745 }
 0x1c3   : > { %1185 = vrot.lane.b32.xlu1 %v4242_v3, %s2145_s19 }
 0x1c4   : > { %1153 = vrot.lane.b32.xlu0 %v4243_v52, %s2145_s19 }
 0x1c5   : > { %v877_v43 = vpop.permute.xlu1 %876 }
 0x1c6   : > { %v845_v49 = vpop.permute.xlu0 %844 }
 0x1c7   : > { %789 = vrot.lane.b32.xlu1 %v4240_v36, %s2141_s21  ;;  %v4248_v36 = vld [vmem:[#allocation12_spill] sm:$0xff]  ;;  %v1368_v15 = vsel %vm1361_vm6, %v1335_v39, %v845_v49  ;;  %v4249_v49 = vld [vmem:[#allocation11_spill] sm:$0xff] }
 0x1c8   : > { %757 = vrot.lane.b32.xlu0 %v4241_v48, %s2141_s21 }
 0x1c9   : > { %v1176_v29 = vpop.permute.xlu1 %1175 }
 0x1ca   : > { %v1482_v7 = vsel %vm1460_vm9, %v1449_v55, %v1176_v29  ;;  %v1144_v44 = vpop.permute.xlu0 %1143 }
 0x1cb   : > { %v1466_v26 = vsel %vm1460_vm9, %v1433_v28, %v1144_v44  ;;  %888 = vrot.lane.b32.xlu1 %v4242_v3, %s2142_s22  ;;  %2052 = vmatmul.mubr.msk.f32.gmra.mrb[4].mxu1 %vm1509_vm10, %v1482_v7  ;;  %v1351_v3 = vsel %vm1328_vm5, %v3193_v53, %v3549_v25 }
 0x1cc   : > { %856 = vrot.lane.b32.xlu0 %v4243_v52, %s2142_s22  ;;  %2028 = vmatmul.mubr.msk.f32.gmra.mrb[4].mxu0 %vm1509_vm10, %v1466_v26  ;;  %v1384_v9 = vsel %vm1361_vm6, %v1351_v3, %v877_v43  ;;  %v4250_v26 = vld [vmem:[#allocation44_spill] sm:$0xff]  ;;  %v223_v3 = vld [vmem:[%s2180_s17 + $0x1a0] sm:$0xff] }
 0x1cd   : > { %v879_v4 = vpop.permute.xlu1 %878  ;;  %v1028_v39 = vrot.slane %v223_v3, 1 }
 0x1ce   : > { %v847_v37 = vpop.permute.xlu0 %846 }
 0x1cf   : > { %1187 = vrot.lane.b32.xlu1 %v4244_v60, %s2145_s19 }
 0x1d0   : > { %1155 = vrot.lane.b32.xlu0 %v4245_v16, %s2145_s19 }
 0x1d1   : > { %v975_v24 = vpop.permute.xlu1 %974 }
 0x1d2   : > { %v943_v59 = vpop.permute.xlu0 %942  ;;  %v1417_v11 = vsel %vm1394_vm7, %v1384_v9, %v975_v24 }
 0x1d3   : > { %890 = vrot.lane.b32.xlu1 %v4244_v60, %s2142_s22  ;;  %v1401_v25 = vsel %vm1394_vm7, %v1368_v15, %v943_v59  ;;  %v1336_v59 = vsel %vm1328_vm5, %v3054_v14, %v3581_v18 }
 0x1d4   : > { %858 = vrot.lane.b32.xlu0 %v4245_v16, %s2142_s22  ;;  %v1352_v16 = vsel %vm1328_vm5, %v3190_v5, %v3579_v33 }
 0x1d5   : > { %v977_v10 = vpop.permute.xlu1 %976 }
 0x1d6   : > { %v945_v47 = vpop.permute.xlu0 %944 }
 0x1d7   : > { %986 = vrot.lane.b32.xlu1 %v4246_v58, %s2143_s27  ;;  %v1385_v58 = vsel %vm1361_vm6, %v1352_v16, %v879_v4 }
 0x1d8   : > { %954 = vrot.lane.b32.xlu0 %v3338_v40, %s2143_s27  ;;  %v729_v40 = vrot.slane %v221_v50, 1 }
 0x1d9   : > { %v1077_v34 = vpop.permute.xlu1 %1076 }
 0x1da   : > { %v1045_v1 = vpop.permute.xlu0 %1044  ;;  %v730_v53 = vsel %vm273_vm0, %v727_v51, %v729_v40  ;;  %v1450_v2 = vsel %vm1427_vm8, %v1417_v11, %v1077_v34  ;;  %v1418_v51 = vsel %vm1394_vm7, %v1385_v58, %v977_v10  ;;  %v222_v40 = vld [vmem:[%s2180_s17 + $0x198] sm:$0xff] }
 0x1db   : > { %988 = vrot.lane.b32.xlu1 %v4247_v8, %s2143_s27  ;;  %v1434_v62 = vsel %vm1427_vm8, %v1401_v25, %v1045_v1 }
 0x1dc   : > { %956 = vrot.lane.b32.xlu0 %v3396_v57, %s2143_s27  ;;  %v828_v57 = vrot.slane %v4247_v8, 2  ;;  %v1369_v8 = vsel %vm1361_vm6, %v1336_v59, %v847_v37  ;;  %v4253_v59 = vld [vmem:[#allocation13_spill] sm:$0xff] }
 0x1dd   : > { %v3630_v21 = vpop.permute.xlu1 %779  ;;  %v1402_v34 = vsel %vm1394_vm7, %v1369_v8, %v945_v47 }
 0x1de   : > { %v3633_v27 = vpop.permute.xlu0 %747  ;;  %v829_v28 = vsel %vm450_vm1, %v827_v56, %v828_v57  ;;  %v831_v37 = vsel %vm450_vm1, %v828_v57, %v830_v45  ;;  %v1027_v57 = vrot.slane %v222_v40, 1  ;;  %v224_v56 = vld [vmem:[%s2180_s17 + $0x1a8] sm:$0x3]  ;;  %v4254_v45 = vld [vmem:[#allocation46_spill] sm:$0xff]  ;;  %s1961_s17 = sshll.u32 %s4257_s13, 8 }
 0x1df   : > { %1088 = vrot.lane.b32.xlu1 %v728_v20, %s2144_s9  ;;  %v1131_v8 = vrot.slane %v224_v56, 2  ;;  %s3803_s24 = scalar_lea.vmem %s3972_s3, %s1961_s17 }
 0x1e0   : > { %1056 = vrot.lane.b32.xlu0 %v4248_v36, %s2144_s9  ;;  %v1029_v11 = vsel %vm273_vm0, %v1027_v57, %v1028_v39 }
 0x1e1   : > { %v1079_v48 = vpop.permute.xlu1 %1078 }
 0x1e2   : > { %v1047_v52 = vpop.permute.xlu0 %1046  ;;  %v1451_v5 = vsel %vm1427_vm8, %v1418_v51, %v1079_v48 }
 0x1e3   : > { %791 = vrot.lane.b32.xlu1 %v728_v20, %s2141_s21  ;;  %v1435_v1 = vsel %vm1427_vm8, %v1402_v34, %v1047_v52  ;;  %v4251_v20 = vld [vmem:[#allocation43_spill] sm:$0xff] }
 0x1e4   : > { %759 = vrot.lane.b32.xlu0 %v4248_v36, %s2141_s21 }
 0x1e5   : > { %v1178_v13 = vpop.permute.xlu1 %1177 }
 0x1e6   : > { %v1483_v43 = vsel %vm1460_vm9, %v1450_v2, %v1178_v13  ;;  %v1146_v55 = vpop.permute.xlu0 %1145  ;;  %v1128_v13 = vrot.slane %v222_v40, 2 }
 0x1e7   : > { %v1467_v29 = vsel %vm1460_vm9, %v1434_v62, %v1146_v55  ;;  %1090 = vrot.lane.b32.xlu1 %v730_v53, %s2144_s9  ;;  %2054 = vmatprep.mubr.msk.f32.mxu1 %vm1509_vm10, %v1483_v43  ;;  %v1129_v62 = vrot.slane %v223_v3, 2 }
 0x1e8   : > { %1058 = vrot.lane.b32.xlu0 %v4249_v49, %s2144_s9  ;;  %2030 = vmatprep.mubr.msk.f32.mxu0 %vm1509_vm10, %v1467_v29 }
 0x1e9   : > { %v3664_v7 = vpop.permute.xlu1 %781  ;;  %v1130_v58 = vsel %vm450_vm1, %v1128_v13, %v1129_v62  ;;  %v1132_v34 = vsel %vm450_vm1, %v1129_v62, %v1131_v8 }
 0x1ea   : > { %v3666_v44 = vpop.permute.xlu0 %749 }
 0x1eb   : > { %1189 = vrot.lane.b32.xlu1 %v829_v28, %s2145_s19 }
 0x1ec   : > { %1157 = vrot.lane.b32.xlu0 %v4250_v26, %s2145_s19 }
 0x1ed   : > { %v881_v60 = vpop.permute.xlu1 %880 }
 0x1ee   : > { %v849_v24 = vpop.permute.xlu0 %848 }
 0x1ef   : > { %793 = vrot.lane.b32.xlu1 %v730_v53, %s2141_s21  ;;  %v1030_v53 = vrot.slane %v224_v56, 1 }
 0x1f0   : > { %761 = vrot.lane.b32.xlu0 %v4249_v49, %s2141_s21  ;;  %v1337_v49 = vsel %vm1328_vm5, %v3077_v6, %v3633_v27 }
 0x1f1   : > { %v1180_v33 = vpop.permute.xlu1 %1179  ;;  %v1031_v43 = vsel %vm273_vm0, %v1028_v39, %v1030_v53 }
 0x1f2   : > { %v1484_v14 = vsel %vm1460_vm9, %v1451_v5, %v1180_v33  ;;  %v1148_v18 = vpop.permute.xlu0 %1147 }
 0x1f3   : > { %v1468_v4 = vsel %vm1460_vm9, %v1435_v1, %v1148_v18  ;;  %892 = vrot.lane.b32.xlu1 %v829_v28, %s2142_s22  ;;  %2055 = vmatmul.mubr.msk.f32.gmra.mrb[6].mxu1 %vm1509_vm10, %v1484_v14  ;;  %v4255_v1 = vld [vmem:[#allocation45_spill] sm:$0xff]  ;;  %v1354_v18 = vsel %vm1328_vm5, %v3210_v32, %v3664_v7 }
 0x1f4   : > { %860 = vrot.lane.b32.xlu0 %v4250_v26, %s2142_s22  ;;  %2031 = vmatmul.mubr.msk.f32.gmra.mrb[6].mxu0 %vm1509_vm10, %v1468_v4  ;;  %v1370_v26 = vsel %vm1361_vm6, %v1337_v49, %v849_v24 }
 0x1f5   : > { %v883_v10 = vpop.permute.xlu1 %882 }
 0x1f6   : > { %v851_v47 = vpop.permute.xlu0 %850 }
 0x1f7   : > { %1191 = vrot.lane.b32.xlu1 %v831_v37, %s2145_s19 }
 0x1f8   : > { %1159 = vrot.lane.b32.xlu0 %v4251_v20, %s2145_s19 }
 0x1f9   : > { %v979_v50 = vpop.permute.xlu1 %978 }
 0x1fa   : > { %v947_v36 = vpop.permute.xlu0 %946 }
 0x1fb   : > { %894 = vrot.lane.b32.xlu1 %v831_v37, %s2142_s22  ;;  %v1338_v37 = vsel %vm1328_vm5, %v3074_v22, %v3666_v44 }
 0x1fc   : > { %862 = vrot.lane.b32.xlu0 %v4251_v20, %s2142_s22  ;;  %v1387_v20 = vsel %vm1361_vm6, %v1354_v18, %v883_v10 }
 0x1fd   : > { %v981_v48 = vpop.permute.xlu1 %980 }
 0x1fe   : > { %v949_v52 = vpop.permute.xlu0 %948 }
 0x1ff   : > { %990 = vrot.lane.b32.xlu1 %v222_v40, %s2143_s27 }
 0x200   : > { %958 = vrot.lane.b32.xlu0 %v3447_v12, %s2143_s27  ;;  %v4252_v12 = vld [vmem:[#allocation14_spill] sm:$0xff] }
 0x201   : > { %v1081_v9 = vpop.permute.xlu1 %1080 }
 0x202   : > { %v1049_v15 = vpop.permute.xlu0 %1048 }
 0x203   : > { %992 = vrot.lane.b32.xlu1 %v223_v3, %s2143_s27 }
 0x204   : > { %960 = vrot.lane.b32.xlu0 %v3506_v31, %s2143_s27  ;;  %v1353_v31 = vsel %vm1328_vm5, %v3213_v41, %v3630_v21  ;;  %v1403_v41 = vsel %vm1394_vm7, %v1370_v26, %v947_v36  ;;  %v1420_v36 = vsel %vm1394_vm7, %v1387_v20, %v981_v48  ;;  %v3798_v20 = vld [vmem:[%s3971_s2] ss:$0 sm:$0xff] }
 0x205   : > { %v784_v25 = vpop.permute.xlu1 %783  ;;  %v1386_v28 = vsel %vm1361_vm6, %v1353_v31, %v881_v60  ;;  %v1436_v6 = vsel %vm1427_vm8, %v1403_v41, %v1049_v15 }
 0x206   : > { %v3710_v2 = vpop.permute.xlu0 %751  ;;  %v1419_v16 = vsel %vm1394_vm7, %v1386_v28, %v979_v50  ;;  %v1371_v50 = vsel %vm1361_vm6, %v1338_v37, %v851_v47  ;;  %v1355_v62 = vsel %vm1328_vm5, %v3233_v23, %v784_v25 }
 0x207   : > { %1092 = vrot.lane.b32.xlu1 %v1029_v11, %s2144_s9  ;;  %v1452_v21 = vsel %vm1427_vm8, %v1419_v16, %v1081_v9  ;;  %v1404_v40 = vsel %vm1394_vm7, %v1371_v50, %v949_v52 }
 0x208   : > { %1060 = vrot.lane.b32.xlu0 %v4252_v12, %s2144_s9 }
 0x209   : > { %v1083_v55 = vpop.permute.xlu1 %1082 }
 0x20a   : > { %v1051_v29 = vpop.permute.xlu0 %1050  ;;  %v1453_v3 = vsel %vm1427_vm8, %v1420_v36, %v1083_v55 }
 0x20b   : > { %1094 = vrot.lane.b32.xlu1 %v1031_v43, %s2144_s9  ;;  %v1437_v39 = vsel %vm1427_vm8, %v1404_v40, %v1051_v29  ;;  %v1339_v43 = vsel %vm1328_vm5, %v3097_v38, %v3710_v2 }
 0x20c   : > { %1062 = vrot.lane.b32.xlu0 %v4253_v59, %s2144_s9 }
 0x20d   : > { %v1182_v51 = vpop.permute.xlu1 %1181 }
 0x20e   : > { %v1485_v27 = vsel %vm1460_vm9, %v1452_v21, %v1182_v51  ;;  %v1150_v60 = vpop.permute.xlu0 %1149 }
 0x20f   : > { %v1469_v24 = vsel %vm1460_vm9, %v1436_v6, %v1150_v60  ;;  %1193 = vrot.lane.b32.xlu1 %v1130_v58, %s2145_s19  ;;  %2057 = vmatprep.mubr.msk.f32.mxu1 %vm1509_vm10, %v1485_v27 }
 0x210   : > { %1161 = vrot.lane.b32.xlu0 %v4254_v45, %s2145_s19  ;;  %2033 = vmatprep.mubr.msk.f32.mxu0 %vm1509_vm10, %v1469_v24 }
 0x211   : > { %v786_v5 = vpop.permute.xlu1 %785 }
 0x212   : > { %v754_v33 = vpop.permute.xlu0 %753  ;;  %v1356_v8 = vsel %vm1328_vm5, %v3230_v30, %v786_v5 }
 0x213   : > { %1195 = vrot.lane.b32.xlu1 %v1132_v34, %s2145_s19  ;;  %v1340_v21 = vsel %vm1328_vm5, %v3094_v17, %v754_v33 }
 0x214   : > { %1163 = vrot.lane.b32.xlu0 %v4255_v1, %s2145_s19 }
 0x215   : > { %v885_v14 = vpop.permute.xlu1 %884 }
 0x216   : > { %v853_v4 = vpop.permute.xlu0 %852  ;;  %v1388_v55 = vsel %vm1361_vm6, %v1355_v62, %v885_v14 }
 0x217   : > { %v1372_v31 = vsel %vm1361_vm6, %v1339_v43, %v853_v4 }
 0x219   : > { %v1184_v57 = vpop.permute.xlu1 %1183 }
 0x21a   : > { %v1486_v32 = vsel %vm1460_vm9, %v1453_v3, %v1184_v57  ;;  %v1152_v7 = vpop.permute.xlu0 %1151 }
 0x21b   : > { %v1470_v9 = vsel %vm1460_vm9, %v1437_v39, %v1152_v7  ;;  %2058 = vmatmul.mubr.msk.f32.gmra.mrb[8].mxu1 %vm1509_vm10, %v1486_v32 }
 0x21c   : > { %2034 = vmatmul.mubr.msk.f32.gmra.mrb[8].mxu0 %vm1509_vm10, %v1470_v9 }
 0x21d   : > { %v887_v22 = vpop.permute.xlu1 %886 }
 0x21e   : > { %v855_v44 = vpop.permute.xlu0 %854  ;;  %v1389_v51 = vsel %vm1361_vm6, %v1356_v8, %v887_v22 }
 0x21f   : > { %v1373_v6 = vsel %vm1361_vm6, %v1340_v21, %v855_v44 }
 0x221   : > { %v983_v10 = vpop.permute.xlu1 %982 }
 0x222   : > { %v951_v47 = vpop.permute.xlu0 %950  ;;  %v1421_v29 = vsel %vm1394_vm7, %v1388_v55, %v983_v10 }
 0x223   : > { %v1405_v49 = vsel %vm1394_vm7, %v1372_v31, %v951_v47 }
 0x225   : > { %v985_v48 = vpop.permute.xlu1 %984 }
 0x226   : > { %v953_v52 = vpop.permute.xlu0 %952  ;;  %v1422_v27 = vsel %vm1394_vm7, %v1389_v51, %v985_v48 }
 0x227   : > { %v1406_v60 = vsel %vm1394_vm7, %v1373_v6, %v953_v52 }
 0x229   : > { %v1085_v56 = vpop.permute.xlu1 %1084 }
 0x22a   : > { %v1053_v15 = vpop.permute.xlu0 %1052  ;;  %v1454_v28 = vsel %vm1427_vm8, %v1421_v29, %v1085_v56 }
 0x22b   : > { %v1438_v16 = vsel %vm1427_vm8, %v1405_v49, %v1053_v15 }
 0x22d   : > { %v788_v11 = vpop.permute.xlu1 %787 }
 0x22e   : > { %v3759_v53 = vpop.permute.xlu0 %755  ;;  %v1357_v48 = vsel %vm1328_vm5, %v3253_v42, %v788_v11 }
 0x22f   : > { %v1341_v56 = vsel %vm1328_vm5, %v3117_v46, %v3759_v53 }
 0x231   : > { %v1087_v13 = vpop.permute.xlu1 %1086 }
 0x232   : > { %v1055_v12 = vpop.permute.xlu0 %1054  ;;  %v1455_v24 = vsel %vm1427_vm8, %v1422_v27, %v1087_v13 }
 0x233   : > { %v1439_v34 = vsel %vm1427_vm8, %v1406_v60, %v1055_v12 }
 0x235   : > { %v1186_v26 = vpop.permute.xlu1 %1185 }
 0x236   : > { %v1487_v23 = vsel %vm1460_vm9, %v1454_v28, %v1186_v26  ;;  %v1154_v25 = vpop.permute.xlu0 %1153 }
 0x237   : > { %v1471_v59 = vsel %vm1460_vm9, %v1438_v16, %v1154_v25  ;;  %2060 = vmatprep.mubr.msk.f32.mxu1 %vm1509_vm10, %v1487_v23 }
 0x238   : > { %2036 = vmatprep.mubr.msk.f32.mxu0 %vm1509_vm10, %v1471_v59 }
 0x239   : > { %v3776_v38 = vpop.permute.xlu1 %789 }
 0x23a   : > { %v3778_v2 = vpop.permute.xlu0 %757  ;;  %v1358_v28 = vsel %vm1328_vm5, %v3250_v61, %v3776_v38 }
 0x23b   : > { %v1342_v16 = vsel %vm1328_vm5, %v3114_v63, %v3778_v2 }
 0x23d   : > { %v889_v58 = vpop.permute.xlu1 %888 }
 0x23e   : > { %v857_v41 = vpop.permute.xlu0 %856  ;;  %v1390_v15 = vsel %vm1361_vm6, %v1357_v48, %v889_v58 }
 0x23f   : > { %v1374_v13 = vsel %vm1361_vm6, %v1341_v56, %v857_v41 }
 0x241   : > { %v1188_v45 = vpop.permute.xlu1 %1187 }
 0x242   : > { %v1488_v30 = vsel %vm1460_vm9, %v1455_v24, %v1188_v45  ;;  %v1156_v5 = vpop.permute.xlu0 %1155 }
 0x243   : > { %v1472_v1 = vsel %vm1460_vm9, %v1439_v34, %v1156_v5  ;;  %2061 = vmatmul.mubr.msk.f32.gmra.mrb[10].mxu1 %vm1509_vm10, %v1488_v30 }
 0x244   : > { %2037 = vmatmul.mubr.msk.f32.gmra.mrb[10].mxu0 %vm1509_vm10, %v1472_v1 }
 0x245   : > { %v891_v17 = vpop.permute.xlu1 %890 }
 0x246   : > { %v859_v33 = vpop.permute.xlu0 %858  ;;  %v1391_v23 = vsel %vm1361_vm6, %v1358_v28, %v891_v17 }
 0x247   : > { %v1375_v25 = vsel %vm1361_vm6, %v1342_v16, %v859_v33 }
 0x249   : > { %v987_v14 = vpop.permute.xlu1 %986 }
 0x24a   : > { %v955_v18 = vpop.permute.xlu0 %954  ;;  %v1423_v62 = vsel %vm1394_vm7, %v1390_v15, %v987_v14 }
 0x24b   : > { %v1407_v12 = vsel %vm1394_vm7, %v1374_v13, %v955_v18 }
 0x24d   : > { %v989_v4 = vpop.permute.xlu1 %988 }
 0x24e   : > { %v957_v37 = vpop.permute.xlu0 %956  ;;  %v1424_v59 = vsel %vm1394_vm7, %v1391_v23, %v989_v4 }
 0x24f   : > { %v1408_v58 = vsel %vm1394_vm7, %v1375_v25, %v957_v37 }
 0x251   : > { %v1089_v50 = vpop.permute.xlu1 %1088 }
 0x252   : > { %v1057_v36 = vpop.permute.xlu0 %1056  ;;  %v2023_v40 = vpop.f32.mrb[0].mxu0  ;;  %v1456_v43 = vsel %vm1427_vm8, %v1423_v62, %v1089_v50 }
 0x253   : > { %v1678_v3 = vadd.f32 %v2023_v40, %v3798_v20  ;;  %v1672_v57 = vpop.f32.mrb[1].mxu0  ;;  %v1440_v11 = vsel %vm1427_vm8, %v1407_v12, %v1057_v36 }
 0x254   : > { %v1673_v39 = vadd.f32 %v3798_v20, %v1672_v57 }
 0x255   : > { %1832 = vst.msk [vmem:[%s3803_s24 + $0x8] sm:$0xff] %vm1229_vm2, %v1678_v3  ;;  %v3809_v32 = vpop.permute.xlu1 %791 }
 0x256   : > { %1831 = vst.msk [vmem:[%s3803_s24] sm:$0xff] %vm1229_vm2, %v1673_v39  ;;  %v3813_v7 = vpop.permute.xlu0 %759  ;;  %v1359_v50 = vsel %vm1328_vm5, %v3273_v0, %v3809_v32 }
 0x257   : > { %v2047_v9 = vpop.f32.mrb[0].mxu1  ;;  %v1343_v40 = vsel %vm1328_vm5, %v3137_v54, %v3813_v7 }
 0x258   : > { %v1758_v22 = vadd.f32 %v2047_v9, %v3798_v20  ;;  %v1752_v44 = vpop.f32.mrb[1].mxu1 }
 0x259   : > { %v1753_v10 = vadd.f32 %v3798_v20, %v1752_v44  ;;  %v1091_v47 = vpop.permute.xlu1 %1090 }
 0x25a   : > { %1848 = vst.msk [vmem:[%s3803_s24 + $0x88] sm:$0xff] %vm1229_vm2, %v1758_v22  ;;  %v1059_v52 = vpop.permute.xlu0 %1058  ;;  %v1457_v8 = vsel %vm1427_vm8, %v1424_v59, %v1091_v47 }
 0x25b   : > { %1847 = vst.msk [vmem:[%s3803_s24 + $0x80] sm:$0xff] %vm1229_vm2, %v1753_v10  ;;  %v1441_v21 = vsel %vm1427_vm8, %v1408_v58, %v1059_v52 }
 0x25d   : > { %v1190_v42 = vpop.permute.xlu1 %1189 }
 0x25e   : > { %v1489_v55 = vsel %vm1460_vm9, %v1456_v43, %v1190_v42  ;;  %v1158_v31 = vpop.permute.xlu0 %1157 }
 0x25f   : > { %v1473_v46 = vsel %vm1460_vm9, %v1440_v11, %v1158_v31  ;;  %2063 = vmatprep.mubr.msk.f32.mxu1 %vm1509_vm10, %v1489_v55 }
 0x260   : > { %2039 = vmatprep.mubr.msk.f32.mxu0 %vm1509_vm10, %v1473_v46 }
 0x261   : > { %v794_v53 = vpop.permute.xlu1 %793 }
 0x262   : > { %v762_v29 = vpop.permute.xlu0 %761  ;;  %v1360_v32 = vsel %vm1328_vm5, %v3270_v19, %v794_v53 }
 0x263   : > { %v1344_v10 = vsel %vm1328_vm5, %v3134_v35, %v762_v29 }
 0x265   : > { %v893_v49 = vpop.permute.xlu1 %892 }
 0x266   : > { %v861_v26 = vpop.permute.xlu0 %860  ;;  %v1392_v3 = vsel %vm1361_vm6, %v1359_v50, %v893_v49 }
 0x267   : > { %v1376_v57 = vsel %vm1361_vm6, %v1343_v40, %v861_v26 }
 0x269   : > { %v1192_v41 = vpop.permute.xlu1 %1191 }
 0x26a   : > { %v1490_v61 = vsel %vm1460_vm9, %v1457_v8, %v1192_v41  ;;  %v1160_v38 = vpop.permute.xlu0 %1159 }
 0x26b   : > { %v1474_v63 = vsel %vm1460_vm9, %v1441_v21, %v1160_v38  ;;  %2064 = vmatmul.mubr.msk.f32.gmra.mrb[12].mxu1 %vm1509_vm10, %v1490_v61 }
 0x26c   : > { %2040 = vmatmul.mubr.msk.f32.gmra.mrb[12].mxu0 %vm1509_vm10, %v1474_v63 }
 0x26d   : > { %v895_v2 = vpop.permute.xlu1 %894 }
 0x26e   : > { %v863_v51 = vpop.permute.xlu0 %862  ;;  %v1393_v47 = vsel %vm1361_vm6, %v1360_v32, %v895_v2 }
 0x26f   : > { %v1377_v52 = vsel %vm1361_vm6, %v1344_v10, %v863_v51 }
 0x271   : > { %v991_v6 = vpop.permute.xlu1 %990 }
 0x272   : > { %v959_v27 = vpop.permute.xlu0 %958  ;;  %v1425_v39 = vsel %vm1394_vm7, %v1392_v3, %v991_v6 }
 0x273   : > { %v1409_v9 = vsel %vm1394_vm7, %v1376_v57, %v959_v27 }
 0x275   : > { %v993_v60 = vpop.permute.xlu1 %992 }
 0x276   : > { %v961_v24 = vpop.permute.xlu0 %960  ;;  %v2026_v45 = vpop.f32.mrb[2].mxu0  ;;  %v1426_v56 = vsel %vm1394_vm7, %v1393_v47, %v993_v60 }
 0x277   : > { %v1688_v34 = vadd.f32 %v2026_v45, %v3798_v20  ;;  %v1682_v30 = vpop.f32.mrb[3].mxu0  ;;  %v1410_v19 = vsel %vm1394_vm7, %v1377_v52, %v961_v24 }
 0x278   : > { %v1683_v5 = vadd.f32 %v3798_v20, %v1682_v30 }
 0x279   : > { %1834 = vst.msk [vmem:[%s3803_s24 + $0x18] sm:$0xff] %vm1229_vm2, %v1688_v34  ;;  %v1093_v1 = vpop.permute.xlu1 %1092 }
 0x27a   : > { %1833 = vst.msk [vmem:[%s3803_s24 + $0x10] sm:$0xff] %vm1229_vm2, %v1683_v5  ;;  %v1061_v17 = vpop.permute.xlu0 %1060  ;;  %v1458_v22 = vsel %vm1427_vm8, %v1425_v39, %v1093_v1 }
 0x27b   : > { %v2050_v33 = vpop.f32.mrb[2].mxu1  ;;  %v1442_v44 = vsel %vm1427_vm8, %v1409_v9, %v1061_v17 }
 0x27c   : > { %v1768_v14 = vadd.f32 %v2050_v33, %v3798_v20  ;;  %v1762_v18 = vpop.f32.mrb[3].mxu1 }
 0x27d   : > { %v1763_v4 = vadd.f32 %v3798_v20, %v1762_v18  ;;  %v1095_v37 = vpop.permute.xlu1 %1094 }
 0x27e   : > { %1850 = vst.msk [vmem:[%s3803_s24 + $0x98] sm:$0xff] %vm1229_vm2, %v1768_v14  ;;  %v1063_v36 = vpop.permute.xlu0 %1062  ;;  %v1459_v15 = vsel %vm1427_vm8, %v1426_v56, %v1095_v37 }
 0x27f   : > { %1849 = vst.msk [vmem:[%s3803_s24 + $0x90] sm:$0xff] %vm1229_vm2, %v1763_v4  ;;  %v1443_v35 = vsel %vm1427_vm8, %v1410_v19, %v1063_v36 }
 0x281   : > { %v1194_v0 = vpop.permute.xlu1 %1193 }
 0x282   : > { %v1491_v54 = vsel %vm1460_vm9, %v1458_v22, %v1194_v0  ;;  %v1162_v7 = vpop.permute.xlu0 %1161 }
 0x283   : > { %v1475_v48 = vsel %vm1460_vm9, %v1442_v44, %v1162_v7  ;;  %2066 = vmatprep.mubr.msk.f32.mxu1 %vm1509_vm10, %v1491_v54 }
 0x284   : > { %2042 = vmatprep.mubr.msk.f32.mxu0 %vm1509_vm10, %v1475_v48 }
 0x285   : > { %v1196_v13 = vpop.permute.xlu1 %1195 }
 0x286   : > { %v1492_v62 = vsel %vm1460_vm9, %v1459_v15, %v1196_v13  ;;  %v1164_v12 = vpop.permute.xlu0 %1163 }
 0x287   : > { %v1476_v43 = vsel %vm1460_vm9, %v1443_v35, %v1164_v12  ;;  %2067 = vmatmul.mubr.msk.f32.gmra.mrb[14].mxu1 %vm1509_vm10, %v1492_v62 }
 0x288   : > { %2043 = vmatmul.mubr.msk.f32.gmra.mrb[14].mxu0 %vm1509_vm10, %v1476_v43 }
 0x29e   : > { %v2053_v42 = vpop.f32.mrb[4].mxu1 }
 0x29f   : > { %v2029_v11 = vpop.f32.mrb[4].mxu0  ;;  %v1778_v55 = vadd.f32 %v2053_v42, %v3798_v20  ;;  %v1772_v31 = vpop.f32.mrb[5].mxu1 }
 0x2a0   : > { %v1698_v46 = vadd.f32 %v2029_v11, %v3798_v20  ;;  %v1692_v53 = vpop.f32.mrb[5].mxu0  ;;  %v1773_v29 = vadd.f32 %v3798_v20, %v1772_v31 }
 0x2a1   : > { %1852 = vst.msk [vmem:[%s3803_s24 + $0xa8] sm:$0xff] %vm1229_vm2, %v1778_v55  ;;  %v1693_v49 = vadd.f32 %v3798_v20, %v1692_v53 }
 0x2a2   : > { %1836 = vst.msk [vmem:[%s3803_s24 + $0x28] sm:$0xff] %vm1229_vm2, %v1698_v46  ;;  %1851 = vst.msk [vmem:[%s3803_s24 + $0xa0] sm:$0xff] %vm1229_vm2, %v1773_v29 }
 0x2a3   : > { %1835 = vst.msk [vmem:[%s3803_s24 + $0x20] sm:$0xff] %vm1229_vm2, %v1693_v49 }
 0x2c6   : > { %v2056_v28 = vpop.f32.mrb[6].mxu1 }
 0x2c7   : > { %v2032_v26 = vpop.f32.mrb[6].mxu0  ;;  %v1788_v16 = vadd.f32 %v2056_v28, %v3798_v20  ;;  %v1782_v23 = vpop.f32.mrb[7].mxu1 }
 0x2c8   : > { %v1708_v25 = vadd.f32 %v2032_v26, %v3798_v20  ;;  %v1702_v59 = vpop.f32.mrb[7].mxu0  ;;  %v1783_v58 = vadd.f32 %v3798_v20, %v1782_v23 }
 0x2c9   : > { %1854 = vst.msk [vmem:[%s3803_s24 + $0xb8] sm:$0xff] %vm1229_vm2, %v1788_v16  ;;  %v1703_v8 = vadd.f32 %v3798_v20, %v1702_v59 }
 0x2ca   : > { %1838 = vst.msk [vmem:[%s3803_s24 + $0x38] sm:$0xff] %vm1229_vm2, %v1708_v25  ;;  %1853 = vst.msk [vmem:[%s3803_s24 + $0xb0] sm:$0xff] %vm1229_vm2, %v1783_v58 }
 0x2cb   : > { %1837 = vst.msk [vmem:[%s3803_s24 + $0x30] sm:$0xff] %vm1229_vm2, %v1703_v8 }
 0x2ee   : > { %v2059_v41 = vpop.f32.mrb[8].mxu1 }
 0x2ef   : > { %v2035_v21 = vpop.f32.mrb[8].mxu0  ;;  %v1798_v61 = vadd.f32 %v2059_v41, %v3798_v20  ;;  %v1792_v38 = vpop.f32.mrb[9].mxu1 }
 0x2f0   : > { %v1718_v63 = vadd.f32 %v2035_v21, %v3798_v20  ;;  %v1712_v2 = vpop.f32.mrb[9].mxu0  ;;  %v1793_v51 = vadd.f32 %v3798_v20, %v1792_v38 }
 0x2f1   : > { %1856 = vst.msk [vmem:[%s3803_s24 + $0xc8] sm:$0xff] %vm1229_vm2, %v1798_v61  ;;  %v1713_v6 = vadd.f32 %v3798_v20, %v1712_v2 }
 0x2f2   : > { %1840 = vst.msk [vmem:[%s3803_s24 + $0x48] sm:$0xff] %vm1229_vm2, %v1718_v63  ;;  %1855 = vst.msk [vmem:[%s3803_s24 + $0xc0] sm:$0xff] %vm1229_vm2, %v1793_v51 }
 0x2f3   : > { %1839 = vst.msk [vmem:[%s3803_s24 + $0x40] sm:$0xff] %vm1229_vm2, %v1713_v6 }
 0x316   : > { %v2062_v27 = vpop.f32.mrb[10].mxu1 }
 0x317   : > { %v2038_v60 = vpop.f32.mrb[10].mxu0  ;;  %v1808_v24 = vadd.f32 %v2062_v27, %v3798_v20  ;;  %v1802_v45 = vpop.f32.mrb[11].mxu1 }
 0x318   : > { %v1728_v34 = vadd.f32 %v2038_v60, %v3798_v20  ;;  %v1722_v30 = vpop.f32.mrb[11].mxu0  ;;  %v1803_v5 = vadd.f32 %v3798_v20, %v1802_v45 }
 0x319   : > { %1858 = vst.msk [vmem:[%s3803_s24 + $0xd8] sm:$0xff] %vm1229_vm2, %v1808_v24  ;;  %v1723_v1 = vadd.f32 %v3798_v20, %v1722_v30 }
 0x31a   : > { %1842 = vst.msk [vmem:[%s3803_s24 + $0x58] sm:$0xff] %vm1229_vm2, %v1728_v34  ;;  %1857 = vst.msk [vmem:[%s3803_s24 + $0xd0] sm:$0xff] %vm1229_vm2, %v1803_v5 }
 0x31b   : > { %1841 = vst.msk [vmem:[%s3803_s24 + $0x50] sm:$0xff] %vm1229_vm2, %v1723_v1 }
 0x33e   : > { %v2065_v17 = vpop.f32.mrb[12].mxu1 }
 0x33f   : > { %v2041_v33 = vpop.f32.mrb[12].mxu0  ;;  %v1818_v14 = vadd.f32 %v2065_v17, %v3798_v20  ;;  %v1812_v18 = vpop.f32.mrb[13].mxu1 }
 0x340   : > { %v1738_v4 = vadd.f32 %v2041_v33, %v3798_v20  ;;  %v1732_v37 = vpop.f32.mrb[13].mxu0  ;;  %v1813_v50 = vadd.f32 %v3798_v20, %v1812_v18 }
 0x341   : > { %1860 = vst.msk [vmem:[%s3803_s24 + $0xe8] sm:$0xff] %vm1229_vm2, %v1818_v14  ;;  %v1733_v36 = vadd.f32 %v3798_v20, %v1732_v37 }
 0x342   : > { %1844 = vst.msk [vmem:[%s3803_s24 + $0x68] sm:$0xff] %vm1229_vm2, %v1738_v4  ;;  %1859 = vst.msk [vmem:[%s3803_s24 + $0xe0] sm:$0xff] %vm1229_vm2, %v1813_v50 }
 0x343   : > { %1843 = vst.msk [vmem:[%s3803_s24 + $0x60] sm:$0xff] %vm1229_vm2, %v1733_v36 }
 0x35a   : > { %v2068_v40 = vpop.f32.mrb[14].mxu1 }
 0x35b   : > { %v2044_v3 = vpop.f32.mrb[14].mxu0  ;;  %v1828_v57 = vadd.f32 %v2068_v40, %v3798_v20  ;;  %v1822_v39 = vpop.f32.mrb[15].mxu1 }
 0x35c   : > { %v1748_v9 = vadd.f32 %v2044_v3, %v3798_v20  ;;  %v1742_v22 = vpop.f32.mrb[15].mxu0  ;;  %v1823_v0 = vadd.f32 %v3798_v20, %v1822_v39 }
 0x35d   : > { %1862 = vst.msk [vmem:[%s3803_s24 + $0xf8] sm:$0xff] %vm1229_vm2, %v1828_v57  ;;  %v1743_v32 = vadd.f32 %v3798_v20, %v1742_v22 }
 0x35e   : > { %1846 = vst.msk [vmem:[%s3803_s24 + $0x78] sm:$0xff] %vm1229_vm2, %v1748_v9  ;;  %1861 = vst.msk [vmem:[%s3803_s24 + $0xf0] sm:$0xff] %vm1229_vm2, %v1823_v0 }
 0x35f   : > { %1845 = vst.msk [vmem:[%s3803_s24 + $0x70] sm:$0xff] %vm1229_vm2, %v1743_v32 }
 0x360 PF: > { %s13_s12 = sadd.s32 1, %s2136_s12  }
 0x361   : > { %p10_p4 = scmp.ge.s32.totalorder %s13_s12, 4  }
 0x363   :  { %12 = sbr.rel (!%p10_p4) target bundleno = 1 (0x1), region = 62 }

// kernel: wavemix_lite_classifier.10
= control target key start
LH: loop header
LB: loop body
LE: loop exit
PB: predicated region body
PF: predicated region fallthrough
CT: control target
= control target key end

     0   :  { %s2166_s12 = smov 0   ;;  %s3969_s0 = inlined_call_operand.vmem [shape: f32[2,18,18,8], index: 0, kind: input, shape index: {}]   ;;  %s3970_s1 = inlined_call_operand.vmem [shape: f32[1,72,16], index: 1, kind: input, shape index: {}]   ;;  %s3971_s2 = inlined_call_operand.vmem [shape: f32[1,16], index: 2, kind: input, shape index: {}]   ;;  %s3972_s3 = inlined_call_operand.vmem [shape: f32[2,16,16,16], index: 3, kind: output, shape index: {}]  }
   0x1 LB: > { %s1918_s13 = sadd.s32 4294967295, %s2136_s12   ;;  %p1922_p0 = scmp.ge.s32.totalorder %s2136_s12, 1  ;;  %s2136_s12 = sphi %s2166_s12, %s13_s12  }
   0x2   : > { %p137_p1 = scmp.lt.s32.totalorder %s2136_s12, 3 }
   0x4   : > { %p138_p2 = pnand %p1922_p0, %p137_p1 }
   0x6   : > { %141 = sbr.rel (%p138_p2) target bundleno = 864 (0x360), region = 32 }
   0xd   : > { %p161_p3 = scmp.lt.s32.totalorder %s1918_s13, 1  ;;  %vm273_vm0 = vcmask 1046528   ;;  %s2138_s18 = smov 8   ;;  %vm450_vm1 = vcmask 1045504   ;;  %vm1229_vm2 = vcmask 64512   ;;  %vm1262_vm3 = vcmask 130048  }
   0xe   : > { %s2139_s19 = smov 16   ;;  %s2140_s20 = smov 24   ;;  %vm1295_vm4 = vcmask 195584   ;;  %vm1328_vm5 = vcmask 261120   ;;  %vm1361_vm6 = vcmask 326656   ;;  %vm1394_vm7 = vcmask 392192  }
   0xf   : > { %s4257_s13 = smov (!%p161_p3, %s1918_s13), 1  ;;  %s2141_s21 = smov 32   ;;  %vm1427_vm8 = vcmask 457728   ;;  %vm1460_vm9 = vcmask 523264   ;;  %vm1509_vm10 = vcmask 588800  }
  0x10   : > { %s2095_s14 = smul.u32 432, %s4257_s13  ;;  %s2142_s22 = smov 40  }
  0x11   : > { %s2143_s27 = smov 48   ;;  %s2144_s9 = smov 56  }
  0x12   : > { %s2180_s17 = scalar_lea.vmem %s3969_s0, %s2095_s14 }
  0x13   : > { %v2183_v0 = vld [vmem:[%s2180_s17 + $0x18] sm:$0xff]  ;;  %v2186_v1 = vld [vmem:[%s2180_s17 + $0x20] sm:$0xff]  ;;  %v2194_v5 = vld [vmem:[%s2180_s17 + $0x8] sm:$0xff] }
  0x14   : > { %v2189_v2 = vld [vmem:[%s2180_s17] sm:$0xff]  ;;  %v279_v3 = vrot.slane %v2183_v0, 1  ;;  %v280_v4 = vrot.slane %v2186_v1, 1  ;;  %v2198_v7 = vld [vmem:[%s2180_s17 + $0x28] sm:$0x3]  ;;  %v275_v8 = vrot.slane %v2194_v5, 1 }
  0x15   : > { %v274_v6 = vrot.slane %v2189_v2, 1  ;;  %v282_v9 = vrot.slane %v2198_v7, 1  ;;  %v2203_v10 = vld [vmem:[%s2180_s17 + $0x10] sm:$0x3]  ;;  %v2206_v11 = vld [vmem:[%s2180_s17 + $0x38] sm:$0xff]  ;;  %v2236_v24 = vld [vmem:[%s2180_s17 + $0x48] sm:$0xff] }
  0x16   : > { %v2209_v12 = vsel %vm273_vm0, %v279_v3, %v280_v4  ;;  %v277_v13 = vrot.slane %v2203_v10, 1  ;;  %v2213_v14 = vld [vmem:[%s2180_s17 + $0x40] sm:$0x3]  ;;  %v2216_v15 = vld [vmem:[%s2180_s17 + $0x30] sm:$0xff]  ;;  %v285_v18 = vrot.slane %v2206_v11, 1  ;;  %v289_v29 = vrot.slane %v2236_v24, 1 }
  0x17   : > { %358 = vrot.lane.b32.xlu1 %v2209_v12, %s2138_s18  ;;  %v276_v16 = vsel %vm273_vm0, %v274_v6, %v275_v8  ;;  %v2223_v17 = vsel %vm273_vm0, %v280_v4, %v282_v9  ;;  %v287_v19 = vrot.slane %v2213_v14, 1  ;;  %v284_v21 = vrot.slane %v2216_v15, 1  ;;  %v2230_v22 = vld [vmem:[%s2180_s17 + $0x50] sm:$0xff]  ;;  %v2233_v23 = vld [vmem:[%s2180_s17 + $0x58] sm:$0x3]  ;;  %v2251_v30 = vld [vmem:[%s2180_s17 + $0x68] sm:$0xff] }
  0x18   : > { %354 = vrot.lane.b32.xlu0 %v276_v16, %s2138_s18  ;;  %v278_v20 = vsel %vm273_vm0, %v275_v8, %v277_v13  ;;  %v290_v26 = vrot.slane %v2230_v22, 1  ;;  %v292_v27 = vrot.slane %v2233_v23, 1  ;;  %v2254_v31 = vld [vmem:[%s2180_s17 + $0x70] sm:$0x3]  ;;  %v2257_v32 = vld [vmem:[%s2180_s17 + $0x60] sm:$0xff]  ;;  %v295_v34 = vrot.slane %v2251_v30, 1 }
  0x19   : > { %v2242_v25 = vsel %vm273_vm0, %v285_v18, %v287_v19  ;;  %v2247_v28 = vsel %vm273_vm0, %v284_v21, %v285_v18  ;;  %v297_v35 = vrot.slane %v2254_v31, 1  ;;  %v294_v37 = vrot.slane %v2257_v32, 1  ;;  %v2273_v38 = vld [vmem:[%s2180_s17 + $0x80] sm:$0xff]  ;;  %v2276_v39 = vld [vmem:[%s2180_s17 + $0x88] sm:$0x3]  ;;  %v2279_v40 = vld [vmem:[%s2180_s17 + $0x78] sm:$0xff] }
  0x1a   : > { %v2264_v33 = vsel %vm273_vm0, %v290_v26, %v292_v27  ;;  %v2269_v36 = vsel %vm273_vm0, %v289_v29, %v290_v26  ;;  %v300_v42 = vrot.slane %v2273_v38, 1  ;;  %v302_v43 = vrot.slane %v2276_v39, 1  ;;  %v2295_v46 = vld [vmem:[%s2180_s17 + $0x98] sm:$0xff]  ;;  %v2298_v47 = vld [vmem:[%s2180_s17 + $0xa0] sm:$0x3]  ;;  %v2301_v48 = vld [vmem:[%s2180_s17 + $0x90] sm:$0xff] }
  0x1b   : > { %360 = vrot.lane.b32.xlu1 %v2223_v17, %s2138_s18  ;;  %4077 = vst [vmem:[#allocation2_spill] sm:$0xff] %v2269_v36  ;;  %v2286_v41 = vsel %vm273_vm0, %v295_v34, %v297_v35  ;;  %v2291_v44 = vsel %vm273_vm0, %v294_v37, %v295_v34  ;;  %v299_v45 = vrot.slane %v2279_v40, 1  ;;  %v305_v50 = vrot.slane %v2295_v46, 1  ;;  %v2317_v54 = vld [vmem:[%s2180_s17 + $0xb0] sm:$0xff]  ;;  %v2320_v55 = vld [vmem:[%s2180_s17 + $0xb8] sm:$0x3] }
  0x1c   : > { %356 = vrot.lane.b32.xlu0 %v278_v20, %s2138_s18  ;;  %4078 = vst [vmem:[#allocation3_spill] sm:$0xff] %v2286_v41  ;;  %4079 = vst [vmem:[#allocation4_spill] sm:$0xff] %v2291_v44  ;;  %v2308_v49 = vsel %vm273_vm0, %v300_v42, %v302_v43  ;;  %v307_v51 = vrot.slane %v2298_v47, 1  ;;  %v304_v53 = vrot.slane %v2301_v48, 1  ;;  %v2323_v56 = vld [vmem:[%s2180_s17 + $0xa8] sm:$0xff]  ;;  %v310_v58 = vrot.slane %v2317_v54, 1 }
  0x1d   : > { %4080 = vst [vmem:[#allocation5_spill] sm:$0xff] %v2308_v49  ;;  %v2313_v52 = vsel %vm273_vm0, %v299_v45, %v300_v42  ;;  %v312_v59 = vrot.slane %v2320_v55, 1  ;;  %v309_v61 = vrot.slane %v2323_v56, 1  ;;  %v2339_v62 = vld [vmem:[%s2180_s17 + $0xc8] sm:$0xff]  ;;  %v2342_v63 = vld [vmem:[%s2180_s17 + $0xd0] sm:$0x3] }
  0x1e   : > { %4081 = vst [vmem:[#allocation6_spill] sm:$0xff] %v2313_v52  ;;  %v2330_v57 = vsel %vm273_vm0, %v305_v50, %v307_v51  ;;  %v2335_v60 = vsel %vm273_vm0, %v304_v53, %v305_v50  ;;  %v2345_v3 = vld [vmem:[%s2180_s17 + $0xc0] sm:$0xff]  ;;  %v315_v6 = vrot.slane %v2339_v62, 1  ;;  %v317_v8 = vrot.slane %v2342_v63, 1  ;;  %v2364_v18 = vld [vmem:[%s2180_s17 + $0xe8] sm:$0x3] }
  0x1f   : > { %364 = vrot.lane.b32.xlu1 %v2242_v25, %s2138_s18  ;;  %4082 = vst [vmem:[#allocation7_spill] sm:$0xff] %v2330_v57  ;;  %4083 = vst [vmem:[#allocation8_spill] sm:$0xff] %v2335_v60  ;;  %v2352_v4 = vsel %vm273_vm0, %v310_v58, %v312_v59  ;;  %v2357_v9 = vsel %vm273_vm0, %v309_v61, %v310_v58  ;;  %v314_v13 = vrot.slane %v2345_v3, 1  ;;  %v2361_v16 = vld [vmem:[%s2180_s17 + $0xe0] sm:$0xff]  ;;  %v2367_v19 = vld [vmem:[%s2180_s17 + $0xd8] sm:$0xff]  ;;  %v322_v26 = vrot.slane %v2364_v18, 1 }
  0x20   : > { %362 = vrot.lane.b32.xlu0 %v2247_v28, %s2138_s18  ;;  %4084 = vst [vmem:[#allocation9_spill] sm:$0xff] %v2352_v4  ;;  %4085 = vst [vmem:[#allocation10_spill] sm:$0xff] %v2357_v9  ;;  %v2374_v20 = vsel %vm273_vm0, %v315_v6, %v317_v8  ;;  %v320_v21 = vrot.slane %v2361_v16, 1  ;;  %v319_v29 = vrot.slane %v2367_v19, 1  ;;  %v2383_v34 = vld [vmem:[%s2180_s17 + $0xf8] sm:$0xff]  ;;  %v2389_v37 = vld [vmem:[%s2180_s17 + $0xf0] sm:$0xff] }
  0x21   : > { %4086 = vst [vmem:[#allocation11_spill] sm:$0xff] %v2374_v20  ;;  %v2379_v27 = vsel %vm273_vm0, %v314_v13, %v315_v6  ;;  %v2386_v35 = vld [vmem:[%s2180_s17 + $0x100] sm:$0x3]  ;;  %v325_v43 = vrot.slane %v2383_v34, 1  ;;  %v324_v51 = vrot.slane %v2389_v37, 1  ;;  %v2405_v53 = vld [vmem:[%s2180_s17 + $0x110] sm:$0xff] }
  0x22   : > { %4087 = vst [vmem:[#allocation12_spill] sm:$0xff] %v2379_v27  ;;  %v2396_v42 = vsel %vm273_vm0, %v320_v21, %v322_v26  ;;  %v327_v45 = vrot.slane %v2386_v35, 1  ;;  %v2401_v50 = vsel %vm273_vm0, %v319_v29, %v320_v21  ;;  %v2408_v58 = vld [vmem:[%s2180_s17 + $0x118] sm:$0x3]  ;;  %v2411_v59 = vld [vmem:[%s2180_s17 + $0x108] sm:$0xff]  ;;  %v330_v6 = vrot.slane %v2405_v53, 1 }
  0x23   : > { %368 = vrot.lane.b32.xlu1 %v2264_v33, %s2138_s18  ;;  %4088 = vst [vmem:[#allocation13_spill] sm:$0xff] %v2396_v42  ;;  %4089 = vst [vmem:[#allocation14_spill] sm:$0xff] %v2401_v50  ;;  %v332_v8 = vrot.slane %v2408_v58, 1  ;;  %v2423_v13 = vsel %vm273_vm0, %v324_v51, %v325_v43  ;;  %v329_v21 = vrot.slane %v2411_v59, 1  ;;  %v2427_v26 = vld [vmem:[%s2180_s17 + $0x128] sm:$0xff] }
  0x24   : > { %366 = vrot.lane.b32.xlu0 %v2269_v36, %s2138_s18  ;;  %v2418_v61 = vsel %vm273_vm0, %v325_v43, %v327_v45  ;;  %4091 = vst [vmem:[#allocation16_spill] sm:$0xff] %v2423_v13  ;;  %4092 = vst [vmem:[#allocation17_spill] sm:$0xff] %v2427_v26  ;;  %v2430_v29 = vld [vmem:[%s2180_s17 + $0x130] sm:$0x3]  ;;  %v335_v43 = vrot.slane %v2427_v26, 1 }
  0x25   : > { %4090 = vst [vmem:[#allocation15_spill] sm:$0xff] %v2418_v61  ;;  %v2440_v45 = vsel %vm273_vm0, %v330_v6, %v332_v8  ;;  %v337_v51 = vrot.slane %v2430_v29, 1 }
  0x26   : > { %4094 = vst [vmem:[#allocation19_spill] sm:$0xff] %v2440_v45 }
  0x27   : > { %372 = vrot.lane.b32.xlu1 %v2286_v41, %s2138_s18  ;;  %v2462_v8 = vsel %vm273_vm0, %v335_v43, %v337_v51  ;;  %v2471_v41 = vld [vmem:[%s2180_s17 + $0x158] sm:$0xff] }
  0x28   : > { %370 = vrot.lane.b32.xlu0 %v2291_v44, %s2138_s18  ;;  %4098 = vst [vmem:[#allocation23_spill] sm:$0xff] %v2462_v8  ;;  %4100 = vst [vmem:[#allocation25_spill] sm:$0xff] %v2471_v41  ;;  %v2496_v44 = vld [vmem:[%s2180_s17 + $0x178] sm:$0x3] }
  0x2b   : > { %376 = vrot.lane.b32.xlu1 %v2308_v49, %s2138_s18 }
  0x2c   : > { %374 = vrot.lane.b32.xlu0 %v2313_v52, %s2138_s18 }
  0x2f   : > { %380 = vrot.lane.b32.xlu1 %v2330_v57, %s2138_s18  ;;  %v2452_v57 = vld [vmem:[%s2180_s17 + $0x148] sm:$0x3] }
  0x30   : > { %378 = vrot.lane.b32.xlu0 %v2335_v60, %s2138_s18  ;;  %v2455_v60 = vld [vmem:[%s2180_s17 + $0x138] sm:$0xff] }
  0x31   : > { %4097 = vst [vmem:[#allocation22_spill] sm:$0xff] %v2455_v60  ;;  %v339_v52 = vrot.slane %v2455_v60, 1 }
  0x33   : > { %384 = vrot.lane.b32.xlu1 %v2352_v4, %s2138_s18 }
  0x34   : > { %382 = vrot.lane.b32.xlu0 %v2357_v9, %s2138_s18  ;;  %v2449_v9 = vld [vmem:[%s2180_s17 + $0x140] sm:$0xff] }
  0x35   : > { %4096 = vst [vmem:[#allocation21_spill] sm:$0xff] %v2449_v9 }
  0x37   : > { %388 = vrot.lane.b32.xlu1 %v2374_v20, %s2138_s18  ;;  %v2433_v20 = vld [vmem:[%s2180_s17 + $0x120] sm:$0xff] }
  0x38   : > { %386 = vrot.lane.b32.xlu0 %v2379_v27, %s2138_s18  ;;  %4093 = vst [vmem:[#allocation18_spill] sm:$0xff] %v2433_v20  ;;  %v2445_v27 = vsel %vm273_vm0, %v329_v21, %v330_v6  ;;  %v334_v4 = vrot.slane %v2433_v20, 1  ;;  %v340_v6 = vrot.slane %v2449_v9, 1  ;;  %v342_v21 = vrot.slane %v2452_v57, 1 }
  0x39   : > { %4095 = vst [vmem:[#allocation20_spill] sm:$0xff] %v2445_v27 }
  0x3a   : > { %v2467_v49 = vsel %vm273_vm0, %v334_v4, %v335_v43  ;;  %v2484_v51 = vsel %vm273_vm0, %v340_v6, %v342_v21  ;;  %v345_v4 = vrot.slane %v2471_v41, 1 }
  0x3b   : > { %392 = vrot.lane.b32.xlu1 %v2396_v42, %s2138_s18  ;;  %4099 = vst [vmem:[#allocation24_spill] sm:$0xff] %v2467_v49  ;;  %4102 = vst [vmem:[#allocation27_spill] sm:$0xff] %v2484_v51  ;;  %v2493_v42 = vld [vmem:[%s2180_s17 + $0x170] sm:$0xff] }
  0x3c   : > { %390 = vrot.lane.b32.xlu0 %v2401_v50, %s2138_s18  ;;  %4104 = vst [vmem:[#allocation29_spill] sm:$0xff] %v2493_v42 }
  0x3f   : > { %396 = vrot.lane.b32.xlu1 %v2418_v61, %s2138_s18  ;;  %v2489_v61 = vsel %vm273_vm0, %v339_v52, %v340_v6  ;;  %v350_v52 = vrot.slane %v2493_v42, 1  ;;  %v352_v6 = vrot.slane %v2496_v44, 1 }
  0x40   : > { %394 = vrot.lane.b32.xlu0 %v2423_v13, %s2138_s18  ;;  %4103 = vst [vmem:[#allocation28_spill] sm:$0xff] %v2489_v61 }
  0x43   : > { %400 = vrot.lane.b32.xlu1 %v2440_v45, %s2138_s18  ;;  %v2474_v45 = vld [vmem:[%s2180_s17 + $0x160] sm:$0x3] }
  0x44   : > { %398 = vrot.lane.b32.xlu0 %v2445_v27, %s2138_s18  ;;  %v2477_v27 = vld [vmem:[%s2180_s17 + $0x150] sm:$0xff]  ;;  %v347_v43 = vrot.slane %v2474_v45, 1 }
  0x45   : > { %4101 = vst [vmem:[#allocation26_spill] sm:$0xff] %v2477_v27  ;;  %v344_v13 = vrot.slane %v2477_v27, 1 }
  0x46   : > { %v2506_v21 = vsel %vm273_vm0, %v345_v4, %v347_v43  ;;  %v452_v43 = vrot.slane %v2194_v5, 2  ;;  %v459_v5 = vrot.slane %v2198_v7, 2  ;;  %v461_v7 = vrot.slane %v2216_v15, 2 }
  0x47   : > { %404 = vrot.lane.b32.xlu1 %v2462_v8, %s2138_s18  ;;  %v2499_v8 = vld [vmem:[%s2180_s17 + $0x168] sm:$0xff]  ;;  %4106 = vst [vmem:[#allocation31_spill] sm:$0xff] %v2506_v21 }
  0x48   : > { %402 = vrot.lane.b32.xlu0 %v2467_v49, %s2138_s18  ;;  %4105 = vst [vmem:[#allocation30_spill] sm:$0xff] %v2499_v8  ;;  %v2511_v49 = vsel %vm273_vm0, %v344_v13, %v345_v4  ;;  %v349_v50 = vrot.slane %v2499_v8, 1  ;;  %v451_v13 = vrot.slane %v2189_v2, 2 }
  0x49   : > { %4107 = vst [vmem:[#allocation32_spill] sm:$0xff] %v2511_v49 }
  0x4a   : > { %v2524_v36 = vsel %vm273_vm0, %v349_v50, %v350_v52  ;;  %v456_v50 = vrot.slane %v2183_v0, 2 }
  0x4b   : > { %408 = vrot.lane.b32.xlu1 %v2484_v51, %s2138_s18  ;;  %v2519_v51 = vsel %vm273_vm0, %v350_v52, %v352_v6  ;;  %4109 = vst [vmem:[#allocation34_spill] sm:$0xff] %v2524_v36  ;;  %v457_v6 = vrot.slane %v2186_v1, 2  ;;  %v462_v52 = vrot.slane %v2206_v11, 2 }
  0x4c   : > { %406 = vrot.lane.b32.xlu0 %v2489_v61, %s2138_s18  ;;  %4108 = vst [vmem:[#allocation33_spill] sm:$0xff] %v2519_v51  ;;  %v454_v61 = vrot.slane %v2203_v10, 2  ;;  %v453_v10 = vsel %vm450_vm1, %v451_v13, %v452_v43  ;;  %v467_v13 = vrot.slane %v2230_v22, 2 }
  0x4d   : > { %v2539_v2 = vsel %vm450_vm1, %v457_v6, %v459_v5 }
  0x4e   : > { %v455_v4 = vsel %vm450_vm1, %v452_v43, %v454_v61  ;;  %v464_v61 = vrot.slane %v2213_v14, 2  ;;  %v2557_v14 = vsel %vm450_vm1, %v461_v7, %v462_v52  ;;  %v477_v7 = vrot.slane %v2273_v38, 2 }
  0x4f   : > { %412 = vrot.lane.b32.xlu1 %v2506_v21, %s2138_s18  ;;  %v489_v21 = vrot.slane %v2320_v55, 2 }
  0x50   : > { %410 = vrot.lane.b32.xlu0 %v2511_v49, %s2138_s18  ;;  %v2552_v43 = vsel %vm450_vm1, %v462_v52, %v464_v61  ;;  %v471_v52 = vrot.slane %v2257_v32, 2  ;;  %v494_v49 = vrot.slane %v2342_v63, 2 }
  0x53   : > { %416 = vrot.lane.b32.xlu1 %v2519_v51, %s2138_s18  ;;  %v2544_v51 = vsel %vm450_vm1, %v456_v50, %v457_v6  ;;  %v466_v6 = vrot.slane %v2236_v24, 2  ;;  %v474_v50 = vrot.slane %v2254_v31, 2 }
  0x54   : > { %414 = vrot.lane.b32.xlu0 %v2524_v36, %s2138_s18  ;;  %v484_v36 = vrot.slane %v2298_v47, 2 }
  0x57   : > { %533 = vrot.lane.b32.xlu1 %v455_v4, %s2139_s19  ;;  %v469_v4 = vrot.slane %v2233_v23, 2  ;;  %v2570_v23 = vsel %vm450_vm1, %v466_v6, %v467_v13 }
  0x58   : > { %531 = vrot.lane.b32.xlu0 %v453_v10, %s2139_s19  ;;  %v472_v10 = vrot.slane %v2251_v30, 2 }
  0x59   : > { %v2565_v5 = vsel %vm450_vm1, %v467_v13, %v469_v4  ;;  %v479_v4 = vrot.slane %v2276_v39, 2  ;;  %v476_v13 = vrot.slane %v2279_v40, 2 }
  0x5a   : > { %v2578_v61 = vsel %vm450_vm1, %v472_v10, %v474_v50  ;;  %v2583_v31 = vsel %vm450_vm1, %v471_v52, %v472_v10  ;;  %v482_v50 = vrot.slane %v2295_v46, 2  ;;  %v481_v10 = vrot.slane %v2301_v48, 2 }
  0x5b   : > { %537 = vrot.lane.b32.xlu1 %v2539_v2, %s2139_s19  ;;  %4110 = vst [vmem:[#allocation35_spill] sm:$0xff] %v2578_v61  ;;  %4111 = vst [vmem:[#allocation36_spill] sm:$0xff] %v2583_v31  ;;  %v2591_v6 = vsel %vm450_vm1, %v477_v7, %v479_v4  ;;  %v2596_v39 = vsel %vm450_vm1, %v476_v13, %v477_v7  ;;  %v487_v4 = vrot.slane %v2317_v54, 2  ;;  %v486_v7 = vrot.slane %v2323_v56, 2 }
  0x5c   : > { %535 = vrot.lane.b32.xlu0 %v2544_v51, %s2139_s19  ;;  %4112 = vst [vmem:[#allocation37_spill] sm:$0xff] %v2591_v6  ;;  %4113 = vst [vmem:[#allocation38_spill] sm:$0xff] %v2596_v39  ;;  %v2604_v52 = vsel %vm450_vm1, %v482_v50, %v484_v36  ;;  %v2609_v47 = vsel %vm450_vm1, %v481_v10, %v482_v50  ;;  %v492_v36 = vrot.slane %v2339_v62, 2  ;;  %v491_v50 = vrot.slane %v2345_v3, 2 }
  0x5d   : > { %4114 = vst [vmem:[#allocation39_spill] sm:$0xff] %v2604_v52  ;;  %4115 = vst [vmem:[#allocation40_spill] sm:$0xff] %v2609_v47  ;;  %v2617_v13 = vsel %vm450_vm1, %v487_v4, %v489_v21  ;;  %v2622_v55 = vsel %vm450_vm1, %v486_v7, %v487_v4  ;;  %v497_v21 = vrot.slane %v2361_v16, 2  ;;  %v496_v4 = vrot.slane %v2367_v19, 2 }
  0x5e   : > { %4116 = vst [vmem:[#allocation41_spill] sm:$0xff] %v2617_v13  ;;  %4117 = vst [vmem:[#allocation42_spill] sm:$0xff] %v2622_v55  ;;  %v2630_v10 = vsel %vm450_vm1, %v492_v36, %v494_v49  ;;  %v2635_v63 = vsel %vm450_vm1, %v491_v50, %v492_v36  ;;  %v502_v49 = vrot.slane %v2383_v34, 2  ;;  %v501_v36 = vrot.slane %v2389_v37, 2 }
  0x5f   : > { %541 = vrot.lane.b32.xlu1 %v2552_v43, %s2139_s19  ;;  %4118 = vst [vmem:[#allocation43_spill] sm:$0xff] %v2630_v10  ;;  %4119 = vst [vmem:[#allocation44_spill] sm:$0xff] %v2635_v63 }
  0x60   : > { %539 = vrot.lane.b32.xlu0 %v2557_v14, %s2139_s19 }
  0x63   : > { %545 = vrot.lane.b32.xlu1 %v2565_v5, %s2139_s19 }
  0x64   : > { %543 = vrot.lane.b32.xlu0 %v2570_v23, %s2139_s19 }
  0x67   : > { %549 = vrot.lane.b32.xlu1 %v2578_v61, %s2139_s19 }
  0x68   : > { %547 = vrot.lane.b32.xlu0 %v2583_v31, %s2139_s19 }
  0x6b   : > { %553 = vrot.lane.b32.xlu1 %v2591_v6, %s2139_s19 }
  0x6c   : > { %551 = vrot.lane.b32.xlu0 %v2596_v39, %s2139_s19 }
  0x6f   : > { %557 = vrot.lane.b32.xlu1 %v2604_v52, %s2139_s19  ;;  %v499_v52 = vrot.slane %v2364_v18, 2  ;;  %v2648_v18 = vsel %vm450_vm1, %v496_v4, %v497_v21 }
  0x70   : > { %555 = vrot.lane.b32.xlu0 %v2609_v47, %s2139_s19  ;;  %4121 = vst [vmem:[#allocation46_spill] sm:$0xff] %v2648_v18  ;;  %v524_v47 = vrot.slane %v2474_v45, 2  ;;  %v527_v45 = vrot.slane %v2493_v42, 2 }
  0x71   : > { %v2643_v7 = vsel %vm450_vm1, %v497_v21, %v499_v52  ;;  %v507_v52 = vrot.slane %v2405_v53, 2  ;;  %v506_v21 = vrot.slane %v2411_v59, 2 }
  0x72   : > { %4120 = vst [vmem:[#allocation45_spill] sm:$0xff] %v2643_v7 }
  0x73   : > { %561 = vrot.lane.b32.xlu1 %v2617_v13, %s2139_s19  ;;  %v504_v13 = vrot.slane %v2386_v35, 2  ;;  %v2661_v35 = vsel %vm450_vm1, %v501_v36, %v502_v49 }
  0x74   : > { %559 = vrot.lane.b32.xlu0 %v2622_v55, %s2139_s19  ;;  %v519_v55 = vrot.slane %v2452_v57, 2 }
  0x75   : > { %v2656_v50 = vsel %vm450_vm1, %v502_v49, %v504_v13  ;;  %v512_v13 = vrot.slane %v2427_v26, 2  ;;  %v511_v49 = vrot.slane %v2433_v20, 2 }
  0x77   : > { %565 = vrot.lane.b32.xlu1 %v2630_v10, %s2139_s19  ;;  %v509_v10 = vrot.slane %v2408_v58, 2  ;;  %v2674_v58 = vsel %vm450_vm1, %v506_v21, %v507_v52 }
  0x78   : > { %563 = vrot.lane.b32.xlu0 %v2635_v63, %s2139_s19  ;;  %v514_v63 = vrot.slane %v2430_v29, 2  ;;  %v2687_v29 = vsel %vm450_vm1, %v511_v49, %v512_v13 }
  0x79   : > { %v2669_v4 = vsel %vm450_vm1, %v507_v52, %v509_v10  ;;  %v517_v10 = vrot.slane %v2449_v9, 2  ;;  %4123 = vst [vmem:[#allocation48_spill] sm:$0xff] %v2687_v29  ;;  %v516_v52 = vrot.slane %v2455_v60, 2 }
  0x7a   : > { %v2682_v36 = vsel %vm450_vm1, %v512_v13, %v514_v63  ;;  %v522_v63 = vrot.slane %v2471_v41, 2  ;;  %v521_v13 = vrot.slane %v2477_v27, 2 }
  0x7b   : > { %569 = vrot.lane.b32.xlu1 %v2643_v7, %s2139_s19  ;;  %4122 = vst [vmem:[#allocation47_spill] sm:$0xff] %v2682_v36  ;;  %v2695_v21 = vsel %vm450_vm1, %v517_v10, %v519_v55  ;;  %v2702_v57 = vsel %vm450_vm1, %v516_v52, %v517_v10  ;;  %v526_v52 = vrot.slane %v2499_v8, 2 }
  0x7c   : > { %567 = vrot.lane.b32.xlu0 %v2648_v18, %s2139_s19  ;;  %4124 = vst [vmem:[#allocation49_spill] sm:$0xff] %v2695_v21  ;;  %4126 = vst [vmem:[#allocation51_spill] sm:$0xff] %v2702_v57  ;;  %v2712_v55 = vsel %vm450_vm1, %v522_v63, %v524_v47  ;;  %v2719_v10 = vsel %vm450_vm1, %v521_v13, %v522_v63 }
  0x7d   : > { %4128 = vst [vmem:[#allocation53_spill] sm:$0xff] %v2712_v55  ;;  %4130 = vst [vmem:[#allocation55_spill] sm:$0xff] %v2719_v10 }
  0x7f   : > { %573 = vrot.lane.b32.xlu1 %v2656_v50, %s2139_s19 }
  0x80   : > { %571 = vrot.lane.b32.xlu0 %v2661_v35, %s2139_s19 }
  0x83   : > { %577 = vrot.lane.b32.xlu1 %v2669_v4, %s2139_s19 }
  0x84   : > { %575 = vrot.lane.b32.xlu0 %v2674_v58, %s2139_s19 }
  0x87   : > { %581 = vrot.lane.b32.xlu1 %v2682_v36, %s2139_s19 }
  0x88   : > { %579 = vrot.lane.b32.xlu0 %v2687_v29, %s2139_s19 }
  0x89   : > { %v2699_v6 = vpop.permute.xlu1 %358 }
  0x8a   : > { %4125 = vst [vmem:[#allocation50_spill] sm:$0xff] %v2699_v6  ;;  %v2705_v49 = vpop.permute.xlu0 %354  ;;  %v529_v6 = vrot.slane %v2496_v44, 2  ;;  %v2734_v44 = vsel %vm450_vm1, %v526_v52, %v527_v45 }
  0x8b   : > { %4127 = vst [vmem:[#allocation52_spill] sm:$0xff] %v2705_v49  ;;  %585 = vrot.lane.b32.xlu1 %v2695_v21, %s2139_s19  ;;  %4133 = vst [vmem:[#allocation58_spill] sm:$0xff] %v2734_v44 }
  0x8c   : > { %583 = vrot.lane.b32.xlu0 %v2702_v57, %s2139_s19  ;;  %v2729_v47 = vsel %vm450_vm1, %v527_v45, %v529_v6 }
  0x8d   : > { %v2716_v39 = vpop.permute.xlu1 %360  ;;  %4132 = vst [vmem:[#allocation57_spill] sm:$0xff] %v2729_v47 }
  0x8e   : > { %4129 = vst [vmem:[#allocation54_spill] sm:$0xff] %v2716_v39  ;;  %v2722_v49 = vpop.permute.xlu0 %356 }
  0x8f   : > { %4131 = vst [vmem:[#allocation56_spill] sm:$0xff] %v2722_v49  ;;  %589 = vrot.lane.b32.xlu1 %v2712_v55, %s2139_s19 }
  0x90   : > { %587 = vrot.lane.b32.xlu0 %v2719_v10, %s2139_s19 }
  0x91   : > { %v2731_v21 = vpop.permute.xlu1 %364 }
  0x92   : > { %v2736_v63 = vpop.permute.xlu0 %362 }
  0x93   : > { %593 = vrot.lane.b32.xlu1 %v2729_v47, %s2139_s19 }
  0x94   : > { %591 = vrot.lane.b32.xlu0 %v2734_v44, %s2139_s19  ;;  %s2145_s19 = smov 64  }
  0x95   : > { %v2742_v13 = vpop.permute.xlu1 %368 }
  0x96   : > { %v2744_v55 = vpop.permute.xlu0 %366 }
  0x97   : > { %631 = vrot.lane.b32.xlu1 %v2186_v1, %s2140_s20 }
  0x98   : > { %629 = vrot.lane.b32.xlu0 %v2183_v0, %s2140_s20 }
  0x99   : > { %v2750_v6 = vpop.permute.xlu1 %372 }
  0x9a   : > { %v2752_v45 = vpop.permute.xlu0 %370 }
  0x9b   : > { %635 = vrot.lane.b32.xlu1 %v2206_v11, %s2140_s20 }
  0x9c   : > { %633 = vrot.lane.b32.xlu0 %v2216_v15, %s2140_s20 }
  0x9d   : > { %v2758_v52 = vpop.permute.xlu1 %376 }
  0x9e   : > { %v2760_v47 = vpop.permute.xlu0 %374 }
  0x9f   : > { %639 = vrot.lane.b32.xlu1 %v2230_v22, %s2140_s20 }
  0xa0   : > { %637 = vrot.lane.b32.xlu0 %v2236_v24, %s2140_s20 }
  0xa1   : > { %v2766_v0 = vpop.permute.xlu1 %380 }
  0xa2   : > { %v2768_v1 = vpop.permute.xlu0 %378 }
  0xa3   : > { %643 = vrot.lane.b32.xlu1 %v2251_v30, %s2140_s20 }
  0xa4   : > { %641 = vrot.lane.b32.xlu0 %v2257_v32, %s2140_s20 }
  0xa5   : > { %v2774_v44 = vpop.permute.xlu1 %384 }
  0xa6   : > { %v2776_v10 = vpop.permute.xlu0 %382 }
  0xa7   : > { %647 = vrot.lane.b32.xlu1 %v2273_v38, %s2140_s20 }
  0xa8   : > { %645 = vrot.lane.b32.xlu0 %v2279_v40, %s2140_s20 }
  0xa9   : > { %v2782_v39 = vpop.permute.xlu1 %388 }
  0xaa   : > { %4134 = vst [vmem:[#allocation59_spill] sm:$0xff] %v2782_v39  ;;  %v2784_v49 = vpop.permute.xlu0 %386 }
  0xab   : > { %4135 = vst [vmem:[#allocation60_spill] sm:$0xff] %v2784_v49  ;;  %651 = vrot.lane.b32.xlu1 %v2295_v46, %s2140_s20 }
  0xac   : > { %649 = vrot.lane.b32.xlu0 %v2301_v48, %s2140_s20 }
  0xad   : > { %v2790_v57 = vpop.permute.xlu1 %392 }
  0xae   : > { %4136 = vst [vmem:[#allocation61_spill] sm:$0xff] %v2790_v57  ;;  %v2792_v61 = vpop.permute.xlu0 %390 }
  0xaf   : > { %4137 = vst [vmem:[#allocation62_spill] sm:$0xff] %v2792_v61  ;;  %655 = vrot.lane.b32.xlu1 %v2317_v54, %s2140_s20 }
  0xb0   : > { %653 = vrot.lane.b32.xlu0 %v2323_v56, %s2140_s20 }
  0xb1   : > { %v2798_v36 = vpop.permute.xlu1 %396 }
  0xb2   : > { %v2800_v39 = vpop.permute.xlu0 %394 }
  0xb3   : > { %659 = vrot.lane.b32.xlu1 %v2339_v62, %s2140_s20 }
  0xb4   : > { %657 = vrot.lane.b32.xlu0 %v2345_v3, %s2140_s20 }
  0xb5   : > { %v2806_v49 = vpop.permute.xlu1 %400 }
  0xb6   : > { %v2808_v57 = vpop.permute.xlu0 %398 }
  0xb7   : > { %4138 = vst [vmem:[#allocation63_spill] sm:$0xff] %v2808_v57  ;;  %663 = vrot.lane.b32.xlu1 %v2361_v16, %s2140_s20 }
  0xb8   : > { %661 = vrot.lane.b32.xlu0 %v2367_v19, %s2140_s20 }
  0xb9   : > { %v2814_v61 = vpop.permute.xlu1 %404 }
  0xba   : > { %4139 = vst [vmem:[#allocation64_spill] sm:$0xff] %v2814_v61  ;;  %v2816_v31 = vpop.permute.xlu0 %402 }
  0xbb   : > { %4140 = vst [vmem:[#allocation65_spill] sm:$0xff] %v2816_v31  ;;  %667 = vrot.lane.b32.xlu1 %v2383_v34, %s2140_s20 }
  0xbc   : > { %665 = vrot.lane.b32.xlu0 %v2389_v37, %s2140_s20 }
  0xbd   : > { %v2822_v62 = vpop.permute.xlu1 %408 }
  0xbe   : > { %4141 = vst [vmem:[#allocation66_spill] sm:$0xff] %v2822_v62  ;;  %v2824_v3 = vpop.permute.xlu0 %406 }
  0xbf   : > { %4142 = vst [vmem:[#allocation67_spill] sm:$0xff] %v2824_v3  ;;  %671 = vrot.lane.b32.xlu1 %v2405_v53, %s2140_s20 }
  0xc0   : > { %669 = vrot.lane.b32.xlu0 %v2411_v59, %s2140_s20 }
  0xc1   : > { %v2830_v16 = vpop.permute.xlu1 %412 }
  0xc2   : > { %4143 = vst [vmem:[#allocation68_spill] sm:$0xff] %v2830_v16  ;;  %v2832_v19 = vpop.permute.xlu0 %410 }
  0xc3   : > { %4144 = vst [vmem:[#allocation69_spill] sm:$0xff] %v2832_v19  ;;  %675 = vrot.lane.b32.xlu1 %v2427_v26, %s2140_s20  ;;  %v4156_v26 = vld [vmem:[#allocation13_spill] sm:$0xff] }
  0xc4   : > { %673 = vrot.lane.b32.xlu0 %v2433_v20, %s2140_s20 }
  0xc5   : > { %v2838_v29 = vpop.permute.xlu1 %416 }
  0xc6   : > { %4145 = vst [vmem:[#allocation70_spill] sm:$0xff] %v2838_v29  ;;  %v2840_v3 = vpop.permute.xlu0 %414 }
  0xc7   : > { %4146 = vst [vmem:[#allocation71_spill] sm:$0xff] %v2840_v3  ;;  %679 = vrot.lane.b32.xlu1 %v2449_v9, %s2140_s20  ;;  %v2863_v3 = vld [vmem:[%s2180_s17 + $0x188] sm:$0xff]  ;;  %v4155_v9 = vld [vmem:[#allocation4_spill] sm:$0xff] }
  0xc8   : > { %677 = vrot.lane.b32.xlu0 %v2455_v60, %s2140_s20  ;;  %4151 = vst [vmem:[#allocation76_spill] sm:$0xff] %v2863_v3  ;;  %v4154_v60 = vld [vmem:[#allocation14_spill] sm:$0xff] }
  0xc9   : > { %v2846_v16 = vpop.permute.xlu1 %533 }
  0xca   : > { %4147 = vst [vmem:[#allocation72_spill] sm:$0xff] %v2846_v16  ;;  %v2848_v19 = vpop.permute.xlu0 %531 }
  0xcb   : > { %4148 = vst [vmem:[#allocation73_spill] sm:$0xff] %v2848_v19  ;;  %683 = vrot.lane.b32.xlu1 %v2471_v41, %s2140_s20  ;;  %v2868_v19 = vld [vmem:[%s2180_s17 + $0x180] sm:$0xff] }
  0xcc   : > { %681 = vrot.lane.b32.xlu0 %v2477_v27, %s2140_s20  ;;  %4152 = vst [vmem:[#allocation77_spill] sm:$0xff] %v2868_v19 }
  0xcd   : > { %v2854_v62 = vpop.permute.xlu1 %537 }
  0xce   : > { %4149 = vst [vmem:[#allocation74_spill] sm:$0xff] %v2854_v62  ;;  %v2856_v29 = vpop.permute.xlu0 %535 }
  0xcf   : > { %4150 = vst [vmem:[#allocation75_spill] sm:$0xff] %v2856_v29  ;;  %687 = vrot.lane.b32.xlu1 %v2493_v42, %s2140_s20 }
  0xd0   : > { %685 = vrot.lane.b32.xlu0 %v2499_v8, %s2140_s20 }
  0xd1   : > { %v2865_v16 = vpop.permute.xlu1 %541 }
  0xd2   : > { %v2870_v41 = vpop.permute.xlu0 %539 }
  0xd3   : > { %691 = vrot.lane.b32.xlu1 %v2863_v3, %s2140_s20 }
  0xd4   : > { %689 = vrot.lane.b32.xlu0 %v2868_v19, %s2140_s20 }
  0xd5   : > { %v2876_v62 = vpop.permute.xlu1 %545 }
  0xd6   : > { %v2878_v29 = vpop.permute.xlu0 %543 }
  0xd7   : > { %733 = vrot.lane.b32.xlu1 %v2223_v17, %s2141_s21  ;;  %v4153_v17 = vld [vmem:[#allocation2_spill] sm:$0xff] }
  0xd8   : > { %731 = vrot.lane.b32.xlu0 %v2209_v12, %s2141_s21 }
  0xd9   : > { %v2884_v8 = vpop.permute.xlu1 %549 }
  0xda   : > { %v2886_v42 = vpop.permute.xlu0 %547 }
  0xdb   : > { %737 = vrot.lane.b32.xlu1 %v2242_v25, %s2141_s21 }
  0xdc   : > { %735 = vrot.lane.b32.xlu0 %v2247_v28, %s2141_s21 }
  0xdd   : > { %v2892_v3 = vpop.permute.xlu1 %553 }
  0xde   : > { %v2894_v19 = vpop.permute.xlu0 %551 }
  0xdf   : > { %741 = vrot.lane.b32.xlu1 %v2264_v33, %s2141_s21 }
  0xe0   : > { %739 = vrot.lane.b32.xlu0 %v4153_v17, %s2141_s21 }
  0xe1   : > { %v2900_v12 = vpop.permute.xlu1 %557 }
  0xe2   : > { %v2902_v27 = vpop.permute.xlu0 %555 }
  0xe3   : > { %763 = vrot.lane.b32.xlu1 %v4154_v60, %s2141_s21  ;;  %v1493_v60 = vld [vmem:[%s3970_s1] sm:$0xff] }
  0xe4   : > { %743 = vrot.lane.b32.xlu0 %v4155_v9, %s2141_s21  ;;  %v1494_v9 = vld [vmem:[%s3970_s1 + $0x8] sm:$0xff] }
  0xe5   : > { %v2908_v20 = vpop.permute.xlu1 %561 }
  0xe6   : > { %v2910_v31 = vpop.permute.xlu0 %559 }
  0xe7   : > { %832 = vrot.lane.b32.xlu1 %v2544_v51, %s2142_s22  ;;  %v2069_v51 = vpack.c.bf16 %v1494_v9, %v1493_v60 }
  0xe8   : > { %765 = vrot.lane.b32.xlu0 %v4156_v26, %s2141_s21 }
  0xe9   : > { %v2916_v61 = vpop.permute.xlu1 %565  ;;  %2070 = vmatprep.subr.bf16.mxu0 %v2069_v51  ;;  %2085 = vmatprep.subr.bf16.mxu1 %v2069_v51 }
  0xea   : > { %4157 = vst [vmem:[#allocation2_spill] sm:$0xff] %v2916_v61  ;;  %v2918_v57 = vpop.permute.xlu0 %563  ;;  %2072 = vmatpush3.bf16.msra.mxu0 %v2069_v51  ;;  %2090 = vmatpush3.bf16.msra.mxu1 %v2069_v51 }
  0xeb   : > { %4158 = vst [vmem:[#allocation78_spill] sm:$0xff] %v2918_v57  ;;  %834 = vrot.lane.b32.xlu1 %v2539_v2, %s2142_s22  ;;  %v1495_v2 = vld [vmem:[%s3970_s1 + $0x10] sm:$0xff] }
  0xec   : > { %864 = vrot.lane.b32.xlu0 %v2648_v18, %s2142_s22  ;;  %v1496_v18 = vld [vmem:[%s3970_s1 + $0x18] sm:$0xff]  ;;  %v1499_v57 = vld [vmem:[%s3970_s1 + $0x30] sm:$0xff] }
  0xed   : > { %v2930_v26 = vpop.permute.xlu1 %569  ;;  %v2073_v60 = vpack.c.bf16 %v1496_v18, %v1495_v2 }
  0xee   : > { %4159 = vst [vmem:[#allocation79_spill] sm:$0xff] %v2930_v26  ;;  %v2932_v61 = vpop.permute.xlu0 %567 }
  0xef   : > { %4160 = vst [vmem:[#allocation80_spill] sm:$0xff] %v2932_v61  ;;  %930 = vrot.lane.b32.xlu1 %v2216_v15, %s2143_s27  ;;  %2074 = vmatprep.subr.bf16.mxu0 %v2073_v60  ;;  %v1497_v61 = vld [vmem:[%s3970_s1 + $0x20] sm:$0xff] }
  0xf0   : > { %866 = vrot.lane.b32.xlu0 %v2643_v7, %s2142_s22  ;;  %2086 = vmatprep.subr.bf16.mxu1 %v2073_v60  ;;  %v1498_v7 = vld [vmem:[%s3970_s1 + $0x28] sm:$0xff] }
  0xf1   : > { %v2944_v9 = vpop.permute.xlu1 %573  ;;  %2076 = vmatpush3.bf16.msra.mxu0 %v2073_v60  ;;  %v2077_v18 = vpack.c.bf16 %v1498_v7, %v1497_v61  ;;  %2091 = vmatpush3.bf16.msra.mxu1 %v2073_v60  ;;  %v1500_v61 = vld [vmem:[%s3970_s1 + $0x38] sm:$0xff] }
  0xf2   : > { %v2946_v26 = vpop.permute.xlu0 %571  ;;  %v2081_v7 = vpack.c.bf16 %v1500_v61, %v1499_v57  ;;  %v4166_v61 = vld [vmem:[#allocation15_spill] sm:$0xff] }
  0xf3   : > { %932 = vrot.lane.b32.xlu1 %v2206_v11, %s2143_s27  ;;  %2078 = vmatprep.subr.bf16.mxu0 %v2077_v18 }
  0xf4   : > { %962 = vrot.lane.b32.xlu0 %v2389_v37, %s2143_s27  ;;  %2087 = vmatprep.subr.bf16.mxu1 %v2077_v18 }
  0xf5   : > { %v2958_v51 = vpop.permute.xlu1 %577  ;;  %2080 = vmatpush3.bf16.msra.mxu0 %v2077_v18  ;;  %2092 = vmatpush3.bf16.msra.mxu1 %v2077_v18 }
  0xf6   : > { %4161 = vst [vmem:[#allocation81_spill] sm:$0xff] %v2958_v51  ;;  %v2960_v2 = vpop.permute.xlu0 %575  ;;  %2082 = vmatprep.subr.bf16.mxu0 %v2081_v7  ;;  %2088 = vmatprep.subr.bf16.mxu1 %v2081_v7  ;;  %v1501_v51 = vld [vmem:[%s3970_s1 + $0x40] sm:$0xff] }
  0xf7   : > { %4162 = vst [vmem:[#allocation82_spill] sm:$0xff] %v2960_v2  ;;  %1032 = vrot.lane.b32.xlu1 %v2247_v28, %s2144_s9  ;;  %v4164_v28 = vld [vmem:[#allocation16_spill] sm:$0xff] }
  0xf8   : > { %964 = vrot.lane.b32.xlu0 %v2383_v34, %s2143_s27 }
  0xf9   : > { %v2972_v60 = vpop.permute.xlu1 %581  ;;  %2084 = vmatpush3.bf16.msra.mxu0 %v2081_v7  ;;  %2093 = vmatpush3.bf16.msra.mxu1 %v2081_v7 }
  0xfa   : > { %v2974_v2 = vpop.permute.xlu0 %579  ;;  %2019 = vmatprep.subr.mxu0 %v1501_v51  ;;  %2089 = vmatprep.subr.mxu1 %v1501_v51 }
  0xfb   : > { %4163 = vst [vmem:[#allocation83_spill] sm:$0xff] %v2974_v2  ;;  %767 = vrot.lane.b32.xlu1 %v4164_v28, %s2141_s21 }
  0xfc   : > { %1064 = vrot.lane.b32.xlu0 %v4164_v28, %s2144_s9 }
  0xfd   : > { %v2983_v57 = vpop.permute.xlu1 %585  ;;  %2020 = vmatpush3.msra.mxu0 %v1501_v51  ;;  %2094 = vmatpush3.msra.mxu1 %v1501_v51 }
  0xfe   : > { %v2985_v18 = vpop.permute.xlu0 %583 }
  0xff   : > { %4165 = vst [vmem:[#allocation16_spill] sm:$0xff] %v2985_v18  ;;  %1066 = vrot.lane.b32.xlu1 %v4166_v61, %s2144_s9 }
 0x100   : > { %1034 = vrot.lane.b32.xlu0 %v2242_v25, %s2144_s9 }
 0x101   : > { %v2991_v28 = vpop.permute.xlu1 %589 }
 0x102   : > { %v2993_v2 = vpop.permute.xlu0 %587 }
 0x103   : > { %4167 = vst [vmem:[#allocation15_spill] sm:$0xff] %v2993_v2  ;;  %1165 = vrot.lane.b32.xlu1 %v2661_v35, %s2145_s19 }
 0x104   : > { %1133 = vrot.lane.b32.xlu0 %v2557_v14, %s2145_s19 }
 0x105   : > { %v2999_v7 = vpop.permute.xlu1 %593 }
 0x106   : > { %4168 = vst [vmem:[#allocation84_spill] sm:$0xff] %v2999_v7  ;;  %v3001_v18 = vpop.permute.xlu0 %591 }
 0x107   : > { %836 = vrot.lane.b32.xlu1 %v2557_v14, %s2142_s22  ;;  %v1235_v14 = vsel %vm1229_vm2, %v2206_v11, %v2731_v21 }
 0x108   : > { %769 = vrot.lane.b32.xlu0 %v4166_v61, %s2141_s21  ;;  %v1268_v61 = vsel %vm1262_vm3, %v1235_v14, %v2865_v16 }
 0x109   : > { %v3007_v25 = vpop.permute.xlu1 %631 }
 0x10a   : > { %v3009_v51 = vpop.permute.xlu0 %629 }
 0x10b   : > { %1135 = vrot.lane.b32.xlu1 %v2552_v43, %s2145_s19 }
 0x10c   : > { %868 = vrot.lane.b32.xlu0 %v2661_v35, %s2142_s22  ;;  %v1234_v35 = vsel %vm1229_vm2, %v2216_v15, %v2736_v63  ;;  %v1237_v15 = vsel %vm1229_vm2, %v2230_v22, %v2742_v13 }
 0x10d   : > { %v3015_v2 = vpop.permute.xlu1 %635  ;;  %v1270_v63 = vsel %vm1262_vm3, %v1237_v15, %v2876_v62 }
 0x10e   : > { %4169 = vst [vmem:[#allocation85_spill] sm:$0xff] %v3015_v2  ;;  %v3017_v7 = vpop.permute.xlu0 %633 }
 0x10f   : > { %4170 = vst [vmem:[#allocation86_spill] sm:$0xff] %v3017_v7  ;;  %838 = vrot.lane.b32.xlu1 %v2552_v43, %s2142_s22  ;;  %v1267_v43 = vsel %vm1262_vm3, %v1234_v35, %v2870_v41  ;;  %v1236_v41 = vsel %vm1229_vm2, %v2236_v24, %v2744_v55 }
 0x110   : > { %1167 = vrot.lane.b32.xlu0 %v2656_v50, %s2145_s19 }
 0x111   : > { %v640_v2 = vpop.permute.xlu1 %639 }
 0x112   : > { %v3034_v7 = vsel %vm1295_vm4, %v1268_v61, %v640_v2  ;;  %v638_v11 = vpop.permute.xlu0 %637  ;;  %v1269_v2 = vsel %vm1262_vm3, %v1236_v41, %v2878_v29 }
 0x113   : > { %v3037_v21 = vsel %vm1295_vm4, %v1267_v43, %v638_v11  ;;  %934 = vrot.lane.b32.xlu1 %v2236_v24, %s2143_s27  ;;  %v1239_v24 = vsel %vm1229_vm2, %v2251_v30, %v2750_v6 }
 0x114   : > { %870 = vrot.lane.b32.xlu0 %v2656_v50, %s2142_s22  ;;  %v1238_v50 = vsel %vm1229_vm2, %v2257_v32, %v2752_v45  ;;  %v1272_v29 = vsel %vm1262_vm3, %v1239_v24, %v2884_v8  ;;  %v1241_v45 = vsel %vm1229_vm2, %v2273_v38, %v2758_v52  ;;  %v4171_v52 = vld [vmem:[#allocation20_spill] sm:$0xff] }
 0x115   : > { %v644_v16 = vpop.permute.xlu1 %643  ;;  %v1271_v62 = vsel %vm1262_vm3, %v1238_v50, %v2886_v42  ;;  %v1240_v42 = vsel %vm1229_vm2, %v2279_v40, %v2760_v47  ;;  %v1274_v8 = vsel %vm1262_vm3, %v1241_v45, %v2892_v3  ;;  %v1243_v40 = vsel %vm1229_vm2, %v2295_v46, %v2766_v0  ;;  %v4172_v0 = vld [vmem:[#allocation19_spill] sm:$0xff] }
 0x116   : > { %v3054_v14 = vsel %vm1295_vm4, %v1270_v63, %v644_v16  ;;  %v642_v35 = vpop.permute.xlu0 %641  ;;  %v1273_v11 = vsel %vm1262_vm3, %v1240_v42, %v2894_v19  ;;  %v1242_v47 = vsel %vm1229_vm2, %v2301_v48, %v2768_v1  ;;  %v1276_v3 = vsel %vm1262_vm3, %v1243_v40, %v2900_v12 }
 0x117   : > { %v3057_v13 = vsel %vm1295_vm4, %v1269_v2, %v642_v35  ;;  %936 = vrot.lane.b32.xlu1 %v2230_v22, %s2143_s27  ;;  %v1275_v41 = vsel %vm1262_vm3, %v1242_v47, %v2902_v27  ;;  %v1245_v48 = vsel %vm1229_vm2, %v2317_v54, %v2774_v44  ;;  %v1244_v27 = vsel %vm1229_vm2, %v2323_v56, %v2776_v10  ;;  %v4180_v47 = vld [vmem:[#allocation83_spill] sm:$0xff] }
 0x118   : > { %966 = vrot.lane.b32.xlu0 %v2411_v59, %s2143_s27  ;;  %v1278_v1 = vsel %vm1262_vm3, %v1245_v48, %v2908_v20  ;;  %v1277_v2 = vsel %vm1262_vm3, %v1244_v27, %v2910_v31  ;;  %v1251_v10 = vsel %vm1229_vm2, %v2383_v34, %v2798_v36  ;;  %v4184_v48 = vld [vmem:[#allocation22_spill] sm:$0xff] }
 0x119   : > { %v648_v55 = vpop.permute.xlu1 %647  ;;  %v1284_v44 = vsel %vm1262_vm3, %v1251_v10, %v2944_v9 }
 0x11a   : > { %v3074_v22 = vsel %vm1295_vm4, %v1272_v29, %v648_v55  ;;  %v646_v61 = vpop.permute.xlu0 %645 }
 0x11b   : > { %v3077_v6 = vsel %vm1295_vm4, %v1271_v62, %v646_v61  ;;  %1036 = vrot.lane.b32.xlu1 %v4153_v17, %s2144_s9  ;;  %v4175_v61 = vld [vmem:[#allocation82_spill] sm:$0xff] }
 0x11c   : > { %968 = vrot.lane.b32.xlu0 %v2405_v53, %s2143_s27 }
 0x11d   : > { %v652_v43 = vpop.permute.xlu1 %651 }
 0x11e   : > { %v3094_v17 = vsel %vm1295_vm4, %v1274_v8, %v652_v43  ;;  %v650_v15 = vpop.permute.xlu0 %649  ;;  %v4177_v8 = vld [vmem:[#allocation17_spill] sm:$0xff] }
 0x11f   : > { %v3097_v38 = vsel %vm1295_vm4, %v1273_v11, %v650_v15  ;;  %771 = vrot.lane.b32.xlu1 %v4171_v52, %s2141_s21  ;;  %v4178_v43 = vld [vmem:[#allocation65_spill] sm:$0xff]  ;;  %v4179_v11 = vld [vmem:[#allocation18_spill] sm:$0xff] }
 0x120   : > { %1068 = vrot.lane.b32.xlu0 %v4171_v52, %s2144_s9  ;;  %v1254_v15 = vsel %vm1229_vm2, %v4179_v11, %v4178_v43 }
 0x121   : > { %v656_v19 = vpop.permute.xlu1 %655 }
 0x122   : > { %v3114_v63 = vsel %vm1295_vm4, %v1276_v3, %v656_v19  ;;  %v654_v16 = vpop.permute.xlu0 %653  ;;  %v1287_v3 = vsel %vm1262_vm3, %v1254_v15, %v4180_v47 }
 0x123   : > { %v3117_v46 = vsel %vm1295_vm4, %v1275_v41, %v654_v16  ;;  %1070 = vrot.lane.b32.xlu1 %v4172_v0, %s2144_s9  ;;  %v4182_v16 = vld [vmem:[#allocation21_spill] sm:$0xff] }
 0x124   : > { %1038 = vrot.lane.b32.xlu0 %v2264_v33, %s2144_s9 }
 0x125   : > { %v660_v12 = vpop.permute.xlu1 %659 }
 0x126   : > { %v3134_v35 = vsel %vm1295_vm4, %v1278_v1, %v660_v12  ;;  %v658_v24 = vpop.permute.xlu0 %657 }
 0x127   : > { %v3137_v54 = vsel %vm1295_vm4, %v1277_v2, %v658_v24  ;;  %1169 = vrot.lane.b32.xlu1 %v2674_v58, %s2145_s19  ;;  %v4185_v2 = vld [vmem:[#allocation16_spill] sm:$0xff] }
 0x128   : > { %1137 = vrot.lane.b32.xlu0 %v2570_v23, %s2145_s19 }
 0x129   : > { %v3143_v33 = vpop.permute.xlu1 %663 }
 0x12a   : > { %v3145_v56 = vpop.permute.xlu0 %661 }
 0x12b   : > { %840 = vrot.lane.b32.xlu1 %v2570_v23, %s2142_s22  ;;  %v1250_v23 = vsel %vm1229_vm2, %v2389_v37, %v2800_v39  ;;  %v1253_v37 = vsel %vm1229_vm2, %v2405_v53, %v2806_v49  ;;  %v4173_v39 = vld [vmem:[#allocation63_spill] sm:$0xff]  ;;  %v4176_v49 = vld [vmem:[#allocation64_spill] sm:$0xff] }
 0x12c   : > { %773 = vrot.lane.b32.xlu0 %v4172_v0, %s2141_s21  ;;  %v1283_v29 = vsel %vm1262_vm3, %v1250_v23, %v2946_v26  ;;  %v1252_v26 = vsel %vm1229_vm2, %v2411_v59, %v4173_v39  ;;  %v1255_v59 = vsel %vm1229_vm2, %v4177_v8, %v4176_v49  ;;  %v4192_v49 = vld [vmem:[#allocation24_spill] sm:$0xff] }
 0x12d   : > { %v3151_v20 = vpop.permute.xlu1 %667  ;;  %v1285_v45 = vsel %vm1262_vm3, %v1252_v26, %v4175_v61  ;;  %v1288_v52 = vsel %vm1262_vm3, %v1255_v59, %v2972_v60  ;;  %v4183_v60 = vld [vmem:[#allocation67_spill] sm:$0xff]  ;;  %v4194_v59 = vld [vmem:[#allocation29_spill] sm:$0xff] }
 0x12e   : > { %v3153_v31 = vpop.permute.xlu0 %665  ;;  %v1256_v27 = vsel %vm1229_vm2, %v4184_v48, %v4183_v60  ;;  %v4198_v60 = vld [vmem:[#allocation23_spill] sm:$0xff] }
 0x12f   : > { %1139 = vrot.lane.b32.xlu1 %v2565_v5, %s2145_s19  ;;  %v1289_v24 = vsel %vm1262_vm3, %v1256_v27, %v4185_v2  ;;  %v4199_v27 = vld [vmem:[#allocation3_spill] sm:$0xff]  ;;  %v4200_v2 = vld [vmem:[#allocation48_spill] sm:$0xff] }
 0x130   : > { %872 = vrot.lane.b32.xlu0 %v2674_v58, %s2142_s22  ;;  %v4174_v58 = vld [vmem:[#allocation81_spill] sm:$0xff] }
 0x131   : > { %v672_v50 = vpop.permute.xlu1 %671  ;;  %v1286_v36 = vsel %vm1262_vm3, %v1253_v37, %v4174_v58  ;;  %v4190_v37 = vld [vmem:[#allocation26_spill] sm:$0xff] }
 0x132   : > { %v3170_v55 = vsel %vm1295_vm4, %v1284_v44, %v672_v50  ;;  %v670_v62 = vpop.permute.xlu0 %669  ;;  %v4186_v44 = vld [vmem:[#allocation4_spill] sm:$0xff] }
 0x133   : > { %v3173_v34 = vsel %vm1295_vm4, %v1283_v29, %v670_v62  ;;  %842 = vrot.lane.b32.xlu1 %v2565_v5, %s2142_s22  ;;  %v4187_v50 = vld [vmem:[#allocation68_spill] sm:$0xff]  ;;  %v4188_v29 = vld [vmem:[#allocation25_spill] sm:$0xff] }
 0x134   : > { %1171 = vrot.lane.b32.xlu0 %v2669_v4, %s2145_s19  ;;  %v1259_v62 = vsel %vm1229_vm2, %v4188_v29, %v4187_v50 }
 0x135   : > { %v676_v9 = vpop.permute.xlu1 %675  ;;  %v1292_v26 = vsel %vm1262_vm3, %v1259_v62, %v2991_v28  ;;  %v4195_v28 = vld [vmem:[#allocation71_spill] sm:$0xff] }
 0x136   : > { %v3190_v5 = vsel %vm1295_vm4, %v1286_v36, %v676_v9  ;;  %v674_v42 = vpop.permute.xlu0 %673  ;;  %v4191_v36 = vld [vmem:[#allocation15_spill] sm:$0xff] }
 0x137   : > { %v3193_v53 = vsel %vm1295_vm4, %v1285_v45, %v674_v42  ;;  %938 = vrot.lane.b32.xlu1 %v2257_v32, %s2143_s27 }
 0x138   : > { %874 = vrot.lane.b32.xlu0 %v2669_v4, %s2142_s22  ;;  %v4181_v4 = vld [vmem:[#allocation66_spill] sm:$0xff] }
 0x139   : > { %v680_v40 = vpop.permute.xlu1 %679  ;;  %v1257_v0 = vsel %vm1229_vm2, %v4182_v16, %v4181_v4 }
 0x13a   : > { %v3210_v32 = vsel %vm1295_vm4, %v1288_v52, %v680_v40  ;;  %v678_v19 = vpop.permute.xlu0 %677  ;;  %v1290_v1 = vsel %vm1262_vm3, %v1257_v0, %v2983_v57  ;;  %v4189_v57 = vld [vmem:[#allocation69_spill] sm:$0xff]  ;;  %v4197_v52 = vld [vmem:[#allocation84_spill] sm:$0xff] }
 0x13b   : > { %v3213_v41 = vsel %vm1295_vm4, %v1287_v3, %v678_v19  ;;  %940 = vrot.lane.b32.xlu1 %v2251_v30, %s2143_s27  ;;  %v1258_v39 = vsel %vm1229_vm2, %v4190_v37, %v4189_v57  ;;  %v4202_v57 = vld [vmem:[#allocation47_spill] sm:$0xff] }
 0x13c   : > { %970 = vrot.lane.b32.xlu0 %v4179_v11, %s2143_s27  ;;  %v1291_v9 = vsel %vm1262_vm3, %v1258_v39, %v4191_v36  ;;  %v4196_v11 = vld [vmem:[#allocation30_spill] sm:$0xff]  ;;  %v4203_v37 = vld [vmem:[#allocation35_spill] sm:$0xff] }
 0x13d   : > { %v684_v12 = vpop.permute.xlu1 %683  ;;  %v1260_v15 = vsel %vm1229_vm2, %v4196_v11, %v4195_v28  ;;  %v4204_v28 = vld [vmem:[#allocation28_spill] sm:$0xff] }
 0x13e   : > { %v3230_v30 = vsel %vm1295_vm4, %v1290_v1, %v684_v12  ;;  %v682_v10 = vpop.permute.xlu0 %681  ;;  %v1293_v3 = vsel %vm1262_vm3, %v1260_v15, %v3001_v18  ;;  %v4201_v18 = vld [vmem:[#allocation36_spill] sm:$0xff] }
 0x13f   : > { %v3233_v23 = vsel %vm1295_vm4, %v1289_v24, %v682_v10  ;;  %1040 = vrot.lane.b32.xlu1 %v4186_v44, %s2144_s9 }
 0x140   : > { %972 = vrot.lane.b32.xlu0 %v4177_v8, %s2143_s27  ;;  %v4193_v8 = vld [vmem:[#allocation70_spill] sm:$0xff] }
 0x141   : > { %v688_v58 = vpop.permute.xlu1 %687  ;;  %v1261_v43 = vsel %vm1229_vm2, %v4194_v59, %v4193_v8  ;;  %v2113_v8 = vld [vmem:[%s2180_s17 + $0x80] sm:$0xff] }
 0x142   : > { %v3250_v61 = vsel %vm1295_vm4, %v1292_v26, %v688_v58  ;;  %v686_v45 = vpop.permute.xlu0 %685  ;;  %v1294_v40 = vsel %vm1262_vm3, %v1261_v43, %v4197_v52 }
 0x143   : > { %v3253_v42 = vsel %vm1295_vm4, %v1291_v9, %v686_v45  ;;  %775 = vrot.lane.b32.xlu1 %v4192_v49, %s2141_s21  ;;  %v2112_v9 = vld [vmem:[%s2180_s17 + $0x78] sm:$0xff] }
 0x144   : > { %1072 = vrot.lane.b32.xlu0 %v4192_v49, %s2144_s9 }
 0x145   : > { %v692_v47 = vpop.permute.xlu1 %691 }
 0x146   : > { %v3270_v19 = vsel %vm1295_vm4, %v1294_v40, %v692_v47  ;;  %v690_v4 = vpop.permute.xlu0 %689  ;;  %v3338_v40 = vld [vmem:[%s2180_s17 + $0xc0] sm:$0xff]  ;;  %v4206_v47 = vld [vmem:[#allocation60_spill] sm:$0xff] }
 0x147   : > { %v3273_v0 = vsel %vm1295_vm4, %v1293_v3, %v690_v4  ;;  %1074 = vrot.lane.b32.xlu1 %v4198_v60, %s2144_s9  ;;  %v1246_v3 = vsel %vm1229_vm2, %v3338_v40, %v4206_v47  ;;  %v4207_v4 = vld [vmem:[#allocation27_spill] sm:$0xff] }
 0x148   : > { %1042 = vrot.lane.b32.xlu0 %v4199_v27, %s2144_s9 }
 0x149   : > { %v3279_v1 = vpop.permute.xlu1 %733 }
 0x14a   : > { %v732_v12 = vpop.permute.xlu0 %731 }
 0x14b   : > { %1173 = vrot.lane.b32.xlu1 %v4200_v2, %s2145_s19 }
 0x14c   : > { %1141 = vrot.lane.b32.xlu0 %v4201_v18, %s2145_s19 }
 0x14d   : > { %v3285_v24 = vpop.permute.xlu1 %737 }
 0x14e   : > { %v3287_v10 = vpop.permute.xlu0 %735 }
 0x14f   : > { %777 = vrot.lane.b32.xlu1 %v4198_v60, %s2141_s21  ;;  %v2115_v60 = vld [vmem:[%s2180_s17] sm:$0xff] }
 0x150   : > { %745 = vrot.lane.b32.xlu0 %v4199_v27, %s2141_s21  ;;  %v4208_v27 = vld [vmem:[#allocation52_spill] sm:$0xff] }
 0x151   : > { %v3293_v44 = vpop.permute.xlu1 %741 }
 0x152   : > { %v3295_v50 = vpop.permute.xlu0 %739 }
 0x153   : > { %876 = vrot.lane.b32.xlu1 %v4200_v2, %s2142_s22  ;;  %v1230_v2 = vsel %vm1229_vm2, %v2115_v60, %v4208_v27 }
 0x154   : > { %844 = vrot.lane.b32.xlu0 %v4201_v18, %s2142_s22  ;;  %v4209_v18 = vld [vmem:[#allocation78_spill] sm:$0xff] }
 0x155   : > { %v764_v29 = vpop.permute.xlu1 %763 }
 0x156   : > { %v3301_v62 = vpop.permute.xlu0 %743 }
 0x157   : > { %1175 = vrot.lane.b32.xlu1 %v4202_v57, %s2145_s19 }
 0x158   : > { %1143 = vrot.lane.b32.xlu0 %v4203_v37, %s2145_s19 }
 0x159   : > { %v833_v39 = vpop.permute.xlu1 %832 }
 0x15a   : > { %v3307_v26 = vpop.permute.xlu0 %765 }
 0x15b   : > { %878 = vrot.lane.b32.xlu1 %v4202_v57, %s2142_s22  ;;  %v1279_v57 = vsel %vm1262_vm3, %v1246_v3, %v4209_v18 }
 0x15c   : > { %846 = vrot.lane.b32.xlu0 %v4203_v37, %s2142_s22  ;;  %v4210_v37 = vld [vmem:[#allocation5_spill] sm:$0xff] }
 0x15d   : > { %v3313_v58 = vpop.permute.xlu1 %834 }
 0x15e   : > { %v865_v36 = vpop.permute.xlu0 %864 }
 0x15f   : > { %974 = vrot.lane.b32.xlu1 %v4184_v48, %s2143_s27  ;;  %v4205_v48 = vld [vmem:[#allocation6_spill] sm:$0xff] }
 0x160   : > { %942 = vrot.lane.b32.xlu0 %v2112_v9, %s2143_s27  ;;  %v4211_v9 = vld [vmem:[#allocation73_spill] sm:$0xff] }
 0x161   : > { %v931_v45 = vpop.permute.xlu1 %930 }
 0x162   : > { %v3319_v49 = vpop.permute.xlu0 %866 }
 0x163   : > { %976 = vrot.lane.b32.xlu1 %v4182_v16, %s2143_s27 }
 0x164   : > { %944 = vrot.lane.b32.xlu0 %v2113_v8, %s2143_s27  ;;  %v1263_v8 = vsel %vm1262_vm3, %v1230_v2, %v4211_v9  ;;  %v4212_v2 = vld [vmem:[#allocation51_spill] sm:$0xff] }
 0x165   : > { %v933_v59 = vpop.permute.xlu1 %932  ;;  %v1296_v47 = vsel %vm1295_vm4, %v1263_v8, %v3009_v51  ;;  %v4213_v51 = vld [vmem:[#allocation38_spill] sm:$0xff] }
 0x166   : > { %v963_v43 = vpop.permute.xlu0 %962  ;;  %v1329_v3 = vsel %vm1328_vm5, %v1296_v47, %v732_v12  ;;  %v2116_v47 = vld [vmem:[%s2180_s17 + $0x8] sm:$0xff] }
 0x167   : > { %1076 = vrot.lane.b32.xlu1 %v4204_v28, %s2144_s9 }
 0x168   : > { %1044 = vrot.lane.b32.xlu0 %v4205_v48, %s2144_s9 }
 0x169   : > { %v1033_v11 = vpop.permute.xlu1 %1032 }
 0x16a   : > { %v3329_v15 = vpop.permute.xlu0 %964 }
 0x16b   : > { %779 = vrot.lane.b32.xlu1 %v4204_v28, %s2141_s21  ;;  %v1312_v28 = vsel %vm1295_vm4, %v1279_v57, %v3145_v56  ;;  %v1362_v56 = vsel %vm1361_vm6, %v1329_v3, %v833_v39 }
 0x16c   : > { %747 = vrot.lane.b32.xlu0 %v4205_v48, %s2141_s21  ;;  %v1345_v60 = vsel %vm1328_vm5, %v1312_v28, %v764_v29  ;;  %v1395_v29 = vsel %vm1394_vm7, %v1362_v56, %v931_v45  ;;  %v4215_v45 = vld [vmem:[#allocation72_spill] sm:$0xff] }
 0x16d   : > { %v3335_v16 = vpop.permute.xlu1 %767  ;;  %v1378_v18 = vsel %vm1361_vm6, %v1345_v60, %v865_v36  ;;  %v1428_v36 = vsel %vm1427_vm8, %v1395_v29, %v1033_v11  ;;  %v4214_v60 = vld [vmem:[#allocation56_spill] sm:$0xff] }
 0x16e   : > { %v1065_v52 = vpop.permute.xlu0 %1064  ;;  %v1411_v57 = vsel %vm1394_vm7, %v1378_v18, %v963_v43  ;;  %v1231_v39 = vsel %vm1229_vm2, %v2116_v47, %v4214_v60 }
 0x16f   : > { %1078 = vrot.lane.b32.xlu1 %v4207_v4, %s2144_s9  ;;  %v1444_v9 = vsel %vm1427_vm8, %v1411_v57, %v1065_v52  ;;  %v1264_v52 = vsel %vm1262_vm3, %v1231_v39, %v4215_v45  ;;  %v3396_v57 = vld [vmem:[%s2180_s17 + $0xc8] sm:$0xff] }
 0x170   : > { %1046 = vrot.lane.b32.xlu0 %v4210_v37, %s2144_s9  ;;  %v1297_v11 = vsel %vm1295_vm4, %v1264_v52, %v3007_v25 }
 0x171   : > { %v1067_v48 = vpop.permute.xlu1 %1066 }
 0x172   : > { %v1035_v27 = vpop.permute.xlu0 %1034 }
 0x173   : > { %1177 = vrot.lane.b32.xlu1 %v4212_v2, %s2145_s19 }
 0x174   : > { %1145 = vrot.lane.b32.xlu0 %v4213_v51, %s2145_s19 }
 0x175   : > { %v1166_v12 = vpop.permute.xlu1 %1165 }
 0x176   : > { %v1134_v8 = vpop.permute.xlu0 %1133  ;;  %v1477_v28 = vsel %vm1460_vm9, %v1444_v9, %v1166_v12 }
 0x177   : > { %781 = vrot.lane.b32.xlu1 %v4207_v4, %s2141_s21  ;;  %v1461_v43 = vsel %vm1460_vm9, %v1428_v36, %v1134_v8  ;;  %2045 = vmatprep.mubr.msk.f32.mxu1 %vm1509_vm10, %v1477_v28  ;;  %v1330_v4 = vsel %vm1328_vm5, %v1297_v11, %v3279_v1  ;;  %v4217_v1 = vld [vmem:[#allocation2_spill] sm:$0xff]  ;;  %v2120_v11 = vld [vmem:[%s2180_s17 + $0x158] sm:$0xff] }
 0x178   : > { %749 = vrot.lane.b32.xlu0 %v4210_v37, %s2141_s21  ;;  %2021 = vmatprep.mubr.msk.f32.mxu0 %vm1509_vm10, %v1461_v43  ;;  %v1363_v56 = vsel %vm1361_vm6, %v1330_v4, %v3313_v58  ;;  %v4216_v37 = vld [vmem:[#allocation59_spill] sm:$0xff]  ;;  %v2121_v4 = vld [vmem:[%s2180_s17 + $0x98] sm:$0xff] }
 0x179   : > { %v3385_v3 = vpop.permute.xlu1 %836  ;;  %v1247_v29 = vsel %vm1229_vm2, %v3396_v57, %v4216_v37  ;;  %v1396_v25 = vsel %vm1394_vm7, %v1363_v56, %v933_v59  ;;  %v4218_v59 = vld [vmem:[#allocation49_spill] sm:$0xff] }
 0x17a   : > { %v3389_v18 = vpop.permute.xlu0 %769  ;;  %v1280_v9 = vsel %vm1262_vm3, %v1247_v29, %v4217_v1  ;;  %v1429_v12 = vsel %vm1427_vm8, %v1396_v25, %v1035_v27  ;;  %v4220_v29 = vld [vmem:[#allocation32_spill] sm:$0xff] }
 0x17b   : > { %880 = vrot.lane.b32.xlu1 %v4212_v2, %s2142_s22  ;;  %v1313_v2 = vsel %vm1295_vm4, %v1280_v9, %v3143_v33  ;;  %v4221_v25 = vld [vmem:[#allocation8_spill] sm:$0xff] }
 0x17c   : > { %848 = vrot.lane.b32.xlu0 %v4213_v51, %s2142_s22  ;;  %v1346_v28 = vsel %vm1328_vm5, %v1313_v2, %v3307_v26  ;;  %v4219_v51 = vld [vmem:[#allocation37_spill] sm:$0xff] }
 0x17d   : > { %v1136_v58 = vpop.permute.xlu1 %1135  ;;  %v1379_v27 = vsel %vm1361_vm6, %v1346_v28, %v3319_v49  ;;  %v4223_v28 = vld [vmem:[#allocation50_spill] sm:$0xff] }
 0x17e   : > { %v1462_v36 = vsel %vm1460_vm9, %v1429_v12, %v1136_v58  ;;  %v869_v8 = vpop.permute.xlu0 %868  ;;  %v1412_v33 = vsel %vm1394_vm7, %v1379_v27, %v3329_v15  ;;  %v2118_v15 = vld [vmem:[%s2180_s17 + $0x150] sm:$0xff]  ;;  %v3447_v12 = vld [vmem:[%s2180_s17 + $0xd8] sm:$0xff]  ;;  %v4222_v58 = vld [vmem:[#allocation62_spill] sm:$0xff] }
 0x17f   : > { %1179 = vrot.lane.b32.xlu1 %v4218_v59, %s2145_s19  ;;  %2022 = vmatmul.mubr.msk.f32.vlgmr.msra.gmra.mrb[0].mxu0 %vm1509_vm10, %v1462_v36  ;;  %v1445_v26 = vsel %vm1427_vm8, %v1412_v33, %v1067_v48  ;;  %v2119_v48 = vld [vmem:[%s2180_s17 + $0x90] sm:$0xff]  ;;  %v1248_v2 = vsel %vm1229_vm2, %v3447_v12, %v4222_v58  ;;  %v2123_v36 = vld [vmem:[%s2180_s17 + $0x18] sm:$0xff]  ;;  %v4225_v33 = vld [vmem:[#allocation75_spill] sm:$0xff] }
 0x180   : > { %1147 = vrot.lane.b32.xlu0 %v4219_v51, %s2145_s19  ;;  %v4224_v27 = vld [vmem:[#allocation80_spill] sm:$0xff]  ;;  %v4227_v58 = vld [vmem:[#allocation31_spill] sm:$0xff] }
 0x181   : > { %v3421_v47 = vpop.permute.xlu1 %838 }
 0x182   : > { %v1168_v60 = vpop.permute.xlu0 %1167 }
 0x183   : > { %v1478_v39 = vsel %vm1460_vm9, %v1445_v26, %v1168_v60  ;;  %882 = vrot.lane.b32.xlu1 %v4218_v59, %s2142_s22  ;;  %v1232_v59 = vsel %vm1229_vm2, %v2123_v36, %v4223_v28  ;;  %v4228_v36 = vld [vmem:[#allocation7_spill] sm:$0xff] }
 0x184   : > { %850 = vrot.lane.b32.xlu0 %v4219_v51, %s2142_s22  ;;  %2046 = vmatmul.mubr.msk.f32.vlgmr.msra.gmra.mrb[0].mxu1 %vm1509_vm10, %v1478_v39  ;;  %v1281_v51 = vsel %vm1262_vm3, %v1248_v2, %v4224_v27  ;;  %v1265_v26 = vsel %vm1262_vm3, %v1232_v59, %v4225_v33  ;;  %v4229_v33 = vld [vmem:[#allocation54_spill] sm:$0xff] }
 0x185   : > { %v935_v49 = vpop.permute.xlu1 %934  ;;  %v1314_v60 = vsel %vm1295_vm4, %v1281_v51, %v3153_v31  ;;  %v2124_v51 = vld [vmem:[%s2180_s17 + $0x20] sm:$0xff] }
 0x186   : > { %v3430_v43 = vpop.permute.xlu0 %870 }
 0x187   : > { %978 = vrot.lane.b32.xlu1 %v2118_v15, %s2143_s27  ;;  %v4226_v15 = vld [vmem:[#allocation86_spill] sm:$0xff] }
 0x188   : > { %946 = vrot.lane.b32.xlu0 %v2119_v48, %s2143_s27  ;;  %v1298_v48 = vsel %vm1295_vm4, %v1265_v26, %v4226_v15  ;;  %v4230_v26 = vld [vmem:[#allocation55_spill] sm:$0xff] }
 0x189   : > { %v937_v45 = vpop.permute.xlu1 %936 }
 0x18a   : > { %v967_v52 = vpop.permute.xlu0 %966 }
 0x18b   : > { %980 = vrot.lane.b32.xlu1 %v2120_v11, %s2143_s27  ;;  %v1347_v11 = vsel %vm1328_vm5, %v1314_v60, %v3335_v16  ;;  %v4233_v60 = vld [vmem:[#allocation85_spill] sm:$0xff] }
 0x18c   : > { %948 = vrot.lane.b32.xlu0 %v2121_v4, %s2143_s27 }
 0x18d   : > { %v1037_v56 = vpop.permute.xlu1 %1036 }
 0x18e   : > { %v969_v37 = vpop.permute.xlu0 %968 }
 0x18f   : > { %1080 = vrot.lane.b32.xlu1 %v4220_v29, %s2144_s9 }
 0x190   : > { %1048 = vrot.lane.b32.xlu0 %v4221_v25, %s2144_s9 }
 0x191   : > { %v3444_v1 = vpop.permute.xlu1 %771 }
 0x192   : > { %v1069_v9 = vpop.permute.xlu0 %1068 }
 0x193   : > { %783 = vrot.lane.b32.xlu1 %v4220_v29, %s2141_s21  ;;  %v1331_v29 = vsel %vm1328_vm5, %v1298_v48, %v3287_v10 }
 0x194   : > { %751 = vrot.lane.b32.xlu0 %v4221_v25, %s2141_s21  ;;  %v1380_v25 = vsel %vm1361_vm6, %v1347_v11, %v869_v8  ;;  %v1364_v31 = vsel %vm1361_vm6, %v1331_v29, %v3385_v3  ;;  %v1233_v3 = vsel %vm1229_vm2, %v2124_v51, %v4229_v33 }
 0x195   : > { %v1071_v39 = vpop.permute.xlu1 %1070  ;;  %v1413_v2 = vsel %vm1394_vm7, %v1380_v25, %v967_v52  ;;  %v1397_v28 = vsel %vm1394_vm7, %v1364_v31, %v935_v49  ;;  %v4231_v49 = vld [vmem:[#allocation74_spill] sm:$0xff] }
 0x196   : > { %v1039_v4 = vpop.permute.xlu0 %1038  ;;  %v1446_v16 = vsel %vm1427_vm8, %v1413_v2, %v1069_v9  ;;  %v1430_v10 = vsel %vm1427_vm8, %v1397_v28, %v1037_v56  ;;  %v1266_v9 = vsel %vm1262_vm3, %v1233_v3, %v4231_v49  ;;  %v4232_v56 = vld [vmem:[#allocation40_spill] sm:$0xff]  ;;  %v3506_v31 = vld [vmem:[%s2180_s17 + $0xe0] sm:$0xff]  ;;  %v4234_v2 = vld [vmem:[#allocation61_spill] sm:$0xff] }
 0x197   : > { %1082 = vrot.lane.b32.xlu1 %v4227_v58, %s2144_s9  ;;  %v1299_v15 = vsel %vm1295_vm4, %v1266_v9, %v4233_v60  ;;  %v1249_v28 = vsel %vm1229_vm2, %v3506_v31, %v4234_v2  ;;  %v4236_v3 = vld [vmem:[#allocation53_spill] sm:$0xff]  ;;  %v2126_v49 = vld [vmem:[%s2180_s17 + $0x168] sm:$0xff] }
 0x198   : > { %1050 = vrot.lane.b32.xlu0 %v4228_v36, %s2144_s9  ;;  %v1332_v11 = vsel %vm1328_vm5, %v1299_v15, %v3285_v24  ;;  %v4235_v24 = vld [vmem:[#allocation79_spill] sm:$0xff]  ;;  %v2128_v15 = vld [vmem:[%s2180_s17 + $0x170] sm:$0xff] }
 0x199   : > { %v1170_v59 = vpop.permute.xlu1 %1169  ;;  %v1365_v25 = vsel %vm1361_vm6, %v1332_v11, %v3421_v47  ;;  %v2127_v9 = vld [vmem:[%s2180_s17 + $0xa8] sm:$0xff]  ;;  %v2129_v11 = vld [vmem:[%s2180_s17 + $0xb0] sm:$0xff] }
 0x19a   : > { %v1479_v8 = vsel %vm1460_vm9, %v1446_v16, %v1170_v59  ;;  %v1138_v27 = vpop.permute.xlu0 %1137  ;;  %v1398_v16 = vsel %vm1394_vm7, %v1365_v25, %v937_v45  ;;  %v1282_v59 = vsel %vm1262_vm3, %v1249_v28, %v4235_v24  ;;  %v4238_v28 = vld [vmem:[#allocation34_spill] sm:$0xff] }
 0x19b   : > { %v1463_v52 = vsel %vm1460_vm9, %v1430_v10, %v1138_v27  ;;  %1181 = vrot.lane.b32.xlu1 %v4230_v26, %s2145_s19  ;;  %2048 = vmatprep.mubr.msk.f32.mxu1 %vm1509_vm10, %v1479_v8  ;;  %v1431_v10 = vsel %vm1427_vm8, %v1398_v16, %v1039_v4  ;;  %v4239_v16 = vld [vmem:[#allocation10_spill] sm:$0xff] }
 0x19c   : > { %1149 = vrot.lane.b32.xlu0 %v4232_v56, %s2145_s19  ;;  %2024 = vmatprep.mubr.msk.f32.mxu0 %vm1509_vm10, %v1463_v52  ;;  %v4237_v52 = vld [vmem:[#allocation39_spill] sm:$0xff] }
 0x19d   : > { %v841_v48 = vpop.permute.xlu1 %840 }
 0x19e   : > { %v3499_v29 = vpop.permute.xlu0 %773 }
 0x19f   : > { %785 = vrot.lane.b32.xlu1 %v4227_v58, %s2141_s21  ;;  %v1315_v58 = vsel %vm1295_vm4, %v1282_v59, %v3151_v20  ;;  %v1349_v59 = vsel %vm1328_vm5, %v3173_v34, %v3444_v1 }
 0x1a0   : > { %753 = vrot.lane.b32.xlu0 %v4228_v36, %s2141_s21  ;;  %v1348_v51 = vsel %vm1328_vm5, %v1315_v58, %v3389_v18 }
 0x1a1   : > { %v1140_v47 = vpop.permute.xlu1 %1139  ;;  %v1381_v45 = vsel %vm1361_vm6, %v1348_v51, %v3430_v43 }
 0x1a2   : > { %v1464_v8 = vsel %vm1460_vm9, %v1431_v10, %v1140_v47  ;;  %v873_v27 = vpop.permute.xlu0 %872  ;;  %v1414_v20 = vsel %vm1394_vm7, %v1381_v45, %v969_v37  ;;  %v1333_v47 = vsel %vm1328_vm5, %v3037_v21, %v3295_v50 }
 0x1a3   : > { %884 = vrot.lane.b32.xlu1 %v4230_v26, %s2142_s22  ;;  %2025 = vmatmul.mubr.msk.f32.gmra.mrb[2].mxu0 %vm1509_vm10, %v1464_v8  ;;  %v1447_v36 = vsel %vm1427_vm8, %v1414_v20, %v1071_v39  ;;  %v1382_v58 = vsel %vm1361_vm6, %v1349_v59, %v873_v27  ;;  %v1366_v8 = vsel %vm1361_vm6, %v1333_v47, %v841_v48  ;;  %v4241_v48 = vld [vmem:[#allocation9_spill] sm:$0xff] }
 0x1a4   : > { %852 = vrot.lane.b32.xlu0 %v4232_v56, %s2142_s22 }
 0x1a5   : > { %v843_v4 = vpop.permute.xlu1 %842 }
 0x1a6   : > { %v1172_v33 = vpop.permute.xlu0 %1171 }
 0x1a7   : > { %v1480_v18 = vsel %vm1460_vm9, %v1447_v36, %v1172_v33  ;;  %1183 = vrot.lane.b32.xlu1 %v4236_v3, %s2145_s19  ;;  %v4240_v36 = vld [vmem:[#allocation33_spill] sm:$0xff] }
 0x1a8   : > { %1151 = vrot.lane.b32.xlu0 %v4237_v52, %s2145_s19  ;;  %2049 = vmatmul.mubr.msk.f32.gmra.mrb[2].mxu1 %vm1509_vm10, %v1480_v18 }
 0x1a9   : > { %v939_v43 = vpop.permute.xlu1 %938 }
 0x1aa   : > { %v875_v26 = vpop.permute.xlu0 %874  ;;  %v1399_v45 = vsel %vm1394_vm7, %v1366_v8, %v939_v43  ;;  %v4247_v8 = vld [vmem:[#allocation76_spill] sm:$0xff] }
 0x1ab   : > { %886 = vrot.lane.b32.xlu1 %v4236_v3, %s2142_s22  ;;  %v4242_v3 = vld [vmem:[#allocation58_spill] sm:$0xff] }
 0x1ac   : > { %854 = vrot.lane.b32.xlu0 %v4237_v52, %s2142_s22  ;;  %v4243_v52 = vld [vmem:[#allocation42_spill] sm:$0xff] }
 0x1ad   : > { %v941_v37 = vpop.permute.xlu1 %940 }
 0x1ae   : > { %v971_v39 = vpop.permute.xlu0 %970 }
 0x1af   : > { %982 = vrot.lane.b32.xlu1 %v2126_v49, %s2143_s27  ;;  %v1415_v51 = vsel %vm1394_vm7, %v1382_v58, %v971_v39  ;;  %v1350_v39 = vsel %vm1328_vm5, %v3170_v55, %v3499_v29  ;;  %v4246_v58 = vld [vmem:[#allocation77_spill] sm:$0xff] }
 0x1b0   : > { %950 = vrot.lane.b32.xlu0 %v2127_v9, %s2143_s27  ;;  %v1334_v9 = vsel %vm1328_vm5, %v3034_v7, %v3293_v44 }
 0x1b1   : > { %v1041_v56 = vpop.permute.xlu1 %1040 }
 0x1b2   : > { %v973_v60 = vpop.permute.xlu0 %972  ;;  %v1432_v20 = vsel %vm1427_vm8, %v1399_v45, %v1041_v56  ;;  %v1383_v56 = vsel %vm1361_vm6, %v1350_v39, %v875_v26  ;;  %v726_v45 = vrot.slane %v4246_v58, 1  ;;  %v1335_v39 = vsel %vm1328_vm5, %v3057_v13, %v3301_v62 }
 0x1b3   : > { %984 = vrot.lane.b32.xlu1 %v2128_v15, %s2143_s27  ;;  %v1367_v15 = vsel %vm1361_vm6, %v1334_v9, %v843_v4 }
 0x1b4   : > { %952 = vrot.lane.b32.xlu0 %v2129_v11, %s2143_s27  ;;  %v1416_v11 = vsel %vm1394_vm7, %v1383_v56, %v973_v60  ;;  %v4244_v60 = vld [vmem:[#allocation57_spill] sm:$0xff]  ;;  %v827_v56 = vrot.slane %v4246_v58, 2 }
 0x1b5   : > { %v3549_v25 = vpop.permute.xlu1 %775 }
 0x1b6   : > { %v1073_v2 = vpop.permute.xlu0 %1072 }
 0x1b7   : > { %1084 = vrot.lane.b32.xlu1 %v4238_v28, %s2144_s9  ;;  %v1448_v34 = vsel %vm1427_vm8, %v1415_v51, %v1073_v2  ;;  %v1400_v2 = vsel %vm1394_vm7, %v1367_v15, %v941_v37  ;;  %v727_v51 = vrot.slane %v4247_v8, 1 }
 0x1b8   : > { %1052 = vrot.lane.b32.xlu0 %v4239_v16, %s2144_s9 }
 0x1b9   : > { %v1075_v24 = vpop.permute.xlu1 %1074 }
 0x1ba   : > { %v1043_v10 = vpop.permute.xlu0 %1042  ;;  %v1449_v55 = vsel %vm1427_vm8, %v1416_v11, %v1075_v24 }
 0x1bb   : > { %787 = vrot.lane.b32.xlu1 %v4238_v28, %s2141_s21  ;;  %v1433_v28 = vsel %vm1427_vm8, %v1400_v2, %v1043_v10 }
 0x1bc   : > { %755 = vrot.lane.b32.xlu0 %v4239_v16, %s2141_s21  ;;  %v4245_v16 = vld [vmem:[#allocation41_spill] sm:$0xff] }
 0x1bd   : > { %v1174_v1 = vpop.permute.xlu1 %1173 }
 0x1be   : > { %v1481_v21 = vsel %vm1460_vm9, %v1448_v34, %v1174_v1  ;;  %v1142_v50 = vpop.permute.xlu0 %1141 }
 0x1bf   : > { %v1465_v27 = vsel %vm1460_vm9, %v1432_v20, %v1142_v50  ;;  %1086 = vrot.lane.b32.xlu1 %v4240_v36, %s2144_s9  ;;  %2051 = vmatprep.mubr.msk.f32.mxu1 %vm1509_vm10, %v1481_v21  ;;  %v728_v20 = vsel %vm273_vm0, %v726_v45, %v727_v51  ;;  %v221_v50 = vld [vmem:[%s2180_s17 + $0x190] sm:$0x3] }
 0x1c0   : > { %1054 = vrot.lane.b32.xlu0 %v4241_v48, %s2144_s9  ;;  %2027 = vmatprep.mubr.msk.f32.mxu0 %vm1509_vm10, %v1465_v27  ;;  %v830_v45 = vrot.slane %v221_v50, 2 }
 0x1c1   : > { %v3579_v33 = vpop.permute.xlu1 %777 }
 0x1c2   : > { %v3581_v18 = vpop.permute.xlu0 %745 }
 0x1c3   : > { %1185 = vrot.lane.b32.xlu1 %v4242_v3, %s2145_s19 }
 0x1c4   : > { %1153 = vrot.lane.b32.xlu0 %v4243_v52, %s2145_s19 }
 0x1c5   : > { %v877_v43 = vpop.permute.xlu1 %876 }
 0x1c6   : > { %v845_v49 = vpop.permute.xlu0 %844 }
 0x1c7   : > { %789 = vrot.lane.b32.xlu1 %v4240_v36, %s2141_s21  ;;  %v4248_v36 = vld [vmem:[#allocation12_spill] sm:$0xff]  ;;  %v1368_v15 = vsel %vm1361_vm6, %v1335_v39, %v845_v49  ;;  %v4249_v49 = vld [vmem:[#allocation11_spill] sm:$0xff] }
 0x1c8   : > { %757 = vrot.lane.b32.xlu0 %v4241_v48, %s2141_s21 }
 0x1c9   : > { %v1176_v29 = vpop.permute.xlu1 %1175 }
 0x1ca   : > { %v1482_v7 = vsel %vm1460_vm9, %v1449_v55, %v1176_v29  ;;  %v1144_v44 = vpop.permute.xlu0 %1143 }
 0x1cb   : > { %v1466_v26 = vsel %vm1460_vm9, %v1433_v28, %v1144_v44  ;;  %888 = vrot.lane.b32.xlu1 %v4242_v3, %s2142_s22  ;;  %2052 = vmatmul.mubr.msk.f32.gmra.mrb[4].mxu1 %vm1509_vm10, %v1482_v7  ;;  %v1351_v3 = vsel %vm1328_vm5, %v3193_v53, %v3549_v25 }
 0x1cc   : > { %856 = vrot.lane.b32.xlu0 %v4243_v52, %s2142_s22  ;;  %2028 = vmatmul.mubr.msk.f32.gmra.mrb[4].mxu0 %vm1509_vm10, %v1466_v26  ;;  %v1384_v9 = vsel %vm1361_vm6, %v1351_v3, %v877_v43  ;;  %v4250_v26 = vld [vmem:[#allocation44_spill] sm:$0xff]  ;;  %v223_v3 = vld [vmem:[%s2180_s17 + $0x1a0] sm:$0xff] }
 0x1cd   : > { %v879_v4 = vpop.permute.xlu1 %878  ;;  %v1028_v39 = vrot.slane %v223_v3, 1 }
 0x1ce   : > { %v847_v37 = vpop.permute.xlu0 %846 }
 0x1cf   : > { %1187 = vrot.lane.b32.xlu1 %v4244_v60, %s2145_s19 }
 0x1d0   : > { %1155 = vrot.lane.b32.xlu0 %v4245_v16, %s2145_s19 }
 0x1d1   : > { %v975_v24 = vpop.permute.xlu1 %974 }
 0x1d2   : > { %v943_v59 = vpop.permute.xlu0 %942  ;;  %v1417_v11 = vsel %vm1394_vm7, %v1384_v9, %v975_v24 }
 0x1d3   : > { %890 = vrot.lane.b32.xlu1 %v4244_v60, %s2142_s22  ;;  %v1401_v25 = vsel %vm1394_vm7, %v1368_v15, %v943_v59  ;;  %v1336_v59 = vsel %vm1328_vm5, %v3054_v14, %v3581_v18 }
 0x1d4   : > { %858 = vrot.lane.b32.xlu0 %v4245_v16, %s2142_s22  ;;  %v1352_v16 = vsel %vm1328_vm5, %v3190_v5, %v3579_v33 }
 0x1d5   : > { %v977_v10 = vpop.permute.xlu1 %976 }
 0x1d6   : > { %v945_v47 = vpop.permute.xlu0 %944 }
 0x1d7   : > { %986 = vrot.lane.b32.xlu1 %v4246_v58, %s2143_s27  ;;  %v1385_v58 = vsel %vm1361_vm6, %v1352_v16, %v879_v4 }
 0x1d8   : > { %954 = vrot.lane.b32.xlu0 %v3338_v40, %s2143_s27  ;;  %v729_v40 = vrot.slane %v221_v50, 1 }
 0x1d9   : > { %v1077_v34 = vpop.permute.xlu1 %1076 }
 0x1da   : > { %v1045_v1 = vpop.permute.xlu0 %1044  ;;  %v730_v53 = vsel %vm273_vm0, %v727_v51, %v729_v40  ;;  %v1450_v2 = vsel %vm1427_vm8, %v1417_v11, %v1077_v34  ;;  %v1418_v51 = vsel %vm1394_vm7, %v1385_v58, %v977_v10  ;;  %v222_v40 = vld [vmem:[%s2180_s17 + $0x198] sm:$0xff] }
 0x1db   : > { %988 = vrot.lane.b32.xlu1 %v4247_v8, %s2143_s27  ;;  %v1434_v62 = vsel %vm1427_vm8, %v1401_v25, %v1045_v1 }
 0x1dc   : > { %956 = vrot.lane.b32.xlu0 %v3396_v57, %s2143_s27  ;;  %v828_v57 = vrot.slane %v4247_v8, 2  ;;  %v1369_v8 = vsel %vm1361_vm6, %v1336_v59, %v847_v37  ;;  %v4253_v59 = vld [vmem:[#allocation13_spill] sm:$0xff] }
 0x1dd   : > { %v3630_v21 = vpop.permute.xlu1 %779  ;;  %v1402_v34 = vsel %vm1394_vm7, %v1369_v8, %v945_v47 }
 0x1de   : > { %v3633_v27 = vpop.permute.xlu0 %747  ;;  %v829_v28 = vsel %vm450_vm1, %v827_v56, %v828_v57  ;;  %v831_v37 = vsel %vm450_vm1, %v828_v57, %v830_v45  ;;  %v1027_v57 = vrot.slane %v222_v40, 1  ;;  %v224_v56 = vld [vmem:[%s2180_s17 + $0x1a8] sm:$0x3]  ;;  %v4254_v45 = vld [vmem:[#allocation46_spill] sm:$0xff]  ;;  %s1961_s17 = sshll.u32 %s4257_s13, 8 }
 0x1df   : > { %1088 = vrot.lane.b32.xlu1 %v728_v20, %s2144_s9  ;;  %v1131_v8 = vrot.slane %v224_v56, 2  ;;  %s3803_s24 = scalar_lea.vmem %s3972_s3, %s1961_s17 }
 0x1e0   : > { %1056 = vrot.lane.b32.xlu0 %v4248_v36, %s2144_s9  ;;  %v1029_v11 = vsel %vm273_vm0, %v1027_v57, %v1028_v39 }
 0x1e1   : > { %v1079_v48 = vpop.permute.xlu1 %1078 }
 0x1e2   : > { %v1047_v52 = vpop.permute.xlu0 %1046  ;;  %v1451_v5 = vsel %vm1427_vm8, %v1418_v51, %v1079_v48 }
 0x1e3   : > { %791 = vrot.lane.b32.xlu1 %v728_v20, %s2141_s21  ;;  %v1435_v1 = vsel %vm1427_vm8, %v1402_v34, %v1047_v52  ;;  %v4251_v20 = vld [vmem:[#allocation43_spill] sm:$0xff] }
 0x1e4   : > { %759 = vrot.lane.b32.xlu0 %v4248_v36, %s2141_s21 }
 0x1e5   : > { %v1178_v13 = vpop.permute.xlu1 %1177 }
 0x1e6   : > { %v1483_v43 = vsel %vm1460_vm9, %v1450_v2, %v1178_v13  ;;  %v1146_v55 = vpop.permute.xlu0 %1145  ;;  %v1128_v13 = vrot.slane %v222_v40, 2 }
 0x1e7   : > { %v1467_v29 = vsel %vm1460_vm9, %v1434_v62, %v1146_v55  ;;  %1090 = vrot.lane.b32.xlu1 %v730_v53, %s2144_s9  ;;  %2054 = vmatprep.mubr.msk.f32.mxu1 %vm1509_vm10, %v1483_v43  ;;  %v1129_v62 = vrot.slane %v223_v3, 2 }
 0x1e8   : > { %1058 = vrot.lane.b32.xlu0 %v4249_v49, %s2144_s9  ;;  %2030 = vmatprep.mubr.msk.f32.mxu0 %vm1509_vm10, %v1467_v29 }
 0x1e9   : > { %v3664_v7 = vpop.permute.xlu1 %781  ;;  %v1130_v58 = vsel %vm450_vm1, %v1128_v13, %v1129_v62  ;;  %v1132_v34 = vsel %vm450_vm1, %v1129_v62, %v1131_v8 }
 0x1ea   : > { %v3666_v44 = vpop.permute.xlu0 %749 }
 0x1eb   : > { %1189 = vrot.lane.b32.xlu1 %v829_v28, %s2145_s19 }
 0x1ec   : > { %1157 = vrot.lane.b32.xlu0 %v4250_v26, %s2145_s19 }
 0x1ed   : > { %v881_v60 = vpop.permute.xlu1 %880 }
 0x1ee   : > { %v849_v24 = vpop.permute.xlu0 %848 }
 0x1ef   : > { %793 = vrot.lane.b32.xlu1 %v730_v53, %s2141_s21  ;;  %v1030_v53 = vrot.slane %v224_v56, 1 }
 0x1f0   : > { %761 = vrot.lane.b32.xlu0 %v4249_v49, %s2141_s21  ;;  %v1337_v49 = vsel %vm1328_vm5, %v3077_v6, %v3633_v27 }
 0x1f1   : > { %v1180_v33 = vpop.permute.xlu1 %1179  ;;  %v1031_v43 = vsel %vm273_vm0, %v1028_v39, %v1030_v53 }
 0x1f2   : > { %v1484_v14 = vsel %vm1460_vm9, %v1451_v5, %v1180_v33  ;;  %v1148_v18 = vpop.permute.xlu0 %1147 }
 0x1f3   : > { %v1468_v4 = vsel %vm1460_vm9, %v1435_v1, %v1148_v18  ;;  %892 = vrot.lane.b32.xlu1 %v829_v28, %s2142_s22  ;;  %2055 = vmatmul.mubr.msk.f32.gmra.mrb[6].mxu1 %vm1509_vm10, %v1484_v14  ;;  %v4255_v1 = vld [vmem:[#allocation45_spill] sm:$0xff]  ;;  %v1354_v18 = vsel %vm1328_vm5, %v3210_v32, %v3664_v7 }
 0x1f4   : > { %860 = vrot.lane.b32.xlu0 %v4250_v26, %s2142_s22  ;;  %2031 = vmatmul.mubr.msk.f32.gmra.mrb[6].mxu0 %vm1509_vm10, %v1468_v4  ;;  %v1370_v26 = vsel %vm1361_vm6, %v1337_v49, %v849_v24 }
 0x1f5   : > { %v883_v10 = vpop.permute.xlu1 %882 }
 0x1f6   : > { %v851_v47 = vpop.permute.xlu0 %850 }
 0x1f7   : > { %1191 = vrot.lane.b32.xlu1 %v831_v37, %s2145_s19 }
 0x1f8   : > { %1159 = vrot.lane.b32.xlu0 %v4251_v20, %s2145_s19 }
 0x1f9   : > { %v979_v50 = vpop.permute.xlu1 %978 }
 0x1fa   : > { %v947_v36 = vpop.permute.xlu0 %946 }
 0x1fb   : > { %894 = vrot.lane.b32.xlu1 %v831_v37, %s2142_s22  ;;  %v1338_v37 = vsel %vm1328_vm5, %v3074_v22, %v3666_v44 }
 0x1fc   : > { %862 = vrot.lane.b32.xlu0 %v4251_v20, %s2142_s22  ;;  %v1387_v20 = vsel %vm1361_vm6, %v1354_v18, %v883_v10 }
 0x1fd   : > { %v981_v48 = vpop.permute.xlu1 %980 }
 0x1fe   : > { %v949_v52 = vpop.permute.xlu0 %948 }
 0x1ff   : > { %990 = vrot.lane.b32.xlu1 %v222_v40, %s2143_s27 }
 0x200   : > { %958 = vrot.lane.b32.xlu0 %v3447_v12, %s2143_s27  ;;  %v4252_v12 = vld [vmem:[#allocation14_spill] sm:$0xff] }
 0x201   : > { %v1081_v9 = vpop.permute.xlu1 %1080 }
 0x202   : > { %v1049_v15 = vpop.permute.xlu0 %1048 }
 0x203   : > { %992 = vrot.lane.b32.xlu1 %v223_v3, %s2143_s27 }
 0x204   : > { %960 = vrot.lane.b32.xlu0 %v3506_v31, %s2143_s27  ;;  %v1353_v31 = vsel %vm1328_vm5, %v3213_v41, %v3630_v21  ;;  %v1403_v41 = vsel %vm1394_vm7, %v1370_v26, %v947_v36  ;;  %v1420_v36 = vsel %vm1394_vm7, %v1387_v20, %v981_v48  ;;  %v3798_v20 = vld [vmem:[%s3971_s2] ss:$0 sm:$0xff] }
 0x205   : > { %v784_v25 = vpop.permute.xlu1 %783  ;;  %v1386_v28 = vsel %vm1361_vm6, %v1353_v31, %v881_v60  ;;  %v1436_v6 = vsel %vm1427_vm8, %v1403_v41, %v1049_v15 }
 0x206   : > { %v3710_v2 = vpop.permute.xlu0 %751  ;;  %v1419_v16 = vsel %vm1394_vm7, %v1386_v28, %v979_v50  ;;  %v1371_v50 = vsel %vm1361_vm6, %v1338_v37, %v851_v47  ;;  %v1355_v62 = vsel %vm1328_vm5, %v3233_v23, %v784_v25 }
 0x207   : > { %1092 = vrot.lane.b32.xlu1 %v1029_v11, %s2144_s9  ;;  %v1452_v21 = vsel %vm1427_vm8, %v1419_v16, %v1081_v9  ;;  %v1404_v40 = vsel %vm1394_vm7, %v1371_v50, %v949_v52 }
 0x208   : > { %1060 = vrot.lane.b32.xlu0 %v4252_v12, %s2144_s9 }
 0x209   : > { %v1083_v55 = vpop.permute.xlu1 %1082 }
 0x20a   : > { %v1051_v29 = vpop.permute.xlu0 %1050  ;;  %v1453_v3 = vsel %vm1427_vm8, %v1420_v36, %v1083_v55 }
 0x20b   : > { %1094 = vrot.lane.b32.xlu1 %v1031_v43, %s2144_s9  ;;  %v1437_v39 = vsel %vm1427_vm8, %v1404_v40, %v1051_v29  ;;  %v1339_v43 = vsel %vm1328_vm5, %v3097_v38, %v3710_v2 }
 0x20c   : > { %1062 = vrot.lane.b32.xlu0 %v4253_v59, %s2144_s9 }
 0x20d   : > { %v1182_v51 = vpop.permute.xlu1 %1181 }
 0x20e   : > { %v1485_v27 = vsel %vm1460_vm9, %v1452_v21, %v1182_v51  ;;  %v1150_v60 = vpop.permute.xlu0 %1149 }
 0x20f   : > { %v1469_v24 = vsel %vm1460_vm9, %v1436_v6, %v1150_v60  ;;  %1193 = vrot.lane.b32.xlu1 %v1130_v58, %s2145_s19  ;;  %2057 = vmatprep.mubr.msk.f32.mxu1 %vm1509_vm10, %v1485_v27 }
 0x210   : > { %1161 = vrot.lane.b32.xlu0 %v4254_v45, %s2145_s19  ;;  %2033 = vmatprep.mubr.msk.f32.mxu0 %vm1509_vm10, %v1469_v24 }
 0x211   : > { %v786_v5 = vpop.permute.xlu1 %785 }
 0x212   : > { %v754_v33 = vpop.permute.xlu0 %753  ;;  %v1356_v8 = vsel %vm1328_vm5, %v3230_v30, %v786_v5 }
 0x213   : > { %1195 = vrot.lane.b32.xlu1 %v1132_v34, %s2145_s19  ;;  %v1340_v21 = vsel %vm1328_vm5, %v3094_v17, %v754_v33 }
 0x214   : > { %1163 = vrot.lane.b32.xlu0 %v4255_v1, %s2145_s19 }
 0x215   : > { %v885_v14 = vpop.permute.xlu1 %884 }
 0x216   : > { %v853_v4 = vpop.permute.xlu0 %852  ;;  %v1388_v55 = vsel %vm1361_vm6, %v1355_v62, %v885_v14 }
 0x217   : > { %v1372_v31 = vsel %vm1361_vm6, %v1339_v43, %v853_v4 }
 0x219   : > { %v1184_v57 = vpop.permute.xlu1 %1183 }
 0x21a   : > { %v1486_v32 = vsel %vm1460_vm9, %v1453_v3, %v1184_v57  ;;  %v1152_v7 = vpop.permute.xlu0 %1151 }
 0x21b   : > { %v1470_v9 = vsel %vm1460_vm9, %v1437_v39, %v1152_v7  ;;  %2058 = vmatmul.mubr.msk.f32.gmra.mrb[8].mxu1 %vm1509_vm10, %v1486_v32 }
 0x21c   : > { %2034 = vmatmul.mubr.msk.f32.gmra.mrb[8].mxu0 %vm1509_vm10, %v1470_v9 }
 0x21d   : > { %v887_v22 = vpop.permute.xlu1 %886 }
 0x21e   : > { %v855_v44 = vpop.permute.xlu0 %854  ;;  %v1389_v51 = vsel %vm1361_vm6, %v1356_v8, %v887_v22 }
 0x21f   : > { %v1373_v6 = vsel %vm1361_vm6, %v1340_v21, %v855_v44 }
 0x221   : > { %v983_v10 = vpop.permute.xlu1 %982 }
 0x222   : > { %v951_v47 = vpop.permute.xlu0 %950  ;;  %v1421_v29 = vsel %vm1394_vm7, %v1388_v55, %v983_v10 }
 0x223   : > { %v1405_v49 = vsel %vm1394_vm7, %v1372_v31, %v951_v47 }
 0x225   : > { %v985_v48 = vpop.permute.xlu1 %984 }
 0x226   : > { %v953_v52 = vpop.permute.xlu0 %952  ;;  %v1422_v27 = vsel %vm1394_vm7, %v1389_v51, %v985_v48 }
 0x227   : > { %v1406_v60 = vsel %vm1394_vm7, %v1373_v6, %v953_v52 }
 0x229   : > { %v1085_v56 = vpop.permute.xlu1 %1084 }
 0x22a   : > { %v1053_v15 = vpop.permute.xlu0 %1052  ;;  %v1454_v28 = vsel %vm1427_vm8, %v1421_v29, %v1085_v56 }
 0x22b   : > { %v1438_v16 = vsel %vm1427_vm8, %v1405_v49, %v1053_v15 }
 0x22d   : > { %v788_v11 = vpop.permute.xlu1 %787 }
 0x22e   : > { %v3759_v53 = vpop.permute.xlu0 %755  ;;  %v1357_v48 = vsel %vm1328_vm5, %v3253_v42, %v788_v11 }
 0x22f   : > { %v1341_v56 = vsel %vm1328_vm5, %v3117_v46, %v3759_v53 }
 0x231   : > { %v1087_v13 = vpop.permute.xlu1 %1086 }
 0x232   : > { %v1055_v12 = vpop.permute.xlu0 %1054  ;;  %v1455_v24 = vsel %vm1427_vm8, %v1422_v27, %v1087_v13 }
 0x233   : > { %v1439_v34 = vsel %vm1427_vm8, %v1406_v60, %v1055_v12 }
 0x235   : > { %v1186_v26 = vpop.permute.xlu1 %1185 }
 0x236   : > { %v1487_v23 = vsel %vm1460_vm9, %v1454_v28, %v1186_v26  ;;  %v1154_v25 = vpop.permute.xlu0 %1153 }
 0x237   : > { %v1471_v59 = vsel %vm1460_vm9, %v1438_v16, %v1154_v25  ;;  %2060 = vmatprep.mubr.msk.f32.mxu1 %vm1509_vm10, %v1487_v23 }
 0x238   : > { %2036 = vmatprep.mubr.msk.f32.mxu0 %vm1509_vm10, %v1471_v59 }
 0x239   : > { %v3776_v38 = vpop.permute.xlu1 %789 }
 0x23a   : > { %v3778_v2 = vpop.permute.xlu0 %757  ;;  %v1358_v28 = vsel %vm1328_vm5, %v3250_v61, %v3776_v38 }
 0x23b   : > { %v1342_v16 = vsel %vm1328_vm5, %v3114_v63, %v3778_v2 }
 0x23d   : > { %v889_v58 = vpop.permute.xlu1 %888 }
 0x23e   : > { %v857_v41 = vpop.permute.xlu0 %856  ;;  %v1390_v15 = vsel %vm1361_vm6, %v1357_v48, %v889_v58 }
 0x23f   : > { %v1374_v13 = vsel %vm1361_vm6, %v1341_v56, %v857_v41 }
 0x241   : > { %v1188_v45 = vpop.permute.xlu1 %1187 }
 0x242   : > { %v1488_v30 = vsel %vm1460_vm9, %v1455_v24, %v1188_v45  ;;  %v1156_v5 = vpop.permute.xlu0 %1155 }
 0x243   : > { %v1472_v1 = vsel %vm1460_vm9, %v1439_v34, %v1156_v5  ;;  %2061 = vmatmul.mubr.msk.f32.gmra.mrb[10].mxu1 %vm1509_vm10, %v1488_v30 }
 0x244   : > { %2037 = vmatmul.mubr.msk.f32.gmra.mrb[10].mxu0 %vm1509_vm10, %v1472_v1 }
 0x245   : > { %v891_v17 = vpop.permute.xlu1 %890 }
 0x246   : > { %v859_v33 = vpop.permute.xlu0 %858  ;;  %v1391_v23 = vsel %vm1361_vm6, %v1358_v28, %v891_v17 }
 0x247   : > { %v1375_v25 = vsel %vm1361_vm6, %v1342_v16, %v859_v33 }
 0x249   : > { %v987_v14 = vpop.permute.xlu1 %986 }
 0x24a   : > { %v955_v18 = vpop.permute.xlu0 %954  ;;  %v1423_v62 = vsel %vm1394_vm7, %v1390_v15, %v987_v14 }
 0x24b   : > { %v1407_v12 = vsel %vm1394_vm7, %v1374_v13, %v955_v18 }
 0x24d   : > { %v989_v4 = vpop.permute.xlu1 %988 }
 0x24e   : > { %v957_v37 = vpop.permute.xlu0 %956  ;;  %v1424_v59 = vsel %vm1394_vm7, %v1391_v23, %v989_v4 }
 0x24f   : > { %v1408_v58 = vsel %vm1394_vm7, %v1375_v25, %v957_v37 }
 0x251   : > { %v1089_v50 = vpop.permute.xlu1 %1088 }
 0x252   : > { %v1057_v36 = vpop.permute.xlu0 %1056  ;;  %v2023_v40 = vpop.f32.mrb[0].mxu0  ;;  %v1456_v43 = vsel %vm1427_vm8, %v1423_v62, %v1089_v50 }
 0x253   : > { %v1678_v3 = vadd.f32 %v2023_v40, %v3798_v20  ;;  %v1672_v57 = vpop.f32.mrb[1].mxu0  ;;  %v1440_v11 = vsel %vm1427_vm8, %v1407_v12, %v1057_v36 }
 0x254   : > { %v1673_v39 = vadd.f32 %v3798_v20, %v1672_v57 }
 0x255   : > { %1832 = vst.msk [vmem:[%s3803_s24 + $0x8] sm:$0xff] %vm1262_vm3, %v1678_v3  ;;  %v3809_v32 = vpop.permute.xlu1 %791 }
 0x256   : > { %1831 = vst.msk [vmem:[%s3803_s24] sm:$0xff] %vm1262_vm3, %v1673_v39  ;;  %v3813_v7 = vpop.permute.xlu0 %759  ;;  %v1359_v50 = vsel %vm1328_vm5, %v3273_v0, %v3809_v32 }
 0x257   : > { %v2047_v9 = vpop.f32.mrb[0].mxu1  ;;  %v1343_v40 = vsel %vm1328_vm5, %v3137_v54, %v3813_v7 }
 0x258   : > { %v1758_v22 = vadd.f32 %v2047_v9, %v3798_v20  ;;  %v1752_v44 = vpop.f32.mrb[1].mxu1 }
 0x259   : > { %v1753_v10 = vadd.f32 %v3798_v20, %v1752_v44  ;;  %v1091_v47 = vpop.permute.xlu1 %1090 }
 0x25a   : > { %1848 = vst.msk [vmem:[%s3803_s24 + $0x88] sm:$0xff] %vm1262_vm3, %v1758_v22  ;;  %v1059_v52 = vpop.permute.xlu0 %1058  ;;  %v1457_v8 = vsel %vm1427_vm8, %v1424_v59, %v1091_v47 }
 0x25b   : > { %1847 = vst.msk [vmem:[%s3803_s24 + $0x80] sm:$0xff] %vm1262_vm3, %v1753_v10  ;;  %v1441_v21 = vsel %vm1427_vm8, %v1408_v58, %v1059_v52 }
 0x25d   : > { %v1190_v42 = vpop.permute.xlu1 %1189 }
 0x25e   : > { %v1489_v55 = vsel %vm1460_vm9, %v1456_v43, %v1190_v42  ;;  %v1158_v31 = vpop.permute.xlu0 %1157 }
 0x25f   : > { %v1473_v46 = vsel %vm1460_vm9, %v1440_v11, %v1158_v31  ;;  %2063 = vmatprep.mubr.msk.f32.mxu1 %vm1509_vm10, %v1489_v55 }
 0x260   : > { %2039 = vmatprep.mubr.msk.f32.mxu0 %vm1509_vm10, %v1473_v46 }
 0x261   : > { %v794_v53 = vpop.permute.xlu1 %793 }
 0x262   : > { %v762_v29 = vpop.permute.xlu0 %761  ;;  %v1360_v32 = vsel %vm1328_vm5, %v3270_v19, %v794_v53 }
 0x263   : > { %v1344_v10 = vsel %vm1328_vm5, %v3134_v35, %v762_v29 }
 0x265   : > { %v893_v49 = vpop.permute.xlu1 %892 }
 0x266   : > { %v861_v26 = vpop.permute.xlu0 %860  ;;  %v1392_v3 = vsel %vm1361_vm6, %v1359_v50, %v893_v49 }
 0x267   : > { %v1376_v57 = vsel %vm1361_vm6, %v1343_v40, %v861_v26 }
 0x269   : > { %v1192_v41 = vpop.permute.xlu1 %1191 }
 0x26a   : > { %v1490_v61 = vsel %vm1460_vm9, %v1457_v8, %v1192_v41  ;;  %v1160_v38 = vpop.permute.xlu0 %1159 }
 0x26b   : > { %v1474_v63 = vsel %vm1460_vm9, %v1441_v21, %v1160_v38  ;;  %2064 = vmatmul.mubr.msk.f32.gmra.mrb[12].mxu1 %vm1509_vm10, %v1490_v61 }
 0x26c   : > { %2040 = vmatmul.mubr.msk.f32.gmra.mrb[12].mxu0 %vm1509_vm10, %v1474_v63 }
 0x26d   : > { %v895_v2 = vpop.permute.xlu1 %894 }
 0x26e   : > { %v863_v51 = vpop.permute.xlu0 %862  ;;  %v1393_v47 = vsel %vm1361_vm6, %v1360_v32, %v895_v2 }
 0x26f   : > { %v1377_v52 = vsel %vm1361_vm6, %v1344_v10, %v863_v51 }
 0x271   : > { %v991_v6 = vpop.permute.xlu1 %990 }
 0x272   : > { %v959_v27 = vpop.permute.xlu0 %958  ;;  %v1425_v39 = vsel %vm1394_vm7, %v1392_v3, %v991_v6 }
 0x273   : > { %v1409_v9 = vsel %vm1394_vm7, %v1376_v57, %v959_v27 }
 0x275   : > { %v993_v60 = vpop.permute.xlu1 %992 }
 0x276   : > { %v961_v24 = vpop.permute.xlu0 %960  ;;  %v2026_v45 = vpop.f32.mrb[2].mxu0  ;;  %v1426_v56 = vsel %vm1394_vm7, %v1393_v47, %v993_v60 }
 0x277   : > { %v1688_v34 = vadd.f32 %v2026_v45, %v3798_v20  ;;  %v1682_v30 = vpop.f32.mrb[3].mxu0  ;;  %v1410_v19 = vsel %vm1394_vm7, %v1377_v52, %v961_v24 }
 0x278   : > { %v1683_v5 = vadd.f32 %v3798_v20, %v1682_v30 }
 0x279   : > { %1834 = vst.msk [vmem:[%s3803_s24 + $0x18] sm:$0xff] %vm1262_vm3, %v1688_v34  ;;  %v1093_v1 = vpop.permute.xlu1 %1092 }
 0x27a   : > { %1833 = vst.msk [vmem:[%s3803_s24 + $0x10] sm:$0xff] %vm1262_vm3, %v1683_v5  ;;  %v1061_v17 = vpop.permute.xlu0 %1060  ;;  %v1458_v22 = vsel %vm1427_vm8, %v1425_v39, %v1093_v1 }
 0x27b   : > { %v2050_v33 = vpop.f32.mrb[2].mxu1  ;;  %v1442_v44 = vsel %vm1427_vm8, %v1409_v9, %v1061_v17 }
 0x27c   : > { %v1768_v14 = vadd.f32 %v2050_v33, %v3798_v20  ;;  %v1762_v18 = vpop.f32.mrb[3].mxu1 }
 0x27d   : > { %v1763_v4 = vadd.f32 %v3798_v20, %v1762_v18  ;;  %v1095_v37 = vpop.permute.xlu1 %1094 }
 0x27e   : > { %1850 = vst.msk [vmem:[%s3803_s24 + $0x98] sm:$0xff] %vm1262_vm3, %v1768_v14  ;;  %v1063_v36 = vpop.permute.xlu0 %1062  ;;  %v1459_v15 = vsel %vm1427_vm8, %v1426_v56, %v1095_v37 }
 0x27f   : > { %1849 = vst.msk [vmem:[%s3803_s24 + $0x90] sm:$0xff] %vm1262_vm3, %v1763_v4  ;;  %v1443_v35 = vsel %vm1427_vm8, %v1410_v19, %v1063_v36 }
 0x281   : > { %v1194_v0 = vpop.permute.xlu1 %1193 }
 0x282   : > { %v1491_v54 = vsel %vm1460_vm9, %v1458_v22, %v1194_v0  ;;  %v1162_v7 = vpop.permute.xlu0 %1161 }
 0x283   : > { %v1475_v48 = vsel %vm1460_vm9, %v1442_v44, %v1162_v7  ;;  %2066 = vmatprep.mubr.msk.f32.mxu1 %vm1509_vm10, %v1491_v54 }
 0x284   : > { %2042 = vmatprep.mubr.msk.f32.mxu0 %vm1509_vm10, %v1475_v48 }
 0x285   : > { %v1196_v13 = vpop.permute.xlu1 %1195 }
 0x286   : > { %v1492_v62 = vsel %vm1460_vm9, %v1459_v15, %v1196_v13  ;;  %v1164_v12 = vpop.permute.xlu0 %1163 }
 0x287   : > { %v1476_v43 = vsel %vm1460_vm9, %v1443_v35, %v1164_v12  ;;  %2067 = vmatmul.mubr.msk.f32.gmra.mrb[14].mxu1 %vm1509_vm10, %v1492_v62 }
 0x288   : > { %2043 = vmatmul.mubr.msk.f32.gmra.mrb[14].mxu0 %vm1509_vm10, %v1476_v43 }
 0x29e   : > { %v2053_v42 = vpop.f32.mrb[4].mxu1 }
 0x29f   : > { %v2029_v11 = vpop.f32.mrb[4].mxu0  ;;  %v1778_v55 = vadd.f32 %v2053_v42, %v3798_v20  ;;  %v1772_v31 = vpop.f32.mrb[5].mxu1 }
 0x2a0   : > { %v1698_v46 = vadd.f32 %v2029_v11, %v3798_v20  ;;  %v1692_v53 = vpop.f32.mrb[5].mxu0  ;;  %v1773_v29 = vadd.f32 %v3798_v20, %v1772_v31 }
 0x2a1   : > { %1852 = vst.msk [vmem:[%s3803_s24 + $0xa8] sm:$0xff] %vm1262_vm3, %v1778_v55  ;;  %v1693_v49 = vadd.f32 %v3798_v20, %v1692_v53 }
 0x2a2   : > { %1836 = vst.msk [vmem:[%s3803_s24 + $0x28] sm:$0xff] %vm1262_vm3, %v1698_v46  ;;  %1851 = vst.msk [vmem:[%s3803_s24 + $0xa0] sm:$0xff] %vm1262_vm3, %v1773_v29 }
 0x2a3   : > { %1835 = vst.msk [vmem:[%s3803_s24 + $0x20] sm:$0xff] %vm1262_vm3, %v1693_v49 }
 0x2c6   : > { %v2056_v28 = vpop.f32.mrb[6].mxu1 }
 0x2c7   : > { %v2032_v26 = vpop.f32.mrb[6].mxu0  ;;  %v1788_v16 = vadd.f32 %v2056_v28, %v3798_v20  ;;  %v1782_v23 = vpop.f32.mrb[7].mxu1 }
 0x2c8   : > { %v1708_v25 = vadd.f32 %v2032_v26, %v3798_v20  ;;  %v1702_v59 = vpop.f32.mrb[7].mxu0  ;;  %v1783_v58 = vadd.f32 %v3798_v20, %v1782_v23 }
 0x2c9   : > { %1854 = vst.msk [vmem:[%s3803_s24 + $0xb8] sm:$0xff] %vm1262_vm3, %v1788_v16  ;;  %v1703_v8 = vadd.f32 %v3798_v20, %v1702_v59 }
 0x2ca   : > { %1838 = vst.msk [vmem:[%s3803_s24 + $0x38] sm:$0xff] %vm1262_vm3, %v1708_v25  ;;  %1853 = vst.msk [vmem:[%s3803_s24 + $0xb0] sm:$0xff] %vm1262_vm3, %v1783_v58 }
 0x2cb   : > { %1837 = vst.msk [vmem:[%s3803_s24 + $0x30] sm:$0xff] %vm1262_vm3, %v1703_v8 }
 0x2ee   : > { %v2059_v41 = vpop.f32.mrb[8].mxu1 }
 0x2ef   : > { %v2035_v21 = vpop.f32.mrb[8].mxu0  ;;  %v1798_v61 = vadd.f32 %v2059_v41, %v3798_v20  ;;  %v1792_v38 = vpop.f32.mrb[9].mxu1 }
 0x2f0   : > { %v1718_v63 = vadd.f32 %v2035_v21, %v3798_v20  ;;  %v1712_v2 = vpop.f32.mrb[9].mxu0  ;;  %v1793_v51 = vadd.f32 %v3798_v20, %v1792_v38 }
 0x2f1   : > { %1856 = vst.msk [vmem:[%s3803_s24 + $0xc8] sm:$0xff] %vm1262_vm3, %v1798_v61  ;;  %v1713_v6 = vadd.f32 %v3798_v20, %v1712_v2 }
 0x2f2   : > { %1840 = vst.msk [vmem:[%s3803_s24 + $0x48] sm:$0xff] %vm1262_vm3, %v1718_v63  ;;  %1855 = vst.msk [vmem:[%s3803_s24 + $0xc0] sm:$0xff] %vm1262_vm3, %v1793_v51 }
 0x2f3   : > { %1839 = vst.msk [vmem:[%s3803_s24 + $0x40] sm:$0xff] %vm1262_vm3, %v1713_v6 }
 0x316   : > { %v2062_v27 = vpop.f32.mrb[10].mxu1 }
 0x317   : > { %v2038_v60 = vpop.f32.mrb[10].mxu0  ;;  %v1808_v24 = vadd.f32 %v2062_v27, %v3798_v20  ;;  %v1802_v45 = vpop.f32.mrb[11].mxu1 }
 0x318   : > { %v1728_v34 = vadd.f32 %v2038_v60, %v3798_v20  ;;  %v1722_v30 = vpop.f32.mrb[11].mxu0  ;;  %v1803_v5 = vadd.f32 %v3798_v20, %v1802_v45 }
 0x319   : > { %1858 = vst.msk [vmem:[%s3803_s24 + $0xd8] sm:$0xff] %vm1262_vm3, %v1808_v24  ;;  %v1723_v1 = vadd.f32 %v3798_v20, %v1722_v30 }
 0x31a   : > { %1842 = vst.msk [vmem:[%s3803_s24 + $0x58] sm:$0xff] %vm1262_vm3, %v1728_v34  ;;  %1857 = vst.msk [vmem:[%s3803_s24 + $0xd0] sm:$0xff] %vm1262_vm3, %v1803_v5 }
 0x31b   : > { %1841 = vst.msk [vmem:[%s3803_s24 + $0x50] sm:$0xff] %vm1262_vm3, %v1723_v1 }
 0x33e   : > { %v2065_v17 = vpop.f32.mrb[12].mxu1 }
 0x33f   : > { %v2041_v33 = vpop.f32.mrb[12].mxu0  ;;  %v1818_v14 = vadd.f32 %v2065_v17, %v3798_v20  ;;  %v1812_v18 = vpop.f32.mrb[13].mxu1 }
 0x340   : > { %v1738_v4 = vadd.f32 %v2041_v33, %v3798_v20  ;;  %v1732_v37 = vpop.f32.mrb[13].mxu0  ;;  %v1813_v50 = vadd.f32 %v3798_v20, %v1812_v18 }
 0x341   : > { %1860 = vst.msk [vmem:[%s3803_s24 + $0xe8] sm:$0xff] %vm1262_vm3, %v1818_v14  ;;  %v1733_v36 = vadd.f32 %v3798_v20, %v1732_v37 }
 0x342   : > { %1844 = vst.msk [vmem:[%s3803_s24 + $0x68] sm:$0xff] %vm1262_vm3, %v1738_v4  ;;  %1859 = vst.msk [vmem:[%s3803_s24 + $0xe0] sm:$0xff] %vm1262_vm3, %v1813_v50 }
 0x343   : > { %1843 = vst.msk [vmem:[%s3803_s24 + $0x60] sm:$0xff] %vm1262_vm3, %v1733_v36 }
 0x35a   : > { %v2068_v40 = vpop.f32.mrb[14].mxu1 }
 0x35b   : > { %v2044_v3 = vpop.f32.mrb[14].mxu0  ;;  %v1828_v57 = vadd.f32 %v2068_v40, %v3798_v20  ;;  %v1822_v39 = vpop.f32.mrb[15].mxu1 }
 0x35c   : > { %v1748_v9 = vadd.f32 %v2044_v3, %v3798_v20  ;;  %v1742_v22 = vpop.f32.mrb[15].mxu0  ;;  %v1823_v0 = vadd.f32 %v3798_v20, %v1822_v39 }
 0x35d   : > { %1862 = vst.msk [vmem:[%s3803_s24 + $0xf8] sm:$0xff] %vm1262_vm3, %v1828_v57  ;;  %v1743_v32 = vadd.f32 %v3798_v20, %v1742_v22 }
 0x35e   : > { %1846 = vst.msk [vmem:[%s3803_s24 + $0x78] sm:$0xff] %vm1262_vm3, %v1748_v9  ;;  %1861 = vst.msk [vmem:[%s3803_s24 + $0xf0] sm:$0xff] %vm1262_vm3, %v1823_v0 }
 0x35f   : > { %1845 = vst.msk [vmem:[%s3803_s24 + $0x70] sm:$0xff] %vm1262_vm3, %v1743_v32 }
 0x360 PF: > { %s13_s12 = sadd.s32 1, %s2136_s12  }
 0x361   : > { %p10_p4 = scmp.ge.s32.totalorder %s13_s12, 4  }
 0x363   :  { %12 = sbr.rel (!%p10_p4) target bundleno = 1 (0x1), region = 62 }

// kernel: wavemix_lite_classifier.11
= control target key start
LH: loop header
LB: loop body
LE: loop exit
PB: predicated region body
PF: predicated region fallthrough
CT: control target
= control target key end

     0   :  { %s2435_s28 = smov 112   ;;  %vm380_vm0 = vcmask 130048   ;;  %s2437_s26 = smov 8   ;;  %vm1345_vm1 = vcmask 31744   ;;  %vm1362_vm2 = vcmask 64512   ;;  %vm1379_vm3 = vcmask 97280   ;;  %s3500_s0 = inlined_call_operand.vmem [shape: f32[16,2,8,32], index: 0, kind: input, shape index: {}]   ;;  %s3501_s1 = inlined_call_operand.vmem [shape: f32[16,4], index: 1, kind: input, shape index: {}]   ;;  %s3502_s3 = inlined_call_operand.vmem [shape: f32[16,32], index: 3, kind: input, shape index: {}]   ;;  %s3503_s2 = inlined_call_operand.vmem [shape: f32[1,16], index: 2, kind: input, shape index: {}]   ;;  %s3504_s5 = inlined_call_operand.vmem [shape: f32[32,16], index: 5, kind: input, shape index: {}]   ;;  %s3505_s4 = inlined_call_operand.vmem [shape: f32[1,32], index: 4, kind: input, shape index: {}]   ;;  %s3506_s6 = inlined_call_operand.vmem [shape: f32[1,16], index: 6, kind: input, shape index: {}]   ;;  %s3507_s7 = inlined_call_operand.vmem [shape: f32[16,8,16], index: 7, kind: output, shape index: {}]  }
   0x1   :  { %v2482_v0 = vld [vmem:[%s3500_s0 + $0x10] sm:$0xff]  ;;  %v2487_v1 = vld [vmem:[%s3500_s0] sm:$0xff]  ;;  %v2496_v2 = vld [vmem:[%s3500_s0 + $0x18] sm:$0xff]  ;;  %vm1776_vm4 = vcmask 261120  }
   0x2   :  { %76 = vrot.lane.b32.xlu1 %v2482_v0, %s2435_s28  ;;  %74 = vrot.lane.b32.xlu0 %v2487_v1, %s2435_s28  ;;  %v2501_v3 = vld [vmem:[%s3500_s0 + $0x8] sm:$0xff]  ;;  %v2515_v5 = vld [vmem:[%s3500_s0 + $0x20] sm:$0xff] }
   0x3   :  { %v2510_v4 = vld [vmem:[%s3500_s0 + $0x28] sm:$0xff]  ;;  %v2524_v6 = vld [vmem:[%s3500_s0 + $0x38] sm:$0xff]  ;;  %v2529_v7 = vld [vmem:[%s3500_s0 + $0x30] sm:$0xff] }
   0x4   :  { %v378_v8 = vld [vmem:[%s3501_s1] sm:$0xff]  ;;  %v379_v9 = vld [vmem:[%s3501_s1 + $0x8] sm:$0xff]  ;;  %v2564_v13 = vld [vmem:[%s3500_s0 + $0x58] sm:$0xff] }
   0x5   :  { %v2541_v10 = vpack.c.bf16 %v379_v9, %v378_v8  ;;  %v2546_v11 = vld [vmem:[%s3500_s0 + $0x48] sm:$0xff]  ;;  %v2551_v12 = vld [vmem:[%s3500_s0 + $0x40] sm:$0xff]  ;;  %v2569_v14 = vld [vmem:[%s3500_s0 + $0x50] sm:$0xff] }
   0x6   :  { %156 = vrot.lane.b32.xlu1 %v2496_v2, %s2435_s28  ;;  %154 = vrot.lane.b32.xlu0 %v2501_v3, %s2435_s28  ;;  %v2580_v15 = vld [vmem:[%s3500_s0 + $0x68] sm:$0xff]  ;;  %v2585_v16 = vld [vmem:[%s3500_s0 + $0x60] sm:$0xff] }
   0x7   :  { %2372 = vmatprep.subr.bf16.mxu0 %v2541_v10  ;;  %2376 = vmatprep.subr.bf16.mxu1 %v2541_v10  ;;  %v2594_v17 = vld [vmem:[%s3500_s0 + $0x78] sm:$0xff]  ;;  %v2599_v18 = vld [vmem:[%s3500_s0 + $0x70] sm:$0xff]  ;;  %v2608_v19 = vld [vmem:[%s3500_s0 + $0x88] sm:$0xff] }
   0x8   :  { %2374 = vmatpush3.bf16.msra.mxu0 %v2541_v10  ;;  %2378 = vmatpush3.bf16.msra.mxu1 %v2541_v10  ;;  %v2613_v20 = vld [vmem:[%s3500_s0 + $0x80] sm:$0xff]  ;;  %v2622_v21 = vld [vmem:[%s3500_s0 + $0x98] sm:$0xff]  ;;  %v2627_v22 = vld [vmem:[%s3500_s0 + $0x90] sm:$0xff] }
   0x9   :  { %2380 = vmatprep.subr.bf16.mxu0 %v2541_v10  ;;  %2384 = vmatprep.subr.bf16.mxu1 %v2541_v10  ;;  %v2636_v23 = vld [vmem:[%s3500_s0 + $0xa8] sm:$0xff]  ;;  %v2641_v24 = vld [vmem:[%s3500_s0 + $0xa0] sm:$0xff]  ;;  %v2650_v25 = vld [vmem:[%s3500_s0 + $0xb8] sm:$0xff] }
   0xa   :  { %158 = vrot.lane.b32.xlu1 %v2510_v4, %s2435_s28  ;;  %78 = vrot.lane.b32.xlu0 %v2515_v5, %s2435_s28  ;;  %v2655_v26 = vld [vmem:[%s3500_s0 + $0xb0] sm:$0xff]  ;;  %v2664_v27 = vld [vmem:[%s3500_s0 + $0xc8] sm:$0xff] }
   0xb   :  { %v2669_v28 = vld [vmem:[%s3500_s0 + $0xc0] sm:$0xff]  ;;  %v2678_v29 = vld [vmem:[%s3500_s0 + $0xd8] sm:$0xff]  ;;  %v2683_v30 = vld [vmem:[%s3500_s0 + $0xd0] sm:$0xff] }
   0xc   :  { %v2692_v31 = vld [vmem:[%s3500_s0 + $0xe8] sm:$0xff]  ;;  %v2697_v32 = vld [vmem:[%s3500_s0 + $0xe0] sm:$0xff]  ;;  %v2706_v33 = vld [vmem:[%s3500_s0 + $0xf8] sm:$0xff] }
   0xd   :  { %v2711_v34 = vld [vmem:[%s3500_s0 + $0xf0] sm:$0xff]  ;;  %s2436_s0 = smov 4  }
   0xe   :  { %160 = vrot.lane.b32.xlu1 %v2524_v6, %s2435_s28  ;;  %80 = vrot.lane.b32.xlu0 %v2529_v7, %s2435_s28 }
  0x12   :  { %162 = vrot.lane.b32.xlu1 %v2546_v11, %s2435_s28  ;;  %82 = vrot.lane.b32.xlu0 %v2551_v12, %s2435_s28 }
  0x16   :  { %164 = vrot.lane.b32.xlu1 %v2564_v13, %s2435_s28  ;;  %84 = vrot.lane.b32.xlu0 %v2569_v14, %s2435_s28 }
  0x1a   :  { %166 = vrot.lane.b32.xlu1 %v2580_v15, %s2435_s28  ;;  %86 = vrot.lane.b32.xlu0 %v2585_v16, %s2435_s28 }
  0x1e   :  { %168 = vrot.lane.b32.xlu1 %v2594_v17, %s2435_s28  ;;  %88 = vrot.lane.b32.xlu0 %v2599_v18, %s2435_s28 }
  0x22   :  { %170 = vrot.lane.b32.xlu1 %v2608_v19, %s2435_s28  ;;  %90 = vrot.lane.b32.xlu0 %v2613_v20, %s2435_s28 }
  0x26   :  { %172 = vrot.lane.b32.xlu1 %v2622_v21, %s2435_s28  ;;  %92 = vrot.lane.b32.xlu0 %v2627_v22, %s2435_s28 }
  0x2a   :  { %174 = vrot.lane.b32.xlu1 %v2636_v23, %s2435_s28  ;;  %94 = vrot.lane.b32.xlu0 %v2641_v24, %s2435_s28 }
  0x2e   :  { %176 = vrot.lane.b32.xlu1 %v2650_v25, %s2435_s28  ;;  %96 = vrot.lane.b32.xlu0 %v2655_v26, %s2435_s28 }
  0x32   :  { %178 = vrot.lane.b32.xlu1 %v2664_v27, %s2435_s28  ;;  %98 = vrot.lane.b32.xlu0 %v2669_v28, %s2435_s28 }
  0x36   :  { %180 = vrot.lane.b32.xlu1 %v2678_v29, %s2435_s28  ;;  %100 = vrot.lane.b32.xlu0 %v2683_v30, %s2435_s28 }
  0x3a   :  { %182 = vrot.lane.b32.xlu1 %v2692_v31, %s2435_s28  ;;  %102 = vrot.lane.b32.xlu0 %v2697_v32, %s2435_s28 }
  0x3e   :  { %184 = vrot.lane.b32.xlu1 %v2706_v33, %s2435_s28  ;;  %104 = vrot.lane.b32.xlu0 %v2711_v34, %s2435_s28 }
  0x74   :  { %v77_v35 = vpop.permute.xlu1 %76  ;;  %v75_v36 = vpop.permute.xlu0 %74 }
  0x75   :  { %v2718_v37 = vadd.f32 %v77_v35, %v2482_v0  ;;  %v2721_v38 = vsub.f32 %v2482_v0, %v77_v35  ;;  %v2736_v45 = vadd.f32 %v75_v36, %v2487_v1  ;;  %v2739_v46 = vsub.f32 %v2487_v1, %v75_v36 }
  0x78   :  { %v157_v39 = vpop.permute.xlu1 %156  ;;  %v155_v40 = vpop.permute.xlu0 %154 }
  0x79   :  { %v2724_v41 = vadd.f32 %v157_v39, %v2496_v2  ;;  %v2727_v42 = vsub.f32 %v2496_v2, %v157_v39  ;;  %v2730_v43 = vadd.f32 %v155_v40, %v2501_v3  ;;  %v2733_v44 = vsub.f32 %v2501_v3, %v155_v40 }
  0x7b   :  { %v219_v47 = vadd.f32 %v2724_v41, %v2718_v37  ;;  %v283_v48 = vadd.f32 %v2727_v42, %v2721_v38  ;;  %v218_v51 = vadd.f32 %v2730_v43, %v2736_v45  ;;  %v282_v52 = vadd.f32 %v2733_v44, %v2739_v46 }
  0x7c   :  { %v159_v49 = vpop.permute.xlu1 %158  ;;  %v79_v50 = vpop.permute.xlu0 %78 }
  0x7d   :  { %v235_v53 = vmul.f32 0.5, %v219_v47  ;;  %v299_v54 = vmul.f32 0.5, %v283_v48  ;;  %v2750_v55 = vadd.f32 %v159_v49, %v2510_v4  ;;  %v2753_v56 = vsub.f32 %v2510_v4, %v159_v49 }
  0x7e   :  { %v2756_v57 = vadd.f32 %v79_v50, %v2515_v5  ;;  %v2759_v58 = vsub.f32 %v2515_v5, %v79_v50  ;;  %v234_v59 = vmul.f32 0.5, %v218_v51  ;;  %v298_v60 = vmul.f32 0.5, %v282_v52 }
  0x80   :  { %v161_v61 = vpop.permute.xlu1 %160  ;;  %v81_v62 = vpop.permute.xlu0 %80  ;;  %v220_v63 = vadd.f32 %v2750_v55, %v2756_v57  ;;  %v284_v0 = vadd.f32 %v2753_v56, %v2759_v58  ;;  %2203 = vmatprep.mubr.msk.f32.mxu0 %vm380_vm0, %v234_v59  ;;  %2231 = vmatprep.mubr.msk.f32.mxu1 %vm380_vm0, %v298_v60 }
  0x81   :  { %v2768_v1 = vadd.f32 %v161_v61, %v2524_v6  ;;  %v2771_v2 = vsub.f32 %v2524_v6, %v161_v61  ;;  %2204 = vmatmul.mubr.msk.f32.vlgmr.msra.gmra.mrb[0].mxu0 %vm380_vm0, %v235_v53  ;;  %v2775_v3 = vadd.f32 %v81_v62, %v2529_v7  ;;  %2232 = vmatmul.mubr.msk.f32.vlgmr.msra.gmra.mrb[0].mxu1 %vm380_vm0, %v299_v54 }
  0x82   :  { %v236_v4 = vmul.f32 0.5, %v220_v63  ;;  %v300_v5 = vmul.f32 0.5, %v284_v0  ;;  %2382 = vmatpush3.bf16.msra.mxu0 %v2541_v10  ;;  %v2782_v9 = vsub.f32 %v2529_v7, %v81_v62  ;;  %2386 = vmatpush3.bf16.msra.mxu1 %v2541_v10 }
  0x83   :  { %v221_v8 = vadd.f32 %v2768_v1, %v2775_v3 }
  0x84   :  { %v163_v35 = vpop.permute.xlu1 %162  ;;  %v83_v6 = vpop.permute.xlu0 %82  ;;  %2206 = vmatprep.mubr.msk.f32.mxu0 %vm380_vm0, %v236_v4  ;;  %2234 = vmatprep.mubr.msk.f32.mxu1 %vm380_vm0, %v300_v5  ;;  %v285_v7 = vadd.f32 %v2771_v2, %v2782_v9 }
  0x85   :  { %v2788_v36 = vadd.f32 %v163_v35, %v2546_v11  ;;  %v2791_v39 = vsub.f32 %v2546_v11, %v163_v35  ;;  %v2794_v40 = vadd.f32 %v83_v6, %v2551_v12  ;;  %v237_v47 = vmul.f32 0.5, %v221_v8 }
  0x86   :  { %v2801_v48 = vsub.f32 %v2551_v12, %v83_v6  ;;  %v301_v49 = vmul.f32 0.5, %v285_v7 }
  0x87   :  { %v222_v10 = vadd.f32 %v2788_v36, %v2794_v40  ;;  %2207 = vmatmul.mubr.msk.f32.gmra.mrb[2].mxu0 %vm380_vm0, %v237_v47 }
  0x88   :  { %v165_v50 = vpop.permute.xlu1 %164  ;;  %v85_v51 = vpop.permute.xlu0 %84  ;;  %v286_v52 = vadd.f32 %v2791_v39, %v2801_v48  ;;  %2235 = vmatmul.mubr.msk.f32.gmra.mrb[2].mxu1 %vm380_vm0, %v301_v49 }
  0x89   :  { %v238_v11 = vmul.f32 0.5, %v222_v10  ;;  %v2808_v53 = vadd.f32 %v165_v50, %v2564_v13  ;;  %v2811_v54 = vsub.f32 %v2564_v13, %v165_v50  ;;  %v2814_v12 = vadd.f32 %v85_v51, %v2569_v14 }
  0x8a   :  { %v2817_v59 = vsub.f32 %v2569_v14, %v85_v51  ;;  %v302_v60 = vmul.f32 0.5, %v286_v52 }
  0x8b   :  { %2209 = vmatprep.mubr.msk.f32.mxu0 %vm380_vm0, %v238_v11  ;;  %v223_v61 = vadd.f32 %v2808_v53, %v2814_v12 }
  0x8c   :  { %v287_v62 = vadd.f32 %v2811_v54, %v2817_v59  ;;  %v167_v63 = vpop.permute.xlu1 %166  ;;  %v87_v0 = vpop.permute.xlu0 %86  ;;  %2237 = vmatprep.mubr.msk.f32.mxu1 %vm380_vm0, %v302_v60 }
  0x8d   :  { %v2826_v13 = vadd.f32 %v167_v63, %v2580_v15  ;;  %v2829_v4 = vsub.f32 %v2580_v15, %v167_v63  ;;  %v2832_v14 = vadd.f32 %v87_v0, %v2585_v16  ;;  %v2835_v5 = vsub.f32 %v2585_v16, %v87_v0 }
  0x8e   :  { %v239_v8 = vmul.f32 0.5, %v223_v61  ;;  %v303_v35 = vmul.f32 0.5, %v287_v62 }
  0x8f   :  { %v224_v6 = vadd.f32 %v2826_v13, %v2832_v14  ;;  %v288_v47 = vadd.f32 %v2829_v4, %v2835_v5 }
  0x90   :  { %2210 = vmatmul.mubr.msk.f32.gmra.mrb[4].mxu0 %vm380_vm0, %v239_v8  ;;  %2238 = vmatmul.mubr.msk.f32.gmra.mrb[4].mxu1 %vm380_vm0, %v303_v35  ;;  %v169_v15 = vpop.permute.xlu1 %168  ;;  %v89_v7 = vpop.permute.xlu0 %88 }
  0x91   :  { %v240_v10 = vmul.f32 0.5, %v224_v6  ;;  %v304_v49 = vmul.f32 0.5, %v288_v47  ;;  %v2844_v50 = vadd.f32 %v169_v15, %v2594_v17  ;;  %v2847_v16 = vsub.f32 %v2594_v17, %v169_v15 }
  0x92   :  { %v2850_v51 = vadd.f32 %v89_v7, %v2599_v18  ;;  %v2853_v11 = vsub.f32 %v2599_v18, %v89_v7 }
  0x93   :  { %2212 = vmatprep.mubr.msk.f32.mxu0 %vm380_vm0, %v240_v10  ;;  %2240 = vmatprep.mubr.msk.f32.mxu1 %vm380_vm0, %v304_v49 }
  0x94   :  { %v225_v52 = vadd.f32 %v2844_v50, %v2850_v51  ;;  %v289_v60 = vadd.f32 %v2847_v16, %v2853_v11  ;;  %v171_v61 = vpop.permute.xlu1 %170  ;;  %v91_v62 = vpop.permute.xlu0 %90 }
  0x95   :  { %v2862_v17 = vadd.f32 %v171_v61, %v2608_v19  ;;  %v2865_v63 = vsub.f32 %v2608_v19, %v171_v61  ;;  %v2868_v18 = vadd.f32 %v91_v62, %v2613_v20  ;;  %v2871_v0 = vsub.f32 %v2613_v20, %v91_v62 }
  0x96   :  { %v241_v8 = vmul.f32 0.5, %v225_v52  ;;  %v305_v35 = vmul.f32 0.5, %v289_v60 }
  0x97   :  { %v226_v6 = vadd.f32 %v2862_v17, %v2868_v18  ;;  %v290_v47 = vadd.f32 %v2865_v63, %v2871_v0 }
  0x98   :  { %2213 = vmatmul.mubr.msk.f32.gmra.mrb[6].mxu0 %vm380_vm0, %v241_v8  ;;  %2241 = vmatmul.mubr.msk.f32.gmra.mrb[6].mxu1 %vm380_vm0, %v305_v35  ;;  %v173_v19 = vpop.permute.xlu1 %172  ;;  %v93_v15 = vpop.permute.xlu0 %92 }
  0x99   :  { %v242_v7 = vmul.f32 0.5, %v226_v6  ;;  %v306_v10 = vmul.f32 0.5, %v290_v47  ;;  %v2880_v49 = vadd.f32 %v173_v19, %v2622_v21  ;;  %v2883_v20 = vsub.f32 %v2622_v21, %v173_v19 }
  0x9a   :  { %v2886_v52 = vadd.f32 %v93_v15, %v2627_v22  ;;  %v2889_v60 = vsub.f32 %v2627_v22, %v93_v15 }
  0x9b   :  { %3519 = vst [vmem:[#allocation2_spill] sm:$0xff] %v2883_v20  ;;  %2215 = vmatprep.mubr.msk.f32.mxu0 %vm380_vm0, %v242_v7  ;;  %2243 = vmatprep.mubr.msk.f32.mxu1 %vm380_vm0, %v306_v10 }
  0x9c   :  { %3520 = vst [vmem:[#allocation3_spill] sm:$0xff] %v2886_v52  ;;  %3521 = vst [vmem:[#allocation4_spill] sm:$0xff] %v2889_v60  ;;  %v227_v61 = vadd.f32 %v2880_v49, %v2886_v52  ;;  %v291_v62 = vadd.f32 %v2883_v20, %v2889_v60  ;;  %v175_v8 = vpop.permute.xlu1 %174  ;;  %v95_v35 = vpop.permute.xlu0 %94 }
  0x9d   :  { %v2898_v21 = vadd.f32 %v175_v8, %v2636_v23  ;;  %v2901_v6 = vsub.f32 %v2636_v23, %v175_v8  ;;  %v2904_v22 = vadd.f32 %v95_v35, %v2641_v24  ;;  %v2907_v47 = vsub.f32 %v2641_v24, %v95_v35 }
  0x9e   :  { %v243_v19 = vmul.f32 0.5, %v227_v61  ;;  %v307_v15 = vmul.f32 0.5, %v291_v62 }
  0x9f   :  { %v228_v7 = vadd.f32 %v2898_v21, %v2904_v22  ;;  %v292_v10 = vadd.f32 %v2901_v6, %v2907_v47 }
  0xa0   :  { %2216 = vmatmul.mubr.msk.f32.gmra.mrb[8].mxu0 %vm380_vm0, %v243_v19  ;;  %2244 = vmatmul.mubr.msk.f32.gmra.mrb[8].mxu1 %vm380_vm0, %v307_v15  ;;  %v177_v23 = vpop.permute.xlu1 %176  ;;  %v97_v8 = vpop.permute.xlu0 %96 }
  0xa1   :  { %v244_v60 = vmul.f32 0.5, %v228_v7  ;;  %v308_v20 = vmul.f32 0.5, %v292_v10  ;;  %v2916_v52 = vadd.f32 %v177_v23, %v2650_v25  ;;  %v2919_v24 = vsub.f32 %v2650_v25, %v177_v23 }
  0xa2   :  { %v2922_v61 = vadd.f32 %v97_v8, %v2655_v26  ;;  %v2925_v62 = vsub.f32 %v2655_v26, %v97_v8 }
  0xa3   :  { %3522 = vst [vmem:[#allocation5_spill] sm:$0xff] %v2916_v52  ;;  %3523 = vst [vmem:[#allocation6_spill] sm:$0xff] %v2919_v24  ;;  %2218 = vmatprep.mubr.msk.f32.mxu0 %vm380_vm0, %v244_v60  ;;  %2246 = vmatprep.mubr.msk.f32.mxu1 %vm380_vm0, %v308_v20 }
  0xa4   :  { %3524 = vst [vmem:[#allocation7_spill] sm:$0xff] %v2922_v61  ;;  %3525 = vst [vmem:[#allocation8_spill] sm:$0xff] %v2925_v62  ;;  %v229_v35 = vadd.f32 %v2916_v52, %v2922_v61  ;;  %v293_v19 = vadd.f32 %v2919_v24, %v2925_v62  ;;  %v179_v15 = vpop.permute.xlu1 %178  ;;  %v99_v7 = vpop.permute.xlu0 %98 }
  0xa5   :  { %v2934_v25 = vadd.f32 %v179_v15, %v2664_v27  ;;  %v2937_v10 = vsub.f32 %v2664_v27, %v179_v15  ;;  %v2940_v26 = vadd.f32 %v99_v7, %v2669_v28  ;;  %v2943_v60 = vsub.f32 %v2669_v28, %v99_v7 }
  0xa6   :  { %v245_v20 = vmul.f32 0.5, %v229_v35  ;;  %v309_v23 = vmul.f32 0.5, %v293_v19 }
  0xa7   :  { %v230_v8 = vadd.f32 %v2934_v25, %v2940_v26  ;;  %v294_v62 = vadd.f32 %v2937_v10, %v2943_v60 }
  0xa8   :  { %2219 = vmatmul.mubr.msk.f32.gmra.mrb[10].mxu0 %vm380_vm0, %v245_v20  ;;  %2247 = vmatmul.mubr.msk.f32.gmra.mrb[10].mxu1 %vm380_vm0, %v309_v23  ;;  %v181_v27 = vpop.permute.xlu1 %180  ;;  %v101_v15 = vpop.permute.xlu0 %100 }
  0xa9   :  { %v246_v24 = vmul.f32 0.5, %v230_v8  ;;  %v310_v61 = vmul.f32 0.5, %v294_v62  ;;  %v2952_v52 = vadd.f32 %v181_v27, %v2678_v29  ;;  %v2955_v28 = vsub.f32 %v2678_v29, %v181_v27 }
  0xaa   :  { %v2958_v35 = vadd.f32 %v101_v15, %v2683_v30  ;;  %v2961_v19 = vsub.f32 %v2683_v30, %v101_v15 }
  0xab   :  { %3526 = vst [vmem:[#allocation9_spill] sm:$0xff] %v2952_v52  ;;  %3527 = vst [vmem:[#allocation10_spill] sm:$0xff] %v2955_v28  ;;  %2221 = vmatprep.mubr.msk.f32.mxu0 %vm380_vm0, %v246_v24  ;;  %2249 = vmatprep.mubr.msk.f32.mxu1 %vm380_vm0, %v310_v61 }
  0xac   :  { %3528 = vst [vmem:[#allocation11_spill] sm:$0xff] %v2958_v35  ;;  %3529 = vst [vmem:[#allocation12_spill] sm:$0xff] %v2961_v19  ;;  %v231_v7 = vadd.f32 %v2952_v52, %v2958_v35  ;;  %v295_v62 = vadd.f32 %v2955_v28, %v2961_v19  ;;  %v183_v20 = vpop.permute.xlu1 %182  ;;  %v103_v23 = vpop.permute.xlu0 %102 }
  0xad   :  { %v2970_v29 = vadd.f32 %v183_v20, %v2692_v31  ;;  %v2973_v8 = vsub.f32 %v2692_v31, %v183_v20  ;;  %v2976_v30 = vadd.f32 %v103_v23, %v2697_v32  ;;  %v2979_v24 = vsub.f32 %v2697_v32, %v103_v23 }
  0xae   :  { %v247_v61 = vmul.f32 0.5, %v231_v7  ;;  %v311_v27 = vmul.f32 0.5, %v295_v62  ;;  %v314_v23 = vsub.f32 %v2736_v45, %v2730_v43 }
  0xaf   :  { %v232_v15 = vadd.f32 %v2970_v29, %v2976_v30  ;;  %v296_v19 = vadd.f32 %v2973_v8, %v2979_v24 }
  0xb0   :  { %2222 = vmatmul.mubr.msk.f32.gmra.mrb[12].mxu0 %vm380_vm0, %v247_v61  ;;  %2250 = vmatmul.mubr.msk.f32.gmra.mrb[12].mxu1 %vm380_vm0, %v311_v27  ;;  %v185_v31 = vpop.permute.xlu1 %184  ;;  %v105_v20 = vpop.permute.xlu0 %104  ;;  %v346_v61 = vsub.f32 %v2739_v46, %v2733_v44  ;;  %v347_v27 = vsub.f32 %v2721_v38, %v2727_v42  ;;  %v316_v46 = vsub.f32 %v2756_v57, %v2750_v55 }
  0xb1   :  { %v248_v28 = vmul.f32 0.5, %v232_v15  ;;  %v312_v35 = vmul.f32 0.5, %v296_v19  ;;  %v2988_v52 = vadd.f32 %v185_v31, %v2706_v33  ;;  %v2991_v32 = vsub.f32 %v2706_v33, %v185_v31  ;;  %v3532_v31 = vld [vmem:[#allocation4_spill] sm:$0xff] }
  0xb2   :  { %v2994_v7 = vadd.f32 %v105_v20, %v2711_v34  ;;  %v2997_v62 = vsub.f32 %v2711_v34, %v105_v20  ;;  %v315_v34 = vsub.f32 %v2718_v37, %v2724_v41  ;;  %v330_v15 = vmul.f32 0.5, %v314_v23 }
  0xb3   :  { %2224 = vmatprep.mubr.msk.f32.mxu0 %vm380_vm0, %v248_v28  ;;  %2252 = vmatprep.mubr.msk.f32.mxu1 %vm380_vm0, %v312_v35  ;;  %v362_v44 = vmul.f32 0.5, %v346_v61  ;;  %v348_v28 = vsub.f32 %v2759_v58, %v2753_v56  ;;  %v363_v38 = vmul.f32 0.5, %v347_v27  ;;  %v317_v41 = vsub.f32 %v2775_v3, %v2768_v1  ;;  %v3531_v35 = vld [vmem:[#allocation2_spill] sm:$0xff]  ;;  %v3533_v61 = vld [vmem:[#allocation5_spill] sm:$0xff]  ;;  %v3536_v27 = vld [vmem:[#allocation8_spill] sm:$0xff] }
  0xb4   :  { %v233_v33 = vadd.f32 %v2988_v52, %v2994_v7  ;;  %v297_v19 = vadd.f32 %v2991_v32, %v2997_v62  ;;  %v331_v37 = vmul.f32 0.5, %v315_v34  ;;  %v349_v42 = vsub.f32 %v2782_v9, %v2771_v2  ;;  %v3535_v34 = vld [vmem:[#allocation6_spill] sm:$0xff] }
  0xb5   :  { %v332_v55 = vmul.f32 0.5, %v316_v46  ;;  %v364_v57 = vmul.f32 0.5, %v348_v28  ;;  %v318_v56 = vsub.f32 %v2794_v40, %v2788_v36  ;;  %v350_v58 = vsub.f32 %v2801_v48, %v2791_v39  ;;  %v3538_v46 = vld [vmem:[#allocation11_spill] sm:$0xff] }
  0xb6   :  { %v249_v43 = vmul.f32 0.5, %v233_v33  ;;  %v313_v45 = vmul.f32 0.5, %v297_v19  ;;  %v333_v1 = vmul.f32 0.5, %v317_v41  ;;  %v365_v3 = vmul.f32 0.5, %v349_v42  ;;  %v3534_v33 = vld [vmem:[#allocation7_spill] sm:$0xff] }
  0xb7   :  { %v319_v2 = vsub.f32 %v2814_v12, %v2808_v53  ;;  %v351_v9 = vsub.f32 %v2817_v59, %v2811_v54  ;;  %v334_v36 = vmul.f32 0.5, %v318_v56  ;;  %v366_v40 = vmul.f32 0.5, %v350_v58 }
  0xb8   :  { %2225 = vmatmul.mubr.msk.f32.gmra.mrb[14].mxu0 %vm380_vm0, %v249_v43  ;;  %2253 = vmatmul.mubr.msk.f32.gmra.mrb[14].mxu1 %vm380_vm0, %v313_v45  ;;  %v320_v39 = vsub.f32 %v2832_v14, %v2826_v13  ;;  %v352_v48 = vsub.f32 %v2835_v5, %v2829_v4  ;;  %v321_v54 = vsub.f32 %v2850_v51, %v2844_v50 }
  0xb9   :  { %2259 = vmatprep.mubr.msk.f32.mxu0 %vm380_vm0, %v330_v15  ;;  %2287 = vmatprep.mubr.msk.f32.mxu1 %vm380_vm0, %v362_v44  ;;  %v335_v53 = vmul.f32 0.5, %v319_v2  ;;  %v367_v12 = vmul.f32 0.5, %v351_v9  ;;  %v353_v59 = vsub.f32 %v2853_v11, %v2847_v16  ;;  %v322_v4 = vsub.f32 %v2868_v18, %v2862_v17  ;;  %v3530_v16 = vld [vmem:[#allocation3_spill] sm:$0xff]  ;;  %v3537_v44 = vld [vmem:[#allocation9_spill] sm:$0xff] }
  0xba   :  { %v336_v13 = vmul.f32 0.5, %v320_v39  ;;  %v368_v14 = vmul.f32 0.5, %v352_v48  ;;  %v354_v5 = vsub.f32 %v2871_v0, %v2865_v63  ;;  %v337_v50 = vmul.f32 0.5, %v321_v54 }
  0xbb   :  { %v369_v51 = vmul.f32 0.5, %v353_v59  ;;  %v323_v11 = vsub.f32 %v3530_v16, %v2880_v49  ;;  %v355_v20 = vsub.f32 %v3532_v31, %v3531_v35  ;;  %v338_v17 = vmul.f32 0.5, %v322_v4 }
  0xbc   :  { %2260 = vmatmul.mubr.msk.f32.vlgmr.msra.gmra.mrb[16].mxu0 %vm380_vm0, %v331_v37  ;;  %2288 = vmatmul.mubr.msk.f32.vlgmr.msra.gmra.mrb[16].mxu1 %vm380_vm0, %v363_v38  ;;  %v370_v18 = vmul.f32 0.5, %v354_v5  ;;  %v324_v63 = vsub.f32 %v2904_v22, %v2898_v21  ;;  %v356_v0 = vsub.f32 %v2907_v47, %v2901_v6  ;;  %v325_v19 = vsub.f32 %v3534_v33, %v3533_v61  ;;  %v3539_v37 = vld [vmem:[#allocation10_spill] sm:$0xff]  ;;  %v3540_v38 = vld [vmem:[#allocation12_spill] sm:$0xff] }
  0xbd   :  { %2262 = vmatprep.mubr.msk.f32.mxu0 %vm380_vm0, %v332_v55  ;;  %2290 = vmatprep.mubr.msk.f32.mxu1 %vm380_vm0, %v364_v57  ;;  %v339_v49 = vmul.f32 0.5, %v323_v11  ;;  %v371_v23 = vmul.f32 0.5, %v355_v20  ;;  %v357_v43 = vsub.f32 %v3536_v27, %v3535_v34  ;;  %v326_v6 = vsub.f32 %v2940_v26, %v2934_v25 }
  0xbe   :  { %v340_v21 = vmul.f32 0.5, %v324_v63  ;;  %v372_v22 = vmul.f32 0.5, %v356_v0  ;;  %v358_v47 = vsub.f32 %v2943_v60, %v2937_v10  ;;  %v341_v45 = vmul.f32 0.5, %v325_v19 }
  0xbf   :  { %v373_v15 = vmul.f32 0.5, %v357_v43  ;;  %v327_v28 = vsub.f32 %v3538_v46, %v3537_v44  ;;  %v359_v41 = vsub.f32 %v3540_v38, %v3539_v37  ;;  %v342_v25 = vmul.f32 0.5, %v326_v6 }
  0xc0   :  { %2263 = vmatmul.mubr.msk.f32.gmra.mrb[18].mxu0 %vm380_vm0, %v333_v1  ;;  %2291 = vmatmul.mubr.msk.f32.gmra.mrb[18].mxu1 %vm380_vm0, %v365_v3  ;;  %v374_v26 = vmul.f32 0.5, %v358_v47  ;;  %v328_v10 = vsub.f32 %v2976_v30, %v2970_v29  ;;  %v360_v60 = vsub.f32 %v2979_v24, %v2973_v8  ;;  %v329_v57 = vsub.f32 %v2994_v7, %v2988_v52 }
  0xc1   :  { %2265 = vmatprep.mubr.msk.f32.mxu0 %vm380_vm0, %v334_v36  ;;  %2293 = vmatprep.mubr.msk.f32.mxu1 %vm380_vm0, %v366_v40  ;;  %v343_v42 = vmul.f32 0.5, %v327_v28  ;;  %v375_v55 = vmul.f32 0.5, %v359_v41  ;;  %v361_v56 = vsub.f32 %v2997_v62, %v2991_v32 }
  0xc2   :  { %v344_v29 = vmul.f32 0.5, %v328_v10  ;;  %v376_v30 = vmul.f32 0.5, %v360_v60  ;;  %v345_v8 = vmul.f32 0.5, %v329_v57 }
  0xc3   :  { %v377_v24 = vmul.f32 0.5, %v361_v56 }
  0xc4   :  { %2266 = vmatmul.mubr.msk.f32.gmra.mrb[20].mxu0 %vm380_vm0, %v335_v53  ;;  %2294 = vmatmul.mubr.msk.f32.gmra.mrb[20].mxu1 %vm380_vm0, %v367_v12 }
  0xc5   :  { %2268 = vmatprep.mubr.msk.f32.mxu0 %vm380_vm0, %v336_v13  ;;  %2296 = vmatprep.mubr.msk.f32.mxu1 %vm380_vm0, %v368_v14 }
  0xc8   :  { %2269 = vmatmul.mubr.msk.f32.gmra.mrb[22].mxu0 %vm380_vm0, %v337_v50  ;;  %2297 = vmatmul.mubr.msk.f32.gmra.mrb[22].mxu1 %vm380_vm0, %v369_v51 }
  0xc9   :  { %2271 = vmatprep.mubr.msk.f32.mxu0 %vm380_vm0, %v338_v17  ;;  %2299 = vmatprep.mubr.msk.f32.mxu1 %vm380_vm0, %v370_v18  ;;  %v1419_v17 = vld [vmem:[%s3502_s3] sm:$0xff]  ;;  %v1420_v18 = vld [vmem:[%s3502_s3 + $0x8] sm:$0xff]  ;;  %s2438_s3 = smov 12  }
  0xca   :  { %v2387_v63 = vpack.c.bf16 %v1420_v18, %v1419_v17 }
  0xcc   :  { %2272 = vmatmul.mubr.msk.f32.gmra.mrb[24].mxu0 %vm380_vm0, %v339_v49  ;;  %2300 = vmatmul.mubr.msk.f32.gmra.mrb[24].mxu1 %vm380_vm0, %v371_v23 }
  0xcd   :  { %2274 = vmatprep.mubr.msk.f32.mxu0 %vm380_vm0, %v340_v21  ;;  %2302 = vmatprep.mubr.msk.f32.mxu1 %vm380_vm0, %v372_v22 }
  0xce   :  { %2388 = vmatprep.subr.bf16.mxu0 %v2387_v63 }
  0xcf   :  { %2390 = vmatpush3.bf16.msra.mxu0 %v2387_v63 }
  0xd0   :  { %2275 = vmatmul.mubr.msk.f32.gmra.mrb[26].mxu0 %vm380_vm0, %v341_v45  ;;  %2303 = vmatmul.mubr.msk.f32.gmra.mrb[26].mxu1 %vm380_vm0, %v373_v15 }
  0xd1   :  { %2277 = vmatprep.mubr.msk.f32.mxu0 %vm380_vm0, %v342_v25  ;;  %2305 = vmatprep.mubr.msk.f32.mxu1 %vm380_vm0, %v374_v26 }
  0xd4   :  { %2278 = vmatmul.mubr.msk.f32.gmra.mrb[28].mxu0 %vm380_vm0, %v343_v42  ;;  %2306 = vmatmul.mubr.msk.f32.gmra.mrb[28].mxu1 %vm380_vm0, %v375_v55 }
  0xd5   :  { %2280 = vmatprep.mubr.msk.f32.mxu0 %vm380_vm0, %v344_v29  ;;  %2308 = vmatprep.mubr.msk.f32.mxu1 %vm380_vm0, %v376_v30 }
  0xd8   :  { %2281 = vmatmul.mubr.msk.f32.gmra.mrb[30].mxu0 %vm380_vm0, %v345_v8  ;;  %2309 = vmatmul.mubr.msk.f32.gmra.mrb[30].mxu1 %vm380_vm0, %v377_v24 }
 0x154   :  { %v3103_v52 = vpop.f32.mrb[0].mxu0  ;;  %v2233_v7 = vpop.f32.mrb[0].mxu1 }
 0x155   :  { %v3105_v32 = vpop.f32.mrb[1].mxu0  ;;  %1171 = vrot.lane.b32.xlu1 %v2233_v7, %s2436_s0  ;;  %v688_v62 = vpop.f32.mrb[1].mxu1 }
 0x156   :  { %1169 = vrot.lane.b32.xlu0 %v688_v62, %s2436_s0 }
 0x15a   :  { %v3109_v58 = vpop.f32.mrb[2].mxu0 }
 0x15b   :  { %v3111_v1 = vpop.f32.mrb[3].mxu0  ;;  %v2236_v3 = vpop.f32.mrb[2].mxu1 }
 0x15c   :  { %1175 = vrot.lane.b32.xlu1 %v2236_v3, %s2436_s0  ;;  %v698_v2 = vpop.f32.mrb[3].mxu1 }
 0x15d   :  { %1173 = vrot.lane.b32.xlu0 %v698_v2, %s2436_s0 }
 0x163   :  { %v3115_v9 = vpop.f32.mrb[4].mxu0  ;;  %v2239_v36 = vpop.f32.mrb[4].mxu1 }
 0x164   :  { %v3117_v40 = vpop.f32.mrb[5].mxu0  ;;  %1179 = vrot.lane.b32.xlu1 %v2239_v36, %s2436_s0  ;;  %v708_v39 = vpop.f32.mrb[5].mxu1 }
 0x165   :  { %1177 = vrot.lane.b32.xlu0 %v708_v39, %s2436_s0 }
 0x16b   :  { %v3121_v48 = vpop.f32.mrb[6].mxu0  ;;  %v2242_v53 = vpop.f32.mrb[6].mxu1 }
 0x16c   :  { %v3123_v12 = vpop.f32.mrb[7].mxu0  ;;  %1183 = vrot.lane.b32.xlu1 %v2242_v53, %s2436_s0  ;;  %v718_v54 = vpop.f32.mrb[7].mxu1 }
 0x16d   :  { %1181 = vrot.lane.b32.xlu0 %v718_v54, %s2436_s0 }
 0x173   :  { %v3127_v59 = vpop.f32.mrb[8].mxu0  ;;  %v2245_v13 = vpop.f32.mrb[8].mxu1 }
 0x174   :  { %v3129_v14 = vpop.f32.mrb[9].mxu0  ;;  %1187 = vrot.lane.b32.xlu1 %v2245_v13, %s2436_s0  ;;  %v728_v4 = vpop.f32.mrb[9].mxu1 }
 0x175   :  { %1185 = vrot.lane.b32.xlu0 %v728_v4, %s2436_s0 }
 0x17b   :  { %v3133_v5 = vpop.f32.mrb[10].mxu0  ;;  %v2248_v50 = vpop.f32.mrb[10].mxu1 }
 0x17c   :  { %v3135_v51 = vpop.f32.mrb[11].mxu0  ;;  %1191 = vrot.lane.b32.xlu1 %v2248_v50, %s2436_s0  ;;  %v738_v16 = vpop.f32.mrb[11].mxu1 }
 0x17d   :  { %1189 = vrot.lane.b32.xlu0 %v738_v16, %s2436_s0 }
 0x183   :  { %v3139_v11 = vpop.f32.mrb[12].mxu0  ;;  %v2251_v35 = vpop.f32.mrb[12].mxu1 }
 0x184   :  { %v3141_v31 = vpop.f32.mrb[13].mxu0  ;;  %1195 = vrot.lane.b32.xlu1 %v2251_v35, %s2436_s0  ;;  %v748_v20 = vpop.f32.mrb[13].mxu1 }
 0x185   :  { %1193 = vrot.lane.b32.xlu0 %v748_v20, %s2436_s0 }
 0x18b   :  { %v3151_v0 = vpop.f32.mrb[14].mxu0  ;;  %v2254_v49 = vpop.f32.mrb[14].mxu1 }
 0x18c   :  { %v3153_v23 = vpop.f32.mrb[15].mxu0  ;;  %1199 = vrot.lane.b32.xlu1 %v2254_v49, %s2436_s0  ;;  %v758_v61 = vpop.f32.mrb[15].mxu1 }
 0x18d   :  { %1197 = vrot.lane.b32.xlu0 %v758_v61, %s2436_s0 }
 0x18f   :  { %v2261_v33 = vpop.f32.mrb[16].mxu0  ;;  %v2289_v19 = vpop.f32.mrb[16].mxu1 }
 0x190   :  { %v881_v34 = vpop.f32.mrb[17].mxu0  ;;  %1235 = vrot.lane.b32.xlu1 %v2261_v33, %s2437_s26  ;;  %v1074_v27 = vpop.f32.mrb[17].mxu1 }
 0x191   :  { %1233 = vrot.lane.b32.xlu0 %v881_v34, %s2437_s26 }
 0x193   :  { %v2264_v43 = vpop.f32.mrb[18].mxu0  ;;  %v2292_v21 = vpop.f32.mrb[18].mxu1 }
 0x194   :  { %v891_v22 = vpop.f32.mrb[19].mxu0  ;;  %1299 = vrot.lane.b32.xlu1 %v2289_v19, %s2438_s3  ;;  %v1084_v6 = vpop.f32.mrb[19].mxu1 }
 0x195   :  { %1297 = vrot.lane.b32.xlu0 %v1074_v27, %s2438_s3 }
 0x197   :  { %v2267_v47 = vpop.f32.mrb[20].mxu0  ;;  %v2295_v45 = vpop.f32.mrb[20].mxu1 }
 0x198   :  { %v901_v15 = vpop.f32.mrb[21].mxu0  ;;  %1239 = vrot.lane.b32.xlu1 %v2264_v43, %s2437_s26  ;;  %v1094_v44 = vpop.f32.mrb[21].mxu1 }
 0x199   :  { %1237 = vrot.lane.b32.xlu0 %v891_v22, %s2437_s26 }
 0x19b   :  { %v2270_v46 = vpop.f32.mrb[22].mxu0  ;;  %v2298_v28 = vpop.f32.mrb[22].mxu1 }
 0x19c   :  { %v911_v37 = vpop.f32.mrb[23].mxu0  ;;  %1303 = vrot.lane.b32.xlu1 %v2292_v21, %s2438_s3  ;;  %v1104_v38 = vpop.f32.mrb[23].mxu1  ;;  %v3213_v21 = vld [vmem:[%s3503_s2] ss:$0 sm:$0xff] }
 0x19d   :  { %1301 = vrot.lane.b32.xlu0 %v1084_v6, %s2438_s3 }
 0x19f   :  { %v2273_v41 = vpop.f32.mrb[24].mxu0  ;;  %v2301_v25 = vpop.f32.mrb[24].mxu1 }
 0x1a0   :  { %v921_v26 = vpop.f32.mrb[25].mxu0  ;;  %1243 = vrot.lane.b32.xlu1 %v2267_v47, %s2437_s26  ;;  %v1114_v10 = vpop.f32.mrb[25].mxu1 }
 0x1a1   :  { %1241 = vrot.lane.b32.xlu0 %v901_v15, %s2437_s26 }
 0x1a3   :  { %v2276_v60 = vpop.f32.mrb[26].mxu0  ;;  %v2304_v42 = vpop.f32.mrb[26].mxu1 }
 0x1a4   :  { %v931_v55 = vpop.f32.mrb[27].mxu0  ;;  %1307 = vrot.lane.b32.xlu1 %v2295_v45, %s2438_s3  ;;  %v1124_v57 = vpop.f32.mrb[27].mxu1 }
 0x1a5   :  { %1305 = vrot.lane.b32.xlu0 %v1094_v44, %s2438_s3 }
 0x1a7   :  { %v2279_v56 = vpop.f32.mrb[28].mxu0  ;;  %v2307_v29 = vpop.f32.mrb[28].mxu1 }
 0x1a8   :  { %v941_v30 = vpop.f32.mrb[29].mxu0  ;;  %1247 = vrot.lane.b32.xlu1 %v2270_v46, %s2437_s26  ;;  %v1134_v8 = vpop.f32.mrb[29].mxu1 }
 0x1a9   :  { %1245 = vrot.lane.b32.xlu0 %v911_v37, %s2437_s26 }
 0x1ab   :  { %v2282_v24 = vpop.f32.mrb[30].mxu0  ;;  %v2310_v7 = vpop.f32.mrb[30].mxu1 }
 0x1ac   :  { %v951_v62 = vpop.f32.mrb[31].mxu0  ;;  %1311 = vrot.lane.b32.xlu1 %v2298_v28, %s2438_s3  ;;  %v1144_v3 = vpop.f32.mrb[31].mxu1 }
 0x1ad   :  { %1309 = vrot.lane.b32.xlu0 %v1104_v38, %s2438_s3 }
 0x1b0   :  { %1251 = vrot.lane.b32.xlu1 %v2273_v41, %s2437_s26 }
 0x1b1   :  { %1249 = vrot.lane.b32.xlu0 %v921_v26, %s2437_s26 }
 0x1b4   :  { %1315 = vrot.lane.b32.xlu1 %v2301_v25, %s2438_s3 }
 0x1b5   :  { %1313 = vrot.lane.b32.xlu0 %v1114_v10, %s2438_s3 }
 0x1b8   :  { %1255 = vrot.lane.b32.xlu1 %v2276_v60, %s2437_s26 }
 0x1b9   :  { %1253 = vrot.lane.b32.xlu0 %v931_v55, %s2437_s26 }
 0x1bc   :  { %1319 = vrot.lane.b32.xlu1 %v2304_v42, %s2438_s3 }
 0x1bd   :  { %1317 = vrot.lane.b32.xlu0 %v1124_v57, %s2438_s3 }
 0x1c0   :  { %1259 = vrot.lane.b32.xlu1 %v2279_v56, %s2437_s26 }
 0x1c1   :  { %1257 = vrot.lane.b32.xlu0 %v941_v30, %s2437_s26 }
 0x1c4   :  { %1323 = vrot.lane.b32.xlu1 %v2307_v29, %s2438_s3 }
 0x1c5   :  { %1321 = vrot.lane.b32.xlu0 %v1134_v8, %s2438_s3 }
 0x1c7   :  { %v1172_v2 = vpop.permute.xlu1 %1171 }
 0x1c8   :  { %1263 = vrot.lane.b32.xlu1 %v2282_v24, %s2437_s26  ;;  %v1170_v36 = vpop.permute.xlu0 %1169  ;;  %v1347_v34 = vsel %vm1345_vm1, %v3103_v52, %v1172_v2 }
 0x1c9   :  { %1261 = vrot.lane.b32.xlu0 %v951_v62, %s2437_s26  ;;  %v1346_v27 = vsel %vm1345_vm1, %v3105_v32, %v1170_v36 }
 0x1cc   :  { %1327 = vrot.lane.b32.xlu1 %v2310_v7, %s2438_s3 }
 0x1cd   :  { %1325 = vrot.lane.b32.xlu0 %v1144_v3, %s2438_s3 }
 0x1ce   :  { %v1176_v39 = vpop.permute.xlu1 %1175 }
 0x1cf   :  { %v1174_v53 = vpop.permute.xlu0 %1173  ;;  %v1349_v28 = vsel %vm1345_vm1, %v3109_v58, %v1176_v39 }
 0x1d0   :  { %v1348_v37 = vsel %vm1345_vm1, %v3111_v1, %v1174_v53 }
 0x1d6   :  { %v1180_v54 = vpop.permute.xlu1 %1179 }
 0x1d7   :  { %v1178_v13 = vpop.permute.xlu0 %1177  ;;  %v1351_v1 = vsel %vm1345_vm1, %v3115_v9, %v1180_v54 }
 0x1d8   :  { %v1350_v56 = vsel %vm1345_vm1, %v3117_v40, %v1178_v13 }
 0x1de   :  { %v1184_v4 = vpop.permute.xlu1 %1183 }
 0x1df   :  { %v1182_v50 = vpop.permute.xlu0 %1181  ;;  %v1353_v40 = vsel %vm1345_vm1, %v3121_v48, %v1184_v4 }
 0x1e0   :  { %v1352_v39 = vsel %vm1345_vm1, %v3123_v12, %v1182_v50 }
 0x1e6   :  { %v3189_v16 = vpop.permute.xlu1 %1187 }
 0x1e7   :  { %v3191_v35 = vpop.permute.xlu0 %1185  ;;  %v1355_v12 = vsel %vm1345_vm1, %v3127_v59, %v3189_v16 }
 0x1e8   :  { %v1354_v4 = vsel %vm1345_vm1, %v3129_v14, %v3191_v35 }
 0x1ee   :  { %v3193_v20 = vpop.permute.xlu1 %1191 }
 0x1ef   :  { %v3195_v17 = vpop.permute.xlu0 %1189  ;;  %v1357_v14 = vsel %vm1345_vm1, %v3133_v5, %v3193_v20 }
 0x1f0   :  { %v1356_v16 = vsel %vm1345_vm1, %v3135_v51, %v3195_v17 }
 0x1f6   :  { %v3197_v18 = vpop.permute.xlu1 %1195 }
 0x1f7   :  { %v3199_v63 = vpop.permute.xlu0 %1193  ;;  %v1359_v51 = vsel %vm1345_vm1, %v3139_v11, %v3197_v18 }
 0x1f8   :  { %v1358_v20 = vsel %vm1345_vm1, %v3141_v31, %v3199_v63 }
 0x1fe   :  { %v3201_v49 = vpop.permute.xlu1 %1199 }
 0x1ff   :  { %v3203_v61 = vpop.permute.xlu0 %1197  ;;  %v1361_v31 = vsel %vm1345_vm1, %v3151_v0, %v3201_v49  ;;  %v1765_v0 = vld [vmem:[%s3504_s5] sm:$0xff] }
 0x200   :  { %v1360_v18 = vsel %vm1345_vm1, %v3153_v23, %v3203_v61  ;;  %v1766_v23 = vld [vmem:[%s3504_s5 + $0x8] sm:$0xff]  ;;  %v1767_v61 = vld [vmem:[%s3504_s5 + $0x10] sm:$0xff] }
 0x201   :  { %v2391_v49 = vpack.c.bf16 %v1766_v23, %v1765_v0 }
 0x202   :  { %v1236_v33 = vpop.permute.xlu1 %1235 }
 0x203   :  { %v1234_v19 = vpop.permute.xlu0 %1233  ;;  %v1364_v43 = vsel %vm1362_vm2, %v1347_v34, %v1236_v33  ;;  %2392 = vmatprep.subr.bf16.mxu1 %v2391_v49 }
 0x204   :  { %v1363_v6 = vsel %vm1362_vm2, %v1346_v27, %v1234_v19  ;;  %2394 = vmatpush3.bf16.msra.mxu1 %v2391_v49 }
 0x206   :  { %v1300_v22 = vpop.permute.xlu1 %1299 }
 0x207   :  { %v1381_v47 = vsel %vm1379_vm3, %v1364_v43, %v1300_v22  ;;  %v1298_v45 = vpop.permute.xlu0 %1297 }
 0x208   :  { %v1380_v15 = vsel %vm1379_vm3, %v1363_v6, %v1298_v45  ;;  %v1404_v44 = vadd.f32 %v3213_v21, %v1381_v47 }
 0x209   :  { %v1403_v52 = vadd.f32 %v3213_v21, %v1380_v15 }
 0x20a   :  { %v1240_v32 = vpop.permute.xlu1 %1239 }
 0x20b   :  { %2315 = vmatprep.mubr.msk.f32.mxu0 %vm380_vm0, %v1403_v52  ;;  %v1238_v46 = vpop.permute.xlu0 %1237  ;;  %v1366_v38 = vsel %vm1362_vm2, %v1349_v28, %v1240_v32 }
 0x20c   :  { %2316 = vmatmul.mubr.msk.f32.vlgmr.msra.gmra.mrb[32].mxu0 %vm380_vm0, %v1404_v44  ;;  %v1365_v25 = vsel %vm1362_vm2, %v1348_v37, %v1238_v46 }
 0x20e   :  { %v1304_v41 = vpop.permute.xlu1 %1303 }
 0x20f   :  { %v1383_v26 = vsel %vm1379_vm3, %v1366_v38, %v1304_v41  ;;  %v1302_v10 = vpop.permute.xlu0 %1301 }
 0x210   :  { %v1382_v60 = vsel %vm1379_vm3, %v1365_v25, %v1302_v10  ;;  %v1406_v55 = vadd.f32 %v3213_v21, %v1383_v26 }
 0x211   :  { %v1405_v42 = vadd.f32 %v3213_v21, %v1382_v60 }
 0x212   :  { %v1244_v57 = vpop.permute.xlu1 %1243 }
 0x213   :  { %2318 = vmatprep.mubr.msk.f32.mxu0 %vm380_vm0, %v1405_v42  ;;  %v1242_v58 = vpop.permute.xlu0 %1241  ;;  %v1368_v29 = vsel %vm1362_vm2, %v1351_v1, %v1244_v57 }
 0x214   :  { %2319 = vmatmul.mubr.msk.f32.gmra.mrb[34].mxu0 %vm380_vm0, %v1406_v55  ;;  %v1367_v8 = vsel %vm1362_vm2, %v1350_v56, %v1242_v58 }
 0x216   :  { %v1308_v30 = vpop.permute.xlu1 %1307 }
 0x217   :  { %v1385_v24 = vsel %vm1379_vm3, %v1368_v29, %v1308_v30  ;;  %v1306_v7 = vpop.permute.xlu0 %1305 }
 0x218   :  { %v1384_v62 = vsel %vm1379_vm3, %v1367_v8, %v1306_v7  ;;  %v1408_v2 = vadd.f32 %v3213_v21, %v1385_v24 }
 0x219   :  { %v1407_v3 = vadd.f32 %v3213_v21, %v1384_v62 }
 0x21a   :  { %v1248_v36 = vpop.permute.xlu1 %1247 }
 0x21b   :  { %2321 = vmatprep.mubr.msk.f32.mxu0 %vm380_vm0, %v1407_v3  ;;  %v1246_v9 = vpop.permute.xlu0 %1245  ;;  %v1370_v53 = vsel %vm1362_vm2, %v1353_v40, %v1248_v36  ;;  %v3329_v40 = vld [vmem:[%s3505_s4] ss:$0 sm:$0xff] }
 0x21c   :  { %2322 = vmatmul.mubr.msk.f32.gmra.mrb[36].mxu0 %vm380_vm0, %v1408_v2  ;;  %v1369_v13 = vsel %vm1362_vm2, %v1352_v39, %v1246_v9 }
 0x21e   :  { %v1312_v54 = vpop.permute.xlu1 %1311 }
 0x21f   :  { %v1387_v33 = vsel %vm1379_vm3, %v1370_v53, %v1312_v54  ;;  %v1310_v19 = vpop.permute.xlu0 %1309 }
 0x220   :  { %v1386_v34 = vsel %vm1379_vm3, %v1369_v13, %v1310_v19  ;;  %v1410_v43 = vadd.f32 %v3213_v21, %v1387_v33 }
 0x221   :  { %v1409_v27 = vadd.f32 %v3213_v21, %v1386_v34 }
 0x222   :  { %v1252_v22 = vpop.permute.xlu1 %1251 }
 0x223   :  { %2324 = vmatprep.mubr.msk.f32.mxu0 %vm380_vm0, %v1409_v27  ;;  %v1250_v48 = vpop.permute.xlu0 %1249  ;;  %v1372_v50 = vsel %vm1362_vm2, %v1355_v12, %v1252_v22 }
 0x224   :  { %2325 = vmatmul.mubr.msk.f32.gmra.mrb[38].mxu0 %vm380_vm0, %v1410_v43  ;;  %v1371_v47 = vsel %vm1362_vm2, %v1354_v4, %v1250_v48 }
 0x226   :  { %v1316_v6 = vpop.permute.xlu1 %1315 }
 0x227   :  { %v1389_v45 = vsel %vm1379_vm3, %v1372_v50, %v1316_v6  ;;  %v1314_v15 = vpop.permute.xlu0 %1313 }
 0x228   :  { %v1388_v52 = vsel %vm1379_vm3, %v1371_v47, %v1314_v15  ;;  %v1412_v32 = vadd.f32 %v3213_v21, %v1389_v45 }
 0x229   :  { %v1411_v44 = vadd.f32 %v3213_v21, %v1388_v52 }
 0x22a   :  { %v1256_v46 = vpop.permute.xlu1 %1255 }
 0x22b   :  { %2327 = vmatprep.mubr.msk.f32.mxu0 %vm380_vm0, %v1411_v44  ;;  %v1254_v59 = vpop.permute.xlu0 %1253  ;;  %v1374_v35 = vsel %vm1362_vm2, %v1357_v14, %v1256_v46 }
 0x22c   :  { %2328 = vmatmul.mubr.msk.f32.gmra.mrb[40].mxu0 %vm380_vm0, %v1412_v32  ;;  %v1373_v37 = vsel %vm1362_vm2, %v1356_v16, %v1254_v59 }
 0x22e   :  { %v1320_v28 = vpop.permute.xlu1 %1319 }
 0x22f   :  { %v1391_v38 = vsel %vm1379_vm3, %v1374_v35, %v1320_v28  ;;  %v1318_v41 = vpop.permute.xlu0 %1317 }
 0x230   :  { %v1390_v25 = vsel %vm1379_vm3, %v1373_v37, %v1318_v41  ;;  %v1414_v10 = vadd.f32 %v3213_v21, %v1391_v38 }
 0x231   :  { %v1413_v26 = vadd.f32 %v3213_v21, %v1390_v25 }
 0x232   :  { %v1260_v60 = vpop.permute.xlu1 %1259 }
 0x233   :  { %2330 = vmatprep.mubr.msk.f32.mxu0 %vm380_vm0, %v1413_v26  ;;  %v1258_v5 = vpop.permute.xlu0 %1257  ;;  %v1376_v17 = vsel %vm1362_vm2, %v1359_v51, %v1260_v60 }
 0x234   :  { %2331 = vmatmul.mubr.msk.f32.gmra.mrb[42].mxu0 %vm380_vm0, %v1414_v10  ;;  %v1375_v55 = vsel %vm1362_vm2, %v1358_v20, %v1258_v5 }
 0x236   :  { %v1324_v42 = vpop.permute.xlu1 %1323 }
 0x237   :  { %v1393_v57 = vsel %vm1379_vm3, %v1376_v17, %v1324_v42  ;;  %v1322_v58 = vpop.permute.xlu0 %1321 }
 0x238   :  { %v1392_v1 = vsel %vm1379_vm3, %v1375_v55, %v1322_v58  ;;  %v1416_v29 = vadd.f32 %v3213_v21, %v1393_v57 }
 0x239   :  { %v1415_v56 = vadd.f32 %v3213_v21, %v1392_v1 }
 0x23a   :  { %v1264_v30 = vpop.permute.xlu1 %1263 }
 0x23b   :  { %2333 = vmatprep.mubr.msk.f32.mxu0 %vm380_vm0, %v1415_v56  ;;  %v1262_v11 = vpop.permute.xlu0 %1261  ;;  %v1378_v63 = vsel %vm1362_vm2, %v1361_v31, %v1264_v30 }
 0x23c   :  { %2334 = vmatmul.mubr.msk.f32.gmra.mrb[44].mxu0 %vm380_vm0, %v1416_v29  ;;  %v1377_v24 = vsel %vm1362_vm2, %v1360_v18, %v1262_v11 }
 0x23e   :  { %v1328_v8 = vpop.permute.xlu1 %1327 }
 0x23f   :  { %v1395_v7 = vsel %vm1379_vm3, %v1378_v63, %v1328_v8  ;;  %v1326_v62 = vpop.permute.xlu0 %1325 }
 0x240   :  { %v1394_v3 = vsel %vm1379_vm3, %v1377_v24, %v1326_v62  ;;  %v1418_v36 = vadd.f32 %v3213_v21, %v1395_v7 }
 0x241   :  { %v1417_v2 = vadd.f32 %v3213_v21, %v1394_v3  ;;  %v1768_v21 = vld [vmem:[%s3504_s5 + $0x18] sm:$0xff] }
 0x242   :  { %v2395_v9 = vpack.c.bf16 %v1768_v21, %v1767_v61 }
 0x243   :  { %2336 = vmatprep.mubr.msk.f32.mxu0 %vm380_vm0, %v1417_v2 }
 0x244   :  { %2337 = vmatmul.mubr.msk.f32.gmra.mrb[46].mxu0 %vm380_vm0, %v1418_v36  ;;  %2396 = vmatprep.subr.bf16.mxu1 %v2395_v9 }
 0x245   :  { %2398 = vmatpush3.bf16.msra.mxu1 %v2395_v9 }
 0x2df   :  { %v2317_v39 = vpop.f32.mrb[32].mxu0 }
 0x2e0   :  { %v1548_v53 = vadd.f32 %v2317_v39, %v3329_v40  ;;  %v1542_v54 = vpop.f32.mrb[33].mxu0 }
 0x2e1   :  { %v1543_v13 = vadd.f32 %v3329_v40, %v1542_v54 }
 0x2e2   :  { %v1638_v33 = vmul.f32 0.044715, %v1548_v53  ;;  %v1622_v31 = vmul.f32 0.5, %v1548_v53 }
 0x2e3   :  { %v1637_v19 = vmul.f32 0.044715, %v1543_v13  ;;  %v1621_v30 = vmul.f32 0.5, %v1543_v13 }
 0x2e4   :  { %v1654_v34 = vmul.f32 %v1638_v33, %v1548_v53 }
 0x2e5   :  { %v1653_v27 = vmul.f32 %v1637_v19, %v1543_v13 }
 0x2e6   :  { %v1670_v43 = vmul.f32 %v1654_v34, %v1548_v53 }
 0x2e7   :  { %v1669_v22 = vmul.f32 %v1653_v27, %v1543_v13  ;;  %v2320_v48 = vpop.f32.mrb[34].mxu0 }
 0x2e8   :  { %v1686_v12 = vadd.f32 %v1670_v43, %v1548_v53  ;;  %v3334_v4 = vadd.f32 %v2320_v48, %v3329_v40  ;;  %v1552_v50 = vpop.f32.mrb[35].mxu0 }
 0x2e9   :  { %v1685_v6 = vadd.f32 %v1669_v22, %v1543_v13  ;;  %v1553_v47 = vadd.f32 %v3329_v40, %v1552_v50 }
 0x2ea   :  { %v1702_v45 = vmul.f32 0.7978846, %v1686_v12  ;;  %v1640_v15 = vmul.f32 0.044715, %v3334_v4  ;;  %v1624_v43 = vmul.f32 0.5, %v3334_v4 }
 0x2eb   :  { %v1639_v52 = vmul.f32 0.044715, %v1553_v47  ;;  %v1701_v44 = vmul.f32 0.7978846, %v1685_v6  ;;  %v1623_v33 = vmul.f32 0.5, %v1553_v47 }
 0x2ec   :  { %2403 = vtanh.f32 %v1702_v45  ;;  %v1656_v32 = vmul.f32 %v1640_v15, %v3334_v4 }
 0x2ed   :  { %v1655_v46 = vmul.f32 %v1639_v52, %v1553_v47  ;;  %2405 = vtanh.f32 %v1701_v44 }
 0x2ee   :  { %v1672_v59 = vmul.f32 %v1656_v32, %v3334_v4 }
 0x2ef   :  { %v1671_v14 = vmul.f32 %v1655_v46, %v1553_v47  ;;  %v2323_v16 = vpop.f32.mrb[36].mxu0 }
 0x2f0   :  { %v1688_v35 = vadd.f32 %v1672_v59, %v3334_v4  ;;  %v3342_v28 = vadd.f32 %v2323_v16, %v3329_v40  ;;  %v1562_v37 = vpop.f32.mrb[37].mxu0 }
 0x2f1   :  { %v1687_v38 = vadd.f32 %v1671_v14, %v1553_v47  ;;  %v3345_v41 = vadd.f32 %v3329_v40, %v1562_v37 }
 0x2f2   :  { %v1642_v25 = vmul.f32 0.044715, %v3342_v28  ;;  %v1704_v26 = vmul.f32 0.7978846, %v1688_v35 }
 0x2f3   :  { %v1641_v10 = vmul.f32 0.044715, %v3345_v41  ;;  %v1703_v60 = vmul.f32 0.7978846, %v1687_v38  ;;  %v1625_v37 = vmul.f32 0.5, %v3345_v41 }
 0x2f4   :  { %v1658_v5 = vmul.f32 %v1642_v25, %v3342_v28  ;;  %2407 = vtanh.f32 %v1704_v26 }
 0x2f5   :  { %v1657_v51 = vmul.f32 %v1641_v10, %v3345_v41  ;;  %2409 = vtanh.f32 %v1703_v60  ;;  %v1626_v10 = vmul.f32 0.5, %v3342_v28 }
 0x2f6   :  { %v2404_v20 = vpop.eup %2403  ;;  %v1674_v17 = vmul.f32 %v1658_v5, %v3342_v28 }
 0x2f7   :  { %v2406_v42 = vpop.eup %2405  ;;  %v1734_v55 = vadd.f32 1.0, %v2404_v20  ;;  %v1673_v57 = vmul.f32 %v1657_v51, %v3345_v41  ;;  %v2326_v58 = vpop.f32.mrb[38].mxu0 }
 0x2f8   :  { %v1690_v1 = vadd.f32 %v1674_v17, %v3342_v28  ;;  %v3355_v56 = vadd.f32 %v2326_v58, %v3329_v40  ;;  %v1572_v29 = vpop.f32.mrb[39].mxu0  ;;  %v1733_v11 = vadd.f32 1.0, %v2406_v42 }
 0x2f9   :  { %v1689_v18 = vadd.f32 %v1673_v57, %v3345_v41  ;;  %v3359_v63 = vadd.f32 %v3329_v40, %v1572_v29  ;;  %v1750_v62 = vmul.f32 %v1734_v55, %v1622_v31 }
 0x2fa   :  { %v1644_v8 = vmul.f32 0.044715, %v3355_v56  ;;  %v1749_v24 = vmul.f32 %v1733_v11, %v1621_v30  ;;  %v1706_v7 = vmul.f32 0.7978846, %v1690_v1 }
 0x2fb   :  { %v1643_v3 = vmul.f32 0.044715, %v3359_v63  ;;  %v1705_v2 = vmul.f32 0.7978846, %v1689_v18 }
 0x2fc   :  { %v1660_v36 = vmul.f32 %v1644_v8, %v3355_v56  ;;  %2347 = vmatprep.mubr.msk.f32.mxu1 %vm1776_vm4, %v1749_v24  ;;  %2411 = vtanh.f32 %v1706_v7  ;;  %v1627_v8 = vmul.f32 0.5, %v3359_v63 }
 0x2fd   :  { %v1659_v0 = vmul.f32 %v1643_v3, %v3359_v63  ;;  %2348 = vmatmul.mubr.msk.f32.vlgmr.msra.gmra.mrb[32].mxu1 %vm1776_vm4, %v1750_v62  ;;  %2413 = vtanh.f32 %v1705_v2  ;;  %v1628_v3 = vmul.f32 0.5, %v3355_v56 }
 0x2fe   :  { %v2408_v23 = vpop.eup %2407  ;;  %v1676_v49 = vmul.f32 %v1660_v36, %v3355_v56 }
 0x2ff   :  { %v2410_v61 = vpop.eup %2409  ;;  %v1675_v21 = vmul.f32 %v1659_v0, %v3359_v63  ;;  %v2329_v9 = vpop.f32.mrb[40].mxu0  ;;  %v1736_v39 = vadd.f32 1.0, %v2408_v23 }
 0x300   :  { %v1692_v53 = vadd.f32 %v1676_v49, %v3355_v56  ;;  %v3371_v54 = vadd.f32 %v2329_v9, %v3329_v40  ;;  %v1582_v13 = vpop.f32.mrb[41].mxu0  ;;  %v1735_v19 = vadd.f32 1.0, %v2410_v61 }
 0x301   :  { %v1691_v34 = vadd.f32 %v1675_v21, %v3359_v63  ;;  %v3375_v27 = vadd.f32 %v3329_v40, %v1582_v13  ;;  %v1752_v6 = vmul.f32 %v1736_v39, %v1624_v43 }
 0x302   :  { %v1646_v22 = vmul.f32 0.044715, %v3371_v54  ;;  %v1751_v48 = vmul.f32 %v1735_v19, %v1623_v33  ;;  %v1708_v12 = vmul.f32 0.7978846, %v1692_v53 }
 0x303   :  { %v1645_v50 = vmul.f32 0.044715, %v3375_v27  ;;  %v1707_v45 = vmul.f32 0.7978846, %v1691_v34 }
 0x304   :  { %v1662_v15 = vmul.f32 %v1646_v22, %v3371_v54  ;;  %2350 = vmatprep.mubr.msk.f32.mxu1 %vm1776_vm4, %v1751_v48  ;;  %2415 = vtanh.f32 %v1708_v12  ;;  %v1629_v22 = vmul.f32 0.5, %v3375_v27 }
 0x305   :  { %v1661_v47 = vmul.f32 %v1645_v50, %v3375_v27  ;;  %2351 = vmatmul.mubr.msk.f32.gmra.mrb[34].mxu1 %vm1776_vm4, %v1752_v6  ;;  %2417 = vtanh.f32 %v1707_v45  ;;  %v1630_v6 = vmul.f32 0.5, %v3371_v54 }
 0x306   :  { %v2412_v52 = vpop.eup %2411  ;;  %v1678_v4 = vmul.f32 %v1662_v15, %v3371_v54 }
 0x307   :  { %v2414_v44 = vpop.eup %2413  ;;  %v1677_v32 = vmul.f32 %v1661_v47, %v3375_v27  ;;  %v2332_v46 = vpop.f32.mrb[42].mxu0  ;;  %v1738_v59 = vadd.f32 1.0, %v2412_v52 }
 0x308   :  { %v1694_v14 = vadd.f32 %v1678_v4, %v3371_v54  ;;  %v3388_v16 = vadd.f32 %v2332_v46, %v3329_v40  ;;  %v1592_v35 = vpop.f32.mrb[43].mxu0  ;;  %v1737_v38 = vadd.f32 1.0, %v2414_v44 }
 0x309   :  { %v1693_v25 = vadd.f32 %v1677_v32, %v3375_v27  ;;  %v3393_v26 = vadd.f32 %v3329_v40, %v1592_v35  ;;  %v1754_v17 = vmul.f32 %v1738_v59, %v1626_v10 }
 0x30a   :  { %v1648_v60 = vmul.f32 0.044715, %v3388_v16  ;;  %v1753_v5 = vmul.f32 %v1737_v38, %v1625_v37  ;;  %v1710_v51 = vmul.f32 0.7978846, %v1694_v14  ;;  %v1632_v10 = vmul.f32 0.5, %v3388_v16 }
 0x30b   :  { %v1647_v20 = vmul.f32 0.044715, %v3393_v26  ;;  %v1709_v42 = vmul.f32 0.7978846, %v1693_v25  ;;  %v1631_v37 = vmul.f32 0.5, %v3393_v26 }
 0x30c   :  { %v1664_v55 = vmul.f32 %v1648_v60, %v3388_v16  ;;  %2353 = vmatprep.mubr.msk.f32.mxu1 %vm1776_vm4, %v1753_v5  ;;  %2419 = vtanh.f32 %v1710_v51 }
 0x30d   :  { %v1663_v41 = vmul.f32 %v1647_v20, %v3393_v26  ;;  %2354 = vmatmul.mubr.msk.f32.gmra.mrb[36].mxu1 %vm1776_vm4, %v1754_v17  ;;  %2421 = vtanh.f32 %v1709_v42 }
 0x30e   :  { %v2416_v57 = vpop.eup %2415  ;;  %v1680_v28 = vmul.f32 %v1664_v55, %v3388_v16 }
 0x30f   :  { %v2418_v58 = vpop.eup %2417  ;;  %v1679_v1 = vmul.f32 %v1663_v41, %v3393_v26  ;;  %v2335_v29 = vpop.f32.mrb[44].mxu0  ;;  %v1740_v30 = vadd.f32 1.0, %v2416_v57 }
 0x310   :  { %v1696_v11 = vadd.f32 %v1680_v28, %v3388_v16  ;;  %v3406_v31 = vadd.f32 %v2335_v29, %v3329_v40  ;;  %v1602_v18 = vpop.f32.mrb[45].mxu0  ;;  %v1739_v24 = vadd.f32 1.0, %v2418_v58 }
 0x311   :  { %v1695_v7 = vadd.f32 %v1679_v1, %v3393_v26  ;;  %v1603_v62 = vadd.f32 %v3329_v40, %v1602_v18  ;;  %v1756_v49 = vmul.f32 %v1740_v30, %v1628_v3 }
 0x312   :  { %v1650_v2 = vmul.f32 0.044715, %v3406_v31  ;;  %v1755_v36 = vmul.f32 %v1739_v24, %v1627_v8  ;;  %v1712_v0 = vmul.f32 0.7978846, %v1696_v11  ;;  %v1634_v26 = vmul.f32 0.5, %v3406_v31 }
 0x313   :  { %v1649_v23 = vmul.f32 0.044715, %v1603_v62  ;;  %v1711_v61 = vmul.f32 0.7978846, %v1695_v7  ;;  %v1633_v41 = vmul.f32 0.5, %v1603_v62 }
 0x314   :  { %v1666_v21 = vmul.f32 %v1650_v2, %v3406_v31  ;;  %2356 = vmatprep.mubr.msk.f32.mxu1 %vm1776_vm4, %v1755_v36  ;;  %2423 = vtanh.f32 %v1712_v0 }
 0x315   :  { %v1665_v63 = vmul.f32 %v1649_v23, %v1603_v62  ;;  %2357 = vmatmul.mubr.msk.f32.gmra.mrb[38].mxu1 %vm1776_vm4, %v1756_v49  ;;  %2425 = vtanh.f32 %v1711_v61 }
 0x316   :  { %v2420_v9 = vpop.eup %2419  ;;  %v1682_v39 = vmul.f32 %v1666_v21, %v3406_v31 }
 0x317   :  { %v2422_v56 = vpop.eup %2421  ;;  %v1681_v53 = vmul.f32 %v1665_v63, %v1603_v62  ;;  %v2338_v13 = vpop.f32.mrb[46].mxu0  ;;  %v1742_v33 = vadd.f32 1.0, %v2420_v9 }
 0x318   :  { %v1698_v19 = vadd.f32 %v1682_v39, %v3406_v31  ;;  %v1618_v34 = vadd.f32 %v2338_v13, %v3329_v40  ;;  %v1612_v43 = vpop.f32.mrb[47].mxu0  ;;  %v1741_v48 = vadd.f32 1.0, %v2422_v56  ;;  %v2072_v31 = vld [vmem:[%s3506_s6] ss:$0 sm:$0xff] }
 0x319   :  { %v1697_v12 = vadd.f32 %v1681_v53, %v1603_v62  ;;  %v1613_v50 = vadd.f32 %v3329_v40, %v1612_v43  ;;  %v1758_v4 = vmul.f32 %v1742_v33, %v1630_v6 }
 0x31a   :  { %v1652_v45 = vmul.f32 0.044715, %v1618_v34  ;;  %v1757_v15 = vmul.f32 %v1741_v48, %v1629_v22  ;;  %v1714_v47 = vmul.f32 0.7978846, %v1698_v19  ;;  %v1636_v18 = vmul.f32 0.5, %v1618_v34 }
 0x31b   :  { %v1651_v52 = vmul.f32 0.044715, %v1613_v50  ;;  %v1713_v44 = vmul.f32 0.7978846, %v1697_v12  ;;  %v1635_v30 = vmul.f32 0.5, %v1613_v50 }
 0x31c   :  { %v1668_v32 = vmul.f32 %v1652_v45, %v1618_v34  ;;  %2359 = vmatprep.mubr.msk.f32.mxu1 %vm1776_vm4, %v1757_v15  ;;  %2427 = vtanh.f32 %v1714_v47 }
 0x31d   :  { %v1667_v46 = vmul.f32 %v1651_v52, %v1613_v50  ;;  %2360 = vmatmul.mubr.msk.f32.gmra.mrb[40].mxu1 %vm1776_vm4, %v1758_v4  ;;  %2429 = vtanh.f32 %v1713_v44 }
 0x31e   :  { %v2424_v27 = vpop.eup %2423  ;;  %v1684_v59 = vmul.f32 %v1668_v32, %v1618_v34 }
 0x31f   :  { %v2426_v14 = vpop.eup %2425  ;;  %v1683_v40 = vmul.f32 %v1667_v46, %v1613_v50  ;;  %v1744_v35 = vadd.f32 1.0, %v2424_v27 }
 0x320   :  { %v1700_v54 = vadd.f32 %v1684_v59, %v1618_v34  ;;  %v1743_v38 = vadd.f32 1.0, %v2426_v14 }
 0x321   :  { %v1699_v25 = vadd.f32 %v1683_v40, %v1613_v50  ;;  %v1760_v51 = vmul.f32 %v1744_v35, %v1632_v10 }
 0x322   :  { %v1759_v60 = vmul.f32 %v1743_v38, %v1631_v37  ;;  %v1716_v5 = vmul.f32 0.7978846, %v1700_v54 }
 0x323   :  { %v1715_v20 = vmul.f32 0.7978846, %v1699_v25 }
 0x324   :  { %2362 = vmatprep.mubr.msk.f32.mxu1 %vm1776_vm4, %v1759_v60  ;;  %2431 = vtanh.f32 %v1716_v5 }
 0x325   :  { %2363 = vmatmul.mubr.msk.f32.gmra.mrb[42].mxu1 %vm1776_vm4, %v1760_v51  ;;  %2433 = vtanh.f32 %v1715_v20 }
 0x326   :  { %v2428_v17 = vpop.eup %2427 }
 0x327   :  { %v2430_v42 = vpop.eup %2429  ;;  %v1746_v55 = vadd.f32 1.0, %v2428_v17 }
 0x328   :  { %v1745_v57 = vadd.f32 1.0, %v2430_v42 }
 0x329   :  { %v1762_v58 = vmul.f32 %v1746_v55, %v1634_v26 }
 0x32a   :  { %v1761_v28 = vmul.f32 %v1745_v57, %v1633_v41 }
 0x32c   :  { %2365 = vmatprep.mubr.msk.f32.mxu1 %vm1776_vm4, %v1761_v28 }
 0x32d   :  { %2366 = vmatmul.mubr.msk.f32.gmra.mrb[44].mxu1 %vm1776_vm4, %v1762_v58 }
 0x32e   :  { %v2432_v16 = vpop.eup %2431 }
 0x32f   :  { %v2434_v1 = vpop.eup %2433  ;;  %v1748_v29 = vadd.f32 1.0, %v2432_v16 }
 0x330   :  { %v1747_v11 = vadd.f32 1.0, %v2434_v1 }
 0x331   :  { %v1764_v24 = vmul.f32 %v1748_v29, %v1636_v18 }
 0x332   :  { %v1763_v8 = vmul.f32 %v1747_v11, %v1635_v30 }
 0x334   :  { %2368 = vmatprep.mubr.msk.f32.mxu1 %vm1776_vm4, %v1763_v8 }
 0x335   :  { %2369 = vmatmul.mubr.msk.f32.gmra.mrb[46].mxu1 %vm1776_vm4, %v1764_v24 }
 0x3d0   :  { %v2349_v7 = vpop.f32.mrb[32].mxu1 }
 0x3d1   :  { %v1897_v62 = vadd.f32 %v2349_v7, %v2072_v31  ;;  %v1891_v3 = vpop.f32.mrb[33].mxu1 }
 0x3d2   :  { %v1892_v2 = vadd.f32 %v2072_v31, %v1891_v3 }
 0x3d3   :  { %1971 = vst.msk [vmem:[%s3507_s7 + $0x8] sm:$0xff] %vm380_vm0, %v1897_v62 }
 0x3d4   :  { %1970 = vst.msk [vmem:[%s3507_s7] sm:$0xff] %vm380_vm0, %v1892_v2 }
 0x3d8   :  { %v2352_v36 = vpop.f32.mrb[34].mxu1 }
 0x3d9   :  { %v1907_v0 = vadd.f32 %v2352_v36, %v2072_v31  ;;  %v1901_v23 = vpop.f32.mrb[35].mxu1 }
 0x3da   :  { %v1902_v49 = vadd.f32 %v2072_v31, %v1901_v23 }
 0x3db   :  { %1973 = vst.msk [vmem:[%s3507_s7 + $0x18] sm:$0xff] %vm380_vm0, %v1907_v0 }
 0x3dc   :  { %1972 = vst.msk [vmem:[%s3507_s7 + $0x10] sm:$0xff] %vm380_vm0, %v1902_v49 }
 0x3e0   :  { %v2355_v61 = vpop.f32.mrb[36].mxu1 }
 0x3e1   :  { %v1917_v21 = vadd.f32 %v2355_v61, %v2072_v31  ;;  %v1911_v63 = vpop.f32.mrb[37].mxu1 }
 0x3e2   :  { %v1912_v9 = vadd.f32 %v2072_v31, %v1911_v63 }
 0x3e3   :  { %1975 = vst.msk [vmem:[%s3507_s7 + $0x28] sm:$0xff] %vm380_vm0, %v1917_v21 }
 0x3e4   :  { %1974 = vst.msk [vmem:[%s3507_s7 + $0x20] sm:$0xff] %vm380_vm0, %v1912_v9 }
 0x3e8   :  { %v2358_v39 = vpop.f32.mrb[38].mxu1 }
 0x3e9   :  { %v1927_v56 = vadd.f32 %v2358_v39, %v2072_v31  ;;  %v1921_v53 = vpop.f32.mrb[39].mxu1 }
 0x3ea   :  { %v1922_v13 = vadd.f32 %v2072_v31, %v1921_v53 }
 0x3eb   :  { %1977 = vst.msk [vmem:[%s3507_s7 + $0x38] sm:$0xff] %vm380_vm0, %v1927_v56 }
 0x3ec   :  { %1976 = vst.msk [vmem:[%s3507_s7 + $0x30] sm:$0xff] %vm380_vm0, %v1922_v13 }
 0x3f0   :  { %v2361_v33 = vpop.f32.mrb[40].mxu1 }
 0x3f1   :  { %v1937_v19 = vadd.f32 %v2361_v33, %v2072_v31  ;;  %v1931_v34 = vpop.f32.mrb[41].mxu1 }
 0x3f2   :  { %v1932_v43 = vadd.f32 %v2072_v31, %v1931_v34 }
 0x3f3   :  { %1979 = vst.msk [vmem:[%s3507_s7 + $0x48] sm:$0xff] %vm380_vm0, %v1937_v19 }
 0x3f4   :  { %1978 = vst.msk [vmem:[%s3507_s7 + $0x40] sm:$0xff] %vm380_vm0, %v1932_v43 }
 0x3f8   :  { %v2364_v22 = vpop.f32.mrb[42].mxu1 }
 0x3f9   :  { %v1947_v48 = vadd.f32 %v2364_v22, %v2072_v31  ;;  %v1941_v12 = vpop.f32.mrb[43].mxu1 }
 0x3fa   :  { %v1942_v50 = vadd.f32 %v2072_v31, %v1941_v12 }
 0x3fb   :  { %1981 = vst.msk [vmem:[%s3507_s7 + $0x58] sm:$0xff] %vm380_vm0, %v1947_v48 }
 0x3fc   :  { %1980 = vst.msk [vmem:[%s3507_s7 + $0x50] sm:$0xff] %vm380_vm0, %v1942_v50 }
 0x400   :  { %v2367_v6 = vpop.f32.mrb[44].mxu1 }
 0x401   :  { %v1957_v45 = vadd.f32 %v2367_v6, %v2072_v31  ;;  %v1951_v15 = vpop.f32.mrb[45].mxu1 }
 0x402   :  { %v1952_v47 = vadd.f32 %v2072_v31, %v1951_v15 }
 0x403   :  { %1983 = vst.msk [vmem:[%s3507_s7 + $0x68] sm:$0xff] %vm380_vm0, %v1957_v45 }
 0x404   :  { %1982 = vst.msk [vmem:[%s3507_s7 + $0x60] sm:$0xff] %vm380_vm0, %v1952_v47 }
 0x408   :  { %v2370_v52 = vpop.f32.mrb[46].mxu1 }
 0x409   :  { %v1967_v4 = vadd.f32 %v2370_v52, %v2072_v31  ;;  %v1961_v44 = vpop.f32.mrb[47].mxu1 }
 0x40a   :  { %v1962_v32 = vadd.f32 %v2072_v31, %v1961_v44 }
 0x40b   :  { %1985 = vst.msk [vmem:[%s3507_s7 + $0x78] sm:$0xff] %vm380_vm0, %v1967_v4 }
 0x40c   :  { %1984 = vst.msk [vmem:[%s3507_s7 + $0x70] sm:$0xff] %vm380_vm0, %v1962_v32 }

// kernel: tile.23
= control target key start
LH: loop header
LB: loop body
LE: loop exit
PB: predicated region body
PF: predicated region fallthrough
CT: control target
= control target key end

     0   :  { %s22_s0 = inlined_call_operand.vmem [shape: f32[16], index: 0, kind: input, shape index: {}]   ;;  %s23_s1 = inlined_call_operand.vmem [shape: f32[4,16], index: 1, kind: output, shape index: {}]  }
   0x1   :  { %v4_v0 = vld [vmem:[%s22_s0] ss:$0 sm:$0xff] }
   0x2   :  { %5 = vst [vmem:[%s23_s1] sm:$0xf] %v4_v0 }

// kernel: wavemix_lite_classifier.12
= control target key start
LH: loop header
LB: loop body
LE: loop exit
PB: predicated region body
PF: predicated region fallthrough
CT: control target
= control target key end

     0   :  { %s1890_s15 = smov 0   ;;  %s2572_s0 = inlined_call_operand.vmem [shape: f32[2,10,10,16], index: 0, kind: input, shape index: {}]   ;;  %s2573_s1 = inlined_call_operand.vmem [shape: f32[4,64,16], index: 1, kind: input, shape index: {}]   ;;  %s2574_s2 = inlined_call_operand.vmem [shape: f32[1,64], index: 2, kind: input, shape index: {}]   ;;  %s2575_s3 = inlined_call_operand.vmem [shape: f32[2,8,8,64], index: 3, kind: output, shape index: {0}]   ;;  %s2576_s4 = inlined_call_operand.vmem [shape: f32[2,2,64], index: 4, kind: output, shape index: {1}]  }
   0x1 LB: > { %s1524_s16 = sadd.s32 4294967295, %s1857_s15   ;;  %p1528_p0 = scmp.ge.s32.totalorder %s1857_s15, 1  ;;  %s1857_s15 = sphi %s1890_s15, %s15_s15  }
   0x2   : > { %p165_p1 = scmp.lt.s32.totalorder %s1857_s15, 3 }
   0x4   : > { %p166_p2 = pnand %p1528_p0, %p165_p1 }
   0x5   : > { %p195_p3 = scmp.lt.s32.totalorder (!%p166_p2), %s1524_s16, 1  ;;  %v374_v0 = vld [vmem:[%s2573_s1] sm:$0xff] (!%p166_p2)  ;;  %v375_v1 = vld [vmem:[%s2573_s1 + $0x8] sm:$0xff] (!%p166_p2)  ;;  %v376_v6 = vld [vmem:[%s2573_s1 + $0x10] sm:$0xff] (!%p166_p2)  ;;  %s1859_s11 = smov (!%p166_p2), 32   ;;  %vm245_vm0 = vcmask (!%p166_p2), 1046528  }
   0x6   : > { %169 = sbr.rel (%p166_p2) target bundleno = 612 (0x264), region = 32  ;;  %v1772_v2 = vpack.c.bf16 (!%p166_p2), %v375_v1, %v374_v0  ;;  %v1542_v3 = vld [vmem:[%s2573_s1 + $0x40] sm:$0xff] (!%p166_p2)  ;;  %v1543_v4 = vld [vmem:[%s2573_s1 + $0x48] sm:$0xff] (!%p166_p2)  ;;  %v377_v7 = vld [vmem:[%s2573_s1 + $0x18] sm:$0xff] (!%p166_p2)  ;;  %s1860_s12 = smov (!%p166_p2), 16   ;;  %vm347_vm1 = vcmask (!%p166_p2), 130048  }
   0x7   : > { %v1788_v5 = vpack.c.bf16 (!%p166_p2), %v1543_v4, %v1542_v3  ;;  %v1776_v8 = vpack.c.bf16 (!%p166_p2), %v377_v7, %v376_v6  ;;  %v1544_v9 = vld [vmem:[%s2573_s1 + $0x50] sm:$0xff] (!%p166_p2)  ;;  %v1545_v10 = vld [vmem:[%s2573_s1 + $0x58] sm:$0xff] (!%p166_p2)  ;;  %v378_v22 = vld [vmem:[%s2573_s1 + $0x20] sm:$0xff] (!%p166_p2)  ;;  %s1861_s5 = smov (!%p166_p2), 48   ;;  %s1863_s21 = smov (!%p166_p2), 112   ;;  %vm365_vm2 = vcmask (!%p166_p2), 392192  }
   0x8   : > { %1773 = vmatprep.subr.bf16.mxu0 (!%p166_p2), %v1772_v2  ;;  %v1792_v14 = vpack.c.bf16 (!%p166_p2), %v1545_v10, %v1544_v9  ;;  %v379_v23 = vld [vmem:[%s2573_s1 + $0x28] sm:$0xff] (!%p166_p2)  ;;  %v1546_v24 = vld [vmem:[%s2573_s1 + $0x60] sm:$0xff] (!%p166_p2)  ;;  %v380_v27 = vld [vmem:[%s2573_s1 + $0x30] sm:$0xff] (!%p166_p2)  ;;  %s1864_s22 = smov (!%p166_p2), 80   ;;  %vm356_vm3 = vcmask (!%p166_p2), 261120   ;;  %vm389_vm4 = vcmask (!%p166_p2), 523264  }
   0x9   : > { %1775 = vmatpush3.bf16.msra.mxu0 (!%p166_p2), %v1772_v2  ;;  %1789 = vmatprep.subr.bf16.mxu1 (!%p166_p2), %v1788_v5  ;;  %v1780_v25 = vpack.c.bf16 (!%p166_p2), %v379_v23, %v378_v22  ;;  %v1547_v26 = vld [vmem:[%s2573_s1 + $0x68] sm:$0xff] (!%p166_p2)  ;;  %v381_v28 = vld [vmem:[%s2573_s1 + $0x38] sm:$0xff] (!%p166_p2)  ;;  %v1548_v31 = vld [vmem:[%s2573_s1 + $0x70] sm:$0xff] (!%p166_p2)  ;;  %vm876_vm5 = vcmask (!%p166_p2), 261248   ;;  %vm1110_vm6 = vcmask (!%p166_p2), 392448   ;;  %vm1342_vm7 = vcmask (!%p166_p2), 523648  }
   0xa   : > { %1777 = vmatprep.subr.bf16.mxu0 (!%p166_p2), %v1776_v8  ;;  %1791 = vmatpush3.bf16.msra.mxu1 (!%p166_p2), %v1788_v5  ;;  %v1796_v29 = vpack.c.bf16 (!%p166_p2), %v1547_v26, %v1546_v24  ;;  %v1784_v30 = vpack.c.bf16 (!%p166_p2), %v381_v28, %v380_v27  ;;  %v1549_v32 = vld [vmem:[%s2573_s1 + $0x78] sm:$0xff] (!%p166_p2)  ;;  %v1559_v59 = vld [vmem:[%s2573_s1 + $0x80] sm:$0xff] (!%p166_p2)  ;;  %v1560_v60 = vld [vmem:[%s2573_s1 + $0x88] sm:$0xff] (!%p166_p2)  ;;  %vm1434_vm8 = vcmask (!%p166_p2), 1040384   ;;  %vm1436_vm9 = vcmask (!%p166_p2), 517120  }
   0xb   : > { %1793 = vmatprep.subr.bf16.mxu1 (!%p166_p2), %v1792_v14  ;;  %v1800_v33 = vpack.c.bf16 (!%p166_p2), %v1549_v32, %v1548_v31  ;;  %v2076_v63 = vpack.c.bf16 (!%p166_p2), %v1560_v60, %v1559_v59  ;;  %v1576_v0 = vld [vmem:[%s2573_s1 + $0xc0] sm:$0xff] (!%p166_p2)  ;;  %v1577_v1 = vld [vmem:[%s2573_s1 + $0xc8] sm:$0xff] (!%p166_p2) }
   0xc   : > { %v2088_v4 = vpack.c.bf16 (!%p166_p2), %v1577_v1, %v1576_v0  ;;  %v1564_v60 = vld [vmem:[%s2573_s1 + $0xa8] sm:$0xff] (!%p166_p2) }
   0xd   : > { %s2578_s16 = smov (!%p195_p3, %s1524_s16), 1  ;;  %1779 = vmatpush3.bf16.msra.mxu0 %v1776_v8 }
   0xe   : > { %s1836_s29 = smul.u32 160, %s2578_s16  ;;  %1795 = vmatpush3.bf16.msra.mxu1 %v1792_v14  ;;  %1781 = vmatprep.subr.bf16.mxu0 %v1780_v25  ;;  %s1595_s26 = sshll.u32 %s2578_s16, 6 }
   0xf   : > { %1797 = vmatprep.subr.bf16.mxu1 %v1796_v29 }
  0x10   : > { %s1922_s6 = scalar_lea.vmem %s2572_s0, %s1836_s29  ;;  %s2325_s29 = scalar_lea.vmem %s2575_s3, %s1595_s26 }
  0x11   : > { %v1931_v11 = vld [vmem:[%s1922_s6 + $0x10] sm:$0xff]  ;;  %v1934_v12 = vld [vmem:[%s1922_s6 + $0x8] sm:$0x3]  ;;  %v1937_v13 = vld [vmem:[%s1922_s6 + $0x18] sm:$0x3]  ;;  %1783 = vmatpush3.bf16.msra.mxu0 %v1780_v25 }
  0x12   : > { %295 = vrot.lane.b32.xlu1 %v1931_v11, %s1859_s11  ;;  %v247_v15 = vrot.slane %v1934_v12, 1  ;;  %v1943_v16 = vld [vmem:[%s1922_s6] sm:$0xff]  ;;  %v249_v17 = vrot.slane %v1931_v11, 1  ;;  %v250_v18 = vrot.slane %v1937_v13, 1  ;;  %v1985_v35 = vld [vmem:[%s1922_s6 + $0x28] sm:$0x3]  ;;  %1785 = vmatprep.subr.bf16.mxu0 %v1784_v30 }
  0x13   : > { %v246_v19 = vrot.slane %v1943_v16, 1  ;;  %v1981_v34 = vld [vmem:[%s1922_s6 + $0x20] sm:$0xff]  ;;  %1799 = vmatpush3.bf16.msra.mxu1 %v1796_v29  ;;  %v253_v37 = vrot.slane %v1985_v35, 1  ;;  %v1997_v39 = vld [vmem:[%s1922_s6 + $0x30] sm:$0xff]  ;;  %v2000_v40 = vld [vmem:[%s1922_s6 + $0x38] sm:$0x3] }
  0x14   : > { %577 = vrot.lane.b32.xlu0 %v247_v15, %s1860_s12  ;;  %v251_v20 = vsel %vm245_vm0, %v249_v17, %v250_v18  ;;  %1801 = vmatprep.subr.bf16.mxu1 %v1800_v33  ;;  %v252_v36 = vrot.slane %v1981_v34, 1  ;;  %v255_v41 = vrot.slane %v1997_v39, 1  ;;  %v256_v42 = vrot.slane %v2000_v40, 1  ;;  %v2015_v44 = vld [vmem:[%s1922_s6 + $0x40] sm:$0xff]  ;;  %v2019_v45 = vld [vmem:[%s1922_s6 + $0x48] sm:$0x3] }
  0x15   : > { %v248_v21 = vsel %vm245_vm0, %v246_v19, %v247_v15  ;;  %1787 = vmatpush3.bf16.msra.mxu0 %v1784_v30  ;;  %v258_v46 = vrot.slane %v2015_v44, 1  ;;  %v259_v47 = vrot.slane %v2019_v45, 1  ;;  %v2031_v49 = vld [vmem:[%s1922_s6 + $0x50] sm:$0xff]  ;;  %v2034_v50 = vld [vmem:[%s1922_s6 + $0x58] sm:$0x3]  ;;  %v2049_v54 = vld [vmem:[%s1922_s6 + $0x60] sm:$0xff] }
  0x16   : > { %601 = vrot.lane.b32.xlu1 %v1937_v13, %s1859_s11  ;;  %v254_v38 = vsel %vm245_vm0, %v252_v36, %v253_v37  ;;  %v257_v43 = vsel %vm245_vm0, %v255_v41, %v256_v42  ;;  %v261_v51 = vrot.slane %v2031_v49, 1  ;;  %v262_v52 = vrot.slane %v2034_v50, 1  ;;  %v2053_v55 = vld [vmem:[%s1922_s6 + $0x68] sm:$0x3]  ;;  %v2071_v61 = vld [vmem:[%s1922_s6 + $0x70] sm:$0xff]  ;;  %1805 = vmatprep.subr.bf16.mxu0 %v2076_v63  ;;  %v2101_v6 = vld [vmem:[%s1922_s6 + $0x80] sm:$0xff] }
  0x17   : > { %1803 = vmatpush3.bf16.msra.mxu1 %v1800_v33  ;;  %v260_v48 = vsel %vm245_vm0, %v258_v46, %v259_v47  ;;  %v264_v56 = vrot.slane %v2049_v54, 1  ;;  %v265_v57 = vrot.slane %v2053_v55, 1  ;;  %v2074_v62 = vld [vmem:[%s1922_s6 + $0x78] sm:$0x3]  ;;  %v267_v2 = vrot.slane %v2071_v61, 1  ;;  %v227_v15 = vld [vmem:[%s1922_s6 + $0x90] sm:$0xff] }
  0x18   : > { %579 = vrot.lane.b32.xlu0 %v250_v18, %s1860_s12  ;;  %v263_v53 = vsel %vm245_vm0, %v261_v51, %v262_v52  ;;  %v268_v3 = vrot.slane %v2074_v62, 1  ;;  %1821 = vmatprep.subr.bf16.mxu1 %v2088_v4  ;;  %v2105_v7 = vld [vmem:[%s1922_s6 + $0x88] sm:$0x3]  ;;  %v320_v8 = vrot.slane %v2101_v6, 1  ;;  %v228_v14 = vld [vmem:[%s1922_s6 + $0x98] sm:$0x3] }
  0x19   : > { %v266_v58 = vsel %vm245_vm0, %v264_v56, %v265_v57  ;;  %v321_v9 = vrot.slane %v2105_v7, 1  ;;  %v944_v17 = vrot.slane %v228_v14, 1  ;;  %s1862_s6 = smov 96   ;;  %v1562_v46 = vld [vmem:[%s2573_s1 + $0x98] sm:$0xff] }
  0x1a   : > { %272 = vrot.lane.b32.xlu1 %v251_v20, %s1860_s12  ;;  %v269_v5 = vsel %vm245_vm0, %v267_v2, %v268_v3 }
  0x1b   : > { %v322_v10 = vsel %vm245_vm0, %v320_v8, %v321_v9 }
  0x1c   : > { %270 = vrot.lane.b32.xlu0 %v248_v21, %s1860_s12 }
  0x1e   : > { %323 = vrot.lane.b32.xlu1 %v251_v20, %s1861_s5  ;;  %v2129_v20 = vld [vmem:[%s2574_s2] ss:$0 sm:$0xff] }
  0x20   : > { %297 = vrot.lane.b32.xlu0 %v1981_v34, %s1859_s11 }
  0x22   : > { %625 = vrot.lane.b32.xlu1 %v250_v18, %s1861_s5  ;;  %v943_v18 = vrot.slane %v227_v15, 1 }
  0x24   : > { %603 = vrot.lane.b32.xlu0 %v1985_v35, %s1859_s11  ;;  %v945_v19 = vsel %vm245_vm0, %v943_v18, %v944_v17 }
  0x26   : > { %627 = vrot.lane.b32.xlu1 %v253_v37, %s1861_s5 }
  0x28   : > { %325 = vrot.lane.b32.xlu0 %v254_v38, %s1861_s5 }
  0x2a   : > { %581 = vrot.lane.b32.xlu1 %v253_v37, %s1860_s12 }
  0x2c   : > { %274 = vrot.lane.b32.xlu0 %v254_v38, %s1860_s12 }
  0x2e   : > { %299 = vrot.lane.b32.xlu1 %v1997_v39, %s1859_s11 }
  0x30   : > { %276 = vrot.lane.b32.xlu0 %v257_v43, %s1860_s12 }
  0x32   : > { %605 = vrot.lane.b32.xlu1 %v2000_v40, %s1859_s11 }
  0x34   : > { %583 = vrot.lane.b32.xlu0 %v256_v42, %s1860_s12 }
  0x36   : > { %327 = vrot.lane.b32.xlu1 %v257_v43, %s1861_s5 }
  0x38   : > { %301 = vrot.lane.b32.xlu0 %v2015_v44, %s1859_s11 }
  0x3a   : > { %629 = vrot.lane.b32.xlu1 %v256_v42, %s1861_s5 }
  0x3c   : > { %607 = vrot.lane.b32.xlu0 %v2019_v45, %s1859_s11 }
  0x3e   : > { %631 = vrot.lane.b32.xlu1 %v259_v47, %s1861_s5 }
  0x40   : > { %329 = vrot.lane.b32.xlu0 %v260_v48, %s1861_s5 }
  0x42   : > { %585 = vrot.lane.b32.xlu1 %v259_v47, %s1860_s12 }
  0x44   : > { %278 = vrot.lane.b32.xlu0 %v260_v48, %s1860_s12 }
  0x46   : > { %303 = vrot.lane.b32.xlu1 %v2031_v49, %s1859_s11 }
  0x48   : > { %280 = vrot.lane.b32.xlu0 %v263_v53, %s1860_s12 }
  0x4a   : > { %609 = vrot.lane.b32.xlu1 %v2034_v50, %s1859_s11 }
  0x4c   : > { %587 = vrot.lane.b32.xlu0 %v262_v52, %s1860_s12 }
  0x4e   : > { %331 = vrot.lane.b32.xlu1 %v263_v53, %s1861_s5 }
  0x50   : > { %305 = vrot.lane.b32.xlu0 %v2049_v54, %s1859_s11 }
  0x52   : > { %633 = vrot.lane.b32.xlu1 %v262_v52, %s1861_s5 }
  0x54   : > { %611 = vrot.lane.b32.xlu0 %v2053_v55, %s1859_s11 }
  0x56   : > { %635 = vrot.lane.b32.xlu1 %v265_v57, %s1861_s5 }
  0x58   : > { %333 = vrot.lane.b32.xlu0 %v266_v58, %s1861_s5 }
  0x5a   : > { %589 = vrot.lane.b32.xlu1 %v265_v57, %s1860_s12  ;;  %v1578_v57 = vld [vmem:[%s2573_s1 + $0xd0] sm:$0xff] }
  0x5c   : > { %282 = vrot.lane.b32.xlu0 %v266_v58, %s1860_s12  ;;  %v1579_v58 = vld [vmem:[%s2573_s1 + $0xd8] sm:$0xff] }
  0x5e   : > { %307 = vrot.lane.b32.xlu1 %v2071_v61, %s1859_s11 }
  0x60   : > { %284 = vrot.lane.b32.xlu0 %v269_v5, %s1860_s12 }
  0x62   : > { %613 = vrot.lane.b32.xlu1 %v2074_v62, %s1859_s11 }
  0x64   : > { %591 = vrot.lane.b32.xlu0 %v268_v3, %s1860_s12 }
  0x66   : > { %335 = vrot.lane.b32.xlu1 %v269_v5, %s1861_s5 }
  0x68   : > { %309 = vrot.lane.b32.xlu0 %v2101_v6, %s1859_s11 }
  0x6a   : > { %637 = vrot.lane.b32.xlu1 %v268_v3, %s1861_s5  ;;  %v1824_v3 = vpack.c.bf16 %v1579_v58, %v1578_v57 }
  0x6c   : > { %615 = vrot.lane.b32.xlu0 %v2105_v7, %s1859_s11 }
  0x6e   : > { %639 = vrot.lane.b32.xlu1 %v321_v9, %s1861_s5 }
  0x70   : > { %337 = vrot.lane.b32.xlu0 %v322_v10, %s1861_s5 }
  0x72   : > { %1169 = vrot.lane.b32.xlu1 %v321_v9, %s1860_s12 }
  0x74   : > { %935 = vrot.lane.b32.xlu0 %v322_v10, %s1860_s12  ;;  %v1580_v10 = vld [vmem:[%s2573_s1 + $0xe0] sm:$0xff] }
  0x76   : > { %1172 = vrot.lane.b32.xlu1 %v228_v14, %s1859_s11  ;;  %v1581_v14 = vld [vmem:[%s2573_s1 + $0xe8] sm:$0xff] }
  0x77   : > { %v1828_v18 = vpack.c.bf16 %v1581_v14, %v1580_v10 }
  0x78   : > { %939 = vrot.lane.b32.xlu0 %v227_v15, %s1859_s11  ;;  %v1566_v15 = vld [vmem:[%s2573_s1 + $0xb8] sm:$0xff] }
  0x7a   : > { %1175 = vrot.lane.b32.xlu1 %v944_v17, %s1861_s5 }
  0x7c   : > { %946 = vrot.lane.b32.xlu0 %v945_v19, %s1861_s5 }
  0x7e   : > { %967 = vrot.lane.b32.xlu1 %v2129_v20, %s1862_s6 }
  0x80   : > { %720 = vrot.lane.b32.xlu0 %v2129_v20, %s1863_s21 }
  0x84   : > { %v296_v21 = vpop.permute.xlu1 %295  ;;  %1200 = vrot.lane.b32.xlu0 %v2129_v20, %s1864_s22 }
  0x86   : > { %v578_v22 = vpop.permute.xlu0 %577 }
  0x87   : > { %v649_v30 = vsel %vm347_vm1, %v1934_v12, %v578_v22  ;;  %v1561_v12 = vld [vmem:[%s2573_s1 + $0x90] sm:$0xff] }
  0x88   : > { %v602_v23 = vpop.permute.xlu1 %601  ;;  %v1808_v56 = vpack.c.bf16 %v1562_v46, %v1561_v12  ;;  %v1582_v22 = vld [vmem:[%s2573_s1 + $0xf0] sm:$0xff] }
  0x89   : > { %v657_v33 = vsel %vm356_vm3, %v649_v30, %v602_v23  ;;  %v1583_v23 = vld [vmem:[%s2573_s1 + $0xf8] sm:$0xff] }
  0x8a   : > { %v580_v24 = vpop.permute.xlu0 %579 }
  0x8c   : > { %v273_v25 = vpop.permute.xlu1 %272 }
  0x8d   : > { %v349_v51 = vsel %vm347_vm1, %v1931_v11, %v273_v25  ;;  %v1563_v11 = vld [vmem:[%s2573_s1 + $0xa0] sm:$0xff] }
  0x8e   : > { %v271_v26 = vpop.permute.xlu0 %270  ;;  %v1812_v9 = vpack.c.bf16 %v1564_v60, %v1563_v11 }
  0x8f   : > { %v348_v27 = vsel %vm347_vm1, %v1943_v16, %v271_v26  ;;  %v650_v16 = vsel %vm347_vm1, %v1937_v13, %v580_v24 }
  0x90   : > { %v324_v28 = vpop.permute.xlu1 %323  ;;  %v357_v29 = vsel %vm356_vm3, %v348_v27, %v296_v21 }
  0x91   : > { %v366_v31 = vsel %vm365_vm2, %v357_v29, %v324_v28 }
  0x92   : > { %1676 = vmatprep.mubr.msk.f32.mxu0 %vm389_vm4, %v366_v31  ;;  %v298_v32 = vpop.permute.xlu0 %297  ;;  %v681_v38 = vrot.slane %v366_v31, 1 }
  0x93   : > { %v358_v52 = vsel %vm356_vm3, %v349_v51, %v298_v32 }
  0x94   : > { %v626_v36 = vpop.permute.xlu1 %625 }
  0x95   : > { %v665_v37 = vsel %vm365_vm2, %v657_v33, %v626_v36 }
  0x96   : > { %v682_v41 = vrot.slane %v665_v37, 1  ;;  %v604_v42 = vpop.permute.xlu0 %603 }
  0x97   : > { %v658_v43 = vsel %vm356_vm3, %v650_v16, %v604_v42 }
  0x98   : > { %v628_v47 = vpop.permute.xlu1 %627  ;;  %v683_v48 = vsel %vm245_vm0, %v681_v38, %v682_v41 }
  0x99   : > { %v666_v13 = vsel %vm365_vm2, %v658_v43, %v628_v47  ;;  %1704 = vmatprep.mubr.msk.f32.mxu1 %vm389_vm4, %v683_v48 }
  0x9a   : > { %v326_v53 = vpop.permute.xlu0 %325  ;;  %v685_v0 = vrot.slane %v666_v13, 1 }
  0x9b   : > { %v2165_v59 = vsel %vm365_vm2, %v358_v52, %v326_v53 }
  0x9c   : > { %v684_v1 = vrot.slane %v2165_v59, 1  ;;  %v582_v2 = vpop.permute.xlu1 %581  ;;  %1677 = vmatmul.mubr.msk.f32.vlgmr.msra.gmra.mrb[0].mxu0 %vm389_vm4, %v2165_v59 }
  0x9d   : > { %1807 = vmatpush3.bf16.msra.mxu0 %v2076_v63  ;;  %v1565_v63 = vld [vmem:[%s2573_s1 + $0xb0] sm:$0xff] }
  0x9e   : > { %v275_v5 = vpop.permute.xlu0 %274  ;;  %v2178_v8 = vsel %vm245_vm0, %v684_v1, %v685_v0  ;;  %1809 = vmatprep.subr.bf16.mxu0 %v1808_v56  ;;  %v1816_v21 = vpack.c.bf16 %v1566_v15, %v1565_v63 }
  0x9f   : > { %1705 = vmatmul.mubr.msk.f32.vlgmr.msra.gmra.mrb[0].mxu1 %vm389_vm4, %v2178_v8  ;;  %v350_v25 = vsel %vm347_vm1, %v1981_v34, %v275_v5  ;;  %v651_v34 = vsel %vm347_vm1, %v1985_v35, %v582_v2 }
  0xa0   : > { %v300_v17 = vpop.permute.xlu1 %299  ;;  %1823 = vmatpush3.bf16.msra.mxu1 %v2088_v4  ;;  %v1832_v4 = vpack.c.bf16 %v1583_v23, %v1582_v22 }
  0xa1   : > { %1811 = vmatpush3.bf16.msra.mxu0 %v1808_v56  ;;  %1825 = vmatprep.subr.bf16.mxu1 %v1824_v3  ;;  %v359_v27 = vsel %vm356_vm3, %v350_v25, %v300_v17 }
  0xa2   : > { %v277_v19 = vpop.permute.xlu0 %276  ;;  %1813 = vmatprep.subr.bf16.mxu0 %v1812_v9 }
  0xa3   : > { %v351_v35 = vsel %vm347_vm1, %v1997_v39, %v277_v19 }
  0xa4   : > { %v606_v24 = vpop.permute.xlu1 %605  ;;  %1827 = vmatpush3.bf16.msra.mxu1 %v1824_v3 }
  0xa5   : > { %1815 = vmatpush3.bf16.msra.mxu0 %v1812_v9  ;;  %1829 = vmatprep.subr.bf16.mxu1 %v1828_v18  ;;  %v659_v31 = vsel %vm356_vm3, %v651_v34, %v606_v24 }
  0xa6   : > { %v584_v26 = vpop.permute.xlu0 %583  ;;  %1817 = vmatprep.subr.bf16.mxu0 %v1816_v21 }
  0xa7   : > { %v652_v36 = vsel %vm347_vm1, %v2000_v40, %v584_v26 }
  0xa8   : > { %v328_v28 = vpop.permute.xlu1 %327  ;;  %1831 = vmatpush3.bf16.msra.mxu1 %v1828_v18 }
  0xa9   : > { %v2205_v29 = vsel %vm365_vm2, %v359_v27, %v328_v28  ;;  %1819 = vmatpush3.bf16.msra.mxu0 %v1816_v21  ;;  %1833 = vmatprep.subr.bf16.mxu1 %v1832_v4 }
  0xaa   : > { %1679 = vmatprep.mubr.msk.f32.mxu0 %vm389_vm4, %v2205_v29  ;;  %v302_v30 = vpop.permute.xlu0 %301  ;;  %v687_v37 = vrot.slane %v2205_v29, 1 }
  0xab   : > { %v360_v40 = vsel %vm356_vm3, %v351_v35, %v302_v30 }
  0xac   : > { %v630_v32 = vpop.permute.xlu1 %629  ;;  %1835 = vmatpush3.bf16.msra.mxu1 %v1832_v4 }
  0xad   : > { %v667_v33 = vsel %vm365_vm2, %v659_v31, %v630_v32 }
  0xae   : > { %v688_v16 = vrot.slane %v667_v33, 1  ;;  %v608_v38 = vpop.permute.xlu0 %607 }
  0xaf   : > { %v660_v41 = vsel %vm356_vm3, %v652_v36, %v608_v38 }
  0xb0   : > { %v632_v42 = vpop.permute.xlu1 %631  ;;  %v2218_v43 = vsel %vm245_vm0, %v687_v37, %v688_v16 }
  0xb1   : > { %v668_v12 = vsel %vm365_vm2, %v660_v41, %v632_v42  ;;  %1707 = vmatprep.mubr.msk.f32.mxu1 %vm389_vm4, %v2218_v43 }
  0xb2   : > { %v330_v46 = vpop.permute.xlu0 %329  ;;  %v691_v48 = vrot.slane %v668_v12, 1 }
  0xb3   : > { %v2227_v47 = vsel %vm365_vm2, %v360_v40, %v330_v46 }
  0xb4   : > { %v690_v51 = vrot.slane %v2227_v47, 1  ;;  %v586_v13 = vpop.permute.xlu1 %585  ;;  %1680 = vmatmul.mubr.msk.f32.gmra.mrb[2].mxu0 %vm389_vm4, %v2227_v47 }
  0xb5   : > { %v653_v3 = vsel %vm347_vm1, %v2019_v45, %v586_v13 }
  0xb6   : > { %v279_v52 = vpop.permute.xlu0 %278  ;;  %v2233_v39 = vsel %vm245_vm0, %v690_v51, %v691_v48 }
  0xb7   : > { %1708 = vmatmul.mubr.msk.f32.gmra.mrb[2].mxu1 %vm389_vm4, %v2233_v39  ;;  %v352_v58 = vsel %vm347_vm1, %v2015_v44, %v279_v52 }
  0xb8   : > { %v304_v53 = vpop.permute.xlu1 %303 }
  0xb9   : > { %v361_v60 = vsel %vm356_vm3, %v352_v58, %v304_v53 }
  0xba   : > { %v281_v56 = vpop.permute.xlu0 %280 }
  0xbb   : > { %v353_v45 = vsel %vm347_vm1, %v2031_v49, %v281_v56 }
  0xbc   : > { %v610_v57 = vpop.permute.xlu1 %609 }
  0xbd   : > { %v661_v5 = vsel %vm356_vm3, %v653_v3, %v610_v57 }
  0xbe   : > { %v588_v11 = vpop.permute.xlu0 %587 }
  0xbf   : > { %v654_v44 = vsel %vm347_vm1, %v2034_v50, %v588_v11 }
  0xc0   : > { %v332_v0 = vpop.permute.xlu1 %331 }
  0xc1   : > { %v2241_v1 = vsel %vm365_vm2, %v361_v60, %v332_v0 }
  0xc2   : > { %1682 = vmatprep.mubr.msk.f32.mxu0 %vm389_vm4, %v2241_v1  ;;  %v306_v2 = vpop.permute.xlu0 %305  ;;  %v693_v14 = vrot.slane %v2241_v1, 1 }
  0xc3   : > { %v362_v50 = vsel %vm356_vm3, %v353_v45, %v306_v2 }
  0xc4   : > { %v634_v9 = vpop.permute.xlu1 %633 }
  0xc5   : > { %v669_v10 = vsel %vm365_vm2, %v661_v5, %v634_v9 }
  0xc6   : > { %v694_v63 = vrot.slane %v669_v10, 1  ;;  %v612_v15 = vpop.permute.xlu0 %611 }
  0xc7   : > { %v662_v17 = vsel %vm356_vm3, %v654_v44, %v612_v15 }
  0xc8   : > { %v636_v18 = vpop.permute.xlu1 %635  ;;  %v2254_v19 = vsel %vm245_vm0, %v693_v14, %v694_v63 }
  0xc9   : > { %v670_v21 = vsel %vm365_vm2, %v662_v17, %v636_v18  ;;  %1710 = vmatprep.mubr.msk.f32.mxu1 %vm389_vm4, %v2254_v19 }
  0xca   : > { %v334_v22 = vpop.permute.xlu0 %333  ;;  %v697_v24 = vrot.slane %v670_v21, 1 }
  0xcb   : > { %v371_v23 = vsel %vm365_vm2, %v362_v50, %v334_v22 }
  0xcc   : > { %v696_v25 = vrot.slane %v371_v23, 1  ;;  %v590_v4 = vpop.permute.xlu1 %589  ;;  %1683 = vmatmul.mubr.msk.f32.gmra.mrb[4].mxu0 %vm389_vm4, %v371_v23 }
  0xcd   : > { %v655_v16 = vsel %vm347_vm1, %v2053_v55, %v590_v4 }
  0xce   : > { %v283_v26 = vpop.permute.xlu0 %282  ;;  %v698_v27 = vsel %vm245_vm0, %v696_v25, %v697_v24 }
  0xcf   : > { %1711 = vmatmul.mubr.msk.f32.gmra.mrb[4].mxu1 %vm389_vm4, %v698_v27  ;;  %v354_v34 = vsel %vm347_vm1, %v2049_v54, %v283_v26 }
  0xd0   : > { %v308_v49 = vpop.permute.xlu1 %307 }
  0xd1   : > { %v363_v32 = vsel %vm356_vm3, %v354_v34, %v308_v49 }
  0xd2   : > { %v285_v28 = vpop.permute.xlu0 %284 }
  0xd3   : > { %v355_v13 = vsel %vm347_vm1, %v2071_v61, %v285_v28 }
  0xd4   : > { %v614_v30 = vpop.permute.xlu1 %613 }
  0xd5   : > { %v663_v38 = vsel %vm356_vm3, %v655_v16, %v614_v30 }
  0xd6   : > { %v592_v31 = vpop.permute.xlu0 %591 }
  0xd7   : > { %v656_v54 = vsel %vm347_vm1, %v2074_v62, %v592_v31 }
  0xd8   : > { %v336_v33 = vpop.permute.xlu1 %335 }
  0xd9   : > { %v372_v36 = vsel %vm365_vm2, %v363_v32, %v336_v33 }
  0xda   : > { %1685 = vmatprep.mubr.msk.f32.mxu0 %vm389_vm4, %v372_v36  ;;  %v310_v37 = vpop.permute.xlu0 %309  ;;  %v699_v35 = vrot.slane %v372_v36, 1 }
  0xdb   : > { %v364_v52 = vsel %vm356_vm3, %v355_v13, %v310_v37 }
  0xdc   : > { %v638_v41 = vpop.permute.xlu1 %637 }
  0xdd   : > { %v671_v42 = vsel %vm365_vm2, %v663_v38, %v638_v41 }
  0xde   : > { %v700_v12 = vrot.slane %v671_v42, 1  ;;  %v616_v40 = vpop.permute.xlu0 %615 }
  0xdf   : > { %v664_v46 = vsel %vm356_vm3, %v656_v54, %v616_v40 }
  0xe0   : > { %v640_v48 = vpop.permute.xlu1 %639  ;;  %v701_v51 = vsel %vm245_vm0, %v699_v35, %v700_v12 }
  0xe1   : > { %v672_v55 = vsel %vm365_vm2, %v664_v46, %v640_v48  ;;  %1713 = vmatprep.mubr.msk.f32.mxu1 %vm389_vm4, %v701_v51 }
  0xe2   : > { %v338_v53 = vpop.permute.xlu0 %337  ;;  %v703_v56 = vrot.slane %v672_v55, 1 }
  0xe3   : > { %v373_v62 = vsel %vm365_vm2, %v364_v52, %v338_v53 }
  0xe4   : > { %v702_v57 = vrot.slane %v373_v62, 1  ;;  %1686 = vmatmul.mubr.msk.f32.gmra.mrb[6].mxu0 %vm389_vm4, %v373_v62  ;;  %v1170_v58 = vpop.permute.xlu1 %1169 }
  0xe5   : > { %1732 = vmatprep.mubr.msk.f32.mxu0 %vm389_vm4, %v2165_v59  ;;  %v1178_v0 = vsel %vm347_vm1, %v2105_v7, %v1170_v58 }
  0xe6   : > { %v936_v11 = vpop.permute.xlu0 %935  ;;  %v704_v61 = vsel %vm245_vm0, %v702_v57, %v703_v56 }
  0xe7   : > { %1714 = vmatmul.mubr.msk.f32.gmra.mrb[6].mxu1 %vm389_vm4, %v704_v61  ;;  %v949_v59 = vsel %vm347_vm1, %v2101_v6, %v936_v11 }
  0xe8   : > { %1733 = vmatmul.mubr.msk.f32.vlgmr.msra.gmra.mrb[8].mxu0 %vm389_vm4, %v2205_v29  ;;  %1760 = vmatprep.mubr.msk.f32.mxu1 %vm389_vm4, %v2178_v8  ;;  %v1173_v60 = vpop.permute.xlu1 %1172 }
  0xe9   : > { %1735 = vmatprep.mubr.msk.f32.mxu0 %vm389_vm4, %v2227_v47  ;;  %v1179_v3 = vsel %vm356_vm3, %v1178_v0, %v1173_v60 }
  0xea   : > { %v940_v2 = vpop.permute.xlu0 %939 }
  0xeb   : > { %1761 = vmatmul.mubr.msk.f32.vlgmr.msra.gmra.mrb[8].mxu1 %vm389_vm4, %v2218_v43  ;;  %v950_v7 = vsel %vm356_vm3, %v949_v59, %v940_v2 }
  0xec   : > { %1736 = vmatmul.mubr.msk.f32.gmra.mrb[10].mxu0 %vm389_vm4, %v2241_v1  ;;  %1763 = vmatprep.mubr.msk.f32.mxu1 %vm389_vm4, %v2233_v39  ;;  %v1176_v8 = vpop.permute.xlu1 %1175 }
  0xed   : > { %1738 = vmatprep.mubr.msk.f32.mxu0 %vm389_vm4, %v371_v23  ;;  %v1180_v6 = vsel %vm365_vm2, %v1179_v3, %v1176_v8 }
  0xee   : > { %v947_v29 = vpop.permute.xlu0 %946  ;;  %v1183_v43 = vrot.slane %v1180_v6, 1 }
  0xef   : > { %v951_v47 = vsel %vm365_vm2, %v950_v7, %v947_v29  ;;  %1764 = vmatmul.mubr.msk.f32.gmra.mrb[10].mxu1 %vm389_vm4, %v2254_v19 }
  0xf0   : > { %1739 = vmatmul.mubr.msk.f32.gmra.mrb[12].mxu0 %vm389_vm4, %v372_v36  ;;  %1766 = vmatprep.mubr.msk.f32.mxu1 %vm389_vm4, %v698_v27  ;;  %v1182_v39 = vrot.slane %v951_v47, 1 }
  0xf1   : > { %1741 = vmatprep.mubr.msk.f32.mxu0 %vm389_vm4, %v373_v62 }
  0xf2   : > { %v1184_v1 = vsel %vm245_vm0, %v1182_v39, %v1183_v43  ;;  %v2328_v44 = vpop.permute.xlu0 %720 }
  0xf3   : > { %1767 = vmatmul.mubr.msk.f32.gmra.mrb[12].mxu1 %vm389_vm4, %v701_v51 }
  0xf4   : > { %1742 = vmatmul.mubr.msk.f32.gmra.mrb[14].mxu0 %vm389_vm4, %v951_v47  ;;  %1769 = vmatprep.mubr.msk.f32.mxu1 %vm389_vm4, %v704_v61 }
  0xf7   : > { %1770 = vmatmul.mubr.msk.f32.gmra.mrb[14].mxu1 %vm389_vm4, %v1184_v1 }
 0x16f   : > { %v1678_v5 = vpop.f32.mrb[0].mxu0 }
 0x170   : > { %v486_v9 = vadd.f32 %v1678_v5, %v2129_v20  ;;  %v480_v10 = vpop.f32.mrb[1].mxu0 }
 0x171   : > { %v481_v14 = vadd.f32 %v2129_v20, %v480_v10 }
 0x172   : > { %520 = vst.msk [vmem:[%s2325_s29 + $0x8] sm:$0xff] %vm347_vm1, %v486_v9  ;;  %v528_v63 = vsel %vm347_vm1, %v486_v9, 0.0  ;;  %v549_v15 = vmul.f32 %v486_v9, %v486_v9  ;;  %v1706_v17 = vpop.f32.mrb[0].mxu1 }
 0x173   : > { %519 = vst.msk [vmem:[%s2325_s29] sm:$0xff] %vm347_vm1, %v481_v14  ;;  %v527_v18 = vsel %vm347_vm1, %v481_v14, 0.0  ;;  %v548_v19 = vmul.f32 %v481_v14, %v481_v14  ;;  %v805_v45 = vpop.f32.mrb[1].mxu1  ;;  %v811_v21 = vadd.f32 %v1706_v17, %v2328_v44 }
 0x174   : > { %v557_v50 = vsel %vm347_vm1, %v549_v15, 0.0  ;;  %v529_v22 = vadd.f32 %v528_v63, %v527_v18  ;;  %v806_v23 = vadd.f32 %v805_v45, %v2328_v44 }
 0x175   : > { %v556_v24 = vsel %vm347_vm1, %v548_v19, 0.0  ;;  %854 = vrot.lane.b32.xlu1 %v811_v21, %s1860_s12  ;;  %v886_v25 = vsel %vm347_vm1, %v811_v21, 0.0  ;;  %v907_v4 = vmul.f32 %v811_v21, %v811_v21 }
 0x176   : > { %v558_v26 = vadd.f32 %v557_v50, %v556_v24  ;;  %v885_v27 = vsel %vm347_vm1, %v806_v23, 0.0  ;;  %v906_v49 = vmul.f32 %v806_v23, %v806_v23  ;;  %852 = vrot.lane.b32.xlu0 %v806_v23, %s1860_s12 }
 0x177   : > { %v915_v28 = vsel %vm347_vm1, %v907_v4, 0.0  ;;  %v887_v30 = vadd.f32 %v886_v25, %v885_v27 }
 0x178   : > { %v914_v34 = vsel %vm347_vm1, %v906_v49, 0.0 }
 0x179   : > { %v916_v31 = vadd.f32 %v915_v28, %v914_v34  ;;  %v2385_v34 = vpop.permute.xlu1 %967 }
 0x187   : > { %v1681_v32 = vpop.f32.mrb[2].mxu0 }
 0x188   : > { %v496_v33 = vadd.f32 %v1681_v32, %v2129_v20  ;;  %v490_v36 = vpop.f32.mrb[3].mxu0 }
 0x189   : > { %v491_v37 = vadd.f32 %v2129_v20, %v490_v36 }
 0x18a   : > { %522 = vst.msk [vmem:[%s2325_s29 + $0x18] sm:$0xff] %vm347_vm1, %v496_v33  ;;  %v1709_v16 = vpop.f32.mrb[2].mxu1  ;;  %v551_v38 = vmul.f32 %v496_v33, %v496_v33  ;;  %v532_v46 = vsel %vm347_vm1, %v496_v33, 0.0 }
 0x18b   : > { %521 = vst.msk [vmem:[%s2325_s29 + $0x10] sm:$0xff] %vm347_vm1, %v491_v37  ;;  %v530_v41 = vsel %vm347_vm1, %v491_v37, 0.0  ;;  %v550_v42 = vmul.f32 %v491_v37, %v491_v37  ;;  %v821_v54 = vadd.f32 %v1709_v16, %v2328_v44  ;;  %v815_v35 = vpop.f32.mrb[3].mxu1 }
 0x18c   : > { %v531_v12 = vadd.f32 %v530_v41, %v529_v22  ;;  %v816_v40 = vadd.f32 %v815_v35, %v2328_v44  ;;  %v561_v62 = vsel %vm347_vm1, %v551_v38, 0.0 }
 0x18d   : > { %v559_v48 = vsel %vm347_vm1, %v550_v42, 0.0  ;;  %v909_v51 = vmul.f32 %v821_v54, %v821_v54  ;;  %858 = vrot.lane.b32.xlu1 %v821_v54, %s1860_s12  ;;  %v890_v57 = vsel %vm347_vm1, %v821_v54, 0.0 }
 0x18e   : > { %v560_v13 = vadd.f32 %v559_v48, %v558_v26  ;;  %v888_v55 = vsel %vm347_vm1, %v816_v40, 0.0  ;;  %v908_v52 = vmul.f32 %v816_v40, %v816_v40  ;;  %856 = vrot.lane.b32.xlu0 %v816_v40, %s1860_s12  ;;  %v533_v53 = vadd.f32 %v532_v46, %v531_v12 }
 0x18f   : > { %v889_v56 = vadd.f32 %v888_v55, %v887_v30  ;;  %v919_v0 = vsel %vm347_vm1, %v909_v51, 0.0 }
 0x190   : > { %v917_v58 = vsel %vm347_vm1, %v908_v52, 0.0  ;;  %v562_v11 = vadd.f32 %v561_v62, %v560_v13 }
 0x191   : > { %v918_v61 = vadd.f32 %v917_v58, %v916_v31  ;;  %v891_v60 = vadd.f32 %v890_v57, %v889_v56 }
 0x193   : > { %v920_v2 = vadd.f32 %v919_v0, %v918_v61  ;;  %v2410_v0 = vpop.permute.xlu0 %1200 }
 0x19f   : > { %v1684_v59 = vpop.f32.mrb[4].mxu0 }
 0x1a0   : > { %v506_v3 = vadd.f32 %v1684_v59, %v2129_v20  ;;  %v500_v8 = vpop.f32.mrb[5].mxu0 }
 0x1a1   : > { %v501_v7 = vadd.f32 %v2129_v20, %v500_v8 }
 0x1a2   : > { %524 = vst.msk [vmem:[%s2325_s29 + $0x28] sm:$0xff] %vm347_vm1, %v506_v3  ;;  %v1712_v29 = vpop.f32.mrb[4].mxu1  ;;  %v553_v6 = vmul.f32 %v506_v3, %v506_v3  ;;  %v536_v10 = vsel %vm347_vm1, %v506_v3, 0.0 }
 0x1a3   : > { %523 = vst.msk [vmem:[%s2325_s29 + $0x20] sm:$0xff] %vm347_vm1, %v501_v7  ;;  %v534_v47 = vsel %vm347_vm1, %v501_v7, 0.0  ;;  %v552_v43 = vmul.f32 %v501_v7, %v501_v7  ;;  %v831_v39 = vadd.f32 %v1712_v29, %v2328_v44  ;;  %v825_v1 = vpop.f32.mrb[5].mxu1 }
 0x1a4   : > { %v535_v5 = vadd.f32 %v534_v47, %v533_v53  ;;  %v826_v9 = vadd.f32 %v825_v1, %v2328_v44  ;;  %v565_v45 = vsel %vm347_vm1, %v553_v6, 0.0 }
 0x1a5   : > { %v563_v14 = vsel %vm347_vm1, %v552_v43, 0.0  ;;  %v911_v63 = vmul.f32 %v831_v39, %v831_v39  ;;  %862 = vrot.lane.b32.xlu1 %v831_v39, %s1860_s12  ;;  %v894_v50 = vsel %vm347_vm1, %v831_v39, 0.0 }
 0x1a6   : > { %v564_v15 = vadd.f32 %v563_v14, %v562_v11  ;;  %v892_v17 = vsel %vm347_vm1, %v826_v9, 0.0  ;;  %v910_v18 = vmul.f32 %v826_v9, %v826_v9  ;;  %860 = vrot.lane.b32.xlu0 %v826_v9, %s1860_s12  ;;  %v537_v19 = vadd.f32 %v536_v10, %v535_v5 }
 0x1a7   : > { %v893_v21 = vadd.f32 %v892_v17, %v891_v60  ;;  %v923_v4 = vsel %vm347_vm1, %v911_v63, 0.0 }
 0x1a8   : > { %v921_v22 = vsel %vm347_vm1, %v910_v18, 0.0  ;;  %v566_v23 = vadd.f32 %v565_v45, %v564_v15 }
 0x1a9   : > { %v922_v24 = vadd.f32 %v921_v22, %v920_v2  ;;  %v895_v25 = vadd.f32 %v894_v50, %v893_v21 }
 0x1ab   : > { %v924_v26 = vadd.f32 %v923_v4, %v922_v24 }
 0x1b7   : > { %v1687_v27 = vpop.f32.mrb[6].mxu0 }
 0x1b8   : > { %v516_v49 = vadd.f32 %v1687_v27, %v2129_v20  ;;  %v510_v28 = vpop.f32.mrb[7].mxu0 }
 0x1b9   : > { %v511_v30 = vadd.f32 %v2129_v20, %v510_v28 }
 0x1ba   : > { %526 = vst.msk [vmem:[%s2325_s29 + $0x38] sm:$0xff] %vm347_vm1, %v516_v49  ;;  %v1715_v31 = vpop.f32.mrb[6].mxu1  ;;  %v555_v32 = vmul.f32 %v516_v49, %v516_v49  ;;  %v540_v35 = vsel %vm347_vm1, %v516_v49, 0.0 }
 0x1bb   : > { %525 = vst.msk [vmem:[%s2325_s29 + $0x30] sm:$0xff] %vm347_vm1, %v511_v30  ;;  %v538_v33 = vsel %vm347_vm1, %v511_v30, 0.0  ;;  %v554_v36 = vmul.f32 %v511_v30, %v511_v30  ;;  %v841_v37 = vadd.f32 %v1715_v31, %v2328_v44  ;;  %v835_v16 = vpop.f32.mrb[7].mxu1  ;;  %v1734_v38 = vpop.f32.mrb[8].mxu0 }
 0x1bc   : > { %v539_v41 = vadd.f32 %v538_v33, %v537_v19  ;;  %v836_v42 = vadd.f32 %v835_v16, %v2328_v44  ;;  %v1045_v20 = vadd.f32 %v1734_v38, %v2385_v34  ;;  %v1039_v54 = vpop.f32.mrb[9].mxu0  ;;  %v569_v44 = vsel %vm347_vm1, %v555_v32, 0.0 }
 0x1bd   : > { %v567_v12 = vsel %vm347_vm1, %v554_v36, 0.0  ;;  %v1040_v40 = vadd.f32 %v1039_v54, %v2385_v34  ;;  %866 = vrot.lane.b32.xlu1 %v841_v37, %s1860_s12  ;;  %v898_v11 = vsel %vm347_vm1, %v841_v37, 0.0  ;;  %v913_v59 = vmul.f32 %v841_v37, %v841_v37 }
 0x1be   : > { %v2399_v46 = vadd.f32 %v540_v35, %v539_v41  ;;  %v568_v48 = vadd.f32 %v567_v12, %v566_v23  ;;  %v896_v51 = vsel %vm347_vm1, %v836_v42, 0.0  ;;  %v912_v13 = vmul.f32 %v836_v42, %v836_v42  ;;  %v1762_v55 = vpop.f32.mrb[8].mxu1  ;;  %864 = vrot.lane.b32.xlu0 %v836_v42, %s1860_s12 }
 0x1bf   : > { %v897_v52 = vadd.f32 %v896_v51, %v895_v25  ;;  %v1120_v53 = vsel %vm347_vm1, %v1045_v20, 0.0  ;;  %v1141_v62 = vmul.f32 %v1045_v20, %v1045_v20  ;;  %v1737_v56 = vpop.f32.mrb[10].mxu0  ;;  %v1271_v57 = vpop.f32.mrb[9].mxu1  ;;  %v1119_v60 = vsel %vm347_vm1, %v1040_v40, 0.0 }
 0x1c0   : > { %v2405_v58 = vadd.f32 %v569_v44, %v568_v48  ;;  %v925_v61 = vsel %vm347_vm1, %v912_v13, 0.0  ;;  %v1049_v2 = vpop.f32.mrb[11].mxu0  ;;  %v1121_v7 = vadd.f32 %v1120_v53, %v1119_v60  ;;  %v1140_v6 = vmul.f32 %v1040_v40, %v1040_v40 }
 0x1c1   : > { %v2412_v3 = vadd.f32 %v898_v11, %v897_v52  ;;  %v2414_v8 = vadd.f32 %v925_v61, %v924_v26  ;;  %1086 = vrot.lane.b32.xlu1 %v1040_v40, %s1859_s11  ;;  %v1149_v29 = vsel %vm347_vm1, %v1141_v62, 0.0  ;;  %v1055_v47 = vadd.f32 %v1737_v56, %v2385_v34 }
 0x1c2   : > { %v1765_v43 = vpop.f32.mrb[10].mxu1  ;;  %1088 = vrot.lane.b32.xlu0 %v1045_v20, %s1859_s11  ;;  %v1272_v39 = vadd.f32 %v1271_v57, %v2410_v0  ;;  %v1050_v1 = vadd.f32 %v1049_v2, %v2385_v34  ;;  %v1148_v14 = vsel %vm347_vm1, %v1140_v6, 0.0  ;;  %v1277_v18 = vadd.f32 %v1762_v55, %v2410_v0 }
 0x1c3   : > { %v1287_v5 = vadd.f32 %v1765_v43, %v2410_v0  ;;  %v1740_v9 = vpop.f32.mrb[12].mxu0  ;;  %v1281_v10 = vpop.f32.mrb[11].mxu1  ;;  %v1143_v63 = vmul.f32 %v1055_v47, %v1055_v47  ;;  %v2429_v19 = vsel %vm347_vm1, %v913_v59, 0.0  ;;  %v1150_v45 = vadd.f32 %v1149_v29, %v1148_v14 }
 0x1c4   : > { %v2425_v15 = vadd.f32 %v1740_v9, %v2385_v34  ;;  %v1059_v17 = vpop.f32.mrb[13].mxu0  ;;  %v1372_v21 = vmul.f32 %v1272_v39, %v1272_v39  ;;  %v1122_v50 = vsel %vm347_vm1, %v1050_v1, 0.0  ;;  %v1124_v22 = vsel %vm347_vm1, %v1055_v47, 0.0 }
 0x1c5   : > { %1318 = vrot.lane.b32.xlu1 %v1272_v39, %s1861_s5  ;;  %v1351_v23 = vsel %vm347_vm1, %v1272_v39, 0.0  ;;  %v1123_v24 = vadd.f32 %v1122_v50, %v1121_v7  ;;  %v1142_v25 = vmul.f32 %v1050_v1, %v1050_v1  ;;  %v1153_v26 = vsel %vm347_vm1, %v1143_v63, 0.0 }
 0x1c6   : > { %v1768_v4 = vpop.f32.mrb[12].mxu1  ;;  %1320 = vrot.lane.b32.xlu0 %v1277_v18, %s1861_s5  ;;  %v1356_v27 = vsel %vm347_vm1, %v1287_v5, 0.0  ;;  %v1375_v49 = vmul.f32 %v1287_v5, %v1287_v5  ;;  %v1145_v28 = vmul.f32 %v2425_v15, %v2425_v15  ;;  %v1282_v33 = vadd.f32 %v1281_v10, %v2410_v0 }
 0x1c7   : > { %v1743_v30 = vpop.f32.mrb[14].mxu0  ;;  %v1291_v31 = vpop.f32.mrb[13].mxu1  ;;  %v1151_v32 = vsel %vm347_vm1, %v1142_v25, 0.0  ;;  %v1060_v36 = vadd.f32 %v1059_v17, %v2385_v34  ;;  %v1125_v37 = vadd.f32 %v1124_v22, %v1123_v24  ;;  %v1380_v38 = vsel %vm347_vm1, %v1372_v21, 0.0 }
 0x1c8   : > { %v1069_v16 = vpop.f32.mrb[15].mxu0  ;;  %v1152_v41 = vadd.f32 %v1151_v32, %v1150_v45  ;;  %v1128_v42 = vsel %vm347_vm1, %v2425_v15, 0.0  ;;  %v1297_v20 = vadd.f32 %v1768_v4, %v2410_v0  ;;  %v1385_v54 = vsel %vm347_vm1, %v1375_v49, 0.0 }
 0x1c9   : > { %1090 = vrot.lane.b32.xlu1 %v1050_v1, %s1859_s11  ;;  %v1374_v35 = vmul.f32 %v1282_v33, %v1282_v33  ;;  %v1126_v12 = vsel %vm347_vm1, %v1060_v36, 0.0  ;;  %v1144_v40 = vmul.f32 %v1060_v36, %v1060_v36  ;;  %v1157_v51 = vsel %vm347_vm1, %v1145_v28, 0.0 }
 0x1ca   : > { %v1771_v48 = vpop.f32.mrb[14].mxu1  ;;  %1092 = vrot.lane.b32.xlu0 %v1055_v47, %s1859_s11  ;;  %v1354_v13 = vsel %vm347_vm1, %v1282_v33, 0.0  ;;  %v1127_v55 = vadd.f32 %v1126_v12, %v1125_v37  ;;  %v1154_v44 = vadd.f32 %v1153_v26, %v1152_v41  ;;  %v1360_v62 = vsel %vm347_vm1, %v1297_v20, 0.0 }
 0x1cb   : > { %v1301_v52 = vpop.f32.mrb[15].mxu1  ;;  %v1155_v53 = vsel %vm347_vm1, %v1144_v40, 0.0  ;;  %v1352_v56 = vsel %vm347_vm1, %v1277_v18, 0.0  ;;  %v1373_v57 = vmul.f32 %v1277_v18, %v1277_v18  ;;  %v1383_v11 = vsel %vm347_vm1, %v1374_v35, 0.0 }
 0x1cc   : > { %v1156_v61 = vadd.f32 %v1155_v53, %v1154_v44  ;;  %v1353_v60 = vadd.f32 %v1352_v56, %v1351_v23  ;;  %v1075_v2 = vadd.f32 %v1743_v30, %v2385_v34  ;;  %v1292_v7 = vadd.f32 %v1291_v31, %v2410_v0 }
 0x1cd   : > { %1322 = vrot.lane.b32.xlu1 %v1282_v33, %s1861_s5  ;;  %v1381_v59 = vsel %vm347_vm1, %v1373_v57, 0.0  ;;  %v1070_v29 = vadd.f32 %v1069_v16, %v2385_v34  ;;  %v1129_v6 = vadd.f32 %v1128_v42, %v1127_v55  ;;  %v1377_v47 = vmul.f32 %v1297_v20, %v1297_v20 }
 0x1ce   : > { %1324 = vrot.lane.b32.xlu0 %v1287_v5, %s1861_s5  ;;  %v1382_v43 = vadd.f32 %v1381_v59, %v1380_v38  ;;  %v1147_v39 = vmul.f32 %v1075_v2, %v1075_v2  ;;  %v1355_v1 = vadd.f32 %v1354_v13, %v1353_v60  ;;  %v1358_v9 = vsel %vm347_vm1, %v1292_v7, 0.0 }
 0x1cf   : > { %v1376_v10 = vmul.f32 %v1292_v7, %v1292_v7  ;;  %v1130_v14 = vsel %vm347_vm1, %v1070_v29, 0.0  ;;  %v1146_v63 = vmul.f32 %v1070_v29, %v1070_v29  ;;  %v1132_v17 = vsel %vm347_vm1, %v1075_v2, 0.0 }
 0x1d0   : > { %v1357_v18 = vadd.f32 %v1356_v27, %v1355_v1  ;;  %v1384_v45 = vadd.f32 %v1383_v11, %v1382_v43  ;;  %v1131_v21 = vadd.f32 %v1130_v14, %v1129_v6  ;;  %v1158_v5 = vadd.f32 %v1157_v51, %v1156_v61 }
 0x1d1   : > { %1094 = vrot.lane.b32.xlu1 %v1060_v36, %s1859_s11  ;;  %v1387_v34 = vsel %vm347_vm1, %v1376_v10, 0.0  ;;  %v1159_v50 = vsel %vm347_vm1, %v1146_v63, 0.0  ;;  %v2470_v22 = vadd.f32 %v1771_v48, %v2410_v0  ;;  %v2475_v4 = vadd.f32 %v1301_v52, %v2410_v0 }
 0x1d2   : > { %1096 = vrot.lane.b32.xlu0 %v2425_v15, %s1859_s11  ;;  %v1359_v23 = vadd.f32 %v1358_v9, %v1357_v18  ;;  %v1386_v24 = vadd.f32 %v1385_v54, %v1384_v45  ;;  %v1133_v25 = vadd.f32 %v1132_v17, %v1131_v21  ;;  %v1389_v26 = vsel %vm347_vm1, %v1377_v47, 0.0 }
 0x1d3   : > { %v1161_v27 = vsel %vm347_vm1, %v1147_v39, 0.0  ;;  %v1160_v49 = vadd.f32 %v1159_v50, %v1158_v5  ;;  %v900_v28 = vrot.slane %v2412_v3, 4  ;;  %v1362_v32 = vsel %vm347_vm1, %v2475_v4, 0.0 }
 0x1d4   : > { %v1388_v30 = vadd.f32 %v1387_v34, %v1386_v24  ;;  %v1361_v31 = vadd.f32 %v1360_v62, %v1359_v23  ;;  %v1378_v15 = vmul.f32 %v2475_v4, %v2475_v4  ;;  %v1379_v0 = vmul.f32 %v2470_v22, %v2470_v22 }
 0x1d5   : > { %1326 = vrot.lane.b32.xlu1 %v1292_v7, %s1861_s5  ;;  %v901_v33 = vadd.f32 %v900_v28, %v2412_v3  ;;  %v1162_v36 = vadd.f32 %v1161_v27, %v1160_v49  ;;  %v928_v37 = vadd.f32 %v2429_v19, %v2414_v8  ;;  %v1134_v42 = vrot.slane %v1133_v25, 4 }
 0x1d6   : > { %1328 = vrot.lane.b32.xlu0 %v1297_v20, %s1861_s5  ;;  %v1363_v16 = vadd.f32 %v1362_v32, %v1361_v31  ;;  %v1390_v38 = vadd.f32 %v1389_v26, %v1388_v30  ;;  %v1391_v41 = vsel %vm347_vm1, %v1378_v15, 0.0  ;;  %v1364_v54 = vsel %vm347_vm1, %v2470_v22, 0.0 }
 0x1d7   : > { %v902_v35 = vrot.slane %v901_v33, 2  ;;  %v1163_v12 = vrot.slane %v1162_v36, 4  ;;  %v929_v40 = vrot.slane %v928_v37, 4  ;;  %v1135_v3 = vadd.f32 %v1134_v42, %v1133_v25 }
 0x1d8   : > { %v1365_v48 = vadd.f32 %v1364_v54, %v1363_v16  ;;  %v1392_v51 = vadd.f32 %v1391_v41, %v1390_v38  ;;  %v1393_v20 = vsel %vm347_vm1, %v1379_v0, 0.0 }
 0x1d9   : > { %1098 = vrot.lane.b32.xlu1 %v1070_v29, %s1859_s11  ;;  %v903_v8 = vadd.f32 %v902_v35, %v901_v33  ;;  %v1164_v19 = vadd.f32 %v1163_v12, %v1162_v36  ;;  %v930_v13 = vadd.f32 %v929_v40, %v928_v37  ;;  %v1136_v44 = vrot.slane %v1135_v3, 2 }
 0x1da   : > { %1100 = vrot.lane.b32.xlu0 %v1075_v2, %s1859_s11  ;;  %v1366_v55 = vrot.slane %v1365_v48, 4  ;;  %v1394_v52 = vadd.f32 %v1393_v20, %v1392_v51  ;;  %v571_v36 = vrot.slane %v2405_v58, 4  ;;  %v542_v37 = vrot.slane %v2399_v46, 4 }
 0x1db   : > { %v904_v53 = vrot.slane %v903_v8, 1  ;;  %v1165_v62 = vrot.slane %v1164_v19, 2  ;;  %v931_v56 = vrot.slane %v930_v13, 2  ;;  %v1137_v7 = vadd.f32 %v1136_v44, %v1135_v3 }
 0x1dc   : > { %v1367_v57 = vadd.f32 %v1366_v55, %v1365_v48  ;;  %v1395_v11 = vrot.slane %v1394_v52, 4  ;;  %v572_v41 = vadd.f32 %v571_v36, %v2405_v58  ;;  %v543_v42 = vadd.f32 %v542_v37, %v2399_v46 }
 0x1dd   : > { %v905_v61 = vadd.f32 %v904_v53, %v903_v8  ;;  %v1166_v60 = vadd.f32 %v1165_v62, %v1164_v19  ;;  %v932_v59 = vadd.f32 %v931_v56, %v930_v13  ;;  %v1138_v10 = vrot.slane %v1137_v7, 1 }
 0x1de   : > { %v1368_v29 = vrot.slane %v1367_v57, 2  ;;  %v1396_v6 = vadd.f32 %v1395_v11, %v1394_v52  ;;  %v573_v12 = vrot.slane %v572_v41, 2  ;;  %v544_v40 = vrot.slane %v543_v42, 2 }
 0x1df   : > { %1402 = vrot.lane.b32.xlu1 %v905_v61, %s1860_s12  ;;  %v1167_v2 = vrot.slane %v1166_v60, 1  ;;  %v933_v47 = vrot.slane %v932_v59, 1  ;;  %v1139_v18 = vadd.f32 %v1138_v10, %v1137_v7 }
 0x1e0   : > { %v1369_v43 = vadd.f32 %v1368_v29, %v1367_v57  ;;  %v1397_v39 = vrot.slane %v1396_v6, 2  ;;  %v574_v48 = vadd.f32 %v573_v12, %v572_v41  ;;  %v545_v3 = vadd.f32 %v544_v40, %v543_v42 }
 0x1e1   : > { %v1168_v1 = vadd.f32 %v1167_v2, %v1166_v60  ;;  %v934_v9 = vadd.f32 %v933_v47, %v932_v59 }
 0x1e2   : > { %v1370_v14 = vrot.slane %v1369_v43, 1  ;;  %v1398_v63 = vadd.f32 %v1397_v39, %v1396_v6  ;;  %v575_v20 = vrot.slane %v574_v48, 1  ;;  %v546_v13 = vrot.slane %v545_v3, 1 }
 0x1e3   : > { %1421 = vrot.lane.b32.xlu0 %v1168_v1, %s1859_s11  ;;  %1417 = vrot.lane.b32.xlu1 %v934_v9, %s1860_s12 }
 0x1e4   : > { %v1371_v17 = vadd.f32 %v1370_v14, %v1369_v43  ;;  %v1399_v45 = vrot.slane %v1398_v63, 1  ;;  %v576_v58 = vadd.f32 %v575_v20, %v574_v48  ;;  %v547_v44 = vadd.f32 %v546_v13, %v545_v3 }
 0x1e6   : > { %v1400_v5 = vadd.f32 %v1399_v45, %v1398_v63 }
 0x1e7   : > { %v855_v21 = vpop.permute.xlu1 %854  ;;  %1410 = vrot.lane.b32.xlu0 %v1371_v17, %s1861_s5  ;;  %1406 = vrot.lane.b32.xlu1 %v1139_v18, %s1859_s11  ;;  %s1532_s11 = sshll.u32 %s2578_s16, 1 }
 0x1e8   : > { %878 = vst.msk [vmem:[%s2325_s29 + $0x8] sm:$0xff] %vm876_vm5, %v855_v21  ;;  %v853_v34 = vpop.permute.xlu0 %852  ;;  %s208_s30 = scalar_lea.vmem %s2576_s4, %s1532_s11 }
 0x1e9   : > { %877 = vst.msk [vmem:[%s2325_s29] sm:$0xff] %vm876_vm5, %v853_v34 }
 0x1eb   : > { %1425 = vrot.lane.b32.xlu0 %v1400_v5, %s1861_s5  ;;  %1330 = vrot.lane.b32.xlu1 %v2475_v4, %s1861_s5 }
 0x1ef   : > { %1332 = vrot.lane.b32.xlu0 %v2470_v22, %s1861_s5 }
 0x1ff   : > { %v859_v50 = vpop.permute.xlu1 %858 }
 0x200   : > { %880 = vst.msk [vmem:[%s2325_s29 + $0x18] sm:$0xff] %vm876_vm5, %v859_v50  ;;  %v857_v23 = vpop.permute.xlu0 %856 }
 0x201   : > { %879 = vst.msk [vmem:[%s2325_s29 + $0x10] sm:$0xff] %vm876_vm5, %v857_v23 }
 0x217   : > { %v863_v24 = vpop.permute.xlu1 %862 }
 0x218   : > { %882 = vst.msk [vmem:[%s2325_s29 + $0x28] sm:$0xff] %vm876_vm5, %v863_v24  ;;  %v861_v25 = vpop.permute.xlu0 %860 }
 0x219   : > { %881 = vst.msk [vmem:[%s2325_s29 + $0x20] sm:$0xff] %vm876_vm5, %v861_v25 }
 0x22f   : > { %v867_v4 = vpop.permute.xlu1 %866 }
 0x230   : > { %884 = vst.msk [vmem:[%s2325_s29 + $0x38] sm:$0xff] %vm876_vm5, %v867_v4  ;;  %v865_v22 = vpop.permute.xlu0 %864 }
 0x231   : > { %883 = vst.msk [vmem:[%s2325_s29 + $0x30] sm:$0xff] %vm876_vm5, %v865_v22 }
 0x233   : > { %v1087_v26 = vpop.permute.xlu1 %1086 }
 0x234   : > { %1111 = vst.msk [vmem:[%s2325_s29] sm:$0xff] %vm1110_vm6, %v1087_v26  ;;  %v1089_v27 = vpop.permute.xlu0 %1088 }
 0x235   : > { %1112 = vst.msk [vmem:[%s2325_s29 + $0x8] sm:$0xff] %vm1110_vm6, %v1089_v27 }
 0x237   : > { %v1319_v49 = vpop.permute.xlu1 %1318 }
 0x238   : > { %1343 = vst.msk [vmem:[%s2325_s29] sm:$0xff] %vm1342_vm7, %v1319_v49  ;;  %v1321_v28 = vpop.permute.xlu0 %1320 }
 0x239   : > { %1344 = vst.msk [vmem:[%s2325_s29 + $0x8] sm:$0xff] %vm1342_vm7, %v1321_v28 }
 0x23b   : > { %v1091_v30 = vpop.permute.xlu1 %1090 }
 0x23c   : > { %1113 = vst.msk [vmem:[%s2325_s29 + $0x10] sm:$0xff] %vm1110_vm6, %v1091_v30  ;;  %v1093_v31 = vpop.permute.xlu0 %1092 }
 0x23d   : > { %1114 = vst.msk [vmem:[%s2325_s29 + $0x18] sm:$0xff] %vm1110_vm6, %v1093_v31 }
 0x23f   : > { %v1323_v32 = vpop.permute.xlu1 %1322 }
 0x240   : > { %1345 = vst.msk [vmem:[%s2325_s29 + $0x10] sm:$0xff] %vm1342_vm7, %v1323_v32  ;;  %v1325_v15 = vpop.permute.xlu0 %1324 }
 0x241   : > { %1346 = vst.msk [vmem:[%s2325_s29 + $0x18] sm:$0xff] %vm1342_vm7, %v1325_v15 }
 0x243   : > { %v1095_v0 = vpop.permute.xlu1 %1094 }
 0x244   : > { %1115 = vst.msk [vmem:[%s2325_s29 + $0x20] sm:$0xff] %vm1110_vm6, %v1095_v0  ;;  %v1097_v33 = vpop.permute.xlu0 %1096 }
 0x245   : > { %1116 = vst.msk [vmem:[%s2325_s29 + $0x28] sm:$0xff] %vm1110_vm6, %v1097_v33 }
 0x247   : > { %v1327_v16 = vpop.permute.xlu1 %1326 }
 0x248   : > { %1347 = vst.msk [vmem:[%s2325_s29 + $0x20] sm:$0xff] %vm1342_vm7, %v1327_v16  ;;  %v1329_v38 = vpop.permute.xlu0 %1328 }
 0x249   : > { %1348 = vst.msk [vmem:[%s2325_s29 + $0x28] sm:$0xff] %vm1342_vm7, %v1329_v38 }
 0x24b   : > { %v1099_v54 = vpop.permute.xlu1 %1098 }
 0x24c   : > { %1117 = vst.msk [vmem:[%s2325_s29 + $0x30] sm:$0xff] %vm1110_vm6, %v1099_v54  ;;  %v1101_v35 = vpop.permute.xlu0 %1100 }
 0x24d   : > { %1118 = vst.msk [vmem:[%s2325_s29 + $0x38] sm:$0xff] %vm1110_vm6, %v1101_v35 }
 0x251   : > { %v1403_v51 = vpop.permute.xlu1 %1402 }
 0x252   : > { %v1413_v53 = vsel %vm347_vm1, %v547_v44, %v1403_v51 }
 0x255   : > { %v1422_v8 = vpop.permute.xlu0 %1421  ;;  %v1418_v19 = vpop.permute.xlu1 %1417 }
 0x256   : > { %v1428_v52 = vsel %vm347_vm1, %v576_v58, %v1418_v19 }
 0x257   : > { %v1429_v56 = vsel %vm356_vm3, %v1428_v52, %v1422_v8 }
 0x259   : > { %v1411_v55 = vpop.permute.xlu0 %1410  ;;  %v1407_v46 = vpop.permute.xlu1 %1406 }
 0x25a   : > { %v1414_v62 = vsel %vm356_vm3, %v1413_v53, %v1407_v46 }
 0x25b   : > { %v1415_v59 = vsel %vm365_vm2, %v1414_v62, %v1411_v55 }
 0x25d   : > { %v1426_v57 = vpop.permute.xlu0 %1425  ;;  %v1331_v11 = vpop.permute.xlu1 %1330 }
 0x25e   : > { %v1430_v61 = vsel %vm365_vm2, %v1429_v56, %v1426_v57  ;;  %1349 = vst.msk [vmem:[%s2325_s29 + $0x30] sm:$0xff] %vm1342_vm7, %v1331_v11 }
 0x25f   : > { %v1432_v60 = vrot.slane %v1430_v61, 7 }
 0x261   : > { %v1435_v7 = vsel %vm1434_vm8, %v1415_v59, %v1432_v60  ;;  %v1333_v29 = vpop.permute.xlu0 %1332 }
 0x262   : > { %1437 = vst.msk [vmem:[%s208_s30] sm:$0x3] %vm1436_vm9, %v1435_v7 }
 0x263   : > { %1350 = vst.msk [vmem:[%s2325_s29 + $0x38] sm:$0xff] %vm1342_vm7, %v1333_v29 }
 0x264 PF: > { %s15_s15 = sadd.s32 1, %s1857_s15  }
 0x265   : > { %p12_p4 = scmp.ge.s32.totalorder %s15_s15, 4  }
 0x267   :  { %14 = sbr.rel (!%p12_p4) target bundleno = 1 (0x1), region = 77 }

// kernel: tile.28
= control target key start
LH: loop header
LB: loop body
LE: loop exit
PB: predicated region body
PF: predicated region fallthrough
CT: control target
= control target key end

     0   :  { %vm7_vm0 = vcmask 130048   ;;  %s37_s8 = smov 16   ;;  %s38_s9 = smov 32   ;;  %vm13_vm1 = vcmask 523648   ;;  %vm19_vm2 = vcmask 392448   ;;  %vm25_vm3 = vcmask 261248   ;;  %s55_s0 = inlined_call_operand.vmem [shape: f32[4,16], index: 0, kind: input, shape index: {}]   ;;  %s56_s1 = inlined_call_operand.vmem [shape: f32[1,64], index: 1, kind: output, shape index: {}]  }
   0x1   :  { %v4_v0 = vld [vmem:[%s55_s0] sm:$0xf]  ;;  %s36_s0 = smov 48  }
   0x2   :  { %5 = vst [vmem:[#allocation1] sm:$0xf] %v4_v0 }
   0x9   :  { %v10_v1 = vld [vmem:[#allocation1 + $0x3] sm:$0x1]   ;;  %v22_v2 = vld [vmem:[#allocation1 + $0x1] sm:$0x1]   ;;  %v6_v3 = vld [vmem:[#allocation1] sm:$0x1]  }
   0xa   :  { %11 = vrot.lane.b32.xlu0 %v10_v1, %s36_s0  ;;  %23 = vrot.lane.b32.xlu1 %v22_v2, %s37_s8  ;;  %v16_v4 = vld [vmem:[#allocation1 + $0x2] sm:$0x1]   ;;  %8 = vst.msk [vmem:[#allocation0] sm:$0x1] %vm7_vm0, %v6_v3  }
   0xe   :  { %17 = vrot.lane.b32.xlu0 %v16_v4, %s38_s9 }
  0x7c   :  { %v12_v5 = vpop.permute.xlu0 %11   ;;  %v24_v6 = vpop.permute.xlu1 %23  }
  0x7d   :  { %14 = vst.msk [vmem:[#allocation0] sm:$0x1] %vm13_vm1, %v12_v5  }
  0x80   :  { %v18_v7 = vpop.permute.xlu0 %17  }
  0x81   :  { %20 = vst.msk [vmem:[#allocation0] sm:$0x1] %vm19_vm2, %v18_v7  }
  0x82   :  { %26 = vst.msk [vmem:[#allocation0] sm:$0x1] %vm25_vm3, %v24_v6  }
  0x89   :  { %v30_v8 = vld [vmem:[#allocation0] sm:$0x1] }
  0x8a   :  { %32 = vst [vmem:[%s56_s1] sm:$0x1] %v30_v8 }

// kernel: wavemix_lite_classifier.13
= control target key start
LH: loop header
LB: loop body
LE: loop exit
PB: predicated region body
PF: predicated region fallthrough
CT: control target
= control target key end

     0   :  { %s339_s16 = smov 32   ;;  %vm104_vm0 = vcmask 261120   ;;  %s340_s8 = smov 96   ;;  %s763_s1 = inlined_call_operand.vmem [shape: f32[16,2,8,32], index: 1, kind: input, shape index: {}]   ;;  %s764_s2 = inlined_call_operand.vmem [shape: f32[2,64], index: 2, kind: input, shape index: {}]   ;;  %s765_s0 = inlined_call_operand.vmem [shape: f32[16,8,64], index: 0, kind: input, shape index: {}]   ;;  %s766_s3 = inlined_call_operand.vmem [shape: f32[16,2,8,32], index: 3, kind: output, shape index: {}]  }
   0x1   :  { %v305_v0 = vld [vmem:[%s763_s1 + $0x8] sm:$0xff]  ;;  %v306_v2 = vld [vmem:[%s763_s1 + $0x18] sm:$0xff]  ;;  %v386_v6 = vld [vmem:[%s764_s2] ss:$0 sm:$0xff] }
   0x2   :  { %v307_v1 = vld [vmem:[%s763_s1 + $0x28] sm:$0xff]  ;;  %154 = vrot.lane.b32.xlu0 %v305_v0, %s339_s16  ;;  %v308_v3 = vld [vmem:[%s763_s1 + $0x38] sm:$0xff]  ;;  %v391_v7 = vld [vmem:[%s764_s2 + $0x1] ss:$0 sm:$0xff] }
   0x3   :  { %158 = vrot.lane.b32.xlu1 %v307_v1, %s339_s16  ;;  %v310_v4 = vld [vmem:[%s763_s1 + $0x58] sm:$0xff]  ;;  %v309_v5 = vld [vmem:[%s763_s1 + $0x48] sm:$0xff]  ;;  %v14_v8 = vld [vmem:[%s765_s0] sm:$0xff] }
   0x4   :  { %v35_v9 = vmul.f32 %v386_v6, %v14_v8  ;;  %v16_v10 = vld [vmem:[%s765_s0 + $0x10] sm:$0xff]  ;;  %v312_v11 = vld [vmem:[%s763_s1 + $0x78] sm:$0xff]  ;;  %v311_v12 = vld [vmem:[%s763_s1 + $0x68] sm:$0xff] }
   0x5   :  { %v72_v13 = vld [vmem:[%s763_s1] sm:$0xff]  ;;  %v37_v14 = vmul.f32 %v386_v6, %v16_v10  ;;  %v15_v15 = vld [vmem:[%s765_s0 + $0x8] sm:$0xff]  ;;  %v17_v16 = vld [vmem:[%s765_s0 + $0x18] sm:$0xff] }
   0x6   :  { %156 = vrot.lane.b32.xlu0 %v306_v2, %s339_s16  ;;  %v419_v17 = vadd.f32 %v391_v7, %v35_v9  ;;  %v74_v18 = vld [vmem:[%s763_s1 + $0x20] sm:$0xff]  ;;  %v36_v19 = vmul.f32 %v386_v6, %v15_v15  ;;  %v38_v20 = vmul.f32 %v386_v6, %v17_v16  ;;  %v19_v21 = vld [vmem:[%s765_s0 + $0x28] sm:$0xff]  ;;  %v73_v23 = vld [vmem:[%s763_s1 + $0x10] sm:$0xff] }
   0x7   :  { %160 = vrot.lane.b32.xlu1 %v308_v3, %s339_s16  ;;  %v430_v22 = vadd.f32 %v391_v7, %v37_v14  ;;  %v75_v24 = vld [vmem:[%s763_s1 + $0x30] sm:$0xff]  ;;  %v40_v25 = vmul.f32 %v386_v6, %v19_v21  ;;  %v18_v26 = vld [vmem:[%s765_s0 + $0x20] sm:$0xff]  ;;  %v21_v32 = vld [vmem:[%s765_s0 + $0x38] sm:$0xff] }
   0x8   :  { %v88_v27 = vadd.f32 %v72_v13, %v419_v17  ;;  %v444_v28 = vadd.f32 %v391_v7, %v36_v19  ;;  %v447_v29 = vadd.f32 %v391_v7, %v38_v20  ;;  %v77_v30 = vld [vmem:[%s763_s1 + $0x50] sm:$0xff]  ;;  %v39_v31 = vmul.f32 %v386_v6, %v18_v26  ;;  %v314_v34 = vld [vmem:[%s763_s1 + $0x98] sm:$0xff]  ;;  %v313_v35 = vld [vmem:[%s763_s1 + $0x88] sm:$0xff] }
   0x9   :  { %v20_v33 = vld [vmem:[%s765_s0 + $0x30] sm:$0xff]  ;;  %v90_v36 = vadd.f32 %v74_v18, %v430_v22  ;;  %v467_v37 = vadd.f32 %v391_v7, %v40_v25  ;;  %v76_v38 = vld [vmem:[%s763_s1 + $0x40] sm:$0xff]  ;;  %v42_v39 = vmul.f32 %v386_v6, %v21_v32  ;;  %v23_v42 = vld [vmem:[%s765_s0 + $0x48] sm:$0xff] }
   0xa   :  { %162 = vrot.lane.b32.xlu0 %v309_v5, %s339_s16  ;;  %v79_v40 = vld [vmem:[%s763_s1 + $0x70] sm:$0xff]  ;;  %v41_v41 = vmul.f32 %v386_v6, %v20_v33  ;;  %105 = vst.msk [vmem:[%s766_s3] sm:$0xff] %vm104_vm0, %v88_v27  ;;  %v89_v43 = vadd.f32 %v73_v23, %v444_v28  ;;  %v91_v44 = vadd.f32 %v75_v24, %v447_v29  ;;  %v78_v46 = vld [vmem:[%s763_s1 + $0x60] sm:$0xff] }
   0xb   :  { %164 = vrot.lane.b32.xlu1 %v310_v4, %s339_s16  ;;  %v489_v45 = vadd.f32 %v391_v7, %v39_v31  ;;  %v22_v47 = vld [vmem:[%s765_s0 + $0x40] sm:$0xff]  ;;  %107 = vst.msk [vmem:[%s766_s3 + $0x20] sm:$0xff] %vm104_vm0, %v90_v36  ;;  %v93_v48 = vadd.f32 %v77_v30, %v467_v37  ;;  %v503_v49 = vadd.f32 %v391_v7, %v42_v39  ;;  %v81_v52 = vld [vmem:[%s763_s1 + $0x90] sm:$0xff] }
   0xc   :  { %v506_v50 = vadd.f32 %v391_v7, %v41_v41  ;;  %v44_v51 = vmul.f32 %v386_v6, %v23_v42  ;;  %v25_v53 = vld [vmem:[%s765_s0 + $0x58] sm:$0xff]  ;;  %v24_v54 = vld [vmem:[%s765_s0 + $0x50] sm:$0xff]  ;;  %106 = vst.msk [vmem:[%s766_s3 + $0x10] sm:$0xff] %vm104_vm0, %v89_v43  ;;  %108 = vst.msk [vmem:[%s766_s3 + $0x30] sm:$0xff] %vm104_vm0, %v91_v44  ;;  %v43_v56 = vmul.f32 %v386_v6, %v22_v47 }
   0xd   :  { %v92_v55 = vadd.f32 %v76_v38, %v489_v45  ;;  %v80_v57 = vld [vmem:[%s763_s1 + $0x80] sm:$0xff]  ;;  %v46_v58 = vmul.f32 %v386_v6, %v25_v53  ;;  %v83_v59 = vld [vmem:[%s763_s1 + $0xb0] sm:$0xff]  ;;  %v45_v60 = vmul.f32 %v386_v6, %v24_v54  ;;  %v27_v61 = vld [vmem:[%s765_s0 + $0x68] sm:$0xff]  ;;  %110 = vst.msk [vmem:[%s766_s3 + $0x50] sm:$0xff] %vm104_vm0, %v93_v48  ;;  %v95_v62 = vadd.f32 %v79_v40, %v503_v49 }
   0xe   :  { %166 = vrot.lane.b32.xlu0 %v311_v12, %s339_s16  ;;  %v94_v63 = vadd.f32 %v78_v46, %v506_v50  ;;  %v546_v0 = vadd.f32 %v391_v7, %v44_v51  ;;  %v82_v1 = vld [vmem:[%s763_s1 + $0xa0] sm:$0xff]  ;;  %v48_v2 = vmul.f32 %v386_v6, %v27_v61  ;;  %v29_v4 = vld [vmem:[%s765_s0 + $0x78] sm:$0xff]  ;;  %v565_v5 = vadd.f32 %v391_v7, %v43_v56  ;;  %v85_v10 = vld [vmem:[%s763_s1 + $0xd0] sm:$0xff] }
   0xf   :  { %168 = vrot.lane.b32.xlu1 %v312_v11, %s339_s16  ;;  %v26_v3 = vld [vmem:[%s765_s0 + $0x60] sm:$0xff]  ;;  %109 = vst.msk [vmem:[%s766_s3 + $0x40] sm:$0xff] %vm104_vm0, %v92_v55  ;;  %v568_v8 = vadd.f32 %v391_v7, %v46_v58  ;;  %v571_v9 = vadd.f32 %v391_v7, %v45_v60  ;;  %v28_v11 = vld [vmem:[%s765_s0 + $0x70] sm:$0xff]  ;;  %v50_v18 = vmul.f32 %v386_v6, %v29_v4 }
  0x10   :  { %v316_v12 = vld [vmem:[%s763_s1 + $0xb8] sm:$0xff]  ;;  %v315_v13 = vld [vmem:[%s763_s1 + $0xa8] sm:$0xff]  ;;  %112 = vst.msk [vmem:[%s766_s3 + $0x70] sm:$0xff] %vm104_vm0, %v95_v62  ;;  %111 = vst.msk [vmem:[%s766_s3 + $0x60] sm:$0xff] %vm104_vm0, %v94_v63  ;;  %v97_v14 = vadd.f32 %v81_v52, %v546_v0  ;;  %v595_v15 = vadd.f32 %v391_v7, %v48_v2  ;;  %v47_v16 = vmul.f32 %v386_v6, %v26_v3 }
  0x11   :  { %v96_v19 = vadd.f32 %v80_v57, %v565_v5  ;;  %v99_v20 = vadd.f32 %v83_v59, %v568_v8  ;;  %v98_v21 = vadd.f32 %v82_v1, %v571_v9  ;;  %v84_v23 = vld [vmem:[%s763_s1 + $0xc0] sm:$0xff]  ;;  %v87_v24 = vld [vmem:[%s763_s1 + $0xf0] sm:$0xff]  ;;  %v49_v25 = vmul.f32 %v386_v6, %v28_v11  ;;  %v318_v32 = vld [vmem:[%s763_s1 + $0xd8] sm:$0xff] }
  0x12   :  { %170 = vrot.lane.b32.xlu0 %v313_v35, %s339_s16  ;;  %114 = vst.msk [vmem:[%s766_s3 + $0x90] sm:$0xff] %vm104_vm0, %v97_v14  ;;  %v101_v26 = vadd.f32 %v85_v10, %v595_v15  ;;  %v68_v27 = vadd.f32 %v391_v7, %v47_v16  ;;  %v616_v30 = vadd.f32 %v391_v7, %v50_v18  ;;  %v86_v31 = vld [vmem:[%s763_s1 + $0xe0] sm:$0xff]  ;;  %v317_v33 = vld [vmem:[%s763_s1 + $0xc8] sm:$0xff] }
  0x13   :  { %172 = vrot.lane.b32.xlu1 %v314_v34, %s339_s16  ;;  %113 = vst.msk [vmem:[%s766_s3 + $0x80] sm:$0xff] %vm104_vm0, %v96_v19  ;;  %116 = vst.msk [vmem:[%s766_s3 + $0xb0] sm:$0xff] %vm104_vm0, %v99_v20  ;;  %v70_v6 = vadd.f32 %v391_v7, %v49_v25  ;;  %v320_v7 = vld [vmem:[%s763_s1 + $0xf8] sm:$0xff] }
  0x14   :  { %115 = vst.msk [vmem:[%s766_s3 + $0xa0] sm:$0xff] %vm104_vm0, %v98_v21  ;;  %118 = vst.msk [vmem:[%s766_s3 + $0xd0] sm:$0xff] %vm104_vm0, %v101_v26  ;;  %v100_v34 = vadd.f32 %v84_v23, %v68_v27  ;;  %v103_v35 = vadd.f32 %v87_v24, %v616_v30  ;;  %v319_v38 = vld [vmem:[%s763_s1 + $0xe8] sm:$0xff] }
  0x15   :  { %v102_v36 = vadd.f32 %v86_v31, %v70_v6 }
  0x16   :  { %174 = vrot.lane.b32.xlu0 %v315_v13, %s339_s16  ;;  %117 = vst.msk [vmem:[%s766_s3 + $0xc0] sm:$0xff] %vm104_vm0, %v100_v34  ;;  %120 = vst.msk [vmem:[%s766_s3 + $0xf0] sm:$0xff] %vm104_vm0, %v103_v35 }
  0x17   :  { %176 = vrot.lane.b32.xlu1 %v316_v12, %s339_s16  ;;  %119 = vst.msk [vmem:[%s766_s3 + $0xe0] sm:$0xff] %vm104_vm0, %v102_v36 }
  0x1a   :  { %178 = vrot.lane.b32.xlu0 %v317_v33, %s339_s16 }
  0x1b   :  { %180 = vrot.lane.b32.xlu1 %v318_v32, %s339_s16 }
  0x1e   :  { %182 = vrot.lane.b32.xlu0 %v319_v38, %s339_s16 }
  0x1f   :  { %184 = vrot.lane.b32.xlu1 %v320_v7, %s339_s16 }
  0x74   :  { %v155_v39 = vpop.permute.xlu0 %154 }
  0x75   :  { %v159_v40 = vpop.permute.xlu1 %158  ;;  %v202_v41 = vadd.f32 %v155_v39, %v419_v17 }
  0x76   :  { %v204_v42 = vadd.f32 %v159_v40, %v430_v22 }
  0x77   :  { %234 = vrot.lane.b32.xlu0 %v202_v41, %s340_s8 }
  0x78   :  { %v157_v43 = vpop.permute.xlu0 %156 }
  0x79   :  { %v161_v44 = vpop.permute.xlu1 %160  ;;  %v203_v46 = vadd.f32 %v157_v43, %v444_v28 }
  0x7a   :  { %v205_v47 = vadd.f32 %v161_v44, %v447_v29 }
  0x7b   :  { %236 = vrot.lane.b32.xlu1 %v203_v46, %s340_s8  ;;  %238 = vrot.lane.b32.xlu0 %v204_v42, %s340_s8 }
  0x7c   :  { %v163_v51 = vpop.permute.xlu0 %162 }
  0x7d   :  { %v165_v48 = vpop.permute.xlu1 %164  ;;  %v206_v52 = vadd.f32 %v163_v51, %v489_v45 }
  0x7e   :  { %v207_v17 = vadd.f32 %v165_v48, %v467_v37 }
  0x7f   :  { %240 = vrot.lane.b32.xlu1 %v205_v47, %s340_s8  ;;  %242 = vrot.lane.b32.xlu0 %v206_v52, %s340_s8 }
  0x80   :  { %v167_v53 = vpop.permute.xlu0 %166 }
  0x81   :  { %v169_v22 = vpop.permute.xlu1 %168  ;;  %v208_v28 = vadd.f32 %v167_v53, %v506_v50 }
  0x82   :  { %v209_v54 = vadd.f32 %v169_v22, %v503_v49 }
  0x83   :  { %244 = vrot.lane.b32.xlu1 %v207_v17, %s340_s8  ;;  %246 = vrot.lane.b32.xlu0 %v208_v28, %s340_s8 }
  0x84   :  { %v171_v55 = vpop.permute.xlu0 %170 }
  0x85   :  { %v173_v29 = vpop.permute.xlu1 %172  ;;  %v210_v45 = vadd.f32 %v171_v55, %v565_v5 }
  0x86   :  { %v211_v37 = vadd.f32 %v173_v29, %v546_v0 }
  0x87   :  { %248 = vrot.lane.b32.xlu1 %v209_v54, %s340_s8  ;;  %250 = vrot.lane.b32.xlu0 %v210_v45, %s340_s8 }
  0x88   :  { %v175_v57 = vpop.permute.xlu0 %174 }
  0x89   :  { %v177_v56 = vpop.permute.xlu1 %176  ;;  %v212_v50 = vadd.f32 %v175_v57, %v571_v9 }
  0x8a   :  { %v213_v49 = vadd.f32 %v177_v56, %v568_v8 }
  0x8b   :  { %252 = vrot.lane.b32.xlu1 %v211_v37, %s340_s8  ;;  %254 = vrot.lane.b32.xlu0 %v212_v50, %s340_s8 }
  0x8c   :  { %v179_v59 = vpop.permute.xlu0 %178 }
  0x8d   :  { %v181_v58 = vpop.permute.xlu1 %180  ;;  %v214_v60 = vadd.f32 %v179_v59, %v68_v27 }
  0x8e   :  { %v215_v61 = vadd.f32 %v181_v58, %v595_v15 }
  0x8f   :  { %256 = vrot.lane.b32.xlu1 %v213_v49, %s340_s8  ;;  %258 = vrot.lane.b32.xlu0 %v214_v60, %s340_s8 }
  0x90   :  { %v183_v63 = vpop.permute.xlu0 %182 }
  0x91   :  { %v185_v62 = vpop.permute.xlu1 %184  ;;  %v216_v0 = vadd.f32 %v183_v63, %v70_v6 }
  0x92   :  { %v217_v1 = vadd.f32 %v185_v62, %v616_v30 }
  0x93   :  { %260 = vrot.lane.b32.xlu1 %v215_v61, %s340_s8  ;;  %262 = vrot.lane.b32.xlu0 %v216_v0, %s340_s8 }
  0x97   :  { %264 = vrot.lane.b32.xlu1 %v217_v1, %s340_s8 }
  0xe9   :  { %v235_v2 = vpop.permute.xlu0 %234 }
  0xea   :  { %321 = vst.msk [vmem:[%s766_s3 + $0x8] sm:$0xff] %vm104_vm0, %v235_v2 }
  0xed   :  { %v237_v3 = vpop.permute.xlu1 %236  ;;  %v239_v4 = vpop.permute.xlu0 %238 }
  0xee   :  { %322 = vst.msk [vmem:[%s766_s3 + $0x18] sm:$0xff] %vm104_vm0, %v237_v3  ;;  %323 = vst.msk [vmem:[%s766_s3 + $0x28] sm:$0xff] %vm104_vm0, %v239_v4 }
  0xf1   :  { %v241_v5 = vpop.permute.xlu1 %240  ;;  %v243_v8 = vpop.permute.xlu0 %242 }
  0xf2   :  { %324 = vst.msk [vmem:[%s766_s3 + $0x38] sm:$0xff] %vm104_vm0, %v241_v5  ;;  %325 = vst.msk [vmem:[%s766_s3 + $0x48] sm:$0xff] %vm104_vm0, %v243_v8 }
  0xf5   :  { %v245_v9 = vpop.permute.xlu1 %244  ;;  %v247_v10 = vpop.permute.xlu0 %246 }
  0xf6   :  { %326 = vst.msk [vmem:[%s766_s3 + $0x58] sm:$0xff] %vm104_vm0, %v245_v9  ;;  %327 = vst.msk [vmem:[%s766_s3 + $0x68] sm:$0xff] %vm104_vm0, %v247_v10 }
  0xf9   :  { %v249_v11 = vpop.permute.xlu1 %248  ;;  %v251_v12 = vpop.permute.xlu0 %250 }
  0xfa   :  { %328 = vst.msk [vmem:[%s766_s3 + $0x78] sm:$0xff] %vm104_vm0, %v249_v11  ;;  %329 = vst.msk [vmem:[%s766_s3 + $0x88] sm:$0xff] %vm104_vm0, %v251_v12 }
  0xfd   :  { %v253_v13 = vpop.permute.xlu1 %252  ;;  %v255_v14 = vpop.permute.xlu0 %254 }
  0xfe   :  { %330 = vst.msk [vmem:[%s766_s3 + $0x98] sm:$0xff] %vm104_vm0, %v253_v13  ;;  %331 = vst.msk [vmem:[%s766_s3 + $0xa8] sm:$0xff] %vm104_vm0, %v255_v14 }
 0x101   :  { %v257_v15 = vpop.permute.xlu1 %256  ;;  %v259_v16 = vpop.permute.xlu0 %258 }
 0x102   :  { %332 = vst.msk [vmem:[%s766_s3 + $0xb8] sm:$0xff] %vm104_vm0, %v257_v15  ;;  %333 = vst.msk [vmem:[%s766_s3 + $0xc8] sm:$0xff] %vm104_vm0, %v259_v16 }
 0x105   :  { %v261_v18 = vpop.permute.xlu1 %260  ;;  %v263_v19 = vpop.permute.xlu0 %262 }
 0x106   :  { %334 = vst.msk [vmem:[%s766_s3 + $0xd8] sm:$0xff] %vm104_vm0, %v261_v18  ;;  %335 = vst.msk [vmem:[%s766_s3 + $0xe8] sm:$0xff] %vm104_vm0, %v263_v19 }
 0x109   :  { %v265_v20 = vpop.permute.xlu1 %264 }
 0x10a   :  { %336 = vst.msk [vmem:[%s766_s3 + $0xf8] sm:$0xff] %vm104_vm0, %v265_v20 }

// kernel: wavemix_lite_classifier.17
= control target key start
LH: loop header
LB: loop body
LE: loop exit
PB: predicated region body
PF: predicated region fallthrough
CT: control target
= control target key end

     0   :  { %vm19_vm0 = vcmask 123904   ;;  %v380_v3 = vmov 0.0|0.0   ;;  %v381_v5 = vmov 0.0   ;;  %vm86_vm1 = vcmask 130048   ;;  %s684_s0 = inlined_call_operand.vmem [shape: f32[2,256,16], index: 0, kind: input, shape index: {}]   ;;  %s685_s1 = inlined_call_operand.vmem [shape: f32[16,10], index: 1, kind: input, shape index: {}]   ;;  %s686_s2 = inlined_call_operand.vmem [shape: f32[1,10], index: 2, kind: input, shape index: {}]   ;;  %s687_s3 = inlined_call_operand.hbm [shape: f32[2,10], index: 3, kind: output, shape index: {}]  }
   0x1   :  { %v239_v0 = vld [vmem:[%s685_s1] sm:$0xff]  ;;  %v240_v1 = vld [vmem:[%s685_s1 + $0x8] sm:$0xff]  ;;  %349 = vmatprep.subr.bf16.mxu0 %v380_v3  ;;  %20 = vst.msk [vmem:[#allocation2] sm:$0x3] %vm19_vm0, %v381_v5  ;;  %v24_v7 = vld [vmem:[%s684_s0 + $0x10] sm:$0xff]  ;;  %vm382_vm2 = vmmov 0  }
   0x2   :  { %v22_v2 = vld [vmem:[%s684_s0] sm:$0xff]  ;;  %v350_v4 = vpack.c.bf16 %v240_v1, %v239_v0  ;;  %v23_v6 = vld [vmem:[%s684_s0 + $0x8] sm:$0xff]  ;;  %v25_v8 = vld [vmem:[%s684_s0 + $0x18] sm:$0xff]  ;;  %v90_v11 = vsel %vm86_vm1, %v24_v7, 0.0  ;;  %346 = vmatprep.mubr.msk.f32.mxu0 %vm382_vm2, %v381_v5 }
   0x3   :  { %v87_v9 = vsel %vm86_vm1, %v22_v2, 0.0  ;;  %v88_v10 = vsel %vm86_vm1, %v23_v6, 0.0  ;;  %v26_v12 = vld [vmem:[%s684_s0 + $0x20] sm:$0xff]  ;;  %v92_v14 = vsel %vm86_vm1, %v25_v8, 0.0  ;;  %v27_v15 = vld [vmem:[%s684_s0 + $0x28] sm:$0xff]  ;;  %v28_v18 = vld [vmem:[%s684_s0 + $0x30] sm:$0xff] }
   0x4   :  { %351 = vmatpush3.bf16.msra.mxu0 %v350_v4  ;;  %v89_v13 = vadd.f32 %v88_v10, %v87_v9  ;;  %v94_v17 = vsel %vm86_vm1, %v26_v12, 0.0  ;;  %v96_v20 = vsel %vm86_vm1, %v27_v15, 0.0  ;;  %v29_v21 = vld [vmem:[%s684_s0 + $0x38] sm:$0xff]  ;;  %v98_v23 = vsel %vm86_vm1, %v28_v18, 0.0  ;;  %v30_v24 = vld [vmem:[%s684_s0 + $0x40] sm:$0xff]  ;;  %v55_v27 = vld [vmem:[%s684_s0 + $0x108] sm:$0xff] }
   0x5   :  { %v54_v25 = vld [vmem:[%s684_s0 + $0x100] sm:$0xff]  ;;  %v56_v28 = vld [vmem:[%s684_s0 + $0x110] sm:$0xff]  ;;  %v57_v29 = vld [vmem:[%s684_s0 + $0x118] sm:$0xff]  ;;  %v100_v30 = vsel %vm86_vm1, %v29_v21, 0.0  ;;  %v157_v34 = vsel %vm86_vm1, %v55_v27, 0.0  ;;  %v102_v37 = vsel %vm86_vm1, %v30_v24, 0.0 }
   0x6   :  { %v91_v16 = vadd.f32 %v90_v11, %v89_v13  ;;  %v31_v31 = vld [vmem:[%s684_s0 + $0x48] sm:$0xff]  ;;  %v156_v33 = vsel %vm86_vm1, %v54_v25, 0.0  ;;  %v159_v35 = vsel %vm86_vm1, %v56_v28, 0.0  ;;  %v58_v36 = vld [vmem:[%s684_s0 + $0x120] sm:$0xff]  ;;  %v32_v39 = vld [vmem:[%s684_s0 + $0x50] sm:$0xff]  ;;  %v161_v41 = vsel %vm86_vm1, %v57_v29, 0.0 }
   0x7   :  { %v158_v38 = vadd.f32 %v157_v34, %v156_v33  ;;  %v59_v42 = vld [vmem:[%s684_s0 + $0x128] sm:$0xff]  ;;  %v104_v43 = vsel %vm86_vm1, %v31_v31, 0.0  ;;  %v33_v45 = vld [vmem:[%s684_s0 + $0x58] sm:$0xff]  ;;  %v163_v47 = vsel %vm86_vm1, %v58_v36, 0.0  ;;  %v60_v48 = vld [vmem:[%s684_s0 + $0x130] sm:$0xff]  ;;  %v106_v49 = vsel %vm86_vm1, %v32_v39, 0.0 }
   0x8   :  { %v93_v19 = vadd.f32 %v92_v14, %v91_v16  ;;  %v34_v51 = vld [vmem:[%s684_s0 + $0x60] sm:$0xff]  ;;  %v165_v53 = vsel %vm86_vm1, %v59_v42, 0.0  ;;  %v61_v54 = vld [vmem:[%s684_s0 + $0x138] sm:$0xff]  ;;  %v108_v55 = vsel %vm86_vm1, %v33_v45, 0.0  ;;  %v35_v57 = vld [vmem:[%s684_s0 + $0x68] sm:$0xff]  ;;  %v167_v59 = vsel %vm86_vm1, %v60_v48, 0.0 }
   0x9   :  { %v160_v44 = vadd.f32 %v159_v35, %v158_v38  ;;  %v62_v60 = vld [vmem:[%s684_s0 + $0x140] sm:$0xff]  ;;  %v110_v61 = vsel %vm86_vm1, %v34_v51, 0.0  ;;  %v36_v63 = vld [vmem:[%s684_s0 + $0x70] sm:$0xff]  ;;  %v169_v1 = vsel %vm86_vm1, %v61_v54, 0.0 }
   0xa   :  { %v95_v22 = vadd.f32 %v94_v17, %v93_v19 }
   0xb   :  { %v162_v50 = vadd.f32 %v161_v41, %v160_v44 }
   0xc   :  { %v97_v26 = vadd.f32 %v96_v20, %v95_v22 }
   0xd   :  { %v164_v56 = vadd.f32 %v163_v47, %v162_v50 }
   0xe   :  { %v99_v32 = vadd.f32 %v98_v23, %v97_v26 }
   0xf   :  { %v166_v62 = vadd.f32 %v165_v53, %v164_v56 }
  0x10   :  { %v101_v40 = vadd.f32 %v100_v30, %v99_v32 }
  0x12   :  { %v103_v46 = vadd.f32 %v102_v37, %v101_v40 }
  0x14   :  { %v105_v52 = vadd.f32 %v104_v43, %v103_v46 }
  0x16   :  { %v107_v58 = vadd.f32 %v106_v49, %v105_v52 }
  0x18   :  { %v109_v0 = vadd.f32 %v108_v55, %v107_v58 }
  0x19   :  { %8 = vsyncpa [#allocation4], 0  ;;  %v63_v2 = vld [vmem:[%s684_s0 + $0x148] sm:$0xff]  ;;  %v112_v3 = vsel %vm86_vm1, %v35_v57, 0.0  ;;  %v168_v4 = vadd.f32 %v167_v59, %v166_v62  ;;  %v37_v5 = vld [vmem:[%s684_s0 + $0x78] sm:$0xff]  ;;  %v171_v7 = vsel %vm86_vm1, %v62_v60, 0.0 }
  0x1a   :  { %v111_v6 = vadd.f32 %v110_v61, %v109_v0  ;;  %v64_v8 = vld [vmem:[%s684_s0 + $0x150] sm:$0xff]  ;;  %v114_v9 = vsel %vm86_vm1, %v36_v63, 0.0  ;;  %v38_v11 = vld [vmem:[%s684_s0 + $0x80] sm:$0xff]  ;;  %v173_v13 = vsel %vm86_vm1, %v63_v2, 0.0  ;;  %v65_v14 = vld [vmem:[%s684_s0 + $0x158] sm:$0xff]  ;;  %v116_v15 = vsel %vm86_vm1, %v37_v5, 0.0 }
  0x1b   :  { %v170_v10 = vadd.f32 %v169_v1, %v168_v4  ;;  %v39_v17 = vld [vmem:[%s684_s0 + $0x88] sm:$0xff]  ;;  %v175_v19 = vsel %vm86_vm1, %v64_v8, 0.0  ;;  %v66_v20 = vld [vmem:[%s684_s0 + $0x160] sm:$0xff]  ;;  %v118_v21 = vsel %vm86_vm1, %v38_v11, 0.0  ;;  %v40_v23 = vld [vmem:[%s684_s0 + $0x90] sm:$0xff]  ;;  %v177_v25 = vsel %vm86_vm1, %v65_v14, 0.0 }
  0x1c   :  { %v113_v12 = vadd.f32 %v112_v3, %v111_v6  ;;  %v67_v26 = vld [vmem:[%s684_s0 + $0x168] sm:$0xff]  ;;  %v120_v27 = vsel %vm86_vm1, %v39_v17, 0.0  ;;  %v41_v29 = vld [vmem:[%s684_s0 + $0x98] sm:$0xff]  ;;  %v179_v31 = vsel %vm86_vm1, %v66_v20, 0.0  ;;  %v68_v32 = vld [vmem:[%s684_s0 + $0x170] sm:$0xff]  ;;  %v122_v33 = vsel %vm86_vm1, %v40_v23, 0.0 }
  0x1d   :  { %v172_v16 = vadd.f32 %v171_v7, %v170_v10  ;;  %v42_v35 = vld [vmem:[%s684_s0 + $0xa0] sm:$0xff]  ;;  %v181_v37 = vsel %vm86_vm1, %v67_v26, 0.0  ;;  %v69_v38 = vld [vmem:[%s684_s0 + $0x178] sm:$0xff]  ;;  %v124_v39 = vsel %vm86_vm1, %v41_v29, 0.0  ;;  %v43_v41 = vld [vmem:[%s684_s0 + $0xa8] sm:$0xff]  ;;  %v183_v43 = vsel %vm86_vm1, %v68_v32, 0.0 }
  0x1e   :  { %v115_v18 = vadd.f32 %v114_v9, %v113_v12  ;;  %v70_v44 = vld [vmem:[%s684_s0 + $0x180] sm:$0xff]  ;;  %v126_v45 = vsel %vm86_vm1, %v42_v35, 0.0  ;;  %v44_v47 = vld [vmem:[%s684_s0 + $0xb0] sm:$0xff]  ;;  %v185_v49 = vsel %vm86_vm1, %v69_v38, 0.0  ;;  %v71_v50 = vld [vmem:[%s684_s0 + $0x188] sm:$0xff]  ;;  %v128_v51 = vsel %vm86_vm1, %v43_v41, 0.0 }
  0x1f   :  { %v174_v22 = vadd.f32 %v173_v13, %v172_v16  ;;  %v45_v53 = vld [vmem:[%s684_s0 + $0xb8] sm:$0xff]  ;;  %v187_v55 = vsel %vm86_vm1, %v70_v44, 0.0  ;;  %v72_v56 = vld [vmem:[%s684_s0 + $0x190] sm:$0xff]  ;;  %v130_v57 = vsel %vm86_vm1, %v44_v47, 0.0  ;;  %v46_v59 = vld [vmem:[%s684_s0 + $0xc0] sm:$0xff]  ;;  %v189_v61 = vsel %vm86_vm1, %v71_v50, 0.0 }
  0x20   :  { %v117_v24 = vadd.f32 %v116_v15, %v115_v18  ;;  %v73_v62 = vld [vmem:[%s684_s0 + $0x198] sm:$0xff]  ;;  %v132_v63 = vsel %vm86_vm1, %v45_v53, 0.0  ;;  %v47_v1 = vld [vmem:[%s684_s0 + $0xc8] sm:$0xff]  ;;  %v191_v3 = vsel %vm86_vm1, %v72_v56, 0.0  ;;  %v74_v4 = vld [vmem:[%s684_s0 + $0x1a0] sm:$0xff]  ;;  %v134_v5 = vsel %vm86_vm1, %v46_v59, 0.0 }
  0x21   :  { %v176_v28 = vadd.f32 %v175_v19, %v174_v22  ;;  %v48_v7 = vld [vmem:[%s684_s0 + $0xd0] sm:$0xff]  ;;  %v193_v9 = vsel %vm86_vm1, %v73_v62, 0.0  ;;  %v75_v10 = vld [vmem:[%s684_s0 + $0x1a8] sm:$0xff]  ;;  %v136_v11 = vsel %vm86_vm1, %v47_v1, 0.0  ;;  %v49_v13 = vld [vmem:[%s684_s0 + $0xd8] sm:$0xff]  ;;  %v195_v15 = vsel %vm86_vm1, %v74_v4, 0.0 }
  0x22   :  { %v119_v30 = vadd.f32 %v118_v21, %v117_v24  ;;  %v76_v16 = vld [vmem:[%s684_s0 + $0x1b0] sm:$0xff]  ;;  %v138_v17 = vsel %vm86_vm1, %v48_v7, 0.0  ;;  %v50_v19 = vld [vmem:[%s684_s0 + $0xe0] sm:$0xff]  ;;  %v197_v21 = vsel %vm86_vm1, %v75_v10, 0.0  ;;  %v77_v22 = vld [vmem:[%s684_s0 + $0x1b8] sm:$0xff]  ;;  %v140_v23 = vsel %vm86_vm1, %v49_v13, 0.0 }
  0x23   :  { %v178_v34 = vadd.f32 %v177_v25, %v176_v28  ;;  %v51_v25 = vld [vmem:[%s684_s0 + $0xe8] sm:$0xff]  ;;  %v78_v28 = vld [vmem:[%s684_s0 + $0x1c0] sm:$0xff]  ;;  %v142_v29 = vsel %vm86_vm1, %v50_v19, 0.0  ;;  %v85_v62 = vld [vmem:[%s684_s0 + $0x1f8] sm:$0xff]  ;;  %vm229_vm3 = vcmask 1041409   ;;  %s383_s5 = smov [#allocation3]  }
  0x24   :  { %v121_v36 = vadd.f32 %v120_v27, %v119_v30  ;;  %v199_v27 = vsel %vm86_vm1, %v76_v16, 0.0  ;;  %v144_v35 = vsel %vm86_vm1, %v51_v25, 0.0  ;;  %v82_v50 = vld [vmem:[%s684_s0 + $0x1e0] sm:$0xff]  ;;  %s329_s6 = sshll.u32 %s383_s5, 4  ;;  %vm321_vm4 = vcmask 74752   ;;  %s330_s6 = int_to_ptr.vmem [resolvable:$true] %s329_s6 }
  0x25   :  { %v180_v40 = vadd.f32 %v179_v31, %v178_v34  ;;  %v52_v31 = vld [vmem:[%s684_s0 + $0xf0] sm:$0xff]  ;;  %v79_v34 = vld [vmem:[%s684_s0 + $0x1c8] sm:$0xff]  ;;  %v21_v16 = vld [vmem:[#allocation2] sm:$0x3]  ;;  %s356_s7 = scalar_lea.vmem %s330_s6, 32  ;;  %p361_p1 = scmp.lt.s32.totalorder %s330_s6, %s330_s6 }
  0x26   :  { %v123_v42 = vadd.f32 %v122_v33, %v121_v36  ;;  %v201_v33 = vsel %vm86_vm1, %v77_v22, 0.0  ;;  %v146_v41 = vsel %vm86_vm1, %v52_v31, 0.0  ;;  %v205_v44 = vsel %vm86_vm1, %v79_v34, 0.0  ;;  %p357_p0 = scmp.ne.s32.totalorder %s330_s6, %s356_s7  ;;  %p362_p2 = scmp.lt.s32.totalorder %s356_s7, %s356_s7 }
  0x27   :  { %v182_v46 = vadd.f32 %v181_v37, %v180_v40  ;;  %v53_v37 = vld [vmem:[%s684_s0 + $0xf8] sm:$0xff]  ;;  %v80_v40 = vld [vmem:[%s684_s0 + $0x1d0] sm:$0xff] }
  0x28   :  { %v125_v48 = vadd.f32 %v124_v39, %v123_v42  ;;  %v203_v39 = vsel %vm86_vm1, %v78_v28, 0.0  ;;  %p363_p3 = por %p362_p2, %p361_p1 }
  0x29   :  { %v184_v52 = vadd.f32 %v183_v43, %v182_v46  ;;  %v148_v46 = vsel %vm86_vm1, %v53_v37, 0.0 }
  0x2a   :  { %v127_v54 = vadd.f32 %v126_v45, %v125_v48  ;;  %v81_v45 = vld [vmem:[%s684_s0 + $0x1d8] sm:$0xff]  ;;  %p364_p4 = pnand %p363_p3, %p357_p0 }
  0x2b   :  { %v186_v58 = vadd.f32 %v185_v49, %v184_v52  ;;  %v207_v49 = vsel %vm86_vm1, %v80_v40, 0.0  ;;  %v209_v53 = vsel %vm86_vm1, %v81_v45, 0.0 }
  0x2c   :  { %v129_v60 = vadd.f32 %v128_v51, %v127_v54  ;;  %v83_v54 = vld [vmem:[%s684_s0 + $0x1e8] sm:$0xff] }
  0x2d   :  { %v188_v0 = vadd.f32 %v187_v55, %v186_v58  ;;  %v84_v58 = vld [vmem:[%s684_s0 + $0x1f0] sm:$0xff] }
  0x2e   :  { %v131_v2 = vadd.f32 %v130_v57, %v129_v60  ;;  %v211_v57 = vsel %vm86_vm1, %v82_v50, 0.0 }
  0x2f   :  { %v190_v6 = vadd.f32 %v189_v61, %v188_v0  ;;  %v213_v61 = vsel %vm86_vm1, %v83_v54, 0.0  ;;  %v215_v0 = vsel %vm86_vm1, %v84_v58, 0.0 }
  0x30   :  { %v133_v8 = vadd.f32 %v132_v63, %v131_v2 }
  0x31   :  { %v192_v12 = vadd.f32 %v191_v3, %v190_v6  ;;  %v217_v3 = vsel %vm86_vm1, %v85_v62, 0.0 }
  0x32   :  { %v135_v14 = vadd.f32 %v134_v5, %v133_v8 }
  0x33   :  { %v194_v18 = vadd.f32 %v193_v9, %v192_v12 }
  0x34   :  { %v137_v20 = vadd.f32 %v136_v11, %v135_v14 }
  0x35   :  { %v196_v24 = vadd.f32 %v195_v15, %v194_v18 }
  0x36   :  { %v139_v26 = vadd.f32 %v138_v17, %v137_v20 }
  0x37   :  { %v198_v30 = vadd.f32 %v197_v21, %v196_v24  ;;  %v337_v21 = vld [vmem:[%s686_s2] ss:$0 sm:$0xff] }
  0x38   :  { %v141_v32 = vadd.f32 %v140_v23, %v139_v26 }
  0x39   :  { %v200_v36 = vadd.f32 %v199_v27, %v198_v30 }
  0x3a   :  { %v143_v38 = vadd.f32 %v142_v29, %v141_v32 }
  0x3b   :  { %v202_v42 = vadd.f32 %v201_v33, %v200_v36 }
  0x3c   :  { %v145_v43 = vadd.f32 %v144_v35, %v143_v38 }
  0x3d   :  { %v204_v47 = vadd.f32 %v203_v39, %v202_v42 }
  0x3e   :  { %v147_v48 = vadd.f32 %v146_v41, %v145_v43 }
  0x3f   :  { %v206_v51 = vadd.f32 %v205_v44, %v204_v47 }
  0x40   :  { %v149_v52 = vadd.f32 %v148_v46, %v147_v48 }
  0x41   :  { %v208_v55 = vadd.f32 %v207_v49, %v206_v51 }
  0x42   :  { %v150_v56 = vrot.slane %v149_v52, 4 }
  0x43   :  { %v210_v59 = vadd.f32 %v209_v53, %v208_v55 }
  0x44   :  { %v151_v60 = vadd.f32 %v150_v56, %v149_v52 }
  0x45   :  { %v212_v63 = vadd.f32 %v211_v57, %v210_v59 }
  0x46   :  { %v152_v1 = vrot.slane %v151_v60, 2 }
  0x47   :  { %v214_v2 = vadd.f32 %v213_v61, %v212_v63 }
  0x48   :  { %v153_v5 = vadd.f32 %v152_v1, %v151_v60 }
  0x49   :  { %v216_v4 = vadd.f32 %v215_v0, %v214_v2 }
  0x4a   :  { %v154_v8 = vrot.slane %v153_v5, 1 }
  0x4b   :  { %v218_v6 = vadd.f32 %v217_v3, %v216_v4 }
  0x4c   :  { %v155_v11 = vadd.f32 %v154_v8, %v153_v5 }
  0x4d   :  { %v219_v7 = vrot.slane %v218_v6, 4 }
  0x4e   :  { %v225_v15 = vmul.f32 0.00390625, %v155_v11 }
  0x4f   :  { %v220_v9 = vadd.f32 %v219_v7, %v218_v6 }
  0x51   :  { %v221_v10 = vrot.slane %v220_v9, 2 }
  0x53   :  { %v222_v12 = vadd.f32 %v221_v10, %v220_v9 }
  0x55   :  { %v223_v13 = vrot.slane %v222_v12, 1 }
  0x57   :  { %v224_v14 = vadd.f32 %v223_v13, %v222_v12 }
  0x59   :  { %v226_v17 = vmul.f32 0.00390625, %v224_v14 }
  0x5b   :  { %v230_v18 = vsel %vm229_vm3, %v226_v17, %v225_v15 }
  0x5c   :  { %v232_v19 = vadd.f32 %v230_v18, %v21_v16 }
  0x5e   :  { %234 = vst.msk [vmem:[#allocation2] sm:$0x3] %vm19_vm0, %v232_v19 }
  0x65   :  { %v238_v20 = vld [vmem:[#allocation2] sm:$0x3] }
  0x66   :  { %347 = vmatmul.mubr.msk.f32.vlgmr.msra.gmra.mrb[0].mxu0 %vm86_vm1, %v238_v20 }
 0x139   :  { %v317_v22 = vpop.f32.mrb[0].mxu0 }
 0x13a   :  { %v318_v23 = vadd.f32 %v337_v21, %v317_v22  ;;  %v348_v24 = vpop.f32.mrb[1].mxu0 }
 0x13c   :  { %322 = vst.msk [vmem:[#allocation3] sm:$0x3] %vm321_vm4, %v318_v23 }
 0x13d   :  { %367 = shalt.err (!%p364_p4)
}
 0x13e   :  { %s368_s10 = scalar_lea.hbm %s687_s3, 32 }
 0x13f   :  { %p369_p5 = scmp.ne.s32.totalorder %s687_s3, %s368_s10  ;;  %p372_p6 = scmp.lt.u32.totalorder %s368_s10, %s687_s3 }
 0x141   :  { %p374_p7 = pnand %p372_p6, %p369_p5 }
 0x143   :  { %377 = shalt.err (!%p374_p7)
}
 0x144   :  { %332 = dma.vmem_to_hbm [thread:$0]  %s330_s6, 32, %s687_s3, [#allocation4]  }
 0x145   :  { %378 = dma.done.wait [#allocation4], 32  }
 0x146   :  { %379 = vsyncadd [#allocation4], 4294967264 }
 0x147   :  { %336 = vsyncpa [#allocation4], 1 }

</bundles_post_ra>
